<compile_context>
chip_gen: v7x
topology: tpu7x:2x2x1
jax: 0.10.0
libtpu: 0.0.40
codegen_flags: <defaults>
</compile_context>

<pallas_src>
import jax
import jax.numpy as jnp
from jax.experimental import pallas as pl
from jax.experimental.pallas import tpu as pltpu

HIDDEN_SIZE = 512
NUM_SEM_CATEGORIES = 16
IN_CH = NUM_SEM_CATEGORIES + 8  # 24 input channels, fixed by the module


# ----------------------------- helpers (host side) -----------------------------

def maxpool2x2(x):
    # NHWC, even spatial dims -> nn.MaxPool2d(2)
    nb, hh, ww, c = x.shape
    return x.reshape(nb, hh // 2, 2, ww // 2, 2, c).max(axis=(2, 4))


def _valid_mask(n, h, w):
    # 1.0 on the H x W interior of the zero-padded (H+2) x (W+2) grid, else 0.0.
    hp, wp = h + 2, w + 2
    yp = jnp.arange(hp)[:, None]
    xp = jnp.arange(wp)[None, :]
    m = ((yp >= 1) & (yp <= h) & (xp >= 1) & (xp <= w)).astype(jnp.float32)
    return jnp.broadcast_to(m[None], (n, hp, wp)).reshape(n * hp * wp, 1)


def _geom(nb, h, w, cin, cout):
    hp, wp = h + 2, w + 2
    return dict(h=h, w=w, hp=hp, wp=wp, cin=cin, cout=cout,
                mp=nb * hp * wp, g=wp + 1)


def _tap_offsets(cin):
    """Lane offsets of the 9 conv taps on the im2col K axis.

    An offset is bumped to the next 128-lane boundary whenever a Cin-wide slab would
    straddle a vreg boundary, so every im2col column-slab store stays within a single
    vreg (cheap rotate + masked store).  Gap lanes are zeroed in-kernel and hit
    zero weight rows.  Returns (offsets, total_K).
    """
    offs, o = [], 0
    for _ in range(9):
        if cin <= 128 and (o % 128) + cin > 128:
            o += 128 - (o % 128)
        offs.append(o)
        o += cin
    return offs, o


# ----------------------------- fused Pallas kernel -----------------------------

def _fused_policy_call(kp, xg, m4, extra, nb, nblk, h, w):
    """One pallas_call for the whole Goal_Oriented_Semantic_Policy forward."""
    cin0 = xg.shape[-1]
    feat_dim = kp["l2_b"].shape[1]
    oh, ow = h // 16, w // 16
    npix = oh * ow

    chans = [(cin0, 32), (32, 64), (64, 128), (128, 64), (64, 32)]
    spat = [(h // 2, w // 2), (h // 4, w // 4), (h // 8, w // 8),
            (h // 16, w // 16), (h // 16, w // 16)]
    geo = [_geom(nb, sh, sw, ci, co) for (sh, sw), (ci, co) in zip(spat, chans)]

    def kernel(x_ref, m4_ref, extra_ref,
               w1, w2, w3, w4, w5, b1, b2, b3, b4, b5,
               l1w, l1b, l2w, l2b, cw, cb,
               val_ref, feat_ref,
               act2, act3, act4, act5,
               co1, co2, co3, co5,
               wm1, wm2, wm3,
               im1, im2, im3, im4, im5, flat):

        def zero_ring(dst, lg):
            # Zero ONLY the per-image padding ring: interiors are fully overwritten by
            # the pooling writes below; guard rows feed only discarded ring outputs.
            hp, wp, hh, gg, cc = lg["hp"], lg["wp"], lg["h"], lg["g"], lg["cin"]
            zl = jnp.zeros((wp + 1, cc), jnp.float32)
            z2 = jnp.zeros((2, cc), jnp.float32)
            for b in range(nb):
                base = gg + b * hp * wp
                dst[pl.ds(base, wp + 1), :] = zl                     # top row + (1,0)
                for y in range(1, hh):
                    dst[pl.ds(base + y * wp + wp - 1, 2), :] = z2    # (y,wp-1)+(y+1,0)
                dst[pl.ds(base + hh * wp + wp - 1, wp + 1), :] = zl  # (h,wp-1)+bottom

        zero_ring(act2, geo[1])
        zero_ring(act3, geo[2])
        zero_ring(act4, geo[3])
        # act5's ring is produced by the m4-masked conv4 store below.

        def conv3x3_relu(read, lg, im_ref, w_ref, b_ref):
            # 3x3/pad-1 conv as ONE big-K bf16 MXU matmul over an im2col scratch.
            wp, mp, gg, cc = lg["wp"], lg["mp"], lg["g"], lg["cin"]
            offs, _ = _tap_offsets(cc)
            pos = 0
            for o in offs:                       # zero alignment-gap lanes (if any)
                if o > pos:
                    im_ref[:, pos:o] = jnp.zeros((mp, o - pos), jnp.bfloat16)
                pos = o + cc
            k = 0
            for dy in (-1, 0, 1):
                for dx in (-1, 0, 1):
                    off = dy * wp + dx
                    im_ref[:, offs[k]:offs[k] + cc] = (
                        read(gg + off, mp).astype(jnp.bfloat16))
                    k += 1
            acc = jnp.dot(im_ref[...], w_ref[...],
                          preferred_element_type=jnp.float32)
            return jnp.maximum(acc + b_ref[...], 0.0)

        def pool_into(co_ref, lg, wm_ref, dst_ref, dst_lg):
            # MaxPool2d(2): W direction first via two whole-buffer stride-2 reads,
            # then each output row is two contiguous reads + max, written straight
            # into the interior of the next layer's padded activation.
            hp, wp, hh, ww, mp = lg["hp"], lg["wp"], lg["h"], lg["w"], lg["mp"]
            half = mp // 2
            wm_ref[...] = jnp.maximum(co_ref[pl.ds(1, half, 2), :],
                                      co_ref[pl.ds(2, half, 2), :])
            hpd, wpd, gd = dst_lg["hp"], dst_lg["wp"], dst_lg["g"]
            ho, wo = hh // 2, ww // 2
            for b in range(nb):
                for yo in range(ho):
                    k1 = (b * hp * wp + (2 * yo + 1) * wp) // 2
                    k2 = k1 + wp // 2
                    pooled = jnp.maximum(wm_ref[pl.ds(k1, wo), :],
                                         wm_ref[pl.ds(k2, wo), :])
                    d = gd + b * hpd * wpd + (yo + 1) * wpd + 1
                    dst_ref[pl.ds(d, wo), :] = pooled

        def read_x(s, m):
            return x_ref[0, pl.ds(s, m), :]

        def act_reader(act):
            return lambda s, m: act[pl.ds(s, m), :]

        # conv stack (the very first MaxPool2d is applied to the HBM input in the
        # wrapper; x_ref is already padded / flattened / guarded).
        co1[pl.ds(0, geo[0]["mp"]), :] = conv3x3_relu(read_x, geo[0], im1, w1, b1)
        pool_into(co1, geo[0], wm1, act2, geo[1])

        co2[pl.ds(0, geo[1]["mp"]), :] = conv3x3_relu(act_reader(act2), geo[1],
                                                      im2, w2, b2)
        pool_into(co2, geo[1], wm2, act3, geo[2])

        co3[pl.ds(0, geo[2]["mp"]), :] = conv3x3_relu(act_reader(act3), geo[2],
                                                      im3, w3, b3)
        pool_into(co3, geo[2], wm3, act4, geo[3])

        o4 = conv3x3_relu(act_reader(act4), geo[3], im4, w4, b4)
        # conv4's padding ring must be zero: it becomes conv5's `padding=1` zeros.
        o4 = jnp.where(m4_ref[...] != 0.0, o4, 0.0)
        act5[pl.ds(geo[4]["g"], geo[4]["mp"]), :] = o4

        co5[...] = conv3x3_relu(act_reader(act5), geo[4], im5, w5, b5)

        # Flatten folded into linear1: compact the interior conv5 pixels and the
        # [orientation|goal] embedding into ONE contiguous bf16 row per sample and
        # run a single (nb, npix*32+16) @ (., hidden) matmul (host-reordered weight).
        hp5, wp5 = geo[4]["hp"], geo[4]["wp"]
        p = 0
        for y in range(oh):
            for x in range(ow):
                s = (y + 1) * wp5 + (x + 1)
                if nb == 1:
                    pix = co5[pl.ds(s, 1), :]
                else:
                    pix = co5[pl.ds(s, nb, hp5 * wp5), :]
                flat[:, p * 32:(p + 1) * 32] = pix.astype(jnp.bfloat16)
                p += 1
        flat[:, npix * 32:npix * 32 + 16] = extra_ref[0]

        hid1 = jnp.maximum(
            jnp.dot(flat[...], l1w[...], preferred_element_type=jnp.float32)
            + l1b[...], 0.0)
        hid2 = jnp.maximum(
            jnp.dot(hid1.astype(jnp.bfloat16), l2w[...],
                    preferred_element_type=jnp.float32) + l2b[...], 0.0)
        feat_ref[...] = hid2.reshape(1, nb, feat_dim)
        # critic_linear: VPU multiply + lane reduction (no 1-lane MXU matmul).
        val_ref[...] = (jnp.sum(hid2 * cw[...], axis=-1, keepdims=True)
                        + cb[...]).reshape(1, nb, 1)

    inputs = [xg, m4, extra,
              kp["c1_w"], kp["c2_w"], kp["c3_w"], kp["c4_w"], kp["c5_w"],
              kp["c1_b"], kp["c2_b"], kp["c3_b"], kp["c4_b"], kp["c5_b"],
              kp["l1_w"], kp["l1_b"], kp["l2_w"], kp["l2_b"],
              kp["crit_w"], kp["crit_b"]]

    in_specs = (
        [pl.BlockSpec((1,) + xg.shape[1:], lambda i: (i, 0, 0)),
         pl.BlockSpec(m4.shape, lambda i: (0, 0)),
         pl.BlockSpec((1, nb, extra.shape[-1]), lambda i: (i, 0, 0))]
        + [pl.BlockSpec(a.shape, lambda i: (0, 0)) for a in inputs[3:]])

    scratch = [
        # zero-ring padded (+guard rows) f32 activations of layers 2..5
        pltpu.VMEM((geo[1]["mp"] + 2 * geo[1]["g"], geo[1]["cin"]), jnp.float32),
        pltpu.VMEM((geo[2]["mp"] + 2 * geo[2]["g"], geo[2]["cin"]), jnp.float32),
        pltpu.VMEM((geo[3]["mp"] + 2 * geo[3]["g"], geo[3]["cin"]), jnp.float32),
        pltpu.VMEM((geo[4]["mp"] + 2 * geo[4]["g"], geo[4]["cin"]), jnp.float32),
        # conv outputs; +8 rows keep the whole-buffer stride-2 W-max read in bounds
        pltpu.VMEM((geo[0]["mp"] + 8, geo[0]["cout"]), jnp.float32),
        pltpu.VMEM((geo[1]["mp"] + 8, geo[1]["cout"]), jnp.float32),
        pltpu.VMEM((geo[2]["mp"] + 8, geo[2]["cout"]), jnp.float32),
        pltpu.VMEM((geo[4]["mp"], geo[4]["cout"]), jnp.float32),
        # W-direction max staging for the three pooled layers
        pltpu.VMEM((geo[0]["mp"] // 2, geo[0]["cout"]), jnp.float32),
        pltpu.VMEM((geo[1]["mp"] // 2, geo[1]["cout"]), jnp.float32),
        pltpu.VMEM((geo[2]["mp"] // 2, geo[2]["cout"]), jnp.float32),
        # bf16 im2col staging (Mp, ~9*Cin) per conv layer
        pltpu.VMEM((geo[0]["mp"], _tap_offsets(geo[0]["cin"])[1]), jnp.bfloat16),
        pltpu.VMEM((geo[1]["mp"], _tap_offsets(geo[1]["cin"])[1]), jnp.bfloat16),
        pltpu.VMEM((geo[2]["mp"], _tap_offsets(geo[2]["cin"])[1]), jnp.bfloat16),
        pltpu.VMEM((geo[3]["mp"], _tap_offsets(geo[3]["cin"])[1]), jnp.bfloat16),
        pltpu.VMEM((geo[4]["mp"], _tap_offsets(geo[4]["cin"])[1]), jnp.bfloat16),
        # flatten(+extras) staging row(s) for the single linear1 matmul
        pltpu.VMEM((nb, npix * 32 + 16), jnp.bfloat16),
    ]

    value, actor = pl.pallas_call(
        kernel,
        out_shape=(jax.ShapeDtypeStruct((nblk, nb, 1), jnp.float32),
                   jax.ShapeDtypeStruct((nblk, nb, feat_dim), jnp.float32)),
        grid=(nblk,),
        in_specs=in_specs,
        out_specs=(pl.BlockSpec((1, nb, 1), lambda i: (i, 0, 0)),
                   pl.BlockSpec((1, nb, feat_dim), lambda i: (i, 0, 0))),
        scratch_shapes=scratch,
        compiler_params=pltpu.CompilerParams(
            dimension_semantics=("parallel",),
            vmem_limit_bytes=32 * 1024 * 1024),
    )(*inputs)
    return value, actor


# ----------------------------- parameters -----------------------------

def init_params(key, input_shape, hidden_size=HIDDEN_SIZE,
                num_sem_categories=NUM_SEM_CATEGORIES):
    _, h, w = input_shape
    out_size = (h // 16) * (w // 16)
    keys = jax.random.split(key, 18)

    def conv_w(k, cin, cout):
        std = 1.0 / jnp.sqrt(9.0 * cin)
        return jax.random.normal(k, (3, 3, cin, cout), jnp.float32) * std  # HWIO

    def lin_w(k, fin, fout):
        std = 1.0 / jnp.sqrt(float(fin))
        return jax.random.normal(k, (fin, fout), jnp.float32) * std        # (in, out)

    def bias(k, nout):
        return jax.random.normal(k, (nout,), jnp.float32) * 0.05

    cin0 = num_sem_categories + 8
    chans = [(cin0, 32), (32, 64), (64, 128), (128, 64), (64, 32)]
    params = {}
    for i, (ci, co) in enumerate(chans, start=1):
        params[f"c{i}_w"] = conv_w(keys[2 * i - 2], ci, co)
        params[f"c{i}_b"] = bias(keys[2 * i - 1], co)
    params["l1_w"] = lin_w(keys[10], out_size * 32 + 8 * 2, hidden_size)
    params["l1_b"] = bias(keys[11], hidden_size)
    params["l2_w"] = lin_w(keys[12], hidden_size, 256)
    params["l2_b"] = bias(keys[13], 256)
    params["crit_w"] = lin_w(keys[14], 256, 1)
    params["crit_b"] = bias(keys[15], 1)
    params["orient_emb"] = jax.random.normal(keys[16], (72, 8), jnp.float32)
    params["goal_emb"] = jax.random.normal(keys[17], (num_sem_categories, 8),
                                           jnp.float32)
    return params


def prepare_params(params, input_shape):
    """One-time re-layout of the (PyTorch-style) parameters into kernel layouts."""
    _, h, w = input_shape
    out_size = (h // 16) * (w // 16)
    hidden = params["l1_w"].shape[1]
    kp = {}
    for i in range(1, 6):
        wz = params[f"c{i}_w"]                        # (3, 3, cin, cout), HWIO
        cin, cout = wz.shape[2], wz.shape[3]
        offs, ktot = _tap_offsets(cin)
        taps = wz.reshape(9, cin, cout)               # tap k = (dy+1)*3 + (dx+1)
        w9 = jnp.zeros((ktot, cout), jnp.float32)
        for k in range(9):
            w9 = w9.at[offs[k]:offs[k] + cin].set(taps[k])
        kp[f"c{i}_w"] = w9.astype(jnp.bfloat16)
        kp[f"c{i}_b"] = params[f"c{i}_b"].reshape(1, cout).astype(jnp.float32)
    l1 = params["l1_w"]                               # (out_size*32 + 16, hidden)
    # torch Flatten is NCHW (row = c*out_size + p); kernel flatten is pixel-major
    # (row = p*32 + c) -> row-permute the weight once on the host.
    l1_pix = (l1[:out_size * 32].reshape(32, out_size, hidden)
              .transpose(1, 0, 2).reshape(out_size * 32, hidden))
    kp["l1_w"] = jnp.concatenate([l1_pix, l1[out_size * 32:]],
                                 axis=0).astype(jnp.bfloat16)
    kp["l1_b"] = params["l1_b"].reshape(1, hidden).astype(jnp.float32)
    kp["l2_w"] = params["l2_w"].astype(jnp.bfloat16)
    kp["l2_b"] = params["l2_b"].reshape(1, -1).astype(jnp.float32)
    kp["crit_w"] = params["crit_w"].reshape(1, -1).astype(jnp.float32)
    kp["crit_b"] = params["crit_b"].reshape(1, 1).astype(jnp.float32)
    return kp


# ----------------------------- public forward -----------------------------

def rl_policy_forward(params, inputs_nchw, rnn_hxs, masks, extras, batch_block=1):
    """RL_Policy.forward (model_type=1, recurrent=False).

    inputs_nchw: (N, 24, H, W) float32 (NCHW, as in PyTorch); H, W divisible by 16.
    extras:      (N, 2) int32 -- [:, 0] orientation idx in [0,72), [:, 1] goal idx.
    Returns (value (N,), actor_features (N, 256), rnn_hxs).
    """
    del masks  # unused in the non-recurrent path
    n, c, h, w = inputs_nchw.shape
    nb = batch_block
    assert n % nb == 0 and h % 16 == 0 and w % 16 == 0
    nblk = n // nb
    kp = prepare_params(params, (c, h, w))

    # XLA glue: NCHW->NHWC, first MaxPool2d(2), conv1 zero padding, flatten + guards.
    x = jnp.transpose(inputs_nchw, (0, 2, 3, 1))
    x = maxpool2x2(x)                                   # (N, H/2, W/2, C)
    sh, sw = h // 2, w // 2
    hp, wp = sh + 2, sw + 2
    g = wp + 1
    xp = jnp.pad(x, ((0, 0), (1, 1), (1, 1), (0, 0)))   # conv1 zero padding (pad=1)
    xf = xp.reshape(nblk, nb * hp * wp, c)
    xg = jnp.pad(xf, ((0, 0), (g, g), (0, 0)))          # guard rows per grid block

    m4 = _valid_mask(nb, h // 16, w // 16)              # conv4 ring mask (see kernel)

    orientation_emb = params["orient_emb"][extras[:, 0]]
    goal_emb = params["goal_emb"][extras[:, 1]]
    extra = (jnp.concatenate([orientation_emb, goal_emb], axis=1)
             .astype(jnp.bfloat16).reshape(nblk, nb, 16))

    value, actor = _fused_policy_call(kp, xg, m4, extra, nb, nblk, h, w)
    return value.reshape(n), actor.reshape(n, actor.shape[-1]), rnn_hxs


# ----------------------------- plain-JAX reference -----------------------------

def reference_forward(params, inputs_nchw, rnn_hxs, masks, extras):
    """Plain-JAX/XLA reference of the same forward pass (for validation only)."""
    del masks
    x = jnp.transpose(inputs_nchw, (0, 2, 3, 1))
    x = maxpool2x2(x)
    for i in range(1, 6):
        x = jax.lax.conv_general_dilated(
            x, params[f"c{i}_w"], window_strides=(1, 1), padding="SAME",
            dimension_numbers=("NHWC", "HWIO", "NHWC"))
        x = jnp.maximum(x + params[f"c{i}_b"], 0.0)
        if i <= 3:
            x = maxpool2x2(x)
    n = x.shape[0]
    x_flat = jnp.transpose(x, (0, 3, 1, 2)).reshape(n, -1)   # torch Flatten (NCHW)
    orient = params["orient_emb"][extras[:, 0]]
    goal = params["goal_emb"][extras[:, 1]]
    f = jnp.concatenate([x_flat, orient, goal], axis=1)
    h1 = jnp.maximum(f @ params["l1_w"] + params["l1_b"], 0.0)
    h2 = jnp.maximum(h1 @ params["l2_w"] + params["l2_b"], 0.0)
    v = h2 @ params["crit_w"] + params["crit_b"]
    return v[:, 0], h2, rnn_hxs


if __name__ == "__main__":
    key = jax.random.PRNGKey(0)
    N, H, W = 2, 32, 32  # H, W must be divisible by 16 (four MaxPool2d(2) stages)
    input_shape = (IN_CH, H, W)

    pkey, ikey, e0key, e1key = jax.random.split(key, 4)
    params = init_params(pkey, input_shape)

    inputs = jax.random.normal(ikey, (N, IN_CH, H, W), jnp.float32)
    extras = jnp.stack(
        [jax.random.randint(e0key, (N,), 0, 72),
         jax.random.randint(e1key, (N,), 0, NUM_SEM_CATEGORIES)],
        axis=1).astype(jnp.int32)
    rnn_hxs = jnp.zeros((N, 1), jnp.float32)  # non-recurrent: rec_state_size == 1
    masks = jnp.ones((N, 1), jnp.float32)

    fwd = jax.jit(rl_policy_forward)
    value, actor_features, rnn_out = fwd(params, inputs, rnn_hxs, masks, extras)
    jax.block_until_ready((value, actor_features, rnn_out))

    assert value.shape == (N,)
    assert actor_features.shape == (N, 256)
    assert rnn_out.shape == rnn_hxs.shape

    # Loose cross-check vs the XLA reference (kernel uses bf16 MXU operands).
    v_ref, a_ref, _ = jax.jit(reference_forward)(params, inputs, rnn_hxs, masks, extras)
    assert jnp.allclose(value, v_ref, rtol=2e-1, atol=2e-1)
    assert jnp.allclose(actor_features, a_ref, rtol=2e-1, atol=2e-1)

    print("KERNEL_OK")
</pallas_src>

<mosaic_0001>
module attributes {stable_mosaic.version = 11 : i64} {
  func.func @kernel(%arg0: i32, %arg1: memref<1x362x24xf32, #tpu.memory_space<vmem>>, %arg2: memref<16x1xf32, #tpu.memory_space<vmem>>, %arg3: memref<1x1x16xbf16, #tpu.memory_space<vmem>>, %arg4: memref<224x32xbf16, #tpu.memory_space<vmem>>, %arg5: memref<288x64xbf16, #tpu.memory_space<vmem>>, %arg6: memref<576x128xbf16, #tpu.memory_space<vmem>>, %arg7: memref<1152x64xbf16, #tpu.memory_space<vmem>>, %arg8: memref<576x32xbf16, #tpu.memory_space<vmem>>, %arg9: memref<1x32xf32, #tpu.memory_space<vmem>>, %arg10: memref<1x64xf32, #tpu.memory_space<vmem>>, %arg11: memref<1x128xf32, #tpu.memory_space<vmem>>, %arg12: memref<1x64xf32, #tpu.memory_space<vmem>>, %arg13: memref<1x32xf32, #tpu.memory_space<vmem>>, %arg14: memref<144x512xbf16, #tpu.memory_space<vmem>>, %arg15: memref<1x512xf32, #tpu.memory_space<vmem>>, %arg16: memref<512x256xbf16, #tpu.memory_space<vmem>>, %arg17: memref<1x256xf32, #tpu.memory_space<vmem>>, %arg18: memref<1x256xf32, #tpu.memory_space<vmem>>, %arg19: memref<1x1xf32, #tpu.memory_space<vmem>>, %arg20: memref<1x1x1xf32, #tpu.memory_space<vmem>>, %arg21: memref<1x1x256xf32, #tpu.memory_space<vmem>>, %arg22: memref<122x32xf32, #tpu.memory_space<vmem>>, %arg23: memref<50x64xf32, #tpu.memory_space<vmem>>, %arg24: memref<26x128xf32, #tpu.memory_space<vmem>>, %arg25: memref<26x64xf32, #tpu.memory_space<vmem>>, %arg26: memref<332x32xf32, #tpu.memory_space<vmem>>, %arg27: memref<108x64xf32, #tpu.memory_space<vmem>>, %arg28: memref<44x128xf32, #tpu.memory_space<vmem>>, %arg29: memref<16x32xf32, #tpu.memory_space<vmem>>, %arg30: memref<162x32xf32, #tpu.memory_space<vmem>>, %arg31: memref<50x64xf32, #tpu.memory_space<vmem>>, %arg32: memref<18x128xf32, #tpu.memory_space<vmem>>, %arg33: memref<324x224xbf16, #tpu.memory_space<vmem>>, %arg34: memref<100x288xbf16, #tpu.memory_space<vmem>>, %arg35: memref<36x576xbf16, #tpu.memory_space<vmem>>, %arg36: memref<16x1152xbf16, #tpu.memory_space<vmem>>, %arg37: memref<16x576xbf16, #tpu.memory_space<vmem>>, %arg38: memref<1x144xbf16, #tpu.memory_space<vmem>>) attributes {dimension_semantics = [#tpu.dimension_semantics<parallel>], iteration_bounds = array<i64: 2>, scalar_prefetch = 0 : i64, scratch_operands = 17 : i64, tpu.core_type = #tpu.core_type<tc>, window_params = [{transform_indices = @transform_0, window_bounds = array<i64: 1, 362, 24>}, {pipeline_mode = #tpu.pipeline_mode<synchronous>, transform_indices = @transform_1, window_bounds = array<i64: 16, 1>}, {transform_indices = @transform_2, window_bounds = array<i64: 1, 1, 16>}, {pipeline_mode = #tpu.pipeline_mode<synchronous>, transform_indices = @transform_3, window_bounds = array<i64: 224, 32>}, {pipeline_mode = #tpu.pipeline_mode<synchronous>, transform_indices = @transform_4, window_bounds = array<i64: 288, 64>}, {pipeline_mode = #tpu.pipeline_mode<synchronous>, transform_indices = @transform_5, window_bounds = array<i64: 576, 128>}, {pipeline_mode = #tpu.pipeline_mode<synchronous>, transform_indices = @transform_6, window_bounds = array<i64: 1152, 64>}, {pipeline_mode = #tpu.pipeline_mode<synchronous>, transform_indices = @transform_7, window_bounds = array<i64: 576, 32>}, {pipeline_mode = #tpu.pipeline_mode<synchronous>, transform_indices = @transform_8, window_bounds = array<i64: 1, 32>}, {pipeline_mode = #tpu.pipeline_mode<synchronous>, transform_indices = @transform_9, window_bounds = array<i64: 1, 64>}, {pipeline_mode = #tpu.pipeline_mode<synchronous>, transform_indices = @transform_10, window_bounds = array<i64: 1, 128>}, {pipeline_mode = #tpu.pipeline_mode<synchronous>, transform_indices = @transform_11, window_bounds = array<i64: 1, 64>}, {pipeline_mode = #tpu.pipeline_mode<synchronous>, transform_indices = @transform_12, window_bounds = array<i64: 1, 32>}, {pipeline_mode = #tpu.pipeline_mode<synchronous>, transform_indices = @transform_13, window_bounds = array<i64: 144, 512>}, {pipeline_mode = #tpu.pipeline_mode<synchronous>, transform_indices = @transform_14, window_bounds = array<i64: 1, 512>}, {pipeline_mode = #tpu.pipeline_mode<synchronous>, transform_indices = @transform_15, window_bounds = array<i64: 512, 256>}, {pipeline_mode = #tpu.pipeline_mode<synchronous>, transform_indices = @transform_16, window_bounds = array<i64: 1, 256>}, {pipeline_mode = #tpu.pipeline_mode<synchronous>, transform_indices = @transform_17, window_bounds = array<i64: 1, 256>}, {pipeline_mode = #tpu.pipeline_mode<synchronous>, transform_indices = @transform_18, window_bounds = array<i64: 1, 1>}, {transform_indices = @transform_19, window_bounds = array<i64: 1, 1, 1>}, {transform_indices = @transform_20, window_bounds = array<i64: 1, 1, 256>}]} {
    %cst = arith.constant 0.000000e+00 : f32
    %0 = vector.broadcast %cst : f32 to vector<11x32xf32>
    %cst_0 = arith.constant 0.000000e+00 : f32
    %1 = vector.broadcast %cst_0 : f32 to vector<2x32xf32>
    %c11 = arith.constant 11 : index
    %c0 = arith.constant 0 : index
    %2 = vector.load %arg22[%c11, %c0] : memref<122x32xf32, #tpu.memory_space<vmem>>, vector<11x32xf32>
    tpu.vector_store %arg22[%c11, %c0], %0 {strides = array<i32>} : memref<122x32xf32, #tpu.memory_space<vmem>>, vector<11x32xf32>,
    %c30 = arith.constant 30 : index
    %c0_1 = arith.constant 0 : index
    %3 = vector.load %arg22[%c30, %c0_1] : memref<122x32xf32, #tpu.memory_space<vmem>>, vector<2x32xf32>
    tpu.vector_store %arg22[%c30, %c0_1], %1 {strides = array<i32>} : memref<122x32xf32, #tpu.memory_space<vmem>>, vector<2x32xf32>,
    %c40 = arith.constant 40 : index
    %c0_2 = arith.constant 0 : index
    %4 = vector.load %arg22[%c40, %c0_2] : memref<122x32xf32, #tpu.memory_space<vmem>>, vector<2x32xf32>
    tpu.vector_store %arg22[%c40, %c0_2], %1 {strides = array<i32>} : memref<122x32xf32, #tpu.memory_space<vmem>>, vector<2x32xf32>,
    %c50 = arith.constant 50 : index
    %c0_3 = arith.constant 0 : index
    %5 = vector.load %arg22[%c50, %c0_3] : memref<122x32xf32, #tpu.memory_space<vmem>>, vector<2x32xf32>
    tpu.vector_store %arg22[%c50, %c0_3], %1 {strides = array<i32>} : memref<122x32xf32, #tpu.memory_space<vmem>>, vector<2x32xf32>,
    %c60 = arith.constant 60 : index
    %c0_4 = arith.constant 0 : index
    %6 = vector.load %arg22[%c60, %c0_4] : memref<122x32xf32, #tpu.memory_space<vmem>>, vector<2x32xf32>
    tpu.vector_store %arg22[%c60, %c0_4], %1 {strides = array<i32>} : memref<122x32xf32, #tpu.memory_space<vmem>>, vector<2x32xf32>,
    %c70 = arith.constant 70 : index
    %c0_5 = arith.constant 0 : index
    %7 = vector.load %arg22[%c70, %c0_5] : memref<122x32xf32, #tpu.memory_space<vmem>>, vector<2x32xf32>
    tpu.vector_store %arg22[%c70, %c0_5], %1 {strides = array<i32>} : memref<122x32xf32, #tpu.memory_space<vmem>>, vector<2x32xf32>,
    %c80 = arith.constant 80 : index
    %c0_6 = arith.constant 0 : index
    %8 = vector.load %arg22[%c80, %c0_6] : memref<122x32xf32, #tpu.memory_space<vmem>>, vector<2x32xf32>
    tpu.vector_store %arg22[%c80, %c0_6], %1 {strides = array<i32>} : memref<122x32xf32, #tpu.memory_space<vmem>>, vector<2x32xf32>,
    %c90 = arith.constant 90 : index
    %c0_7 = arith.constant 0 : index
    %9 = vector.load %arg22[%c90, %c0_7] : memref<122x32xf32, #tpu.memory_space<vmem>>, vector<2x32xf32>
    tpu.vector_store %arg22[%c90, %c0_7], %1 {strides = array<i32>} : memref<122x32xf32, #tpu.memory_space<vmem>>, vector<2x32xf32>,
    %c100 = arith.constant 100 : index
    %c0_8 = arith.constant 0 : index
    %10 = vector.load %arg22[%c100, %c0_8] : memref<122x32xf32, #tpu.memory_space<vmem>>, vector<11x32xf32>
    tpu.vector_store %arg22[%c100, %c0_8], %0 {strides = array<i32>} : memref<122x32xf32, #tpu.memory_space<vmem>>, vector<11x32xf32>,
    %cst_9 = arith.constant 0.000000e+00 : f32
    %11 = vector.broadcast %cst_9 : f32 to vector<7x64xf32>
    %cst_10 = arith.constant 0.000000e+00 : f32
    %12 = vector.broadcast %cst_10 : f32 to vector<2x64xf32>
    %c7 = arith.constant 7 : index
    %c0_11 = arith.constant 0 : index
    %13 = vector.load %arg23[%c7, %c0_11] : memref<50x64xf32, #tpu.memory_space<vmem>>, vector<7x64xf32>
    tpu.vector_store %arg23[%c7, %c0_11], %11 {strides = array<i32>} : memref<50x64xf32, #tpu.memory_space<vmem>>, vector<7x64xf32>,
    %c18 = arith.constant 18 : index
    %c0_12 = arith.constant 0 : index
    %14 = vector.load %arg23[%c18, %c0_12] : memref<50x64xf32, #tpu.memory_space<vmem>>, vector<2x64xf32>
    tpu.vector_store %arg23[%c18, %c0_12], %12 {strides = array<i32>} : memref<50x64xf32, #tpu.memory_space<vmem>>, vector<2x64xf32>,
    %c24 = arith.constant 24 : index
    %c0_13 = arith.constant 0 : index
    %15 = vector.load %arg23[%c24, %c0_13] : memref<50x64xf32, #tpu.memory_space<vmem>>, vector<2x64xf32>
    tpu.vector_store %arg23[%c24, %c0_13], %12 {strides = array<i32>} : memref<50x64xf32, #tpu.memory_space<vmem>>, vector<2x64xf32>,
    %c30_14 = arith.constant 30 : index
    %c0_15 = arith.constant 0 : index
    %16 = vector.load %arg23[%c30_14, %c0_15] : memref<50x64xf32, #tpu.memory_space<vmem>>, vector<2x64xf32>
    tpu.vector_store %arg23[%c30_14, %c0_15], %12 {strides = array<i32>} : memref<50x64xf32, #tpu.memory_space<vmem>>, vector<2x64xf32>,
    %c36 = arith.constant 36 : index
    %c0_16 = arith.constant 0 : index
    %17 = vector.load %arg23[%c36, %c0_16] : memref<50x64xf32, #tpu.memory_space<vmem>>, vector<7x64xf32>
    tpu.vector_store %arg23[%c36, %c0_16], %11 {strides = array<i32>} : memref<50x64xf32, #tpu.memory_space<vmem>>, vector<7x64xf32>,
    %cst_17 = arith.constant 0.000000e+00 : f32
    %18 = vector.broadcast %cst_17 : f32 to vector<5x128xf32>
    %cst_18 = arith.constant 0.000000e+00 : f32
    %19 = vector.broadcast %cst_18 : f32 to vector<2x128xf32>
    %c5 = arith.constant 5 : index
    %c0_19 = arith.constant 0 : index
    %20 = vector.load %arg24[%c5, %c0_19] : memref<26x128xf32, #tpu.memory_space<vmem>>, vector<5x128xf32>
    tpu.vector_store %arg24[%c5, %c0_19], %18 {strides = array<i32>} : memref<26x128xf32, #tpu.memory_space<vmem>>, vector<5x128xf32>,
    %c12 = arith.constant 12 : index
    %c0_20 = arith.constant 0 : index
    %21 = vector.load %arg24[%c12, %c0_20] : memref<26x128xf32, #tpu.memory_space<vmem>>, vector<2x128xf32>
    tpu.vector_store %arg24[%c12, %c0_20], %19 {strides = array<i32>} : memref<26x128xf32, #tpu.memory_space<vmem>>, vector<2x128xf32>,
    %c16 = arith.constant 16 : index
    %c0_21 = arith.constant 0 : index
    %22 = vector.load %arg24[%c16, %c0_21] : memref<26x128xf32, #tpu.memory_space<vmem>>, vector<5x128xf32>
    tpu.vector_store %arg24[%c16, %c0_21], %18 {strides = array<i32>} : memref<26x128xf32, #tpu.memory_space<vmem>>, vector<5x128xf32>,
    %cst_22 = arith.constant 0.000000e+00 : bf16
    %23 = vector.broadcast %cst_22 : bf16 to vector<324x8xbf16>
    %c0_23 = arith.constant 0 : index
    %c120 = arith.constant 120 : index
    %24 = vector.load %arg33[%c0_23, %c120] : memref<324x224xbf16, #tpu.memory_space<vmem>>, vector<324x8xbf16>
    tpu.vector_store %arg33[%c0_23, %c120], %23 {strides = array<i32>} : memref<324x224xbf16, #tpu.memory_space<vmem>>, vector<324x8xbf16>,
    %c0_24 = arith.constant 0 : index
    %c0_25 = arith.constant 0 : index
    %c0_26 = arith.constant 0 : index
    %25 = vector.load %arg1[%c0_24, %c0_25, %c0_26] : memref<1x362x24xf32, #tpu.memory_space<vmem>>, vector<1x324x24xf32>
    %26 = vector.shape_cast %25 : vector<1x324x24xf32> to vector<324x24xf32>
    %27 = arith.truncf %26 : vector<324x24xf32> to vector<324x24xbf16>
    %c0_27 = arith.constant 0 : index
    %c0_28 = arith.constant 0 : index
    %28 = vector.load %arg33[%c0_27, %c0_28] : memref<324x224xbf16, #tpu.memory_space<vmem>>, vector<324x24xbf16>
    tpu.vector_store %arg33[%c0_27, %c0_28], %27 {strides = array<i32>} : memref<324x224xbf16, #tpu.memory_space<vmem>>, vector<324x24xbf16>,
    %c0_29 = arith.constant 0 : index
    %c1 = arith.constant 1 : index
    %c0_30 = arith.constant 0 : index
    %29 = vector.load %arg1[%c0_29, %c1, %c0_30] : memref<1x362x24xf32, #tpu.memory_space<vmem>>, vector<1x324x24xf32>
    %30 = vector.shape_cast %29 : vector<1x324x24xf32> to vector<324x24xf32>
    %31 = arith.truncf %30 : vector<324x24xf32> to vector<324x24xbf16>
    %c0_31 = arith.constant 0 : index
    %c24_32 = arith.constant 24 : index
    %32 = vector.load %arg33[%c0_31, %c24_32] : memref<324x224xbf16, #tpu.memory_space<vmem>>, vector<324x24xbf16>
    tpu.vector_store %arg33[%c0_31, %c24_32], %31 {strides = array<i32>} : memref<324x224xbf16, #tpu.memory_space<vmem>>, vector<324x24xbf16>,
    %c0_33 = arith.constant 0 : index
    %c2 = arith.constant 2 : index
    %c0_34 = arith.constant 0 : index
    %33 = vector.load %arg1[%c0_33, %c2, %c0_34] : memref<1x362x24xf32, #tpu.memory_space<vmem>>, vector<1x324x24xf32>
    %34 = vector.shape_cast %33 : vector<1x324x24xf32> to vector<324x24xf32>
    %35 = arith.truncf %34 : vector<324x24xf32> to vector<324x24xbf16>
    %c0_35 = arith.constant 0 : index
    %c48 = arith.constant 48 : index
    %36 = vector.load %arg33[%c0_35, %c48] : memref<324x224xbf16, #tpu.memory_space<vmem>>, vector<324x24xbf16>
    tpu.vector_store %arg33[%c0_35, %c48], %35 {strides = array<i32>} : memref<324x224xbf16, #tpu.memory_space<vmem>>, vector<324x24xbf16>,
    %c0_36 = arith.constant 0 : index
    %c18_37 = arith.constant 18 : index
    %c0_38 = arith.constant 0 : index
    %37 = vector.load %arg1[%c0_36, %c18_37, %c0_38] : memref<1x362x24xf32, #tpu.memory_space<vmem>>, vector<1x324x24xf32>
    %38 = vector.shape_cast %37 : vector<1x324x24xf32> to vector<324x24xf32>
    %39 = arith.truncf %38 : vector<324x24xf32> to vector<324x24xbf16>
    %c0_39 = arith.constant 0 : index
    %c72 = arith.constant 72 : index
    %40 = vector.load %arg33[%c0_39, %c72] : memref<324x224xbf16, #tpu.memory_space<vmem>>, vector<324x24xbf16>
    tpu.vector_store %arg33[%c0_39, %c72], %39 {strides = array<i32>} : memref<324x224xbf16, #tpu.memory_space<vmem>>, vector<324x24xbf16>,
    %c0_40 = arith.constant 0 : index
    %c19 = arith.constant 19 : index
    %c0_41 = arith.constant 0 : index
    %41 = vector.load %arg1[%c0_40, %c19, %c0_41] : memref<1x362x24xf32, #tpu.memory_space<vmem>>, vector<1x324x24xf32>
    %42 = vector.shape_cast %41 : vector<1x324x24xf32> to vector<324x24xf32>
    %43 = arith.truncf %42 : vector<324x24xf32> to vector<324x24xbf16>
    %c0_42 = arith.constant 0 : index
    %c96 = arith.constant 96 : index
    %44 = vector.load %arg33[%c0_42, %c96] : memref<324x224xbf16, #tpu.memory_space<vmem>>, vector<324x24xbf16>
    tpu.vector_store %arg33[%c0_42, %c96], %43 {strides = array<i32>} : memref<324x224xbf16, #tpu.memory_space<vmem>>, vector<324x24xbf16>,
    %c0_43 = arith.constant 0 : index
    %c20 = arith.constant 20 : index
    %c0_44 = arith.constant 0 : index
    %45 = vector.load %arg1[%c0_43, %c20, %c0_44] : memref<1x362x24xf32, #tpu.memory_space<vmem>>, vector<1x324x24xf32>
    %46 = vector.shape_cast %45 : vector<1x324x24xf32> to vector<324x24xf32>
    %47 = arith.truncf %46 : vector<324x24xf32> to vector<324x24xbf16>
    %c0_45 = arith.constant 0 : index
    %c128 = arith.constant 128 : index
    %48 = vector.load %arg33[%c0_45, %c128] : memref<324x224xbf16, #tpu.memory_space<vmem>>, vector<324x24xbf16>
    tpu.vector_store %arg33[%c0_45, %c128], %47 {strides = array<i32>} : memref<324x224xbf16, #tpu.memory_space<vmem>>, vector<324x24xbf16>,
    %c0_46 = arith.constant 0 : index
    %c36_47 = arith.constant 36 : index
    %c0_48 = arith.constant 0 : index
    %49 = vector.load %arg1[%c0_46, %c36_47, %c0_48] : memref<1x362x24xf32, #tpu.memory_space<vmem>>, vector<1x324x24xf32>
    %50 = vector.shape_cast %49 : vector<1x324x24xf32> to vector<324x24xf32>
    %51 = arith.truncf %50 : vector<324x24xf32> to vector<324x24xbf16>
    %c0_49 = arith.constant 0 : index
    %c152 = arith.constant 152 : index
    %52 = vector.load %arg33[%c0_49, %c152] : memref<324x224xbf16, #tpu.memory_space<vmem>>, vector<324x24xbf16>
    tpu.vector_store %arg33[%c0_49, %c152], %51 {strides = array<i32>} : memref<324x224xbf16, #tpu.memory_space<vmem>>, vector<324x24xbf16>,
    %c0_50 = arith.constant 0 : index
    %c37 = arith.constant 37 : index
    %c0_51 = arith.constant 0 : index
    %53 = vector.load %arg1[%c0_50, %c37, %c0_51] : memref<1x362x24xf32, #tpu.memory_space<vmem>>, vector<1x324x24xf32>
    %54 = vector.shape_cast %53 : vector<1x324x24xf32> to vector<324x24xf32>
    %55 = arith.truncf %54 : vector<324x24xf32> to vector<324x24xbf16>
    %c0_52 = arith.constant 0 : index
    %c176 = arith.constant 176 : index
    %56 = vector.load %arg33[%c0_52, %c176] : memref<324x224xbf16, #tpu.memory_space<vmem>>, vector<324x24xbf16>
    tpu.vector_store %arg33[%c0_52, %c176], %55 {strides = array<i32>} : memref<324x224xbf16, #tpu.memory_space<vmem>>, vector<324x24xbf16>,
    %c0_53 = arith.constant 0 : index
    %c38 = arith.constant 38 : index
    %c0_54 = arith.constant 0 : index
    %57 = vector.load %arg1[%c0_53, %c38, %c0_54] : memref<1x362x24xf32, #tpu.memory_space<vmem>>, vector<1x324x24xf32>
    %58 = vector.shape_cast %57 : vector<1x324x24xf32> to vector<324x24xf32>
    %59 = arith.truncf %58 : vector<324x24xf32> to vector<324x24xbf16>
    %c0_55 = arith.constant 0 : index
    %c200 = arith.constant 200 : index
    %60 = vector.load %arg33[%c0_55, %c200] : memref<324x224xbf16, #tpu.memory_space<vmem>>, vector<324x24xbf16>
    tpu.vector_store %arg33[%c0_55, %c200], %59 {strides = array<i32>} : memref<324x224xbf16, #tpu.memory_space<vmem>>, vector<324x24xbf16>,
    %c0_56 = arith.constant 0 : index
    %c0_57 = arith.constant 0 : index
    %61 = vector.load %arg33[%c0_56, %c0_57] : memref<324x224xbf16, #tpu.memory_space<vmem>>, vector<324x224xbf16>
    %c0_58 = arith.constant 0 : index
    %c0_59 = arith.constant 0 : index
    %62 = vector.load %arg4[%c0_58, %c0_59] : memref<224x32xbf16, #tpu.memory_space<vmem>>, vector<224x32xbf16>
    %cst_60 = arith.constant dense<0.000000e+00> : vector<324x32xf32>
    %63 = tpu.matmul %61, %62, %cst_60 {dimension_numbers = #tpu.dot_dimension_numbers<[1], [0], [0], [1], [0, 0, 1, 1], [], []>} : vector<324x224xbf16>, vector<224x32xbf16>, vector<324x32xf32> -> vector<324x32xf32>
    %c0_61 = arith.constant 0 : index
    %c0_62 = arith.constant 0 : index
    %64 = vector.load %arg9[%c0_61, %c0_62] : memref<1x32xf32, #tpu.memory_space<vmem>>, vector<1x32xf32>
    %65 = vector.broadcast %64 : vector<1x32xf32> to vector<324x32xf32>
    %66 = arith.addf %63, %65 : vector<324x32xf32>
    %cst_63 = arith.constant 0.000000e+00 : f32
    %67 = vector.broadcast %cst_63 : f32 to vector<324x32xf32>
    %68 = arith.maximumf %66, %67 : vector<324x32xf32>
    %c0_64 = arith.constant 0 : index
    %c0_65 = arith.constant 0 : index
    %69 = vector.load %arg26[%c0_64, %c0_65] : memref<332x32xf32, #tpu.memory_space<vmem>>, vector<324x32xf32>
    tpu.vector_store %arg26[%c0_64, %c0_65], %68 {strides = array<i32>} : memref<332x32xf32, #tpu.memory_space<vmem>>, vector<324x32xf32>,
    %c1_66 = arith.constant 1 : index
    %c0_67 = arith.constant 0 : index
    %70 = tpu.strided_load %arg26[%c1_66, %c0_67] {strides = array<i32: 2, 1>} : memref<332x32xf32, #tpu.memory_space<vmem>>, vector<162x32xf32>
    %c2_68 = arith.constant 2 : index
    %c0_69 = arith.constant 0 : index
    %71 = tpu.strided_load %arg26[%c2_68, %c0_69] {strides = array<i32: 2, 1>} : memref<332x32xf32, #tpu.memory_space<vmem>>, vector<162x32xf32>
    %72 = arith.maximumf %70, %71 : vector<162x32xf32>
    %c0_70 = arith.constant 0 : index
    %c0_71 = arith.constant 0 : index
    %73 = vector.load %arg30[%c0_70, %c0_71] : memref<162x32xf32, #tpu.memory_space<vmem>>, vector<162x32xf32>
    tpu.vector_store %arg30[%c0_70, %c0_71], %72 {strides = array<i32>} : memref<162x32xf32, #tpu.memory_space<vmem>>, vector<162x32xf32>,
    %c9 = arith.constant 9 : index
    %c0_72 = arith.constant 0 : index
    %74 = vector.load %arg30[%c9, %c0_72] : memref<162x32xf32, #tpu.memory_space<vmem>>, vector<8x32xf32>
    %c18_73 = arith.constant 18 : index
    %c0_74 = arith.constant 0 : index
    %75 = vector.load %arg30[%c18_73, %c0_74] : memref<162x32xf32, #tpu.memory_space<vmem>>, vector<8x32xf32>
    %76 = arith.maximumf %74, %75 : vector<8x32xf32>
    %c22 = arith.constant 22 : index
    %c0_75 = arith.constant 0 : index
    %77 = vector.load %arg22[%c22, %c0_75] : memref<122x32xf32, #tpu.memory_space<vmem>>, vector<8x32xf32>
    tpu.vector_store %arg22[%c22, %c0_75], %76 {strides = array<i32>} : memref<122x32xf32, #tpu.memory_space<vmem>>, vector<8x32xf32>,
    %c27 = arith.constant 27 : index
    %c0_76 = arith.constant 0 : index
    %78 = vector.load %arg30[%c27, %c0_76] : memref<162x32xf32, #tpu.memory_space<vmem>>, vector<8x32xf32>
    %c36_77 = arith.constant 36 : index
    %c0_78 = arith.constant 0 : index
    %79 = vector.load %arg30[%c36_77, %c0_78] : memref<162x32xf32, #tpu.memory_space<vmem>>, vector<8x32xf32>
    %80 = arith.maximumf %78, %79 : vector<8x32xf32>
    %c32 = arith.constant 32 : index
    %c0_79 = arith.constant 0 : index
    %81 = vector.load %arg22[%c32, %c0_79] : memref<122x32xf32, #tpu.memory_space<vmem>>, vector<8x32xf32>
    tpu.vector_store %arg22[%c32, %c0_79], %80 {strides = array<i32>} : memref<122x32xf32, #tpu.memory_space<vmem>>, vector<8x32xf32>,
    %c45 = arith.constant 45 : index
    %c0_80 = arith.constant 0 : index
    %82 = vector.load %arg30[%c45, %c0_80] : memref<162x32xf32, #tpu.memory_space<vmem>>, vector<8x32xf32>
    %c54 = arith.constant 54 : index
    %c0_81 = arith.constant 0 : index
    %83 = vector.load %arg30[%c54, %c0_81] : memref<162x32xf32, #tpu.memory_space<vmem>>, vector<8x32xf32>
    %84 = arith.maximumf %82, %83 : vector<8x32xf32>
    %c42 = arith.constant 42 : index
    %c0_82 = arith.constant 0 : index
    %85 = vector.load %arg22[%c42, %c0_82] : memref<122x32xf32, #tpu.memory_space<vmem>>, vector<8x32xf32>
    tpu.vector_store %arg22[%c42, %c0_82], %84 {strides = array<i32>} : memref<122x32xf32, #tpu.memory_space<vmem>>, vector<8x32xf32>,
    %c63 = arith.constant 63 : index
    %c0_83 = arith.constant 0 : index
    %86 = vector.load %arg30[%c63, %c0_83] : memref<162x32xf32, #tpu.memory_space<vmem>>, vector<8x32xf32>
    %c72_84 = arith.constant 72 : index
    %c0_85 = arith.constant 0 : index
    %87 = vector.load %arg30[%c72_84, %c0_85] : memref<162x32xf32, #tpu.memory_space<vmem>>, vector<8x32xf32>
    %88 = arith.maximumf %86, %87 : vector<8x32xf32>
    %c52 = arith.constant 52 : index
    %c0_86 = arith.constant 0 : index
    %89 = vector.load %arg22[%c52, %c0_86] : memref<122x32xf32, #tpu.memory_space<vmem>>, vector<8x32xf32>
    tpu.vector_store %arg22[%c52, %c0_86], %88 {strides = array<i32>} : memref<122x32xf32, #tpu.memory_space<vmem>>, vector<8x32xf32>,
    %c81 = arith.constant 81 : index
    %c0_87 = arith.constant 0 : index
    %90 = vector.load %arg30[%c81, %c0_87] : memref<162x32xf32, #tpu.memory_space<vmem>>, vector<8x32xf32>
    %c90_88 = arith.constant 90 : index
    %c0_89 = arith.constant 0 : index
    %91 = vector.load %arg30[%c90_88, %c0_89] : memref<162x32xf32, #tpu.memory_space<vmem>>, vector<8x32xf32>
    %92 = arith.maximumf %90, %91 : vector<8x32xf32>
    %c62 = arith.constant 62 : index
    %c0_90 = arith.constant 0 : index
    %93 = vector.load %arg22[%c62, %c0_90] : memref<122x32xf32, #tpu.memory_space<vmem>>, vector<8x32xf32>
    tpu.vector_store %arg22[%c62, %c0_90], %92 {strides = array<i32>} : memref<122x32xf32, #tpu.memory_space<vmem>>, vector<8x32xf32>,
    %c99 = arith.constant 99 : index
    %c0_91 = arith.constant 0 : index
    %94 = vector.load %arg30[%c99, %c0_91] : memref<162x32xf32, #tpu.memory_space<vmem>>, vector<8x32xf32>
    %c108 = arith.constant 108 : index
    %c0_92 = arith.constant 0 : index
    %95 = vector.load %arg30[%c108, %c0_92] : memref<162x32xf32, #tpu.memory_space<vmem>>, vector<8x32xf32>
    %96 = arith.maximumf %94, %95 : vector<8x32xf32>
    %c72_93 = arith.constant 72 : index
    %c0_94 = arith.constant 0 : index
    %97 = vector.load %arg22[%c72_93, %c0_94] : memref<122x32xf32, #tpu.memory_space<vmem>>, vector<8x32xf32>
    tpu.vector_store %arg22[%c72_93, %c0_94], %96 {strides = array<i32>} : memref<122x32xf32, #tpu.memory_space<vmem>>, vector<8x32xf32>,
    %c117 = arith.constant 117 : index
    %c0_95 = arith.constant 0 : index
    %98 = vector.load %arg30[%c117, %c0_95] : memref<162x32xf32, #tpu.memory_space<vmem>>, vector<8x32xf32>
    %c126 = arith.constant 126 : index
    %c0_96 = arith.constant 0 : index
    %99 = vector.load %arg30[%c126, %c0_96] : memref<162x32xf32, #tpu.memory_space<vmem>>, vector<8x32xf32>
    %100 = arith.maximumf %98, %99 : vector<8x32xf32>
    %c82 = arith.constant 82 : index
    %c0_97 = arith.constant 0 : index
    %101 = vector.load %arg22[%c82, %c0_97] : memref<122x32xf32, #tpu.memory_space<vmem>>, vector<8x32xf32>
    tpu.vector_store %arg22[%c82, %c0_97], %100 {strides = array<i32>} : memref<122x32xf32, #tpu.memory_space<vmem>>, vector<8x32xf32>,
    %c135 = arith.constant 135 : index
    %c0_98 = arith.constant 0 : index
    %102 = vector.load %arg30[%c135, %c0_98] : memref<162x32xf32, #tpu.memory_space<vmem>>, vector<8x32xf32>
    %c144 = arith.constant 144 : index
    %c0_99 = arith.constant 0 : index
    %103 = vector.load %arg30[%c144, %c0_99] : memref<162x32xf32, #tpu.memory_space<vmem>>, vector<8x32xf32>
    %104 = arith.maximumf %102, %103 : vector<8x32xf32>
    %c92 = arith.constant 92 : index
    %c0_100 = arith.constant 0 : index
    %105 = vector.load %arg22[%c92, %c0_100] : memref<122x32xf32, #tpu.memory_space<vmem>>, vector<8x32xf32>
    tpu.vector_store %arg22[%c92, %c0_100], %104 {strides = array<i32>} : memref<122x32xf32, #tpu.memory_space<vmem>>, vector<8x32xf32>,
    %c0_101 = arith.constant 0 : index
    %c0_102 = arith.constant 0 : index
    %106 = vector.load %arg22[%c0_101, %c0_102] : memref<122x32xf32, #tpu.memory_space<vmem>>, vector<100x32xf32>
    %107 = arith.truncf %106 : vector<100x32xf32> to vector<100x32xbf16>
    %c0_103 = arith.constant 0 : index
    %c0_104 = arith.constant 0 : index
    %108 = vector.load %arg34[%c0_103, %c0_104] : memref<100x288xbf16, #tpu.memory_space<vmem>>, vector<100x32xbf16>
    tpu.vector_store %arg34[%c0_103, %c0_104], %107 {strides = array<i32>} : memref<100x288xbf16, #tpu.memory_space<vmem>>, vector<100x32xbf16>,
    %c1_105 = arith.constant 1 : index
    %c0_106 = arith.constant 0 : index
    %109 = vector.load %arg22[%c1_105, %c0_106] : memref<122x32xf32, #tpu.memory_space<vmem>>, vector<100x32xf32>
    %110 = arith.truncf %109 : vector<100x32xf32> to vector<100x32xbf16>
    %c0_107 = arith.constant 0 : index
    %c32_108 = arith.constant 32 : index
    %111 = vector.load %arg34[%c0_107, %c32_108] : memref<100x288xbf16, #tpu.memory_space<vmem>>, vector<100x32xbf16>
    tpu.vector_store %arg34[%c0_107, %c32_108], %110 {strides = array<i32>} : memref<100x288xbf16, #tpu.memory_space<vmem>>, vector<100x32xbf16>,
    %c2_109 = arith.constant 2 : index
    %c0_110 = arith.constant 0 : index
    %112 = vector.load %arg22[%c2_109, %c0_110] : memref<122x32xf32, #tpu.memory_space<vmem>>, vector<100x32xf32>
    %113 = arith.truncf %112 : vector<100x32xf32> to vector<100x32xbf16>
    %c0_111 = arith.constant 0 : index
    %c64 = arith.constant 64 : index
    %114 = vector.load %arg34[%c0_111, %c64] : memref<100x288xbf16, #tpu.memory_space<vmem>>, vector<100x32xbf16>
    tpu.vector_store %arg34[%c0_111, %c64], %113 {strides = array<i32>} : memref<100x288xbf16, #tpu.memory_space<vmem>>, vector<100x32xbf16>,
    %c10 = arith.constant 10 : index
    %c0_112 = arith.constant 0 : index
    %115 = vector.load %arg22[%c10, %c0_112] : memref<122x32xf32, #tpu.memory_space<vmem>>, vector<100x32xf32>
    %116 = arith.truncf %115 : vector<100x32xf32> to vector<100x32xbf16>
    %c0_113 = arith.constant 0 : index
    %c96_114 = arith.constant 96 : index
    %117 = vector.load %arg34[%c0_113, %c96_114] : memref<100x288xbf16, #tpu.memory_space<vmem>>, vector<100x32xbf16>
    tpu.vector_store %arg34[%c0_113, %c96_114], %116 {strides = array<i32>} : memref<100x288xbf16, #tpu.memory_space<vmem>>, vector<100x32xbf16>,
    %c11_115 = arith.constant 11 : index
    %c0_116 = arith.constant 0 : index
    %118 = vector.load %arg22[%c11_115, %c0_116] : memref<122x32xf32, #tpu.memory_space<vmem>>, vector<100x32xf32>
    %119 = arith.truncf %118 : vector<100x32xf32> to vector<100x32xbf16>
    %c0_117 = arith.constant 0 : index
    %c128_118 = arith.constant 128 : index
    %120 = vector.load %arg34[%c0_117, %c128_118] : memref<100x288xbf16, #tpu.memory_space<vmem>>, vector<100x32xbf16>
    tpu.vector_store %arg34[%c0_117, %c128_118], %119 {strides = array<i32>} : memref<100x288xbf16, #tpu.memory_space<vmem>>, vector<100x32xbf16>,
    %c12_119 = arith.constant 12 : index
    %c0_120 = arith.constant 0 : index
    %121 = vector.load %arg22[%c12_119, %c0_120] : memref<122x32xf32, #tpu.memory_space<vmem>>, vector<100x32xf32>
    %122 = arith.truncf %121 : vector<100x32xf32> to vector<100x32xbf16>
    %c0_121 = arith.constant 0 : index
    %c160 = arith.constant 160 : index
    %123 = vector.load %arg34[%c0_121, %c160] : memref<100x288xbf16, #tpu.memory_space<vmem>>, vector<100x32xbf16>
    tpu.vector_store %arg34[%c0_121, %c160], %122 {strides = array<i32>} : memref<100x288xbf16, #tpu.memory_space<vmem>>, vector<100x32xbf16>,
    %c20_122 = arith.constant 20 : index
    %c0_123 = arith.constant 0 : index
    %124 = vector.load %arg22[%c20_122, %c0_123] : memref<122x32xf32, #tpu.memory_space<vmem>>, vector<100x32xf32>
    %125 = arith.truncf %124 : vector<100x32xf32> to vector<100x32xbf16>
    %c0_124 = arith.constant 0 : index
    %c192 = arith.constant 192 : index
    %126 = vector.load %arg34[%c0_124, %c192] : memref<100x288xbf16, #tpu.memory_space<vmem>>, vector<100x32xbf16>
    tpu.vector_store %arg34[%c0_124, %c192], %125 {strides = array<i32>} : memref<100x288xbf16, #tpu.memory_space<vmem>>, vector<100x32xbf16>,
    %c21 = arith.constant 21 : index
    %c0_125 = arith.constant 0 : index
    %127 = vector.load %arg22[%c21, %c0_125] : memref<122x32xf32, #tpu.memory_space<vmem>>, vector<100x32xf32>
    %128 = arith.truncf %127 : vector<100x32xf32> to vector<100x32xbf16>
    %c0_126 = arith.constant 0 : index
    %c224 = arith.constant 224 : index
    %129 = vector.load %arg34[%c0_126, %c224] : memref<100x288xbf16, #tpu.memory_space<vmem>>, vector<100x32xbf16>
    tpu.vector_store %arg34[%c0_126, %c224], %128 {strides = array<i32>} : memref<100x288xbf16, #tpu.memory_space<vmem>>, vector<100x32xbf16>,
    %c22_127 = arith.constant 22 : index
    %c0_128 = arith.constant 0 : index
    %130 = vector.load %arg22[%c22_127, %c0_128] : memref<122x32xf32, #tpu.memory_space<vmem>>, vector<100x32xf32>
    %131 = arith.truncf %130 : vector<100x32xf32> to vector<100x32xbf16>
    %c0_129 = arith.constant 0 : index
    %c256 = arith.constant 256 : index
    %132 = vector.load %arg34[%c0_129, %c256] : memref<100x288xbf16, #tpu.memory_space<vmem>>, vector<100x32xbf16>
    tpu.vector_store %arg34[%c0_129, %c256], %131 {strides = array<i32>} : memref<100x288xbf16, #tpu.memory_space<vmem>>, vector<100x32xbf16>,
    %c0_130 = arith.constant 0 : index
    %c0_131 = arith.constant 0 : index
    %133 = vector.load %arg34[%c0_130, %c0_131] : memref<100x288xbf16, #tpu.memory_space<vmem>>, vector<100x288xbf16>
    %c0_132 = arith.constant 0 : index
    %c0_133 = arith.constant 0 : index
    %134 = vector.load %arg5[%c0_132, %c0_133] : memref<288x64xbf16, #tpu.memory_space<vmem>>, vector<288x64xbf16>
    %cst_134 = arith.constant dense<0.000000e+00> : vector<100x64xf32>
    %135 = tpu.matmul %133, %134, %cst_134 {dimension_numbers = #tpu.dot_dimension_numbers<[1], [0], [0], [1], [0, 0, 1, 1], [], []>} : vector<100x288xbf16>, vector<288x64xbf16>, vector<100x64xf32> -> vector<100x64xf32>
    %c0_135 = arith.constant 0 : index
    %c0_136 = arith.constant 0 : index
    %136 = vector.load %arg10[%c0_135, %c0_136] : memref<1x64xf32, #tpu.memory_space<vmem>>, vector<1x64xf32>
    %137 = vector.broadcast %136 : vector<1x64xf32> to vector<100x64xf32>
    %138 = arith.addf %135, %137 : vector<100x64xf32>
    %cst_137 = arith.constant 0.000000e+00 : f32
    %139 = vector.broadcast %cst_137 : f32 to vector<100x64xf32>
    %140 = arith.maximumf %138, %139 : vector<100x64xf32>
    %c0_138 = arith.constant 0 : index
    %c0_139 = arith.constant 0 : index
    %141 = vector.load %arg27[%c0_138, %c0_139] : memref<108x64xf32, #tpu.memory_space<vmem>>, vector<100x64xf32>
    tpu.vector_store %arg27[%c0_138, %c0_139], %140 {strides = array<i32>} : memref<108x64xf32, #tpu.memory_space<vmem>>, vector<100x64xf32>,
    %c1_140 = arith.constant 1 : index
    %c0_141 = arith.constant 0 : index
    %142 = tpu.strided_load %arg27[%c1_140, %c0_141] {strides = array<i32: 2, 1>} : memref<108x64xf32, #tpu.memory_space<vmem>>, vector<50x64xf32>
    %c2_142 = arith.constant 2 : index
    %c0_143 = arith.constant 0 : index
    %143 = tpu.strided_load %arg27[%c2_142, %c0_143] {strides = array<i32: 2, 1>} : memref<108x64xf32, #tpu.memory_space<vmem>>, vector<50x64xf32>
    %144 = arith.maximumf %142, %143 : vector<50x64xf32>
    %c0_144 = arith.constant 0 : index
    %c0_145 = arith.constant 0 : index
    %145 = vector.load %arg31[%c0_144, %c0_145] : memref<50x64xf32, #tpu.memory_space<vmem>>, vector<50x64xf32>
    tpu.vector_store %arg31[%c0_144, %c0_145], %144 {strides = array<i32>} : memref<50x64xf32, #tpu.memory_space<vmem>>, vector<50x64xf32>,
    %c5_146 = arith.constant 5 : index
    %c0_147 = arith.constant 0 : index
    %146 = vector.load %arg31[%c5_146, %c0_147] : memref<50x64xf32, #tpu.memory_space<vmem>>, vector<4x64xf32>
    %c10_148 = arith.constant 10 : index
    %c0_149 = arith.constant 0 : index
    %147 = vector.load %arg31[%c10_148, %c0_149] : memref<50x64xf32, #tpu.memory_space<vmem>>, vector<4x64xf32>
    %148 = arith.maximumf %146, %147 : vector<4x64xf32>
    %c14 = arith.constant 14 : index
    %c0_150 = arith.constant 0 : index
    %149 = vector.load %arg23[%c14, %c0_150] : memref<50x64xf32, #tpu.memory_space<vmem>>, vector<4x64xf32>
    tpu.vector_store %arg23[%c14, %c0_150], %148 {strides = array<i32>} : memref<50x64xf32, #tpu.memory_space<vmem>>, vector<4x64xf32>,
    %c15 = arith.constant 15 : index
    %c0_151 = arith.constant 0 : index
    %150 = vector.load %arg31[%c15, %c0_151] : memref<50x64xf32, #tpu.memory_space<vmem>>, vector<4x64xf32>
    %c20_152 = arith.constant 20 : index
    %c0_153 = arith.constant 0 : index
    %151 = vector.load %arg31[%c20_152, %c0_153] : memref<50x64xf32, #tpu.memory_space<vmem>>, vector<4x64xf32>
    %152 = arith.maximumf %150, %151 : vector<4x64xf32>
    %c20_154 = arith.constant 20 : index
    %c0_155 = arith.constant 0 : index
    %153 = vector.load %arg23[%c20_154, %c0_155] : memref<50x64xf32, #tpu.memory_space<vmem>>, vector<4x64xf32>
    tpu.vector_store %arg23[%c20_154, %c0_155], %152 {strides = array<i32>} : memref<50x64xf32, #tpu.memory_space<vmem>>, vector<4x64xf32>,
    %c25 = arith.constant 25 : index
    %c0_156 = arith.constant 0 : index
    %154 = vector.load %arg31[%c25, %c0_156] : memref<50x64xf32, #tpu.memory_space<vmem>>, vector<4x64xf32>
    %c30_157 = arith.constant 30 : index
    %c0_158 = arith.constant 0 : index
    %155 = vector.load %arg31[%c30_157, %c0_158] : memref<50x64xf32, #tpu.memory_space<vmem>>, vector<4x64xf32>
    %156 = arith.maximumf %154, %155 : vector<4x64xf32>
    %c26 = arith.constant 26 : index
    %c0_159 = arith.constant 0 : index
    %157 = vector.load %arg23[%c26, %c0_159] : memref<50x64xf32, #tpu.memory_space<vmem>>, vector<4x64xf32>
    tpu.vector_store %arg23[%c26, %c0_159], %156 {strides = array<i32>} : memref<50x64xf32, #tpu.memory_space<vmem>>, vector<4x64xf32>,
    %c35 = arith.constant 35 : index
    %c0_160 = arith.constant 0 : index
    %158 = vector.load %arg31[%c35, %c0_160] : memref<50x64xf32, #tpu.memory_space<vmem>>, vector<4x64xf32>
    %c40_161 = arith.constant 40 : index
    %c0_162 = arith.constant 0 : index
    %159 = vector.load %arg31[%c40_161, %c0_162] : memref<50x64xf32, #tpu.memory_space<vmem>>, vector<4x64xf32>
    %160 = arith.maximumf %158, %159 : vector<4x64xf32>
    %c32_163 = arith.constant 32 : index
    %c0_164 = arith.constant 0 : index
    %161 = vector.load %arg23[%c32_163, %c0_164] : memref<50x64xf32, #tpu.memory_space<vmem>>, vector<4x64xf32>
    tpu.vector_store %arg23[%c32_163, %c0_164], %160 {strides = array<i32>} : memref<50x64xf32, #tpu.memory_space<vmem>>, vector<4x64xf32>,
    %c0_165 = arith.constant 0 : index
    %c0_166 = arith.constant 0 : index
    %162 = vector.load %arg23[%c0_165, %c0_166] : memref<50x64xf32, #tpu.memory_space<vmem>>, vector<36x64xf32>
    %163 = arith.truncf %162 : vector<36x64xf32> to vector<36x64xbf16>
    %c0_167 = arith.constant 0 : index
    %c0_168 = arith.constant 0 : index
    %164 = vector.load %arg35[%c0_167, %c0_168] : memref<36x576xbf16, #tpu.memory_space<vmem>>, vector<36x64xbf16>
    tpu.vector_store %arg35[%c0_167, %c0_168], %163 {strides = array<i32>} : memref<36x576xbf16, #tpu.memory_space<vmem>>, vector<36x64xbf16>,
    %c1_169 = arith.constant 1 : index
    %c0_170 = arith.constant 0 : index
    %165 = vector.load %arg23[%c1_169, %c0_170] : memref<50x64xf32, #tpu.memory_space<vmem>>, vector<36x64xf32>
    %166 = arith.truncf %165 : vector<36x64xf32> to vector<36x64xbf16>
    %c0_171 = arith.constant 0 : index
    %c64_172 = arith.constant 64 : index
    %167 = vector.load %arg35[%c0_171, %c64_172] : memref<36x576xbf16, #tpu.memory_space<vmem>>, vector<36x64xbf16>
    tpu.vector_store %arg35[%c0_171, %c64_172], %166 {strides = array<i32>} : memref<36x576xbf16, #tpu.memory_space<vmem>>, vector<36x64xbf16>,
    %c2_173 = arith.constant 2 : index
    %c0_174 = arith.constant 0 : index
    %168 = vector.load %arg23[%c2_173, %c0_174] : memref<50x64xf32, #tpu.memory_space<vmem>>, vector<36x64xf32>
    %169 = arith.truncf %168 : vector<36x64xf32> to vector<36x64xbf16>
    %c0_175 = arith.constant 0 : index
    %c128_176 = arith.constant 128 : index
    %170 = vector.load %arg35[%c0_175, %c128_176] : memref<36x576xbf16, #tpu.memory_space<vmem>>, vector<36x64xbf16>
    tpu.vector_store %arg35[%c0_175, %c128_176], %169 {strides = array<i32>} : memref<36x576xbf16, #tpu.memory_space<vmem>>, vector<36x64xbf16>,
    %c6 = arith.constant 6 : index
    %c0_177 = arith.constant 0 : index
    %171 = vector.load %arg23[%c6, %c0_177] : memref<50x64xf32, #tpu.memory_space<vmem>>, vector<36x64xf32>
    %172 = arith.truncf %171 : vector<36x64xf32> to vector<36x64xbf16>
    %c0_178 = arith.constant 0 : index
    %c192_179 = arith.constant 192 : index
    %173 = vector.load %arg35[%c0_178, %c192_179] : memref<36x576xbf16, #tpu.memory_space<vmem>>, vector<36x64xbf16>
    tpu.vector_store %arg35[%c0_178, %c192_179], %172 {strides = array<i32>} : memref<36x576xbf16, #tpu.memory_space<vmem>>, vector<36x64xbf16>,
    %c7_180 = arith.constant 7 : index
    %c0_181 = arith.constant 0 : index
    %174 = vector.load %arg23[%c7_180, %c0_181] : memref<50x64xf32, #tpu.memory_space<vmem>>, vector<36x64xf32>
    %175 = arith.truncf %174 : vector<36x64xf32> to vector<36x64xbf16>
    %c0_182 = arith.constant 0 : index
    %c256_183 = arith.constant 256 : index
    %176 = vector.load %arg35[%c0_182, %c256_183] : memref<36x576xbf16, #tpu.memory_space<vmem>>, vector<36x64xbf16>
    tpu.vector_store %arg35[%c0_182, %c256_183], %175 {strides = array<i32>} : memref<36x576xbf16, #tpu.memory_space<vmem>>, vector<36x64xbf16>,
    %c8 = arith.constant 8 : index
    %c0_184 = arith.constant 0 : index
    %177 = vector.load %arg23[%c8, %c0_184] : memref<50x64xf32, #tpu.memory_space<vmem>>, vector<36x64xf32>
    %178 = arith.truncf %177 : vector<36x64xf32> to vector<36x64xbf16>
    %c0_185 = arith.constant 0 : index
    %c320 = arith.constant 320 : index
    %179 = vector.load %arg35[%c0_185, %c320] : memref<36x576xbf16, #tpu.memory_space<vmem>>, vector<36x64xbf16>
    tpu.vector_store %arg35[%c0_185, %c320], %178 {strides = array<i32>} : memref<36x576xbf16, #tpu.memory_space<vmem>>, vector<36x64xbf16>,
    %c12_186 = arith.constant 12 : index
    %c0_187 = arith.constant 0 : index
    %180 = vector.load %arg23[%c12_186, %c0_187] : memref<50x64xf32, #tpu.memory_space<vmem>>, vector<36x64xf32>
    %181 = arith.truncf %180 : vector<36x64xf32> to vector<36x64xbf16>
    %c0_188 = arith.constant 0 : index
    %c384 = arith.constant 384 : index
    %182 = vector.load %arg35[%c0_188, %c384] : memref<36x576xbf16, #tpu.memory_space<vmem>>, vector<36x64xbf16>
    tpu.vector_store %arg35[%c0_188, %c384], %181 {strides = array<i32>} : memref<36x576xbf16, #tpu.memory_space<vmem>>, vector<36x64xbf16>,
    %c13 = arith.constant 13 : index
    %c0_189 = arith.constant 0 : index
    %183 = vector.load %arg23[%c13, %c0_189] : memref<50x64xf32, #tpu.memory_space<vmem>>, vector<36x64xf32>
    %184 = arith.truncf %183 : vector<36x64xf32> to vector<36x64xbf16>
    %c0_190 = arith.constant 0 : index
    %c448 = arith.constant 448 : index
    %185 = vector.load %arg35[%c0_190, %c448] : memref<36x576xbf16, #tpu.memory_space<vmem>>, vector<36x64xbf16>
    tpu.vector_store %arg35[%c0_190, %c448], %184 {strides = array<i32>} : memref<36x576xbf16, #tpu.memory_space<vmem>>, vector<36x64xbf16>,
    %c14_191 = arith.constant 14 : index
    %c0_192 = arith.constant 0 : index
    %186 = vector.load %arg23[%c14_191, %c0_192] : memref<50x64xf32, #tpu.memory_space<vmem>>, vector<36x64xf32>
    %187 = arith.truncf %186 : vector<36x64xf32> to vector<36x64xbf16>
    %c0_193 = arith.constant 0 : index
    %c512 = arith.constant 512 : index
    %188 = vector.load %arg35[%c0_193, %c512] : memref<36x576xbf16, #tpu.memory_space<vmem>>, vector<36x64xbf16>
    tpu.vector_store %arg35[%c0_193, %c512], %187 {strides = array<i32>} : memref<36x576xbf16, #tpu.memory_space<vmem>>, vector<36x64xbf16>,
    %c0_194 = arith.constant 0 : index
    %c0_195 = arith.constant 0 : index
    %189 = vector.load %arg35[%c0_194, %c0_195] : memref<36x576xbf16, #tpu.memory_space<vmem>>, vector<36x576xbf16>
    %c0_196 = arith.constant 0 : index
    %c0_197 = arith.constant 0 : index
    %190 = vector.load %arg6[%c0_196, %c0_197] : memref<576x128xbf16, #tpu.memory_space<vmem>>, vector<576x128xbf16>
    %cst_198 = arith.constant dense<0.000000e+00> : vector<36x128xf32>
    %191 = tpu.matmul %189, %190, %cst_198 {dimension_numbers = #tpu.dot_dimension_numbers<[1], [0], [0], [1], [0, 0, 1, 1], [], []>} : vector<36x576xbf16>, vector<576x128xbf16>, vector<36x128xf32> -> vector<36x128xf32>
    %c0_199 = arith.constant 0 : index
    %c0_200 = arith.constant 0 : index
    %192 = vector.load %arg11[%c0_199, %c0_200] : memref<1x128xf32, #tpu.memory_space<vmem>>, vector<1x128xf32>
    %193 = vector.broadcast %192 : vector<1x128xf32> to vector<36x128xf32>
    %194 = arith.addf %191, %193 : vector<36x128xf32>
    %cst_201 = arith.constant 0.000000e+00 : f32
    %195 = vector.broadcast %cst_201 : f32 to vector<36x128xf32>
    %196 = arith.maximumf %194, %195 : vector<36x128xf32>
    %c0_202 = arith.constant 0 : index
    %c0_203 = arith.constant 0 : index
    %197 = vector.load %arg28[%c0_202, %c0_203] : memref<44x128xf32, #tpu.memory_space<vmem>>, vector<36x128xf32>
    tpu.vector_store %arg28[%c0_202, %c0_203], %196 {strides = array<i32>} : memref<44x128xf32, #tpu.memory_space<vmem>>, vector<36x128xf32>,
    %c1_204 = arith.constant 1 : index
    %c0_205 = arith.constant 0 : index
    %198 = tpu.strided_load %arg28[%c1_204, %c0_205] {strides = array<i32: 2, 1>} : memref<44x128xf32, #tpu.memory_space<vmem>>, vector<18x128xf32>
    %c2_206 = arith.constant 2 : index
    %c0_207 = arith.constant 0 : index
    %199 = tpu.strided_load %arg28[%c2_206, %c0_207] {strides = array<i32: 2, 1>} : memref<44x128xf32, #tpu.memory_space<vmem>>, vector<18x128xf32>
    %200 = arith.maximumf %198, %199 : vector<18x128xf32>
    %c0_208 = arith.constant 0 : index
    %c0_209 = arith.constant 0 : index
    %201 = vector.load %arg32[%c0_208, %c0_209] : memref<18x128xf32, #tpu.memory_space<vmem>>, vector<18x128xf32>
    tpu.vector_store %arg32[%c0_208, %c0_209], %200 {strides = array<i32>} : memref<18x128xf32, #tpu.memory_space<vmem>>, vector<18x128xf32>,
    %c3 = arith.constant 3 : index
    %c0_210 = arith.constant 0 : index
    %202 = vector.load %arg32[%c3, %c0_210] : memref<18x128xf32, #tpu.memory_space<vmem>>, vector<2x128xf32>
    %c6_211 = arith.constant 6 : index
    %c0_212 = arith.constant 0 : index
    %203 = vector.load %arg32[%c6_211, %c0_212] : memref<18x128xf32, #tpu.memory_space<vmem>>, vector<2x128xf32>
    %204 = arith.maximumf %202, %203 : vector<2x128xf32>
    %c10_213 = arith.constant 10 : index
    %c0_214 = arith.constant 0 : index
    %205 = vector.load %arg24[%c10_213, %c0_214] : memref<26x128xf32, #tpu.memory_space<vmem>>, vector<2x128xf32>
    tpu.vector_store %arg24[%c10_213, %c0_214], %204 {strides = array<i32>} : memref<26x128xf32, #tpu.memory_space<vmem>>, vector<2x128xf32>,
    %c9_215 = arith.constant 9 : index
    %c0_216 = arith.constant 0 : index
    %206 = vector.load %arg32[%c9_215, %c0_216] : memref<18x128xf32, #tpu.memory_space<vmem>>, vector<2x128xf32>
    %c12_217 = arith.constant 12 : index
    %c0_218 = arith.constant 0 : index
    %207 = vector.load %arg32[%c12_217, %c0_218] : memref<18x128xf32, #tpu.memory_space<vmem>>, vector<2x128xf32>
    %208 = arith.maximumf %206, %207 : vector<2x128xf32>
    %c14_219 = arith.constant 14 : index
    %c0_220 = arith.constant 0 : index
    %209 = vector.load %arg24[%c14_219, %c0_220] : memref<26x128xf32, #tpu.memory_space<vmem>>, vector<2x128xf32>
    tpu.vector_store %arg24[%c14_219, %c0_220], %208 {strides = array<i32>} : memref<26x128xf32, #tpu.memory_space<vmem>>, vector<2x128xf32>,
    %c0_221 = arith.constant 0 : index
    %c0_222 = arith.constant 0 : index
    %210 = vector.load %arg24[%c0_221, %c0_222] : memref<26x128xf32, #tpu.memory_space<vmem>>, vector<16x128xf32>
    %211 = arith.truncf %210 : vector<16x128xf32> to vector<16x128xbf16>
    %c0_223 = arith.constant 0 : index
    %c0_224 = arith.constant 0 : index
    %212 = vector.load %arg36[%c0_223, %c0_224] : memref<16x1152xbf16, #tpu.memory_space<vmem>>, vector<16x128xbf16>
    tpu.vector_store %arg36[%c0_223, %c0_224], %211 {strides = array<i32>} : memref<16x1152xbf16, #tpu.memory_space<vmem>>, vector<16x128xbf16>,
    %c1_225 = arith.constant 1 : index
    %c0_226 = arith.constant 0 : index
    %213 = vector.load %arg24[%c1_225, %c0_226] : memref<26x128xf32, #tpu.memory_space<vmem>>, vector<16x128xf32>
    %214 = arith.truncf %213 : vector<16x128xf32> to vector<16x128xbf16>
    %c0_227 = arith.constant 0 : index
    %c128_228 = arith.constant 128 : index
    %215 = vector.load %arg36[%c0_227, %c128_228] : memref<16x1152xbf16, #tpu.memory_space<vmem>>, vector<16x128xbf16>
    tpu.vector_store %arg36[%c0_227, %c128_228], %214 {strides = array<i32>} : memref<16x1152xbf16, #tpu.memory_space<vmem>>, vector<16x128xbf16>,
    %c2_229 = arith.constant 2 : index
    %c0_230 = arith.constant 0 : index
    %216 = vector.load %arg24[%c2_229, %c0_230] : memref<26x128xf32, #tpu.memory_space<vmem>>, vector<16x128xf32>
    %217 = arith.truncf %216 : vector<16x128xf32> to vector<16x128xbf16>
    %c0_231 = arith.constant 0 : index
    %c256_232 = arith.constant 256 : index
    %218 = vector.load %arg36[%c0_231, %c256_232] : memref<16x1152xbf16, #tpu.memory_space<vmem>>, vector<16x128xbf16>
    tpu.vector_store %arg36[%c0_231, %c256_232], %217 {strides = array<i32>} : memref<16x1152xbf16, #tpu.memory_space<vmem>>, vector<16x128xbf16>,
    %c4 = arith.constant 4 : index
    %c0_233 = arith.constant 0 : index
    %219 = vector.load %arg24[%c4, %c0_233] : memref<26x128xf32, #tpu.memory_space<vmem>>, vector<16x128xf32>
    %220 = arith.truncf %219 : vector<16x128xf32> to vector<16x128xbf16>
    %c0_234 = arith.constant 0 : index
    %c384_235 = arith.constant 384 : index
    %221 = vector.load %arg36[%c0_234, %c384_235] : memref<16x1152xbf16, #tpu.memory_space<vmem>>, vector<16x128xbf16>
    tpu.vector_store %arg36[%c0_234, %c384_235], %220 {strides = array<i32>} : memref<16x1152xbf16, #tpu.memory_space<vmem>>, vector<16x128xbf16>,
    %c5_236 = arith.constant 5 : index
    %c0_237 = arith.constant 0 : index
    %222 = vector.load %arg24[%c5_236, %c0_237] : memref<26x128xf32, #tpu.memory_space<vmem>>, vector<16x128xf32>
    %223 = arith.truncf %222 : vector<16x128xf32> to vector<16x128xbf16>
    %c0_238 = arith.constant 0 : index
    %c512_239 = arith.constant 512 : index
    %224 = vector.load %arg36[%c0_238, %c512_239] : memref<16x1152xbf16, #tpu.memory_space<vmem>>, vector<16x128xbf16>
    tpu.vector_store %arg36[%c0_238, %c512_239], %223 {strides = array<i32>} : memref<16x1152xbf16, #tpu.memory_space<vmem>>, vector<16x128xbf16>,
    %c6_240 = arith.constant 6 : index
    %c0_241 = arith.constant 0 : index
    %225 = vector.load %arg24[%c6_240, %c0_241] : memref<26x128xf32, #tpu.memory_space<vmem>>, vector<16x128xf32>
    %226 = arith.truncf %225 : vector<16x128xf32> to vector<16x128xbf16>
    %c0_242 = arith.constant 0 : index
    %c640 = arith.constant 640 : index
    %227 = vector.load %arg36[%c0_242, %c640] : memref<16x1152xbf16, #tpu.memory_space<vmem>>, vector<16x128xbf16>
    tpu.vector_store %arg36[%c0_242, %c640], %226 {strides = array<i32>} : memref<16x1152xbf16, #tpu.memory_space<vmem>>, vector<16x128xbf16>,
    %c8_243 = arith.constant 8 : index
    %c0_244 = arith.constant 0 : index
    %228 = vector.load %arg24[%c8_243, %c0_244] : memref<26x128xf32, #tpu.memory_space<vmem>>, vector<16x128xf32>
    %229 = arith.truncf %228 : vector<16x128xf32> to vector<16x128xbf16>
    %c0_245 = arith.constant 0 : index
    %c768 = arith.constant 768 : index
    %230 = vector.load %arg36[%c0_245, %c768] : memref<16x1152xbf16, #tpu.memory_space<vmem>>, vector<16x128xbf16>
    tpu.vector_store %arg36[%c0_245, %c768], %229 {strides = array<i32>} : memref<16x1152xbf16, #tpu.memory_space<vmem>>, vector<16x128xbf16>,
    %c9_246 = arith.constant 9 : index
    %c0_247 = arith.constant 0 : index
    %231 = vector.load %arg24[%c9_246, %c0_247] : memref<26x128xf32, #tpu.memory_space<vmem>>, vector<16x128xf32>
    %232 = arith.truncf %231 : vector<16x128xf32> to vector<16x128xbf16>
    %c0_248 = arith.constant 0 : index
    %c896 = arith.constant 896 : index
    %233 = vector.load %arg36[%c0_248, %c896] : memref<16x1152xbf16, #tpu.memory_space<vmem>>, vector<16x128xbf16>
    tpu.vector_store %arg36[%c0_248, %c896], %232 {strides = array<i32>} : memref<16x1152xbf16, #tpu.memory_space<vmem>>, vector<16x128xbf16>,
    %c10_249 = arith.constant 10 : index
    %c0_250 = arith.constant 0 : index
    %234 = vector.load %arg24[%c10_249, %c0_250] : memref<26x128xf32, #tpu.memory_space<vmem>>, vector<16x128xf32>
    %235 = arith.truncf %234 : vector<16x128xf32> to vector<16x128xbf16>
    %c0_251 = arith.constant 0 : index
    %c1024 = arith.constant 1024 : index
    %236 = vector.load %arg36[%c0_251, %c1024] : memref<16x1152xbf16, #tpu.memory_space<vmem>>, vector<16x128xbf16>
    tpu.vector_store %arg36[%c0_251, %c1024], %235 {strides = array<i32>} : memref<16x1152xbf16, #tpu.memory_space<vmem>>, vector<16x128xbf16>,
    %c0_252 = arith.constant 0 : index
    %c0_253 = arith.constant 0 : index
    %237 = vector.load %arg36[%c0_252, %c0_253] : memref<16x1152xbf16, #tpu.memory_space<vmem>>, vector<16x1152xbf16>
    %c0_254 = arith.constant 0 : index
    %c0_255 = arith.constant 0 : index
    %238 = vector.load %arg7[%c0_254, %c0_255] : memref<1152x64xbf16, #tpu.memory_space<vmem>>, vector<1152x64xbf16>
    %cst_256 = arith.constant dense<0.000000e+00> : vector<16x64xf32>
    %239 = tpu.matmul %237, %238, %cst_256 {dimension_numbers = #tpu.dot_dimension_numbers<[1], [0], [0], [1], [0, 0, 1, 1], [], []>} : vector<16x1152xbf16>, vector<1152x64xbf16>, vector<16x64xf32> -> vector<16x64xf32>
    %c0_257 = arith.constant 0 : index
    %c0_258 = arith.constant 0 : index
    %240 = vector.load %arg12[%c0_257, %c0_258] : memref<1x64xf32, #tpu.memory_space<vmem>>, vector<1x64xf32>
    %241 = vector.broadcast %240 : vector<1x64xf32> to vector<16x64xf32>
    %242 = arith.addf %239, %241 : vector<16x64xf32>
    %cst_259 = arith.constant 0.000000e+00 : f32
    %243 = vector.broadcast %cst_259 : f32 to vector<16x64xf32>
    %244 = arith.maximumf %242, %243 : vector<16x64xf32>
    %c0_260 = arith.constant 0 : index
    %c0_261 = arith.constant 0 : index
    %245 = vector.load %arg2[%c0_260, %c0_261] : memref<16x1xf32, #tpu.memory_space<vmem>>, vector<16x1xf32>
    %cst_262 = arith.constant 0.000000e+00 : f32
    %246 = vector.broadcast %cst_262 : f32 to vector<16x1xf32>
    %247 = arith.cmpf one, %245, %246 : vector<16x1xf32>
    %cst_263 = arith.constant 0.000000e+00 : f32
    %248 = vector.shape_cast %247 : vector<16x1xi1> to vector<16x1xi1>
    %249 = vector.broadcast %248 : vector<16x1xi1> to vector<16x64xi1>
    %250 = vector.broadcast %cst_263 : f32 to vector<16x64xf32>
    %251 = arith.select %249, %244, %250 : vector<16x64xi1>, vector<16x64xf32>
    %c5_264 = arith.constant 5 : index
    %c0_265 = arith.constant 0 : index
    %252 = vector.load %arg25[%c5_264, %c0_265] : memref<26x64xf32, #tpu.memory_space<vmem>>, vector<16x64xf32>
    tpu.vector_store %arg25[%c5_264, %c0_265], %251 {strides = array<i32>} : memref<26x64xf32, #tpu.memory_space<vmem>>, vector<16x64xf32>,
    %c0_266 = arith.constant 0 : index
    %c0_267 = arith.constant 0 : index
    %253 = vector.load %arg25[%c0_266, %c0_267] : memref<26x64xf32, #tpu.memory_space<vmem>>, vector<16x64xf32>
    %254 = arith.truncf %253 : vector<16x64xf32> to vector<16x64xbf16>
    %c0_268 = arith.constant 0 : index
    %c0_269 = arith.constant 0 : index
    %255 = vector.load %arg37[%c0_268, %c0_269] : memref<16x576xbf16, #tpu.memory_space<vmem>>, vector<16x64xbf16>
    tpu.vector_store %arg37[%c0_268, %c0_269], %254 {strides = array<i32>} : memref<16x576xbf16, #tpu.memory_space<vmem>>, vector<16x64xbf16>,
    %c1_270 = arith.constant 1 : index
    %c0_271 = arith.constant 0 : index
    %256 = vector.load %arg25[%c1_270, %c0_271] : memref<26x64xf32, #tpu.memory_space<vmem>>, vector<16x64xf32>
    %257 = arith.truncf %256 : vector<16x64xf32> to vector<16x64xbf16>
    %c0_272 = arith.constant 0 : index
    %c64_273 = arith.constant 64 : index
    %258 = vector.load %arg37[%c0_272, %c64_273] : memref<16x576xbf16, #tpu.memory_space<vmem>>, vector<16x64xbf16>
    tpu.vector_store %arg37[%c0_272, %c64_273], %257 {strides = array<i32>} : memref<16x576xbf16, #tpu.memory_space<vmem>>, vector<16x64xbf16>,
    %c2_274 = arith.constant 2 : index
    %c0_275 = arith.constant 0 : index
    %259 = vector.load %arg25[%c2_274, %c0_275] : memref<26x64xf32, #tpu.memory_space<vmem>>, vector<16x64xf32>
    %260 = arith.truncf %259 : vector<16x64xf32> to vector<16x64xbf16>
    %c0_276 = arith.constant 0 : index
    %c128_277 = arith.constant 128 : index
    %261 = vector.load %arg37[%c0_276, %c128_277] : memref<16x576xbf16, #tpu.memory_space<vmem>>, vector<16x64xbf16>
    tpu.vector_store %arg37[%c0_276, %c128_277], %260 {strides = array<i32>} : memref<16x576xbf16, #tpu.memory_space<vmem>>, vector<16x64xbf16>,
    %c4_278 = arith.constant 4 : index
    %c0_279 = arith.constant 0 : index
    %262 = vector.load %arg25[%c4_278, %c0_279] : memref<26x64xf32, #tpu.memory_space<vmem>>, vector<16x64xf32>
    %263 = arith.truncf %262 : vector<16x64xf32> to vector<16x64xbf16>
    %c0_280 = arith.constant 0 : index
    %c192_281 = arith.constant 192 : index
    %264 = vector.load %arg37[%c0_280, %c192_281] : memref<16x576xbf16, #tpu.memory_space<vmem>>, vector<16x64xbf16>
    tpu.vector_store %arg37[%c0_280, %c192_281], %263 {strides = array<i32>} : memref<16x576xbf16, #tpu.memory_space<vmem>>, vector<16x64xbf16>,
    %c5_282 = arith.constant 5 : index
    %c0_283 = arith.constant 0 : index
    %265 = vector.load %arg25[%c5_282, %c0_283] : memref<26x64xf32, #tpu.memory_space<vmem>>, vector<16x64xf32>
    %266 = arith.truncf %265 : vector<16x64xf32> to vector<16x64xbf16>
    %c0_284 = arith.constant 0 : index
    %c256_285 = arith.constant 256 : index
    %267 = vector.load %arg37[%c0_284, %c256_285] : memref<16x576xbf16, #tpu.memory_space<vmem>>, vector<16x64xbf16>
    tpu.vector_store %arg37[%c0_284, %c256_285], %266 {strides = array<i32>} : memref<16x576xbf16, #tpu.memory_space<vmem>>, vector<16x64xbf16>,
    %c6_286 = arith.constant 6 : index
    %c0_287 = arith.constant 0 : index
    %268 = vector.load %arg25[%c6_286, %c0_287] : memref<26x64xf32, #tpu.memory_space<vmem>>, vector<16x64xf32>
    %269 = arith.truncf %268 : vector<16x64xf32> to vector<16x64xbf16>
    %c0_288 = arith.constant 0 : index
    %c320_289 = arith.constant 320 : index
    %270 = vector.load %arg37[%c0_288, %c320_289] : memref<16x576xbf16, #tpu.memory_space<vmem>>, vector<16x64xbf16>
    tpu.vector_store %arg37[%c0_288, %c320_289], %269 {strides = array<i32>} : memref<16x576xbf16, #tpu.memory_space<vmem>>, vector<16x64xbf16>,
    %c8_290 = arith.constant 8 : index
    %c0_291 = arith.constant 0 : index
    %271 = vector.load %arg25[%c8_290, %c0_291] : memref<26x64xf32, #tpu.memory_space<vmem>>, vector<16x64xf32>
    %272 = arith.truncf %271 : vector<16x64xf32> to vector<16x64xbf16>
    %c0_292 = arith.constant 0 : index
    %c384_293 = arith.constant 384 : index
    %273 = vector.load %arg37[%c0_292, %c384_293] : memref<16x576xbf16, #tpu.memory_space<vmem>>, vector<16x64xbf16>
    tpu.vector_store %arg37[%c0_292, %c384_293], %272 {strides = array<i32>} : memref<16x576xbf16, #tpu.memory_space<vmem>>, vector<16x64xbf16>,
    %c9_294 = arith.constant 9 : index
    %c0_295 = arith.constant 0 : index
    %274 = vector.load %arg25[%c9_294, %c0_295] : memref<26x64xf32, #tpu.memory_space<vmem>>, vector<16x64xf32>
    %275 = arith.truncf %274 : vector<16x64xf32> to vector<16x64xbf16>
    %c0_296 = arith.constant 0 : index
    %c448_297 = arith.constant 448 : index
    %276 = vector.load %arg37[%c0_296, %c448_297] : memref<16x576xbf16, #tpu.memory_space<vmem>>, vector<16x64xbf16>
    tpu.vector_store %arg37[%c0_296, %c448_297], %275 {strides = array<i32>} : memref<16x576xbf16, #tpu.memory_space<vmem>>, vector<16x64xbf16>,
    %c10_298 = arith.constant 10 : index
    %c0_299 = arith.constant 0 : index
    %277 = vector.load %arg25[%c10_298, %c0_299] : memref<26x64xf32, #tpu.memory_space<vmem>>, vector<16x64xf32>
    %278 = arith.truncf %277 : vector<16x64xf32> to vector<16x64xbf16>
    %c0_300 = arith.constant 0 : index
    %c512_301 = arith.constant 512 : index
    %279 = vector.load %arg37[%c0_300, %c512_301] : memref<16x576xbf16, #tpu.memory_space<vmem>>, vector<16x64xbf16>
    tpu.vector_store %arg37[%c0_300, %c512_301], %278 {strides = array<i32>} : memref<16x576xbf16, #tpu.memory_space<vmem>>, vector<16x64xbf16>,
    %c0_302 = arith.constant 0 : index
    %c0_303 = arith.constant 0 : index
    %280 = vector.load %arg37[%c0_302, %c0_303] : memref<16x576xbf16, #tpu.memory_space<vmem>>, vector<16x576xbf16>
    %c0_304 = arith.constant 0 : index
    %c0_305 = arith.constant 0 : index
    %281 = vector.load %arg8[%c0_304, %c0_305] : memref<576x32xbf16, #tpu.memory_space<vmem>>, vector<576x32xbf16>
    %cst_306 = arith.constant dense<0.000000e+00> : vector<16x32xf32>
    %282 = tpu.matmul %280, %281, %cst_306 {dimension_numbers = #tpu.dot_dimension_numbers<[1], [0], [0], [1], [0, 0, 1, 1], [], []>} : vector<16x576xbf16>, vector<576x32xbf16>, vector<16x32xf32> -> vector<16x32xf32>
    %c0_307 = arith.constant 0 : index
    %c0_308 = arith.constant 0 : index
    %283 = vector.load %arg13[%c0_307, %c0_308] : memref<1x32xf32, #tpu.memory_space<vmem>>, vector<1x32xf32>
    %284 = vector.broadcast %283 : vector<1x32xf32> to vector<16x32xf32>
    %285 = arith.addf %282, %284 : vector<16x32xf32>
    %cst_309 = arith.constant 0.000000e+00 : f32
    %286 = vector.broadcast %cst_309 : f32 to vector<16x32xf32>
    %287 = arith.maximumf %285, %286 : vector<16x32xf32>
    %c0_310 = arith.constant 0 : index
    %c0_311 = arith.constant 0 : index
    %288 = vector.load %arg29[%c0_310, %c0_311] : memref<16x32xf32, #tpu.memory_space<vmem>>, vector<16x32xf32>
    tpu.vector_store %arg29[%c0_310, %c0_311], %287 {strides = array<i32>} : memref<16x32xf32, #tpu.memory_space<vmem>>, vector<16x32xf32>,
    %c5_312 = arith.constant 5 : index
    %c0_313 = arith.constant 0 : index
    %289 = vector.load %arg29[%c5_312, %c0_313] : memref<16x32xf32, #tpu.memory_space<vmem>>, vector<1x32xf32>
    %290 = arith.truncf %289 : vector<1x32xf32> to vector<1x32xbf16>
    %c0_314 = arith.constant 0 : index
    %c0_315 = arith.constant 0 : index
    %291 = vector.load %arg38[%c0_314, %c0_315] : memref<1x144xbf16, #tpu.memory_space<vmem>>, vector<1x32xbf16>
    tpu.vector_store %arg38[%c0_314, %c0_315], %290 {strides = array<i32>} : memref<1x144xbf16, #tpu.memory_space<vmem>>, vector<1x32xbf16>,
    %c6_316 = arith.constant 6 : index
    %c0_317 = arith.constant 0 : index
    %292 = vector.load %arg29[%c6_316, %c0_317] : memref<16x32xf32, #tpu.memory_space<vmem>>, vector<1x32xf32>
    %293 = arith.truncf %292 : vector<1x32xf32> to vector<1x32xbf16>
    %c0_318 = arith.constant 0 : index
    %c32_319 = arith.constant 32 : index
    %294 = vector.load %arg38[%c0_318, %c32_319] : memref<1x144xbf16, #tpu.memory_space<vmem>>, vector<1x32xbf16>
    tpu.vector_store %arg38[%c0_318, %c32_319], %293 {strides = array<i32>} : memref<1x144xbf16, #tpu.memory_space<vmem>>, vector<1x32xbf16>,
    %c9_320 = arith.constant 9 : index
    %c0_321 = arith.constant 0 : index
    %295 = vector.load %arg29[%c9_320, %c0_321] : memref<16x32xf32, #tpu.memory_space<vmem>>, vector<1x32xf32>
    %296 = arith.truncf %295 : vector<1x32xf32> to vector<1x32xbf16>
    %c0_322 = arith.constant 0 : index
    %c64_323 = arith.constant 64 : index
    %297 = vector.load %arg38[%c0_322, %c64_323] : memref<1x144xbf16, #tpu.memory_space<vmem>>, vector<1x32xbf16>
    tpu.vector_store %arg38[%c0_322, %c64_323], %296 {strides = array<i32>} : memref<1x144xbf16, #tpu.memory_space<vmem>>, vector<1x32xbf16>,
    %c10_324 = arith.constant 10 : index
    %c0_325 = arith.constant 0 : index
    %298 = vector.load %arg29[%c10_324, %c0_325] : memref<16x32xf32, #tpu.memory_space<vmem>>, vector<1x32xf32>
    %299 = arith.truncf %298 : vector<1x32xf32> to vector<1x32xbf16>
    %c0_326 = arith.constant 0 : index
    %c96_327 = arith.constant 96 : index
    %300 = vector.load %arg38[%c0_326, %c96_327] : memref<1x144xbf16, #tpu.memory_space<vmem>>, vector<1x32xbf16>
    tpu.vector_store %arg38[%c0_326, %c96_327], %299 {strides = array<i32>} : memref<1x144xbf16, #tpu.memory_space<vmem>>, vector<1x32xbf16>,
    %c0_328 = arith.constant 0 : index
    %c0_329 = arith.constant 0 : index
    %c0_330 = arith.constant 0 : index
    %301 = vector.load %arg3[%c0_328, %c0_329, %c0_330] : memref<1x1x16xbf16, #tpu.memory_space<vmem>>, vector<1x1x16xbf16>
    %302 = vector.shape_cast %301 : vector<1x1x16xbf16> to vector<1x16xbf16>
    %c0_331 = arith.constant 0 : index
    %c128_332 = arith.constant 128 : index
    %303 = vector.load %arg38[%c0_331, %c128_332] : memref<1x144xbf16, #tpu.memory_space<vmem>>, vector<1x16xbf16>
    tpu.vector_store %arg38[%c0_331, %c128_332], %302 {strides = array<i32>} : memref<1x144xbf16, #tpu.memory_space<vmem>>, vector<1x16xbf16>,
    %c0_333 = arith.constant 0 : index
    %c0_334 = arith.constant 0 : index
    %304 = vector.load %arg38[%c0_333, %c0_334] : memref<1x144xbf16, #tpu.memory_space<vmem>>, vector<1x144xbf16>
    %c0_335 = arith.constant 0 : index
    %c0_336 = arith.constant 0 : index
    %305 = vector.load %arg14[%c0_335, %c0_336] : memref<144x512xbf16, #tpu.memory_space<vmem>>, vector<144x512xbf16>
    %cst_337 = arith.constant dense<0.000000e+00> : vector<1x512xf32>
    %306 = tpu.matmul %304, %305, %cst_337 {dimension_numbers = #tpu.dot_dimension_numbers<[1], [0], [0], [1], [0, 0, 1, 1], [], []>} : vector<1x144xbf16>, vector<144x512xbf16>, vector<1x512xf32> -> vector<1x512xf32>
    %c0_338 = arith.constant 0 : index
    %c0_339 = arith.constant 0 : index
    %307 = vector.load %arg15[%c0_338, %c0_339] : memref<1x512xf32, #tpu.memory_space<vmem>>, vector<1x512xf32>
    %308 = arith.addf %306, %307 : vector<1x512xf32>
    %cst_340 = arith.constant 0.000000e+00 : f32
    %309 = vector.broadcast %cst_340 : f32 to vector<1x512xf32>
    %310 = arith.maximumf %308, %309 : vector<1x512xf32>
    %311 = arith.truncf %310 : vector<1x512xf32> to vector<1x512xbf16>
    %c0_341 = arith.constant 0 : index
    %c0_342 = arith.constant 0 : index
    %312 = vector.load %arg16[%c0_341, %c0_342] : memref<512x256xbf16, #tpu.memory_space<vmem>>, vector<512x256xbf16>
    %cst_343 = arith.constant dense<0.000000e+00> : vector<1x256xf32>
    %313 = tpu.matmul %311, %312, %cst_343 {dimension_numbers = #tpu.dot_dimension_numbers<[1], [0], [0], [1], [0, 0, 1, 1], [], []>} : vector<1x512xbf16>, vector<512x256xbf16>, vector<1x256xf32> -> vector<1x256xf32>
    %c0_344 = arith.constant 0 : index
    %c0_345 = arith.constant 0 : index
    %314 = vector.load %arg17[%c0_344, %c0_345] : memref<1x256xf32, #tpu.memory_space<vmem>>, vector<1x256xf32>
    %315 = arith.addf %313, %314 : vector<1x256xf32>
    %cst_346 = arith.constant 0.000000e+00 : f32
    %316 = vector.broadcast %cst_346 : f32 to vector<1x256xf32>
    %317 = arith.maximumf %315, %316 : vector<1x256xf32>
    %318 = vector.shape_cast %317 : vector<1x256xf32> to vector<1x1x256xf32>
    %c0_347 = arith.constant 0 : index
    %c0_348 = arith.constant 0 : index
    %c0_349 = arith.constant 0 : index
    %319 = vector.load %arg21[%c0_347, %c0_348, %c0_349] : memref<1x1x256xf32, #tpu.memory_space<vmem>>, vector<1x1x256xf32>
    tpu.vector_store %arg21[%c0_347, %c0_348, %c0_349], %318 {strides = array<i32>} : memref<1x1x256xf32, #tpu.memory_space<vmem>>, vector<1x1x256xf32>,
    %c0_350 = arith.constant 0 : index
    %c0_351 = arith.constant 0 : index
    %320 = vector.load %arg18[%c0_350, %c0_351] : memref<1x256xf32, #tpu.memory_space<vmem>>, vector<1x256xf32>
    %321 = arith.mulf %317, %320 : vector<1x256xf32>
    %cst_352 = arith.constant dense<0.000000e+00> : vector<1xf32>
    %322 = vector.multi_reduction <add>, %321, %cst_352 [1] : vector<1x256xf32> to vector<1xf32>
    %323 = vector.shape_cast %322 : vector<1xf32> to vector<1x1xf32>
    %c0_353 = arith.constant 0 : index
    %c0_354 = arith.constant 0 : index
    %324 = vector.load %arg19[%c0_353, %c0_354] : memref<1x1xf32, #tpu.memory_space<vmem>>, vector<1x1xf32>
    %325 = arith.addf %323, %324 : vector<1x1xf32>
    %326 = vector.shape_cast %325 : vector<1x1xf32> to vector<1x1x1xf32>
    %c0_355 = arith.constant 0 : index
    %c0_356 = arith.constant 0 : index
    %c0_357 = arith.constant 0 : index
    %327 = vector.load %arg20[%c0_355, %c0_356, %c0_357] : memref<1x1x1xf32, #tpu.memory_space<vmem>>, vector<1x1x1xf32>
    tpu.vector_store %arg20[%c0_355, %c0_356, %c0_357], %326 {strides = array<i32>} : memref<1x1x1xf32, #tpu.memory_space<vmem>>, vector<1x1x1xf32>,
    return
  }
  func.func @transform_0(%arg0: i32) -> (i32, i32, i32) {
    %c0_i32 = arith.constant 0 : i32
    %c0_i32_0 = arith.constant 0 : i32
    %c0_i32_1 = arith.constant 0 : i32
    return %arg0, %c0_i32, %c0_i32_0 : i32, i32, i32
  }
  func.func @transform_1(%arg0: i32) -> (i32, i32) {
    %c0_i32 = arith.constant 0 : i32
    %c0_i32_0 = arith.constant 0 : i32
    %c0_i32_1 = arith.constant 0 : i32
    return %c0_i32, %c0_i32_0 : i32, i32
  }
  func.func @transform_2(%arg0: i32) -> (i32, i32, i32) {
    %c0_i32 = arith.constant 0 : i32
    %c0_i32_0 = arith.constant 0 : i32
    %c0_i32_1 = arith.constant 0 : i32
    return %arg0, %c0_i32, %c0_i32_0 : i32, i32, i32
  }
  func.func @transform_3(%arg0: i32) -> (i32, i32) {
    %c0_i32 = arith.constant 0 : i32
    %c0_i32_0 = arith.constant 0 : i32
    %c0_i32_1 = arith.constant 0 : i32
    return %c0_i32, %c0_i32_0 : i32, i32
  }
  func.func @transform_4(%arg0: i32) -> (i32, i32) {
    %c0_i32 = arith.constant 0 : i32
    %c0_i32_0 = arith.constant 0 : i32
    %c0_i32_1 = arith.constant 0 : i32
    return %c0_i32, %c0_i32_0 : i32, i32
  }
  func.func @transform_5(%arg0: i32) -> (i32, i32) {
    %c0_i32 = arith.constant 0 : i32
    %c0_i32_0 = arith.constant 0 : i32
    %c0_i32_1 = arith.constant 0 : i32
    return %c0_i32, %c0_i32_0 : i32, i32
  }
  func.func @transform_6(%arg0: i32) -> (i32, i32) {
    %c0_i32 = arith.constant 0 : i32
    %c0_i32_0 = arith.constant 0 : i32
    %c0_i32_1 = arith.constant 0 : i32
    return %c0_i32, %c0_i32_0 : i32, i32
  }
  func.func @transform_7(%arg0: i32) -> (i32, i32) {
    %c0_i32 = arith.constant 0 : i32
    %c0_i32_0 = arith.constant 0 : i32
    %c0_i32_1 = arith.constant 0 : i32
    return %c0_i32, %c0_i32_0 : i32, i32
  }
  func.func @transform_8(%arg0: i32) -> (i32, i32) {
    %c0_i32 = arith.constant 0 : i32
    %c0_i32_0 = arith.constant 0 : i32
    %c0_i32_1 = arith.constant 0 : i32
    return %c0_i32, %c0_i32_0 : i32, i32
  }
  func.func @transform_9(%arg0: i32) -> (i32, i32) {
    %c0_i32 = arith.constant 0 : i32
    %c0_i32_0 = arith.constant 0 : i32
    %c0_i32_1 = arith.constant 0 : i32
    return %c0_i32, %c0_i32_0 : i32, i32
  }
  func.func @transform_10(%arg0: i32) -> (i32, i32) {
    %c0_i32 = arith.constant 0 : i32
    %c0_i32_0 = arith.constant 0 : i32
    %c0_i32_1 = arith.constant 0 : i32
    return %c0_i32, %c0_i32_0 : i32, i32
  }
  func.func @transform_11(%arg0: i32) -> (i32, i32) {
    %c0_i32 = arith.constant 0 : i32
    %c0_i32_0 = arith.constant 0 : i32
    %c0_i32_1 = arith.constant 0 : i32
    return %c0_i32, %c0_i32_0 : i32, i32
  }
  func.func @transform_12(%arg0: i32) -> (i32, i32) {
    %c0_i32 = arith.constant 0 : i32
    %c0_i32_0 = arith.constant 0 : i32
    %c0_i32_1 = arith.constant 0 : i32
    return %c0_i32, %c0_i32_0 : i32, i32
  }
  func.func @transform_13(%arg0: i32) -> (i32, i32) {
    %c0_i32 = arith.constant 0 : i32
    %c0_i32_0 = arith.constant 0 : i32
    %c0_i32_1 = arith.constant 0 : i32
    return %c0_i32, %c0_i32_0 : i32, i32
  }
  func.func @transform_14(%arg0: i32) -> (i32, i32) {
    %c0_i32 = arith.constant 0 : i32
    %c0_i32_0 = arith.constant 0 : i32
    %c0_i32_1 = arith.constant 0 : i32
    return %c0_i32, %c0_i32_0 : i32, i32
  }
  func.func @transform_15(%arg0: i32) -> (i32, i32) {
    %c0_i32 = arith.constant 0 : i32
    %c0_i32_0 = arith.constant 0 : i32
    %c0_i32_1 = arith.constant 0 : i32
    return %c0_i32, %c0_i32_0 : i32, i32
  }
  func.func @transform_16(%arg0: i32) -> (i32, i32) {
    %c0_i32 = arith.constant 0 : i32
    %c0_i32_0 = arith.constant 0 : i32
    %c0_i32_1 = arith.constant 0 : i32
    return %c0_i32, %c0_i32_0 : i32, i32
  }
  func.func @transform_17(%arg0: i32) -> (i32, i32) {
    %c0_i32 = arith.constant 0 : i32
    %c0_i32_0 = arith.constant 0 : i32
    %c0_i32_1 = arith.constant 0 : i32
    return %c0_i32, %c0_i32_0 : i32, i32
  }
  func.func @transform_18(%arg0: i32) -> (i32, i32) {
    %c0_i32 = arith.constant 0 : i32
    %c0_i32_0 = arith.constant 0 : i32
    %c0_i32_1 = arith.constant 0 : i32
    return %c0_i32, %c0_i32_0 : i32, i32
  }
  func.func @transform_19(%arg0: i32) -> (i32, i32, i32) {
    %c0_i32 = arith.constant 0 : i32
    %c0_i32_0 = arith.constant 0 : i32
    %c0_i32_1 = arith.constant 0 : i32
    return %arg0, %c0_i32, %c0_i32_0 : i32, i32, i32
  }
  func.func @transform_20(%arg0: i32) -> (i32, i32, i32) {
    %c0_i32 = arith.constant 0 : i32
    %c0_i32_0 = arith.constant 0 : i32
    %c0_i32_1 = arith.constant 0 : i32
    return %arg0, %c0_i32, %c0_i32_0 : i32, i32, i32
  }
}

</mosaic_0001>

<bundles_post_ra>
// kernel: rl_policy_forward.1
= control target key start
LH: loop header
LB: loop body
LE: loop exit
PB: predicated region body
PF: predicated region fallthrough
CT: control target
= control target key end

     0   :  { %s11519_s23 = smov 0   ;;  %s14284_s0 = inlined_call_operand.vmem [shape: f32[2,362,24], index: 0, kind: input, shape index: {}]   ;;  %s14285_s1 = inlined_call_operand.vmem [shape: f32[16,1], index: 1, kind: input, shape index: {}]   ;;  %s14286_s2 = inlined_call_operand.vmem [shape: bf16[2,1,16], index: 2, kind: input, shape index: {}]   ;;  %s14287_s3 = inlined_call_operand.vmem [shape: bf16[224,32], index: 3, kind: input, shape index: {}]   ;;  %s14288_s4 = inlined_call_operand.vmem [shape: bf16[288,64], index: 4, kind: input, shape index: {}]   ;;  %s14289_s5 = inlined_call_operand.vmem [shape: bf16[576,128], index: 5, kind: input, shape index: {}]   ;;  %s14290_s6 = inlined_call_operand.vmem [shape: bf16[1152,64], index: 6, kind: input, shape index: {}]   ;;  %s14291_s7 = inlined_call_operand.vmem [shape: bf16[576,32], index: 7, kind: input, shape index: {}]   ;;  %s14292_s8 = inlined_call_operand.vmem [shape: f32[1,32], index: 8, kind: input, shape index: {}]   ;;  %s14293_s9 = inlined_call_operand.vmem [shape: f32[1,64], index: 9, kind: input, shape index: {}]   ;;  %s14294_s10 = inlined_call_operand.vmem [shape: f32[1,128], index: 10, kind: input, shape index: {}]   ;;  %s14295_s11 = inlined_call_operand.vmem [shape: f32[1,64], index: 11, kind: input, shape index: {}]   ;;  %s14296_s12 = inlined_call_operand.vmem [shape: f32[1,32], index: 12, kind: input, shape index: {}]   ;;  %s14297_s13 = inlined_call_operand.vmem [shape: bf16[144,512], index: 13, kind: input, shape index: {}]   ;;  %s14298_s14 = inlined_call_operand.vmem [shape: f32[1,512], index: 14, kind: input, shape index: {}]   ;;  %s14299_s15 = inlined_call_operand.vmem [shape: bf16[512,256], index: 15, kind: input, shape index: {}]   ;;  %s14300_s16 = inlined_call_operand.vmem [shape: f32[1,256], index: 16, kind: input, shape index: {}]   ;;  %s14301_s17 = inlined_call_operand.vmem [shape: f32[1,256], index: 17, kind: input, shape index: {}]   ;;  %s14302_s18 = inlined_call_operand.<no memory space> [shape: f32[1,1], index: 18, kind: input, shape index: {}]   ;;  %s14303_s19 = inlined_call_operand.vmem [shape: f32[2,1,1], index: 19, kind: output, shape index: {0}]   ;;  %s14304_s20 = inlined_call_operand.vmem [shape: f32[2,1,256], index: 20, kind: output, shape index: {1}]  }
   0x1   :  { %14313 = sst [smem:[#allocation20_spill]] %s14284_s0  ;;  %v26_v0 = vstv %s14302_s18 }
   0x2   :  { %14314 = sst [smem:[#allocation21_spill]] %s14285_s1  ;;  %27 = vst [vmem:[#allocation19] sm:$0x1] %v26_v0 }
   0x3   :  { %14315 = sst [smem:[#allocation22_spill]] %s14286_s2 }
   0x4   :  { %14316 = sst [smem:[#allocation23_spill]] %s14287_s3 }
   0x5   :  { %14317 = sst [smem:[#allocation24_spill]] %s14288_s4 }
   0x6   :  { %14318 = sst [smem:[#allocation25_spill]] %s14289_s5 }
   0x7 LB: > { %s9119_s24 = sadd.s32 4294967295, %s11399_s23   ;;  %p9123_p0 = scmp.ge.s32.totalorder %s11399_s23, 1  ;;  %s11399_s23 = sphi %s11519_s23, %s33_s23  }
   0x8   : > { %p575_p1 = scmp.lt.s32.totalorder %s11399_s23, 3 }
   0xa   : > { %p576_p2 = pnand %p9123_p0, %p575_p1 }
   0xb   : > { %p638_p3 = scmp.lt.s32.totalorder (!%p576_p2), %s9119_s24, 1  ;;  %s14319_s18 = sld [smem:[#allocation23_spill]] (!%p576_p2)  ;;  %v11401_v2 = vmov (!%p576_p2), 0   ;;  %vm678_vm0 = vcmask (!%p576_p2), 1044416   ;;  %vm927_vm1 = vcmask (!%p576_p2), 191488   ;;  %vm1258_vm2 = vcmask (!%p576_p2), 388288  }
   0xc   : > { %579 = sbr.rel (%p576_p2) target bundleno = 3274 (0xcca), region = 96  ;;  %3938 = vmatprep.subr.bf16.mxu0 (!%p576_p2), %v11401_v2  ;;  %10981 = vset.pattern.permute.xlu1 (!%p576_p2), %v11401_v2  ;;  %s14320_s29 = sld [smem:[#allocation20_spill]] (!%p576_p2)  ;;  %679 = vst.msk [vmem:[#allocation13] sm:$0xf] (!%p576_p2), %vm678_vm0, %v11401_v2  ;;  %680 = vst.msk [vmem:[#allocation13 + $0x8] sm:$0xf] (!%p576_p2), %vm678_vm0, %v11401_v2 }
   0xd   : > { %10982 = vset.pattern.permute.xlu0 (!%p576_p2), %v11401_v2  ;;  %681 = vst.msk [vmem:[#allocation13 + $0x10] sm:$0xf] (!%p576_p2), %vm678_vm0, %v11401_v2  ;;  %682 = vst.msk [vmem:[#allocation13 + $0x18] sm:$0xf] (!%p576_p2), %vm678_vm0, %v11401_v2  ;;  %s11402_s1 = smov (!%p576_p2), 48   ;;  %s11403_s22 = smov (!%p576_p2), 24  }
   0xe   : > { %683 = vst.msk [vmem:[#allocation13 + $0x20] sm:$0xf] (!%p576_p2), %vm678_vm0, %v11401_v2  ;;  %684 = vst.msk [vmem:[#allocation13 + $0x28] sm:$0xf] (!%p576_p2), %vm678_vm0, %v11401_v2  ;;  %s11404_s4 = smov (!%p576_p2), 72   ;;  %s14308_s25 = smov (!%p576_p2), 96  }
   0xf   : > { %685 = vst.msk [vmem:[#allocation13 + $0x30] sm:$0xf] (!%p576_p2), %vm678_vm0, %v11401_v2  ;;  %686 = vst.msk [vmem:[#allocation13 + $0x38] sm:$0xf] (!%p576_p2), %vm678_vm0, %v11401_v2  ;;  %vm1589_vm3 = vcmask (!%p576_p2), 585088   ;;  %vm1920_vm4 = vcmask (!%p576_p2), 781888  }
  0x10   : > { %687 = vst.msk [vmem:[#allocation13 + $0x40] sm:$0xf] (!%p576_p2), %vm678_vm0, %v11401_v2  ;;  %688 = vst.msk [vmem:[#allocation13 + $0x48] sm:$0xf] (!%p576_p2), %vm678_vm0, %v11401_v2  ;;  %vm2251_vm5 = vcmask (!%p576_p2), 978688   ;;  %vm3874_vm6 = vcmask (!%p576_p2), 785408  }
  0x11   : > { %v10983_v1 = vld [vmem:[%s14319_s18] sm:$0xff] (!%p576_p2)   ;;  %v10984_v3 = vld [vmem:[%s14319_s18 + $0x8] sm:$0xff] (!%p576_p2)   ;;  %v10985_v4 = vld [vmem:[%s14319_s18 + $0x10] sm:$0xff] (!%p576_p2)   ;;  %689 = vst.msk [vmem:[#allocation13 + $0x50] sm:$0xf] (!%p576_p2), %vm678_vm0, %v11401_v2  ;;  %vm654_vm7 = vcmask (!%p576_p2), 261120  }
  0x12   : > { %3939 = vmatpush1.bf16.msra.mxu0 (!%p576_p2), %v10983_v1  ;;  %690 = vst.msk [vmem:[#allocation13 + $0x58] sm:$0xf] (!%p576_p2), %vm678_vm0, %v11401_v2  ;;  %691 = vst.msk [vmem:[#allocation13 + $0x60] sm:$0xf] (!%p576_p2), %vm678_vm0, %v11401_v2  ;;  %v10986_v17 = vld [vmem:[%s14319_s18 + $0x18] sm:$0xff] (!%p576_p2)   ;;  %v10987_v24 = vld [vmem:[%s14319_s18 + $0x20] sm:$0xff] (!%p576_p2)  }
  0x13   : > { %s14331_s24 = smov (!%p638_p3, %s9119_s24), 1  ;;  %3940 = vmatprep.subr.bf16.mxu0 %v11401_v2  ;;  %692 = vst.msk [vmem:[#allocation13 + $0x68] sm:$0xf] %vm678_vm0, %v11401_v2  ;;  %693 = vst.msk [vmem:[#allocation13 + $0x70] sm:$0xf] %vm678_vm0, %v11401_v2  ;;  %v10988_v33 = vld [vmem:[%s14319_s18 + $0x28] sm:$0xff]  }
  0x14   : > { %s10962_s27 = smul.u32 368, %s14331_s24  ;;  %694 = vst.msk [vmem:[#allocation13 + $0x78] sm:$0xf] %vm678_vm0, %v11401_v2  ;;  %695 = vst.msk [vmem:[#allocation13 + $0x80] sm:$0xf] %vm678_vm0, %v11401_v2  ;;  %v10989_v46 = vld [vmem:[%s14319_s18 + $0x30] sm:$0xff]  }
  0x15   : > { %696 = vst.msk [vmem:[#allocation13 + $0x88] sm:$0xf] %vm678_vm0, %v11401_v2  ;;  %697 = vst.msk [vmem:[#allocation13 + $0x90] sm:$0xf] %vm678_vm0, %v11401_v2  ;;  %v10990_v55 = vld [vmem:[%s14319_s18 + $0x38] sm:$0xff]   ;;  %v10991_v60 = vld [vmem:[%s14319_s18 + $0x40] sm:$0xff]  }
  0x16   : > { %s11543_s30 = scalar_lea.vmem %s14320_s29, %s10962_s27  ;;  %3941 = vmatpush1.bf16.msra.mxu0 %v10984_v3  ;;  %698 = vst.msk [vmem:[#allocation13 + $0x98] sm:$0xf] %vm678_vm0, %v11401_v2  ;;  %699 = vst.msk [vmem:[#allocation13 + $0xa0] sm:$0xf] %vm678_vm0, %v11401_v2  ;;  %v10992_v63 = vld [vmem:[%s14319_s18 + $0x48] sm:$0xff]   ;;  %vm658_vm8 = vcmask 254976  }
  0x17   : > { %700 = vst.msk [vmem:[#allocation13 + $0xa8] sm:$0xf] %vm678_vm0, %v11401_v2  ;;  %701 = vst.msk [vmem:[#allocation13 + $0xb0] sm:$0xf] %vm678_vm0, %v11401_v2  ;;  %v1301_v5 = vld [vmem:[%s11543_s30 + $0x2] sm:$0xff]  ;;  %v1302_v7 = vld [vmem:[%s11543_s30 + $0xa] sm:$0xff]  ;;  %3942 = vmatprep.subr.bf16.mxu0 %v11401_v2 }
  0x18   : > { %702 = vst.msk [vmem:[#allocation13 + $0xb8] sm:$0xf] %vm678_vm0, %v11401_v2  ;;  %703 = vst.msk [vmem:[#allocation13 + $0xc0] sm:$0xf] %vm678_vm0, %v11401_v2  ;;  %v970_v6 = vld [vmem:[%s11543_s30 + $0x1] sm:$0xff]  ;;  %v10135_v8 = vpack.c.bf16 %v1301_v5, %v1301_v5  ;;  %v971_v10 = vld [vmem:[%s11543_s30 + $0x9] sm:$0xff]  ;;  %v10136_v15 = vpack.c.bf16 %v1302_v7, %v1302_v7 }
  0x19   : > { %704 = vst.msk [vmem:[#allocation13 + $0xc8] sm:$0xf] %vm678_vm0, %v11401_v2  ;;  %705 = vst.msk [vmem:[#allocation13 + $0xd0] sm:$0xf] %vm678_vm0, %v11401_v2  ;;  %v10094_v9 = vpack.c.bf16 %v970_v6, %v970_v6  ;;  %v2542_v11 = vld [vmem:[%s11543_s30 + $0x2c] sm:$0xff]  ;;  %v2541_v12 = vld [vmem:[%s11543_s30 + $0x24] sm:$0xff]  ;;  %v10095_v16 = vpack.c.bf16 %v971_v10, %v971_v10 }
  0x1a   : > { %706 = vst.msk [vmem:[#allocation13 + $0xd8] sm:$0xf] %vm678_vm0, %v11401_v2  ;;  %707 = vst.msk [vmem:[#allocation13 + $0xe0] sm:$0xf] %vm678_vm0, %v11401_v2  ;;  %v10300_v13 = vpack.c.bf16 %v2542_v11, %v2542_v11  ;;  %v10299_v14 = vpack.c.bf16 %v2541_v12, %v2541_v12  ;;  %1466 = vrot.lane.b32.xlu1 %v10135_v8, %s11402_s1  ;;  %3943 = vmatpush1.bf16.msra.mxu0 %v10985_v4  ;;  %v2544_v18 = vld [vmem:[%s11543_s30 + $0x3c] sm:$0xff]  ;;  %v2543_v20 = vld [vmem:[%s11543_s30 + $0x34] sm:$0xff] }
  0x1b   : > { %708 = vst.msk [vmem:[#allocation13 + $0xe8] sm:$0xf] %vm678_vm0, %v11401_v2  ;;  %709 = vst.msk [vmem:[#allocation13 + $0xf0] sm:$0xf] %vm678_vm0, %v11401_v2  ;;  %1135 = vrot.lane.b32.xlu0 %v10094_v9, %s11403_s22  ;;  %3944 = vmatprep.subr.bf16.mxu0 %v11401_v2  ;;  %v11644_v19 = vpack.c.bf16 %v2544_v18, %v2544_v18  ;;  %v1633_v21 = vld [vmem:[%s11543_s30 + $0x1a] sm:$0xff]  ;;  %v11650_v22 = vpack.c.bf16 %v2543_v20, %v2543_v20  ;;  %v1632_v23 = vld [vmem:[%s11543_s30 + $0x12] sm:$0xff] }
  0x1c   : > { %710 = vst.msk [vmem:[#allocation13 + $0xf8] sm:$0xf] %vm678_vm0, %v11401_v2  ;;  %711 = vst.msk [vmem:[#allocation13 + $0x100] sm:$0xf] %vm678_vm0, %v11401_v2  ;;  %v11661_v25 = vpack.c.bf16 %v1633_v21, %v1633_v21  ;;  %v2546_v26 = vld [vmem:[%s11543_s30 + $0x4c] sm:$0xff]  ;;  %v2545_v27 = vld [vmem:[%s11543_s30 + $0x44] sm:$0xff]  ;;  %v11667_v28 = vpack.c.bf16 %v1632_v23, %v1632_v23 }
  0x1d   : > { %712 = vst.msk [vmem:[#allocation13 + $0x108] sm:$0xf] %vm678_vm0, %v11401_v2  ;;  %713 = vst.msk [vmem:[#allocation13 + $0x110] sm:$0xf] %vm678_vm0, %v11401_v2  ;;  %v11669_v29 = vpack.c.bf16 %v2546_v26, %v2546_v26  ;;  %v11671_v30 = vpack.c.bf16 %v2545_v27, %v2545_v27  ;;  %v2871_v31 = vld [vmem:[%s11543_s30 + $0x2d] sm:$0xff]  ;;  %v2870_v32 = vld [vmem:[%s11543_s30 + $0x25] sm:$0xff] }
  0x1e   : > { %714 = vst.msk [vmem:[#allocation13 + $0x118] sm:$0xf] %vm678_vm0, %v11401_v2  ;;  %715 = vst.msk [vmem:[#allocation13 + $0x120] sm:$0xf] %vm678_vm0, %v11401_v2  ;;  %1468 = vrot.lane.b32.xlu1 %v10136_v15, %s11402_s1  ;;  %3945 = vmatpush1.bf16.msra.mxu0 %v10986_v17  ;;  %v10341_v34 = vpack.c.bf16 %v2871_v31, %v2871_v31  ;;  %v10340_v35 = vpack.c.bf16 %v2870_v32, %v2870_v32  ;;  %v1964_v36 = vld [vmem:[%s11543_s30 + $0x1b] sm:$0xff]  ;;  %v1963_v37 = vld [vmem:[%s11543_s30 + $0x13] sm:$0xff] }
  0x1f   : > { %716 = vst.msk [vmem:[#allocation13 + $0x128] sm:$0xf] %vm678_vm0, %v11401_v2  ;;  %717 = vst.msk [vmem:[#allocation13 + $0x130] sm:$0xf] %vm678_vm0, %v11401_v2  ;;  %1137 = vrot.lane.b32.xlu0 %v10095_v16, %s11403_s22  ;;  %3946 = vmatprep.subr.bf16.mxu0 %v11401_v2  ;;  %v3200_v38 = vld [vmem:[%s11543_s30 + $0x2e] sm:$0xff]  ;;  %v3199_v39 = vld [vmem:[%s11543_s30 + $0x26] sm:$0xff]  ;;  %v10218_v41 = vpack.c.bf16 %v1964_v36, %v1964_v36  ;;  %v10217_v42 = vpack.c.bf16 %v1963_v37, %v1963_v37 }
  0x20   : > { %718 = vst.msk [vmem:[#allocation13 + $0x138] sm:$0xf] %vm678_vm0, %v11401_v2  ;;  %v721_v40 = vld [vmem:[%s11543_s30] sm:$0xff]  ;;  %v722_v44 = vld [vmem:[%s11543_s30 + $0x8] sm:$0xff]  ;;  %v2294_v51 = vld [vmem:[%s11543_s30 + $0x14] sm:$0xff]  ;;  %v10382_v56 = vpack.c.bf16 %v3200_v38, %v3200_v38  ;;  %v10381_v57 = vpack.c.bf16 %v3199_v39, %v3199_v39  ;;  %vm656_vm9 = vcmask 256000  }
  0x21   : > { %2503 = vst.msk [vmem:[#allocation13 + $0x1c] sm:$0xf] %vm927_vm1, %v10300_v13  ;;  %2502 = vst.msk [vmem:[#allocation13 + $0x14] sm:$0xf] %vm927_vm1, %v10299_v14  ;;  %v10053_v43 = vpack.c.bf16 %v721_v40, %v721_v40  ;;  %v10054_v45 = vpack.c.bf16 %v722_v44, %v722_v44  ;;  %v2550_v47 = vld [vmem:[%s11543_s30 + $0x6c] sm:$0xff]  ;;  %v2549_v49 = vld [vmem:[%s11543_s30 + $0x64] sm:$0xff]  ;;  %v10258_v54 = vpack.c.bf16 %v2294_v51, %v2294_v51 }
  0x22   : > { %2505 = vst.msk [vmem:[#allocation13 + $0x2c] sm:$0xf] %vm927_vm1, %v11644_v19  ;;  %2504 = vst.msk [vmem:[#allocation13 + $0x24] sm:$0xf] %vm927_vm1, %v11650_v22  ;;  %2708 = vrot.lane.b32.xlu1 %v10300_v13, %s11403_s22  ;;  %3947 = vmatpush1.bf16.msra.mxu0 %v10987_v24  ;;  %v11701_v48 = vpack.c.bf16 %v2550_v47, %v2550_v47  ;;  %v2295_v50 = vld [vmem:[%s11543_s30 + $0x1c] sm:$0xff]  ;;  %v11707_v52 = vpack.c.bf16 %v2549_v49, %v2549_v49  ;;  %v972_v59 = vld [vmem:[%s11543_s30 + $0x11] sm:$0xff] }
  0x23   : > { %2706 = vrot.lane.b32.xlu0 %v10299_v14, %s11403_s22  ;;  %3948 = vmatprep.subr.bf16.mxu0 %v11401_v2  ;;  %2507 = vst.msk [vmem:[#allocation13 + $0x3c] sm:$0xf] %vm927_vm1, %v11669_v29  ;;  %2506 = vst.msk [vmem:[#allocation13 + $0x34] sm:$0xf] %vm927_vm1, %v11671_v30  ;;  %v10259_v53 = vpack.c.bf16 %v2295_v50, %v2295_v50  ;;  %v973_v58 = vld [vmem:[%s11543_s30 + $0x19] sm:$0xff]  ;;  %v10096_v62 = vpack.c.bf16 %v972_v59, %v972_v59  ;;  %v723_v1 = vld [vmem:[%s11543_s30 + $0x10] sm:$0xff] }
  0x24   : > { %928 = vst.msk [vmem:[#allocation13] sm:$0xf] %vm927_vm1, %v10053_v43  ;;  %929 = vst.msk [vmem:[#allocation13 + $0x8] sm:$0xf] %vm927_vm1, %v10054_v45  ;;  %v10097_v61 = vpack.c.bf16 %v973_v58, %v973_v58  ;;  %v724_v0 = vld [vmem:[%s11543_s30 + $0x18] sm:$0xff]  ;;  %v10055_v4 = vpack.c.bf16 %v723_v1, %v723_v1  ;;  %v10993_v5 = vld [vmem:[%s14319_s18 + $0x50] sm:$0xff]  }
  0x25   : > { %2511 = vst.msk [vmem:[#allocation13 + $0x5c] sm:$0xf] %vm927_vm1, %v11701_v48  ;;  %2501 = vst.msk [vmem:[#allocation13 + $0xc] sm:$0xf] %vm927_vm1, %v10259_v53  ;;  %v10056_v3 = vpack.c.bf16 %v724_v0, %v724_v0  ;;  %v2552_v6 = vld [vmem:[%s11543_s30 + $0x7c] sm:$0xff]  ;;  %v2551_v7 = vld [vmem:[%s11543_s30 + $0x74] sm:$0xff] }
  0x26   : > { %1799 = vrot.lane.b32.xlu1 %v11661_v25, %s11404_s4  ;;  %3949 = vmatpush1.bf16.msra.mxu0 %v10988_v33  ;;  %2500 = vst.msk [vmem:[#allocation13 + $0x4] sm:$0xf] %vm927_vm1, %v10258_v54  ;;  %2510 = vst.msk [vmem:[#allocation13 + $0x54] sm:$0xf] %vm927_vm1, %v11707_v52  ;;  %v11748_v8 = vpack.c.bf16 %v2552_v6, %v2552_v6  ;;  %v11750_v9 = vpack.c.bf16 %v2551_v7, %v2551_v7  ;;  %v1635_v10 = vld [vmem:[%s11543_s30 + $0x2a] sm:$0xff]  ;;  %v1634_v11 = vld [vmem:[%s11543_s30 + $0x22] sm:$0xff] }
  0x27   : > { %1797 = vrot.lane.b32.xlu0 %v11667_v28, %s11404_s4  ;;  %3950 = vmatprep.subr.bf16.mxu0 %v11401_v2  ;;  %931 = vst.msk [vmem:[#allocation13 + $0x18] sm:$0xf] %vm927_vm1, %v10056_v3  ;;  %930 = vst.msk [vmem:[#allocation13 + $0x10] sm:$0xf] %vm927_vm1, %v10055_v4  ;;  %v10994_v12 = vld [vmem:[%s14319_s18 + $0x58] sm:$0xff]   ;;  %v10179_v15 = vpack.c.bf16 %v1635_v10, %v1635_v10  ;;  %v10178_v16 = vpack.c.bf16 %v1634_v11, %v1634_v11  ;;  %v10995_v17 = vld [vmem:[%s14319_s18 + $0x60] sm:$0xff]  }
  0x28   : > { %2513 = vst.msk [vmem:[#allocation13 + $0x6c] sm:$0xf] %vm927_vm1, %v11748_v8  ;;  %2512 = vst.msk [vmem:[#allocation13 + $0x64] sm:$0xf] %vm927_vm1, %v11750_v9  ;;  %v2873_v13 = vld [vmem:[%s11543_s30 + $0x3d] sm:$0xff]  ;;  %v2872_v14 = vld [vmem:[%s11543_s30 + $0x35] sm:$0xff] }
  0x29   : > { %v1966_v18 = vld [vmem:[%s11543_s30 + $0x2b] sm:$0xff]  ;;  %v1965_v20 = vld [vmem:[%s11543_s30 + $0x23] sm:$0xff]  ;;  %v10342_v21 = vpack.c.bf16 %v2872_v14, %v2872_v14  ;;  %v1637_v43 = vld [vmem:[%s11543_s30 + $0x3a] sm:$0xff]  ;;  %s14321_s3 = sld [smem:[#allocation24_spill]]  ;;  %vm11407_vm10 = vmmov 0   ;;  %vm4219_vm11 = vcmask 257024  }
  0x2a   : > { %3037 = vrot.lane.b32.xlu1 %v10341_v34, %s11402_s1  ;;  %3951 = vmatpush1.bf16.msra.mxu0 %v10989_v46  ;;  %v725_v23 = vld [vmem:[%s11543_s30 + $0x20] sm:$0xff]  ;;  %v10996_v24 = vld [vmem:[%s14319_s18 + $0x68] sm:$0xff]   ;;  %v10220_v31 = vpack.c.bf16 %v1966_v18, %v1966_v18  ;;  %v10219_v32 = vpack.c.bf16 %v1965_v20, %v1965_v20  ;;  %v1636_v44 = vld [vmem:[%s11543_s30 + $0x32] sm:$0xff]  ;;  %v10181_v47 = vpack.c.bf16 %v1637_v43, %v1637_v43  ;;  %vm719_vm12 = vcmask 1042368   ;;  %s14309_s2 = smov 32   ;;  %s14322_s5 = sld [smem:[#allocation25_spill]] }
  0x2b   : > { %3035 = vrot.lane.b32.xlu0 %v10340_v35, %s11402_s1  ;;  %3952 = vmatprep.subr.bf16.mxu0 %v11401_v2  ;;  %v10057_v26 = vpack.c.bf16 %v725_v23, %v725_v23  ;;  %v3202_v27 = vld [vmem:[%s11543_s30 + $0x3e] sm:$0xff]  ;;  %v2554_v33 = vld [vmem:[%s11543_s30 + $0x8c] sm:$0xff]  ;;  %v10180_v49 = vpack.c.bf16 %v1636_v44, %v1636_v44  ;;  %v2547_v11 = vld [vmem:[%s11543_s30 + $0x54] sm:$0xff]  ;;  %vm968_vm13 = vcmask 189440   ;;  %720 = vst.msk [vmem:[#allocation13 + $0x140] sm:$0x3] %vm719_vm12, %v11401_v2 }
  0x2c   : > { %v2553_v34 = vld [vmem:[%s11543_s30 + $0x84] sm:$0xff]  ;;  %v11793_v37 = vpack.c.bf16 %v2554_v33, %v2554_v33  ;;  %v10384_v39 = vpack.c.bf16 %v3202_v27, %v3202_v27  ;;  %v2875_v45 = vld [vmem:[%s11543_s30 + $0x4d] sm:$0xff]  ;;  %v1968_v50 = vld [vmem:[%s11543_s30 + $0x3b] sm:$0xff]  ;;  %vm1299_vm14 = vcmask 386240   ;;  %vm1630_vm15 = vcmask 583040   ;;  %s14323_s28 = sld [smem:[#allocation21_spill]] }
  0x2d   : > { %932 = vst.msk [vmem:[#allocation13 + $0x20] sm:$0xf] %vm927_vm1, %v10057_v26  ;;  %v975_v35 = vld [vmem:[%s11543_s30 + $0x29] sm:$0xff]  ;;  %v974_v36 = vld [vmem:[%s11543_s30 + $0x21] sm:$0xff]  ;;  %v11795_v38 = vpack.c.bf16 %v2553_v34, %v2553_v34  ;;  %v1967_v51 = vld [vmem:[%s11543_s30 + $0x33] sm:$0xff]  ;;  %v10345_v53 = vpack.c.bf16 %v2875_v45, %v2875_v45  ;;  %v10222_v59 = vpack.c.bf16 %v1968_v50, %v1968_v50  ;;  %vm1961_vm0 = vcmask 779840  }
  0x2e   : > { %2130 = vrot.lane.b32.xlu1 %v10218_v41, %s14308_s25  ;;  %3953 = vmatpush1.bf16.msra.mxu0 %v10990_v55  ;;  %2515 = vst.msk [vmem:[#allocation13 + $0x7c] sm:$0xf] %vm927_vm1, %v11793_v37  ;;  %v10099_v41 = vpack.c.bf16 %v975_v35, %v975_v35  ;;  %v2874_v46 = vld [vmem:[%s11543_s30 + $0x45] sm:$0xff]  ;;  %v728_v55 = vld [vmem:[%s11543_s30 + $0x38] sm:$0xff]  ;;  %v3204_v58 = vld [vmem:[%s11543_s30 + $0x4e] sm:$0xff]  ;;  %vm4777_vm12 = vcmask 1042176  }
  0x2f   : > { %2128 = vrot.lane.b32.xlu0 %v10217_v42, %s14308_s25  ;;  %3954 = vmatprep.subr.bf16.mxu0 %v11401_v2  ;;  %2514 = vst.msk [vmem:[#allocation13 + $0x74] sm:$0xf] %vm927_vm1, %v11795_v38  ;;  %v10098_v42 = vpack.c.bf16 %v974_v36, %v974_v36  ;;  %v10344_v54 = vpack.c.bf16 %v2874_v46, %v2874_v46  ;;  %v976_v0 = vld [vmem:[%s11543_s30 + $0x31] sm:$0xff]  ;;  %v2548_v10 = vld [vmem:[%s11543_s30 + $0x5c] sm:$0xff]  ;;  %v2557_v35 = vld [vmem:[%s11543_s30 + $0xa4] sm:$0xff]  ;;  %s14324_s27 = smov 64  }
  0x30   : > { %v10386_v4 = vpack.c.bf16 %v3204_v58, %v3204_v58  ;;  %v10100_v7 = vpack.c.bf16 %v976_v0, %v976_v0  ;;  %v10306_v14 = vpack.c.bf16 %v2548_v10, %v2548_v10  ;;  %v2558_v34 = vld [vmem:[%s11543_s30 + $0xac] sm:$0xff]  ;;  %v2303_v44 = vld [vmem:[%s11543_s30 + $0x5c] sm:$0xff]  ;;  %v2302_v45 = vld [vmem:[%s11543_s30 + $0x54] sm:$0xff] }
  0x31   : > { %v979_v36 = vld [vmem:[%s11543_s30 + $0x49] sm:$0xff]  ;;  %v10267_v46 = vpack.c.bf16 %v2303_v44, %v2303_v44  ;;  %v732_v0 = vld [vmem:[%s11543_s30 + $0x58] sm:$0xff] }
  0x32   : > { %3366 = vrot.lane.b32.xlu1 %v10382_v56, %s11404_s4  ;;  %3955 = vmatpush1.bf16.msra.mxu0 %v10991_v60  ;;  %v727_v56 = vld [vmem:[%s11543_s30 + $0x30] sm:$0xff]  ;;  %v10221_v60 = vpack.c.bf16 %v1967_v51, %v1967_v51  ;;  %v2878_v58 = vld [vmem:[%s11543_s30 + $0x65] sm:$0xff] }
  0x33   : > { %3364 = vrot.lane.b32.xlu0 %v10381_v57, %s11404_s4  ;;  %3956 = vmatprep.subr.bf16.mxu0 %v11401_v2  ;;  %v10059_v57 = vpack.c.bf16 %v727_v56, %v727_v56  ;;  %2509 = vst.msk [vmem:[#allocation13 + $0x4c] sm:$0xf] %vm927_vm1, %v10267_v46  ;;  %v2880_v46 = vld [vmem:[%s11543_s30 + $0x75] sm:$0xff] }
  0x35   : > { %934 = vst.msk [vmem:[#allocation13 + $0x30] sm:$0xf] %vm927_vm1, %v10059_v57  ;;  %v2879_v57 = vld [vmem:[%s11543_s30 + $0x6d] sm:$0xff] }
  0x36   : > { %1141 = vrot.lane.b32.xlu1 %v10097_v61, %s11403_s22  ;;  %3957 = vmatpush1.bf16.msra.mxu0 %v10992_v63  ;;  %v2556_v61 = vld [vmem:[%s11543_s30 + $0x9c] sm:$0xff] }
  0x37   : > { %1139 = vrot.lane.b32.xlu0 %v10096_v62, %s11403_s22  ;;  %3958 = vmatprep.subr.bf16.mxu0 %v11401_v2  ;;  %v2555_v62 = vld [vmem:[%s11543_s30 + $0x94] sm:$0xff]  ;;  %v11833_v1 = vpack.c.bf16 %v2556_v61, %v2556_v61 }
  0x38   : > { %v977_v63 = vld [vmem:[%s11543_s30 + $0x39] sm:$0xff]  ;;  %v11835_v3 = vpack.c.bf16 %v2555_v62, %v2555_v62 }
  0x39   : > { %2517 = vst.msk [vmem:[#allocation13 + $0x8c] sm:$0xf] %vm927_vm1, %v11833_v1  ;;  %v10101_v6 = vpack.c.bf16 %v977_v63, %v977_v63  ;;  %v1972_v62 = vld [vmem:[%s11543_s30 + $0x5b] sm:$0xff]  ;;  %v10348_v63 = vpack.c.bf16 %v2878_v58, %v2878_v58 }
  0x3a   : > { %1472 = vrot.lane.b32.xlu1 %v11661_v25, %s11402_s1  ;;  %3959 = vmatpush1.bf16.msra.mxu0 %v10993_v5  ;;  %2516 = vst.msk [vmem:[#allocation13 + $0x84] sm:$0xf] %vm927_vm1, %v11835_v3 }
  0x3b   : > { %1470 = vrot.lane.b32.xlu0 %v11667_v28, %s11402_s1  ;;  %3960 = vmatprep.subr.bf16.mxu0 %v11401_v2  ;;  %v3201_v28 = vld [vmem:[%s11543_s30 + $0x36] sm:$0xff] }
  0x3c   : > { %v10383_v40 = vpack.c.bf16 %v3201_v28, %v3201_v28  ;;  %v3206_v28 = vld [vmem:[%s11543_s30 + $0x5e] sm:$0xff] }
  0x3e   : > { %2712 = vrot.lane.b32.xlu1 %v11644_v19, %s11403_s22  ;;  %3961 = vmatpush1.bf16.msra.mxu0 %v10994_v12  ;;  %v10343_v19 = vpack.c.bf16 %v2873_v13, %v2873_v13  ;;  %v1639_v12 = vld [vmem:[%s11543_s30 + $0x4a] sm:$0xff]  ;;  %v1638_v13 = vld [vmem:[%s11543_s30 + $0x42] sm:$0xff] }
  0x3f   : > { %2710 = vrot.lane.b32.xlu0 %v11650_v22, %s11403_s22  ;;  %v726_v22 = vld [vmem:[%s11543_s30 + $0x28] sm:$0xff]  ;;  %3962 = vmatprep.subr.bf16.mxu0 %v11401_v2  ;;  %v10183_v18 = vpack.c.bf16 %v1639_v12, %v1639_v12  ;;  %v10182_v20 = vpack.c.bf16 %v1638_v13, %v1638_v13  ;;  %v10226_v13 = vpack.c.bf16 %v1972_v62, %v1972_v62 }
  0x40   : > { %v10058_v25 = vpack.c.bf16 %v726_v22, %v726_v22  ;;  %v3207_v12 = vld [vmem:[%s11543_s30 + $0x66] sm:$0xff] }
  0x42   : > { %1803 = vrot.lane.b32.xlu1 %v10179_v15, %s11404_s4  ;;  %3963 = vmatpush1.bf16.msra.mxu0 %v10995_v17  ;;  %933 = vst.msk [vmem:[#allocation13 + $0x28] sm:$0xf] %vm927_vm1, %v10058_v25  ;;  %v2876_v17 = vld [vmem:[%s11543_s30 + $0x55] sm:$0xff]  ;;  %v729_v25 = vld [vmem:[%s11543_s30 + $0x40] sm:$0xff] }
  0x43   : > { %1801 = vrot.lane.b32.xlu0 %v10178_v16, %s11404_s4  ;;  %3964 = vmatprep.subr.bf16.mxu0 %v11401_v2  ;;  %v10346_v23 = vpack.c.bf16 %v2876_v17, %v2876_v17  ;;  %v10061_v27 = vpack.c.bf16 %v729_v25, %v729_v25  ;;  %v2560_v17 = vld [vmem:[%s11543_s30 + $0xbc] sm:$0xff] }
  0x45   : > { %936 = vst.msk [vmem:[#allocation13 + $0x40] sm:$0xf] %vm927_vm1, %v10061_v27 }
  0x46   : > { %3041 = vrot.lane.b32.xlu1 %v10343_v19, %s11402_s1  ;;  %3965 = vmatpush1.bf16.msra.mxu0 %v10996_v24  ;;  %v1970_v19 = vld [vmem:[%s11543_s30 + $0x4b] sm:$0xff] }
  0x47   : > { %3039 = vrot.lane.b32.xlu0 %v10342_v21, %s11402_s1  ;;  %v1969_v21 = vld [vmem:[%s11543_s30 + $0x43] sm:$0xff] }
  0x48   : > { %v730_v24 = vld [vmem:[%s11543_s30 + $0x48] sm:$0xff]  ;;  %v10223_v33 = vpack.c.bf16 %v1969_v21, %v1969_v21  ;;  %v11933_v21 = vpack.c.bf16 %v2560_v17, %v2560_v17 }
  0x49   : > { %v10062_v26 = vpack.c.bf16 %v730_v24, %v730_v24  ;;  %v10389_v24 = vpack.c.bf16 %v3207_v12, %v3207_v12 }
  0x4a   : > { %2134 = vrot.lane.b32.xlu1 %v10220_v31, %s14308_s25  ;;  %v3205_v31 = vld [vmem:[%s11543_s30 + $0x56] sm:$0xff]  ;;  %2521 = vst.msk [vmem:[#allocation13 + $0xac] sm:$0xf] %vm927_vm1, %v11933_v21 }
  0x4b   : > { %2132 = vrot.lane.b32.xlu0 %v10219_v32, %s14308_s25  ;;  %937 = vst.msk [vmem:[#allocation13 + $0x48] sm:$0xf] %vm927_vm1, %v10062_v26  ;;  %v10224_v32 = vpack.c.bf16 %v1970_v19, %v1970_v19  ;;  %v10387_v43 = vpack.c.bf16 %v3205_v31, %v3205_v31  ;;  %v980_v19 = vld [vmem:[%s11543_s30 + $0x51] sm:$0xff] }
  0x4e   : > { %3370 = vrot.lane.b32.xlu1 %v10384_v39, %s11404_s4  ;;  %v978_v39 = vld [vmem:[%s11543_s30 + $0x41] sm:$0xff] }
  0x4f   : > { %3368 = vrot.lane.b32.xlu0 %v10383_v40, %s11404_s4  ;;  %v11873_v40 = vpack.c.bf16 %v2558_v34, %v2558_v34  ;;  %v10102_v50 = vpack.c.bf16 %v978_v39, %v978_v39 }
  0x51   : > { %2519 = vst.msk [vmem:[#allocation13 + $0x9c] sm:$0xf] %vm927_vm1, %v11873_v40 }
  0x52   : > { %1145 = vrot.lane.b32.xlu1 %v10099_v41, %s11403_s22  ;;  %v11875_v41 = vpack.c.bf16 %v2557_v35, %v2557_v35  ;;  %v1643_v35 = vld [vmem:[%s11543_s30 + $0x6a] sm:$0xff] }
  0x53   : > { %1143 = vrot.lane.b32.xlu0 %v10098_v42, %s11403_s22  ;;  %v10388_v42 = vpack.c.bf16 %v3206_v28, %v3206_v28  ;;  %v10104_v28 = vpack.c.bf16 %v980_v19, %v980_v19  ;;  %v1645_v19 = vld [vmem:[%s11543_s30 + $0x7a] sm:$0xff] }
  0x54   : > { %2518 = vst.msk [vmem:[#allocation13 + $0x94] sm:$0xf] %vm927_vm1, %v11875_v41 }
  0x56   : > { %1476 = vrot.lane.b32.xlu1 %v10179_v15, %s11402_s1  ;;  %v10305_v15 = vpack.c.bf16 %v2547_v11, %v2547_v11  ;;  %v3208_v11 = vld [vmem:[%s11543_s30 + $0x6e] sm:$0xff] }
  0x57   : > { %1474 = vrot.lane.b32.xlu0 %v10178_v16, %s11402_s1  ;;  %v2877_v16 = vld [vmem:[%s11543_s30 + $0x5d] sm:$0xff] }
  0x58   : > { %v10347_v22 = vpack.c.bf16 %v2877_v16, %v2877_v16 }
  0x5a   : > { %2716 = vrot.lane.b32.xlu1 %v11669_v29, %s11403_s22  ;;  %v10060_v29 = vpack.c.bf16 %v728_v55, %v728_v55  ;;  %v1640_v55 = vld [vmem:[%s11543_s30 + $0x52] sm:$0xff] }
  0x5b   : > { %2714 = vrot.lane.b32.xlu0 %v11671_v30, %s11403_s22  ;;  %v3203_v30 = vld [vmem:[%s11543_s30 + $0x46] sm:$0xff] }
  0x5c   : > { %935 = vst.msk [vmem:[#allocation13 + $0x38] sm:$0xf] %vm927_vm1, %v10060_v29  ;;  %v10385_v5 = vpack.c.bf16 %v3203_v30, %v3203_v30 }
  0x5e   : > { %1807 = vrot.lane.b32.xlu1 %v10181_v47, %s11404_s4 }
  0x5f   : > { %1805 = vrot.lane.b32.xlu0 %v10180_v49, %s11404_s4 }
  0x62   : > { %3045 = vrot.lane.b32.xlu1 %v10345_v53, %s11402_s1 }
  0x63   : > { %3043 = vrot.lane.b32.xlu0 %v10344_v54, %s11402_s1  ;;  %v1641_v54 = vld [vmem:[%s11543_s30 + $0x5a] sm:$0xff] }
  0x64   : > { %v11904_v30 = vpack.c.bf16 %v1641_v54, %v1641_v54  ;;  %v10350_v54 = vpack.c.bf16 %v2880_v46, %v2880_v46 }
  0x66   : > { %2138 = vrot.lane.b32.xlu1 %v10222_v59, %s14308_s25  ;;  %v11906_v59 = vpack.c.bf16 %v1640_v55, %v1640_v55  ;;  %v734_v55 = vld [vmem:[%s11543_s30 + $0x68] sm:$0xff] }
  0x67   : > { %2136 = vrot.lane.b32.xlu0 %v10221_v60, %s14308_s25 }
  0x6a   : > { %3374 = vrot.lane.b32.xlu1 %v10386_v4, %s11404_s4  ;;  %v731_v4 = vld [vmem:[%s11543_s30 + $0x50] sm:$0xff] }
  0x6b   : > { %3372 = vrot.lane.b32.xlu0 %v10385_v5, %s11404_s4  ;;  %v10064_v5 = vpack.c.bf16 %v732_v0, %v732_v0  ;;  %v2561_v0 = vld [vmem:[%s11543_s30 + $0xc4] sm:$0xff] }
  0x6d   : > { %939 = vst.msk [vmem:[#allocation13 + $0x58] sm:$0xf] %vm927_vm1, %v10064_v5  ;;  %v982_v5 = vld [vmem:[%s11543_s30 + $0x61] sm:$0xff] }
  0x6e   : > { %1149 = vrot.lane.b32.xlu1 %v10101_v6, %s11403_s22  ;;  %v10063_v6 = vpack.c.bf16 %v731_v4, %v731_v4  ;;  %v983_v4 = vld [vmem:[%s11543_s30 + $0x69] sm:$0xff] }
  0x6f   : > { %1147 = vrot.lane.b32.xlu0 %v10100_v7, %s11403_s22 }
  0x70   : > { %938 = vst.msk [vmem:[#allocation13 + $0x50] sm:$0xf] %vm927_vm1, %v10063_v6 }
  0x72   : > { %1480 = vrot.lane.b32.xlu1 %v10181_v47, %s11402_s1  ;;  %v10266_v47 = vpack.c.bf16 %v2302_v45, %v2302_v45  ;;  %v2881_v45 = vld [vmem:[%s11543_s30 + $0x7d] sm:$0xff] }
  0x73   : > { %1478 = vrot.lane.b32.xlu0 %v10180_v49, %s11402_s1  ;;  %v10103_v49 = vpack.c.bf16 %v979_v36, %v979_v36  ;;  %v1642_v36 = vld [vmem:[%s11543_s30 + $0x62] sm:$0xff] }
  0x74   : > { %2508 = vst.msk [vmem:[#allocation13 + $0x44] sm:$0xf] %vm927_vm1, %v10266_v47  ;;  %v11967_v47 = vpack.c.bf16 %v1643_v35, %v1643_v35 }
  0x76   : > { %2720 = vrot.lane.b32.xlu1 %v10306_v14, %s11403_s22 }
  0x77   : > { %2718 = vrot.lane.b32.xlu0 %v10305_v15, %s11403_s22 }
  0x7a   : > { %1811 = vrot.lane.b32.xlu1 %v10183_v18, %s11404_s4 }
  0x7b   : > { %1809 = vrot.lane.b32.xlu0 %v10182_v20, %s11404_s4 }
  0x7e   : > { %3049 = vrot.lane.b32.xlu1 %v10347_v22, %s11402_s1 }
  0x7f   : > { %3047 = vrot.lane.b32.xlu0 %v10346_v23, %s11402_s1  ;;  %v10390_v23 = vpack.c.bf16 %v3208_v11, %v3208_v11 }
  0x82   : > { %2142 = vrot.lane.b32.xlu1 %v10224_v32, %s14308_s25 }
  0x83   : > { %2140 = vrot.lane.b32.xlu0 %v10223_v33, %s14308_s25 }
  0x86   : > { %3378 = vrot.lane.b32.xlu1 %v10388_v42, %s11404_s4 }
  0x87   : > { %3376 = vrot.lane.b32.xlu0 %v10387_v43, %s11404_s4 }
  0x8a   : > { %1153 = vrot.lane.b32.xlu1 %v10103_v49, %s11403_s22  ;;  %v11969_v49 = vpack.c.bf16 %v1642_v36, %v1642_v36 }
  0x8b   : > { %1151 = vrot.lane.b32.xlu0 %v10102_v50, %s11403_s22 }
  0x8c   : > { %v1467_v51 = vpop.permute.xlu1 %1466 }
  0x8d   : > { %v1136_v53 = vpop.permute.xlu0 %1135 }
  0x8e   : > { %1259 = vst.msk [vmem:[#allocation13] sm:$0xf] %vm1258_vm2, %v1136_v53  ;;  %1484 = vrot.lane.b32.xlu1 %v10183_v18, %s11402_s1  ;;  %v2559_v18 = vld [vmem:[%s11543_s30 + $0xb4] sm:$0xff]  ;;  %v1973_v53 = vld [vmem:[%s11543_s30 + $0x63] sm:$0xff] }
  0x8f   : > { %1482 = vrot.lane.b32.xlu0 %v10182_v20, %s11402_s1  ;;  %1590 = vst.msk [vmem:[#allocation13] sm:$0xf] %vm1589_vm3, %v1467_v51  ;;  %v981_v20 = vld [vmem:[%s11543_s30 + $0x59] sm:$0xff]  ;;  %v11935_v22 = vpack.c.bf16 %v2559_v18, %v2559_v18  ;;  %v10227_v62 = vpack.c.bf16 %v1973_v53, %v1973_v53 }
  0x90   : > { %v1469_v56 = vpop.permute.xlu1 %1468  ;;  %v10105_v27 = vpack.c.bf16 %v981_v20, %v981_v20 }
  0x91   : > { %v1138_v29 = vpop.permute.xlu0 %1137  ;;  %2520 = vst.msk [vmem:[#allocation13 + $0xa4] sm:$0xf] %vm927_vm1, %v11935_v22 }
  0x92   : > { %1260 = vst.msk [vmem:[#allocation13 + $0x8] sm:$0xf] %vm1258_vm2, %v1138_v29  ;;  %2724 = vrot.lane.b32.xlu1 %v11701_v48, %s11403_s22  ;;  %v1971_v48 = vld [vmem:[%s11543_s30 + $0x53] sm:$0xff]  ;;  %v10066_v29 = vpack.c.bf16 %v734_v55, %v734_v55 }
  0x93   : > { %2722 = vrot.lane.b32.xlu0 %v11707_v52, %s11403_s22  ;;  %1591 = vst.msk [vmem:[#allocation13 + $0x8] sm:$0xf] %vm1589_vm3, %v1469_v56  ;;  %v10349_v52 = vpack.c.bf16 %v2879_v57, %v2879_v57  ;;  %v10225_v14 = vpack.c.bf16 %v1971_v48, %v1971_v48  ;;  %v733_v56 = vld [vmem:[%s11543_s30 + $0x60] sm:$0xff] }
  0x94   : > { %v2709_v60 = vpop.permute.xlu1 %2708  ;;  %v10065_v57 = vpack.c.bf16 %v733_v56, %v733_v56  ;;  %941 = vst.msk [vmem:[#allocation13 + $0x68] sm:$0xf] %vm927_vm1, %v10066_v29  ;;  %v2564_v56 = vld [vmem:[%s11543_s30 + $0xdc] sm:$0xff]  ;;  %v2563_v29 = vld [vmem:[%s11543_s30 + $0xd4] sm:$0xff] }
  0x95   : > { %v2707_v61 = vpop.permute.xlu0 %2706  ;;  %2830 = vst.msk [vmem:[#allocation13 + $0xc] sm:$0xf] %vm1258_vm2, %v2709_v60  ;;  %v3209_v60 = vld [vmem:[%s11543_s30 + $0x76] sm:$0xff] }
  0x96   : > { %2829 = vst.msk [vmem:[#allocation13 + $0x4] sm:$0xf] %vm1258_vm2, %v2707_v61  ;;  %1815 = vrot.lane.b32.xlu1 %v11904_v30, %s11404_s4  ;;  %v10391_v11 = vpack.c.bf16 %v3209_v60, %v3209_v60 }
  0x97   : > { %1813 = vrot.lane.b32.xlu0 %v11906_v59, %s11404_s4  ;;  %940 = vst.msk [vmem:[#allocation13 + $0x60] sm:$0xf] %vm927_vm1, %v10065_v57  ;;  %v985_v57 = vld [vmem:[%s11543_s30 + $0x79] sm:$0xff] }
  0x98   : > { %v1800_v7 = vpop.permute.xlu1 %1799 }
  0x99   : > { %v1798_v10 = vpop.permute.xlu0 %1797  ;;  %1922 = vst.msk [vmem:[#allocation13 + $0x8] sm:$0xf] %vm1920_vm4, %v1800_v7  ;;  %v11998_v7 = vpack.c.bf16 %v2561_v0, %v2561_v0 }
  0x9a   : > { %1921 = vst.msk [vmem:[#allocation13] sm:$0xf] %vm1920_vm4, %v1798_v10  ;;  %3053 = vrot.lane.b32.xlu1 %v10349_v52, %s11402_s1 }
  0x9b   : > { %3051 = vrot.lane.b32.xlu0 %v10348_v63, %s11402_s1  ;;  %v2562_v63 = vld [vmem:[%s11543_s30 + $0xcc] sm:$0xff]  ;;  %2522 = vst.msk [vmem:[#allocation13 + $0xb4] sm:$0xf] %vm927_vm1, %v11998_v7 }
  0x9c   : > { %v3038_v15 = vpop.permute.xlu1 %3037  ;;  %v11996_v6 = vpack.c.bf16 %v2562_v63, %v2562_v63 }
  0x9d   : > { %v3036_v16 = vpop.permute.xlu0 %3035  ;;  %3159 = vst.msk [vmem:[#allocation13 + $0xc] sm:$0xf] %vm1589_vm3, %v3038_v15  ;;  %v10106_v15 = vpack.c.bf16 %v982_v5, %v982_v5 }
  0x9e   : > { %3158 = vst.msk [vmem:[#allocation13 + $0x4] sm:$0xf] %vm1589_vm3, %v3036_v16  ;;  %2146 = vrot.lane.b32.xlu1 %v10226_v13, %s14308_s25 }
  0x9f   : > { %2144 = vrot.lane.b32.xlu0 %v10225_v14, %s14308_s25  ;;  %2523 = vst.msk [vmem:[#allocation13 + $0xbc] sm:$0xf] %vm927_vm1, %v11996_v6  ;;  %v10107_v14 = vpack.c.bf16 %v983_v4, %v983_v4 }
  0xa0   : > { %v2131_v25 = vpop.permute.xlu1 %2130 }
  0xa1   : > { %v2129_v26 = vpop.permute.xlu0 %2128  ;;  %2253 = vst.msk [vmem:[#allocation13 + $0x8] sm:$0xf] %vm2251_vm5, %v2131_v25 }
  0xa2   : > { %2252 = vst.msk [vmem:[#allocation13] sm:$0xf] %vm2251_vm5, %v2129_v26  ;;  %3382 = vrot.lane.b32.xlu1 %v10390_v23, %s11404_s4  ;;  %v1644_v23 = vld [vmem:[%s11543_s30 + $0x72] sm:$0xff] }
  0xa3   : > { %3380 = vrot.lane.b32.xlu0 %v10389_v24, %s11404_s4  ;;  %v12032_v35 = vpack.c.bf16 %v1644_v23, %v1644_v23 }
  0xa4   : > { %v3367_v31 = vpop.permute.xlu1 %3366 }
  0xa5   : > { %v3365_v32 = vpop.permute.xlu0 %3364  ;;  %3488 = vst.msk [vmem:[#allocation13 + $0xc] sm:$0xf] %vm1920_vm4, %v3367_v31 }
  0xa6   : > { %3487 = vst.msk [vmem:[#allocation13 + $0x4] sm:$0xf] %vm1920_vm4, %v3365_v32  ;;  %1157 = vrot.lane.b32.xlu1 %v10105_v27, %s11403_s22  ;;  %v2883_v32 = vld [vmem:[%s11543_s30 + $0x8d] sm:$0xff] }
  0xa7   : > { %1155 = vrot.lane.b32.xlu0 %v10104_v28, %s11403_s22 }
  0xa8   : > { %v1142_v33 = vpop.permute.xlu1 %1141 }
  0xa9   : > { %v1140_v34 = vpop.permute.xlu0 %1139  ;;  %1262 = vst.msk [vmem:[#allocation13 + $0x18] sm:$0xf] %vm1258_vm2, %v1142_v33  ;;  %v10997_v43 = vld [vmem:[#allocation13] ss:$8 sps:$4 sm:$0xff]   ;;  %v2882_v33 = vld [vmem:[%s11543_s30 + $0x85] sm:$0xff] }
  0xaa   : > { %1261 = vst.msk [vmem:[#allocation13 + $0x10] sm:$0xf] %vm1258_vm2, %v1140_v34  ;;  %1488 = vrot.lane.b32.xlu1 %v11904_v30, %s11402_s1  ;;  %v12030_v34 = vpack.c.bf16 %v1645_v19, %v1645_v19  ;;  %v2884_v19 = vld [vmem:[%s11543_s30 + $0x95] sm:$0xff] }
  0xab   : > { %1486 = vrot.lane.b32.xlu0 %v11906_v59, %s11402_s1  ;;  %v3210_v59 = vld [vmem:[%s11543_s30 + $0x7e] sm:$0xff] }
  0xac   : > { %v1473_v39 = vpop.permute.xlu1 %1472  ;;  %v10392_v10 = vpack.c.bf16 %v3210_v59, %v3210_v59  ;;  %v12061_v59 = vpack.c.bf16 %v2563_v29, %v2563_v29  ;;  %v1649_v29 = vld [vmem:[%s11543_s30 + $0x9a] sm:$0xff] }
  0xad   : > { %v1471_v42 = vpop.permute.xlu0 %1470  ;;  %1593 = vst.msk [vmem:[#allocation13 + $0x18] sm:$0xf] %vm1589_vm3, %v1473_v39  ;;  %v10999_v44 = vld [vmem:[#allocation13 + $0x4] ss:$8 sps:$4 sm:$0xff]  }
  0xae   : > { %1592 = vst.msk [vmem:[#allocation13 + $0x10] sm:$0xf] %vm1589_vm3, %v1471_v42  ;;  %2728 = vrot.lane.b32.xlu1 %v11748_v8, %s11403_s22  ;;  %9552 = vmatprep.mubr.msk.bf16.mxu0 %vm3874_vm6, %v10999_v44  ;;  %v1974_v8 = vld [vmem:[%s11543_s30 + $0x6b] sm:$0xff]  ;;  %v1975_v42 = vld [vmem:[%s11543_s30 + $0x73] sm:$0xff] }
  0xaf   : > { %2726 = vrot.lane.b32.xlu0 %v11750_v9, %s11403_s22  ;;  %3971 = vmatmul.mubr.bf16.vlgmr.msra.gmra.mrb[0].mxu0 %v10997_v43  ;;  %v10351_v9 = vpack.c.bf16 %v2881_v45, %v2881_v45  ;;  %v10228_v61 = vpack.c.bf16 %v1974_v8, %v1974_v8  ;;  %v10352_v43 = vpack.c.bf16 %v2882_v33, %v2882_v33  ;;  %v736_v44 = vld [vmem:[%s11543_s30 + $0x78] sm:$0xff]  ;;  %v735_v45 = vld [vmem:[%s11543_s30 + $0x70] sm:$0xff]  ;;  %v3211_v8 = vld [vmem:[%s11543_s30 + $0x86] sm:$0xff] }
  0xb0   : > { %v2713_v50 = vpop.permute.xlu1 %2712  ;;  %v10068_v46 = vpack.c.bf16 %v736_v44, %v736_v44  ;;  %2524 = vst.msk [vmem:[#allocation13 + $0xc4] sm:$0xf] %vm927_vm1, %v12061_v59 }
  0xb1   : > { %v2711_v51 = vpop.permute.xlu0 %2710  ;;  %2832 = vst.msk [vmem:[#allocation13 + $0x1c] sm:$0xf] %vm1258_vm2, %v2713_v50 }
  0xb2   : > { %2831 = vst.msk [vmem:[#allocation13 + $0x14] sm:$0xf] %vm1258_vm2, %v2711_v51  ;;  %1819 = vrot.lane.b32.xlu1 %v11967_v47, %s11404_s4  ;;  %v3212_v51 = vld [vmem:[%s11543_s30 + $0x8e] sm:$0xff] }
  0xb3   : > { %1817 = vrot.lane.b32.xlu0 %v11969_v49, %s11404_s4  ;;  %943 = vst.msk [vmem:[#allocation13 + $0x78] sm:$0xf] %vm927_vm1, %v10068_v46  ;;  %v10394_v60 = vpack.c.bf16 %v3212_v51, %v3212_v51  ;;  %v986_v46 = vld [vmem:[%s11543_s30 + $0x81] sm:$0xff] }
  0xb4   : > { %v1804_v58 = vpop.permute.xlu1 %1803 }
  0xb5   : > { %v1802_v30 = vpop.permute.xlu0 %1801  ;;  %1924 = vst.msk [vmem:[#allocation13 + $0x18] sm:$0xf] %vm1920_vm4, %v1804_v58  ;;  %v984_v58 = vld [vmem:[%s11543_s30 + $0x71] sm:$0xff] }
  0xb6   : > { %1923 = vst.msk [vmem:[#allocation13 + $0x10] sm:$0xf] %vm1920_vm4, %v1802_v30  ;;  %3057 = vrot.lane.b32.xlu1 %v10351_v9, %s11402_s1  ;;  %v10229_v9 = vpack.c.bf16 %v1975_v42, %v1975_v42  ;;  %v12059_v30 = vpack.c.bf16 %v2564_v56, %v2564_v56  ;;  %v10108_v63 = vpack.c.bf16 %v984_v58, %v984_v58 }
  0xb7   : > { %3055 = vrot.lane.b32.xlu0 %v10350_v54, %s11402_s1 }
  0xb8   : > { %v3042_v48 = vpop.permute.xlu1 %3041  ;;  %2525 = vst.msk [vmem:[#allocation13 + $0xcc] sm:$0xf] %vm927_vm1, %v12059_v30 }
  0xb9   : > { %v3040_v52 = vpop.permute.xlu0 %3039  ;;  %3161 = vst.msk [vmem:[#allocation13 + $0x1c] sm:$0xf] %vm1589_vm3, %v3042_v48 }
  0xba   : > { %3160 = vst.msk [vmem:[#allocation13 + $0x14] sm:$0xf] %vm1589_vm3, %v3040_v52  ;;  %2150 = vrot.lane.b32.xlu1 %v10228_v61, %s14308_s25  ;;  %v10393_v61 = vpack.c.bf16 %v3211_v8, %v3211_v8  ;;  %v10109_v52 = vpack.c.bf16 %v985_v57, %v985_v57  ;;  %v1648_v57 = vld [vmem:[%s11543_s30 + $0x92] sm:$0xff] }
  0xbb   : > { %2148 = vrot.lane.b32.xlu0 %v10227_v62, %s14308_s25 }
  0xbc   : > { %v2135_v12 = vpop.permute.xlu1 %2134 }
  0xbd   : > { %v2133_v13 = vpop.permute.xlu0 %2132  ;;  %2255 = vst.msk [vmem:[#allocation13 + $0x18] sm:$0xf] %vm2251_vm5, %v2135_v12  ;;  %v1646_v12 = vld [vmem:[%s11543_s30 + $0x82] sm:$0xff] }
  0xbe   : > { %2254 = vst.msk [vmem:[#allocation13 + $0x10] sm:$0xf] %vm2251_vm5, %v2133_v13  ;;  %3386 = vrot.lane.b32.xlu1 %v10392_v10, %s11404_s4 }
  0xbf   : > { %3384 = vrot.lane.b32.xlu0 %v10391_v11, %s11404_s4  ;;  %v1647_v11 = vld [vmem:[%s11543_s30 + $0x8a] sm:$0xff] }
  0xc0   : > { %v3371_v16 = vpop.permute.xlu1 %3370  ;;  %v10191_v23 = vpack.c.bf16 %v1647_v11, %v1647_v11 }
  0xc1   : > { %v3369_v17 = vpop.permute.xlu0 %3368  ;;  %3490 = vst.msk [vmem:[#allocation13 + $0x1c] sm:$0xf] %vm1920_vm4, %v3371_v16 }
  0xc2   : > { %3489 = vst.msk [vmem:[#allocation13 + $0x14] sm:$0xf] %vm1920_vm4, %v3369_v17  ;;  %1161 = vrot.lane.b32.xlu1 %v10107_v14, %s11403_s22 }
  0xc3   : > { %1159 = vrot.lane.b32.xlu0 %v10106_v15, %s11403_s22 }
  0xc4   : > { %v1146_v18 = vpop.permute.xlu1 %1145 }
  0xc5   : > { %v1144_v20 = vpop.permute.xlu0 %1143  ;;  %1264 = vst.msk [vmem:[#allocation13 + $0x28] sm:$0xf] %vm1258_vm2, %v1146_v18 }
  0xc6   : > { %1263 = vst.msk [vmem:[#allocation13 + $0x20] sm:$0xf] %vm1258_vm2, %v1144_v20  ;;  %1492 = vrot.lane.b32.xlu1 %v11967_v47, %s11402_s1  ;;  %v10067_v47 = vpack.c.bf16 %v735_v45, %v735_v45  ;;  %v2885_v20 = vld [vmem:[%s11543_s30 + $0x9d] sm:$0xff]  ;;  %v987_v45 = vld [vmem:[%s11543_s30 + $0x89] sm:$0xff] }
  0xc7   : > { %1490 = vrot.lane.b32.xlu0 %v11969_v49, %s11402_s1  ;;  %v10111_v8 = vpack.c.bf16 %v987_v45, %v987_v45 }
  0xc8   : > { %v1477_v24 = vpop.permute.xlu1 %1476  ;;  %v3531_v27 = vld [vmem:[#allocation13 + $0x18] sm:$0xff]  ;;  %942 = vst.msk [vmem:[#allocation13 + $0x70] sm:$0xf] %vm927_vm1, %v10067_v47 }
  0xc9   : > { %v1475_v25 = vpop.permute.xlu0 %1474  ;;  %v3530_v26 = vld [vmem:[#allocation13 + $0x10] sm:$0xff]  ;;  %1595 = vst.msk [vmem:[#allocation13 + $0x28] sm:$0xf] %vm1589_vm3, %v1477_v24  ;;  %v10190_v24 = vpack.c.bf16 %v1646_v12, %v1646_v12 }
  0xca   : > { %v11000_v28 = vld [vmem:[#allocation13 + $0x14] ss:$8 sps:$4 sm:$0xff]   ;;  %1594 = vst.msk [vmem:[#allocation13 + $0x20] sm:$0xf] %vm1589_vm3, %v1475_v25  ;;  %v9498_v31 = vcombine.low %v3530_v26, %v3531_v27  ;;  %2732 = vrot.lane.b32.xlu1 %v11793_v37, %s11403_s22  ;;  %v1976_v37 = vld [vmem:[%s11543_s30 + $0x7b] sm:$0xff] }
  0xcb   : > { %2730 = vrot.lane.b32.xlu0 %v11795_v38, %s11403_s22  ;;  %9553 = vmatprep.mubr.msk.bf16.mxu0 %vm3874_vm6, %v11000_v28  ;;  %v10353_v38 = vpack.c.bf16 %v2883_v32, %v2883_v32  ;;  %v10230_v53 = vpack.c.bf16 %v1976_v37, %v1976_v37  ;;  %v1978_v27 = vld [vmem:[%s11543_s30 + $0x8b] sm:$0xff]  ;;  %v10354_v28 = vpack.c.bf16 %v2884_v19, %v2884_v19  ;;  %v737_v32 = vld [vmem:[%s11543_s30 + $0x80] sm:$0xff]  ;;  %v3213_v37 = vld [vmem:[%s11543_s30 + $0x96] sm:$0xff] }
  0xcc   : > { %v2717_v36 = vpop.permute.xlu1 %2716  ;;  %3979 = vmatmul.mubr.bf16.gmra.mrb[4].mxu0 %v9498_v31  ;;  %v738_v31 = vld [vmem:[%s11543_s30 + $0x88] sm:$0xff]  ;;  %v10232_v42 = vpack.c.bf16 %v1978_v27, %v1978_v27  ;;  %v1980_v12 = vld [vmem:[%s11543_s30 + $0x9b] sm:$0xff] }
  0xcd   : > { %v2715_v39 = vpop.permute.xlu0 %2714  ;;  %2834 = vst.msk [vmem:[#allocation13 + $0x2c] sm:$0xf] %vm1258_vm2, %v2717_v36  ;;  %v10070_v33 = vpack.c.bf16 %v738_v31, %v738_v31  ;;  %v10234_v19 = vpack.c.bf16 %v1980_v12, %v1980_v12  ;;  %v988_v31 = vld [vmem:[%s11543_s30 + $0x91] sm:$0xff]  ;;  %v990_v12 = vld [vmem:[%s11543_s30 + $0xa1] sm:$0xff] }
  0xce   : > { %2833 = vst.msk [vmem:[#allocation13 + $0x24] sm:$0xf] %vm1258_vm2, %v2715_v39  ;;  %1823 = vrot.lane.b32.xlu1 %v12030_v34, %s11404_s4  ;;  %v3214_v39 = vld [vmem:[%s11543_s30 + $0x9e] sm:$0xff] }
  0xcf   : > { %1821 = vrot.lane.b32.xlu0 %v12032_v35, %s11404_s4  ;;  %945 = vst.msk [vmem:[#allocation13 + $0x88] sm:$0xf] %vm927_vm1, %v10070_v33  ;;  %v10396_v47 = vpack.c.bf16 %v3214_v39, %v3214_v39 }
  0xd0   : > { %v1808_v49 = vpop.permute.xlu1 %1807 }
  0xd1   : > { %v1806_v50 = vpop.permute.xlu0 %1805  ;;  %1926 = vst.msk [vmem:[#allocation13 + $0x28] sm:$0xf] %vm1920_vm4, %v1808_v49  ;;  %v10395_v49 = vpack.c.bf16 %v3213_v37, %v3213_v37 }
  0xd2   : > { %1925 = vst.msk [vmem:[#allocation13 + $0x20] sm:$0xf] %vm1920_vm4, %v1806_v50  ;;  %3061 = vrot.lane.b32.xlu1 %v10353_v38, %s11402_s1 }
  0xd3   : > { %3059 = vrot.lane.b32.xlu0 %v10352_v43, %s11402_s1 }
  0xd4   : > { %v3046_v54 = vpop.permute.xlu1 %3045 }
  0xd5   : > { %v3044_v55 = vpop.permute.xlu0 %3043  ;;  %3163 = vst.msk [vmem:[#allocation13 + $0x2c] sm:$0xf] %vm1589_vm3, %v3046_v54 }
  0xd6   : > { %3162 = vst.msk [vmem:[#allocation13 + $0x24] sm:$0xf] %vm1589_vm3, %v3044_v55  ;;  %2154 = vrot.lane.b32.xlu1 %v10230_v53, %s14308_s25  ;;  %v10110_v53 = vpack.c.bf16 %v986_v46, %v986_v46 }
  0xd7   : > { %2152 = vrot.lane.b32.xlu0 %v10229_v9, %s14308_s25 }
  0xd8   : > { %v2139_v62 = vpop.permute.xlu1 %2138 }
  0xd9   : > { %v2137_v48 = vpop.permute.xlu0 %2136  ;;  %2257 = vst.msk [vmem:[#allocation13 + $0x28] sm:$0xf] %vm2251_vm5, %v2139_v62 }
  0xda   : > { %2256 = vst.msk [vmem:[#allocation13 + $0x20] sm:$0xf] %vm2251_vm5, %v2137_v48  ;;  %3390 = vrot.lane.b32.xlu1 %v10394_v60, %s11404_s4 }
  0xdb   : > { %3388 = vrot.lane.b32.xlu0 %v10393_v61, %s11404_s4 }
  0xdc   : > { %v3375_v0 = vpop.permute.xlu1 %3374 }
  0xdd   : > { %v3373_v4 = vpop.permute.xlu0 %3372  ;;  %3492 = vst.msk [vmem:[#allocation13 + $0x2c] sm:$0xf] %vm1920_vm4, %v3375_v0  ;;  %v10192_v0 = vpack.c.bf16 %v1648_v57, %v1648_v57  ;;  %v742_v57 = vld [vmem:[%s11543_s30 + $0xa8] sm:$0xff] }
  0xde   : > { %3491 = vst.msk [vmem:[#allocation13 + $0x24] sm:$0xf] %vm1920_vm4, %v3373_v4  ;;  %1165 = vrot.lane.b32.xlu1 %v10109_v52, %s11403_s22  ;;  %v2887_v4 = vld [vmem:[%s11543_s30 + $0xad] sm:$0xff] }
  0xdf   : > { %1163 = vrot.lane.b32.xlu0 %v10108_v63, %s11403_s22  ;;  %v10193_v63 = vpack.c.bf16 %v1649_v29, %v1649_v29  ;;  %v1981_v29 = vld [vmem:[%s11543_s30 + $0xa3] sm:$0xff] }
  0xe0   : > { %v1150_v5 = vpop.permute.xlu1 %1149 }
  0xe1   : > { %v1148_v10 = vpop.permute.xlu0 %1147  ;;  %1266 = vst.msk [vmem:[#allocation13 + $0x38] sm:$0xf] %vm1258_vm2, %v1150_v5  ;;  %v2886_v5 = vld [vmem:[%s11543_s30 + $0xa5] sm:$0xff] }
  0xe2   : > { %1265 = vst.msk [vmem:[#allocation13 + $0x30] sm:$0xf] %vm1258_vm2, %v1148_v10  ;;  %1496 = vrot.lane.b32.xlu1 %v12030_v34, %s11402_s1  ;;  %v10069_v34 = vpack.c.bf16 %v737_v32, %v737_v32 }
  0xe3   : > { %1494 = vrot.lane.b32.xlu0 %v12032_v35, %s11402_s1 }
  0xe4   : > { %v1481_v13 = vpop.permute.xlu1 %1480  ;;  %v3533_v16 = vld [vmem:[#allocation13 + $0x28] sm:$0xff]  ;;  %944 = vst.msk [vmem:[#allocation13 + $0x80] sm:$0xf] %vm927_vm1, %v10069_v34 }
  0xe5   : > { %v1479_v14 = vpop.permute.xlu0 %1478  ;;  %v3532_v15 = vld [vmem:[#allocation13 + $0x20] sm:$0xff]  ;;  %1597 = vst.msk [vmem:[#allocation13 + $0x38] sm:$0xf] %vm1589_vm3, %v1481_v13 }
  0xe6   : > { %v11002_v17 = vld [vmem:[#allocation13 + $0x24] ss:$8 sps:$4 sm:$0xff]   ;;  %1596 = vst.msk [vmem:[#allocation13 + $0x30] sm:$0xf] %vm1589_vm3, %v1479_v14  ;;  %v9500_v18 = vcombine.low %v3532_v15, %v3533_v16  ;;  %2736 = vrot.lane.b32.xlu1 %v11833_v1, %s11403_s22  ;;  %v1977_v1 = vld [vmem:[%s11543_s30 + $0x83] sm:$0xff] }
  0xe7   : > { %2734 = vrot.lane.b32.xlu0 %v11835_v3, %s11403_s22  ;;  %9554 = vmatprep.mubr.msk.bf16.mxu0 %vm3874_vm6, %v11002_v17  ;;  %v10355_v3 = vpack.c.bf16 %v2885_v20, %v2885_v20  ;;  %v10231_v38 = vpack.c.bf16 %v1977_v1, %v1977_v1  ;;  %v1979_v13 = vld [vmem:[%s11543_s30 + $0x93] sm:$0xff] }
  0xe8   : > { %v2721_v25 = vpop.permute.xlu1 %2720  ;;  %3987 = vmatmul.mubr.bf16.gmra.mrb[8].mxu0 %v9500_v18  ;;  %v740_v14 = vld [vmem:[%s11543_s30 + $0x98] sm:$0xff]  ;;  %v739_v15 = vld [vmem:[%s11543_s30 + $0x90] sm:$0xff] }
  0xe9   : > { %v2719_v26 = vpop.permute.xlu0 %2718  ;;  %2836 = vst.msk [vmem:[#allocation13 + $0x3c] sm:$0xf] %vm1258_vm2, %v2721_v25  ;;  %v10072_v18 = vpack.c.bf16 %v740_v14, %v740_v14  ;;  %v10071_v20 = vpack.c.bf16 %v739_v15, %v739_v15  ;;  %v3215_v25 = vld [vmem:[%s11543_s30 + $0xa6] sm:$0xff] }
  0xea   : > { %2835 = vst.msk [vmem:[#allocation13 + $0x34] sm:$0xf] %vm1258_vm2, %v2719_v26  ;;  %1827 = vrot.lane.b32.xlu1 %v10191_v23, %s11404_s4 }
  0xeb   : > { %1825 = vrot.lane.b32.xlu0 %v10190_v24, %s11404_s4  ;;  %947 = vst.msk [vmem:[#allocation13 + $0x98] sm:$0xf] %vm927_vm1, %v10072_v18  ;;  %946 = vst.msk [vmem:[#allocation13 + $0x90] sm:$0xf] %vm927_vm1, %v10071_v20 }
  0xec   : > { %v1812_v35 = vpop.permute.xlu1 %1811 }
  0xed   : > { %v1810_v36 = vpop.permute.xlu0 %1809  ;;  %1928 = vst.msk [vmem:[#allocation13 + $0x38] sm:$0xf] %vm1920_vm4, %v1812_v35  ;;  %v10112_v35 = vpack.c.bf16 %v988_v31, %v988_v31 }
  0xee   : > { %1927 = vst.msk [vmem:[#allocation13 + $0x30] sm:$0xf] %vm1920_vm4, %v1810_v36  ;;  %3065 = vrot.lane.b32.xlu1 %v10355_v3, %s11402_s1  ;;  %v10397_v3 = vpack.c.bf16 %v3215_v25, %v3215_v25 }
  0xef   : > { %3063 = vrot.lane.b32.xlu0 %v10354_v28, %s11402_s1  ;;  %v989_v28 = vld [vmem:[%s11543_s30 + $0x99] sm:$0xff] }
  0xf0   : > { %v3050_v43 = vpop.permute.xlu1 %3049  ;;  %v10113_v34 = vpack.c.bf16 %v989_v28, %v989_v28 }
  0xf1   : > { %v3048_v44 = vpop.permute.xlu0 %3047  ;;  %3165 = vst.msk [vmem:[#allocation13 + $0x3c] sm:$0xf] %vm1589_vm3, %v3050_v43  ;;  %v1650_v43 = vld [vmem:[%s11543_s30 + $0xa2] sm:$0xff] }
  0xf2   : > { %3164 = vst.msk [vmem:[#allocation13 + $0x34] sm:$0xf] %vm1589_vm3, %v3048_v44  ;;  %2158 = vrot.lane.b32.xlu1 %v10232_v42, %s14308_s25 }
  0xf3   : > { %2156 = vrot.lane.b32.xlu0 %v10231_v38, %s14308_s25  ;;  %v1651_v38 = vld [vmem:[%s11543_s30 + $0xaa] sm:$0xff] }
  0xf4   : > { %v2143_v50 = vpop.permute.xlu1 %2142 }
  0xf5   : > { %v2141_v51 = vpop.permute.xlu0 %2140  ;;  %2259 = vst.msk [vmem:[#allocation13 + $0x38] sm:$0xf] %vm2251_vm5, %v2143_v50 }
  0xf6   : > { %2258 = vst.msk [vmem:[#allocation13 + $0x30] sm:$0xf] %vm2251_vm5, %v2141_v51  ;;  %3394 = vrot.lane.b32.xlu1 %v10396_v47, %s11404_s4  ;;  %v10195_v51 = vpack.c.bf16 %v1651_v38, %v1651_v38  ;;  %v743_v38 = vld [vmem:[%s11543_s30 + $0xb0] sm:$0xff] }
  0xf7   : > { %3392 = vrot.lane.b32.xlu0 %v10395_v49, %s11404_s4 }
  0xf8   : > { %v3379_v9 = vpop.permute.xlu1 %3378 }
  0xf9   : > { %v3377_v54 = vpop.permute.xlu0 %3376  ;;  %3494 = vst.msk [vmem:[#allocation13 + $0x3c] sm:$0xf] %vm1920_vm4, %v3379_v9  ;;  %v2888_v9 = vld [vmem:[%s11543_s30 + $0xb5] sm:$0xff] }
  0xfa   : > { %3493 = vst.msk [vmem:[#allocation13 + $0x34] sm:$0xf] %vm1920_vm4, %v3377_v54  ;;  %1169 = vrot.lane.b32.xlu1 %v10111_v8, %s11403_s22  ;;  %v10194_v8 = vpack.c.bf16 %v1650_v43, %v1650_v43 }
  0xfb   : > { %1167 = vrot.lane.b32.xlu0 %v10110_v53, %s11403_s22  ;;  %v2889_v53 = vld [vmem:[%s11543_s30 + $0xbd] sm:$0xff] }
  0xfc   : > { %v1154_v55 = vpop.permute.xlu1 %1153 }
  0xfd   : > { %v1152_v56 = vpop.permute.xlu0 %1151  ;;  %1268 = vst.msk [vmem:[#allocation13 + $0x48] sm:$0xf] %vm1258_vm2, %v1154_v55 }
  0xfe   : > { %1267 = vst.msk [vmem:[#allocation13 + $0x40] sm:$0xf] %vm1258_vm2, %v1152_v56  ;;  %1500 = vrot.lane.b32.xlu1 %v10191_v23, %s11402_s1  ;;  %v10233_v23 = vpack.c.bf16 %v1979_v13, %v1979_v13  ;;  %v1982_v56 = vld [vmem:[%s11543_s30 + $0xab] sm:$0xff] }
  0xff   : > { %1498 = vrot.lane.b32.xlu0 %v10190_v24, %s11402_s1  ;;  %v3216_v24 = vld [vmem:[%s11543_s30 + $0xae] sm:$0xff] }
 0x100   : > { %v1485_v58 = vpop.permute.xlu1 %1484  ;;  %v3535_v62 = vld [vmem:[#allocation13 + $0x38] sm:$0xff]  ;;  %v10398_v1 = vpack.c.bf16 %v3216_v24, %v3216_v24  ;;  %v1652_v24 = vld [vmem:[%s11543_s30 + $0xb2] sm:$0xff] }
 0x101   : > { %v1483_v60 = vpop.permute.xlu0 %1482  ;;  %v3534_v61 = vld [vmem:[#allocation13 + $0x30] sm:$0xff]  ;;  %1599 = vst.msk [vmem:[#allocation13 + $0x48] sm:$0xf] %vm1589_vm3, %v1485_v58 }
 0x102   : > { %v11004_v48 = vld [vmem:[#allocation13 + $0x34] ss:$8 sps:$4 sm:$0xff]   ;;  %1598 = vst.msk [vmem:[#allocation13 + $0x40] sm:$0xf] %vm1589_vm3, %v1483_v60  ;;  %v9502_v52 = vcombine.low %v3534_v61, %v3535_v62  ;;  %2740 = vrot.lane.b32.xlu1 %v11873_v40, %s11403_s22  ;;  %v10357_v40 = vpack.c.bf16 %v2887_v4, %v2887_v4  ;;  %v10074_v62 = vpack.c.bf16 %v742_v57, %v742_v57  ;;  %v3217_v4 = vld [vmem:[%s11543_s30 + $0xb6] sm:$0xff] }
 0x103   : > { %2738 = vrot.lane.b32.xlu0 %v11875_v41, %s11403_s22  ;;  %9555 = vmatprep.mubr.msk.bf16.mxu0 %vm3874_vm6, %v11004_v48  ;;  %v10356_v41 = vpack.c.bf16 %v2886_v5, %v2886_v5  ;;  %v741_v58 = vld [vmem:[%s11543_s30 + $0xa0] sm:$0xff] }
 0x104   : > { %v2725_v10 = vpop.permute.xlu1 %2724  ;;  %3995 = vmatmul.mubr.bf16.gmra.mrb[12].mxu0 %v9502_v52  ;;  %v10073_v48 = vpack.c.bf16 %v741_v58, %v741_v58  ;;  %v10236_v52 = vpack.c.bf16 %v1982_v56, %v1982_v56  ;;  %949 = vst.msk [vmem:[#allocation13 + $0xa8] sm:$0xf] %vm927_vm1, %v10074_v62 }
 0x105   : > { %v2723_v11 = vpop.permute.xlu0 %2722  ;;  %2838 = vst.msk [vmem:[#allocation13 + $0x4c] sm:$0xf] %vm1258_vm2, %v2725_v10 }
 0x106   : > { %2837 = vst.msk [vmem:[#allocation13 + $0x44] sm:$0xf] %vm1258_vm2, %v2723_v11  ;;  %1831 = vrot.lane.b32.xlu1 %v10193_v63, %s11404_s4 }
 0x107   : > { %1829 = vrot.lane.b32.xlu0 %v10192_v0, %s11404_s4  ;;  %948 = vst.msk [vmem:[#allocation13 + $0xa0] sm:$0xf] %vm927_vm1, %v10073_v48  ;;  %v1655_v48 = vld [vmem:[%s11543_s30 + $0xca] sm:$0xff] }
 0x108   : > { %v1816_v16 = vpop.permute.xlu1 %1815 }
 0x109   : > { %v1814_v17 = vpop.permute.xlu0 %1813  ;;  %1930 = vst.msk [vmem:[#allocation13 + $0x48] sm:$0xf] %vm1920_vm4, %v1816_v16  ;;  %v10114_v16 = vpack.c.bf16 %v990_v12, %v990_v12  ;;  %v2893_v12 = vld [vmem:[%s11543_s30 + $0xdd] sm:$0xff] }
 0x10a   : > { %1929 = vst.msk [vmem:[#allocation13 + $0x40] sm:$0xf] %vm1920_vm4, %v1814_v17  ;;  %3069 = vrot.lane.b32.xlu1 %v10357_v40, %s11402_s1  ;;  %v10399_v40 = vpack.c.bf16 %v3217_v4, %v3217_v4 }
 0x10b   : > { %3067 = vrot.lane.b32.xlu0 %v10356_v41, %s11402_s1  ;;  %v991_v41 = vld [vmem:[%s11543_s30 + $0xa9] sm:$0xff] }
 0x10c   : > { %v3054_v26 = vpop.permute.xlu1 %3053  ;;  %v10115_v15 = vpack.c.bf16 %v991_v41, %v991_v41 }
 0x10d   : > { %v3052_v27 = vpop.permute.xlu0 %3051  ;;  %3167 = vst.msk [vmem:[#allocation13 + $0x4c] sm:$0xf] %vm1589_vm3, %v3054_v26 }
 0x10e   : > { %3166 = vst.msk [vmem:[#allocation13 + $0x44] sm:$0xf] %vm1589_vm3, %v3052_v27  ;;  %2162 = vrot.lane.b32.xlu1 %v10234_v19, %s14308_s25 }
 0x10f   : > { %2160 = vrot.lane.b32.xlu0 %v10233_v23, %s14308_s25  ;;  %v1653_v23 = vld [vmem:[%s11543_s30 + $0xba] sm:$0xff] }
 0x110   : > { %v2147_v32 = vpop.permute.xlu1 %2146  ;;  %v10197_v31 = vpack.c.bf16 %v1653_v23, %v1653_v23 }
 0x111   : > { %v2145_v33 = vpop.permute.xlu0 %2144  ;;  %2261 = vst.msk [vmem:[#allocation13 + $0x48] sm:$0xf] %vm2251_vm5, %v2147_v32  ;;  %v10196_v32 = vpack.c.bf16 %v1652_v24, %v1652_v24 }
 0x112   : > { %2260 = vst.msk [vmem:[#allocation13 + $0x40] sm:$0xf] %vm2251_vm5, %v2145_v33  ;;  %3398 = vrot.lane.b32.xlu1 %v10398_v1, %s11404_s4  ;;  %v2891_v33 = vld [vmem:[%s11543_s30 + $0xcd] sm:$0xff] }
 0x113   : > { %3396 = vrot.lane.b32.xlu0 %v10397_v3, %s11404_s4 }
 0x114   : > { %v3383_v36 = vpop.permute.xlu1 %3382 }
 0x115   : > { %v3381_v39 = vpop.permute.xlu0 %3380  ;;  %3496 = vst.msk [vmem:[#allocation13 + $0x4c] sm:$0xf] %vm1920_vm4, %v3383_v36 }
 0x116   : > { %3495 = vst.msk [vmem:[#allocation13 + $0x44] sm:$0xf] %vm1920_vm4, %v3381_v39  ;;  %1173 = vrot.lane.b32.xlu1 %v10113_v34, %s11403_s22  ;;  %v2890_v34 = vld [vmem:[%s11543_s30 + $0xc5] sm:$0xff]  ;;  %v1984_v39 = vld [vmem:[%s11543_s30 + $0xbb] sm:$0xff] }
 0x117   : > { %1171 = vrot.lane.b32.xlu0 %v10112_v35, %s11403_s22 }
 0x118   : > { %v1158_v37 = vpop.permute.xlu1 %1157 }
 0x119   : > { %v1156_v42 = vpop.permute.xlu0 %1155  ;;  %1270 = vst.msk [vmem:[#allocation13 + $0x58] sm:$0xf] %vm1258_vm2, %v1158_v37  ;;  %v1983_v37 = vld [vmem:[%s11543_s30 + $0xb3] sm:$0xff] }
 0x11a   : > { %1269 = vst.msk [vmem:[#allocation13 + $0x50] sm:$0xf] %vm1258_vm2, %v1156_v42  ;;  %1504 = vrot.lane.b32.xlu1 %v10193_v63, %s11402_s1  ;;  %v10235_v63 = vpack.c.bf16 %v1981_v29, %v1981_v29  ;;  %v744_v42 = vld [vmem:[%s11543_s30 + $0xb8] sm:$0xff] }
 0x11b   : > { %1502 = vrot.lane.b32.xlu0 %v10192_v0, %s11402_s1  ;;  %v3218_v0 = vld [vmem:[%s11543_s30 + $0xbe] sm:$0xff] }
 0x11c   : > { %v1489_v44 = vpop.permute.xlu1 %1488  ;;  %v3537_v47 = vld [vmem:[#allocation13 + $0x48] sm:$0xff]  ;;  %v10400_v11 = vpack.c.bf16 %v3218_v0, %v3218_v0 }
 0x11d   : > { %v1487_v45 = vpop.permute.xlu0 %1486  ;;  %v3536_v46 = vld [vmem:[#allocation13 + $0x40] sm:$0xff]  ;;  %1601 = vst.msk [vmem:[#allocation13 + $0x58] sm:$0xf] %vm1589_vm3, %v1489_v44 }
 0x11e   : > { %v11006_v49 = vld [vmem:[#allocation13 + $0x44] ss:$8 sps:$4 sm:$0xff]   ;;  %1600 = vst.msk [vmem:[#allocation13 + $0x50] sm:$0xf] %vm1589_vm3, %v1487_v45  ;;  %v9504_v50 = vcombine.low %v3536_v46, %v3537_v47  ;;  %2744 = vrot.lane.b32.xlu1 %v11933_v21, %s11403_s22  ;;  %v10359_v21 = vpack.c.bf16 %v2889_v53, %v2889_v53  ;;  %v10076_v45 = vpack.c.bf16 %v744_v42, %v744_v42 }
 0x11f   : > { %2742 = vrot.lane.b32.xlu0 %v11935_v22, %s11403_s22  ;;  %9556 = vmatprep.mubr.msk.bf16.mxu0 %vm3874_vm6, %v11006_v49  ;;  %v10358_v22 = vpack.c.bf16 %v2888_v9, %v2888_v9  ;;  %v10075_v46 = vpack.c.bf16 %v743_v38, %v743_v38  ;;  %v10238_v47 = vpack.c.bf16 %v1984_v39, %v1984_v39  ;;  %v2566_v38 = vld [vmem:[%s11543_s30 + $0xec] sm:$0xff] }
 0x120   : > { %v2729_v54 = vpop.permute.xlu1 %2728  ;;  %4003 = vmatmul.mubr.bf16.gmra.mrb[16].mxu0 %v9504_v50  ;;  %v10237_v49 = vpack.c.bf16 %v1983_v37, %v1983_v37  ;;  %951 = vst.msk [vmem:[#allocation13 + $0xb8] sm:$0xf] %vm927_vm1, %v10076_v45  ;;  %v3220_v50 = vld [vmem:[%s11543_s30 + $0xce] sm:$0xff] }
 0x121   : > { %v2727_v55 = vpop.permute.xlu0 %2726  ;;  %2840 = vst.msk [vmem:[#allocation13 + $0x5c] sm:$0xf] %vm1258_vm2, %v2729_v54  ;;  %v10402_v9 = vpack.c.bf16 %v3220_v50, %v3220_v50  ;;  %v1656_v50 = vld [vmem:[%s11543_s30 + $0xd2] sm:$0xff] }
 0x122   : > { %2839 = vst.msk [vmem:[#allocation13 + $0x54] sm:$0xf] %vm1258_vm2, %v2727_v55  ;;  %1835 = vrot.lane.b32.xlu1 %v10195_v51, %s11404_s4  ;;  %v993_v55 = vld [vmem:[%s11543_s30 + $0xb9] sm:$0xff] }
 0x123   : > { %1833 = vrot.lane.b32.xlu0 %v10194_v8, %s11404_s4  ;;  %950 = vst.msk [vmem:[#allocation13 + $0xb0] sm:$0xf] %vm927_vm1, %v10075_v46  ;;  %v10117_v29 = vpack.c.bf16 %v993_v55, %v993_v55  ;;  %v10324_v46 = vpack.c.bf16 %v2566_v38, %v2566_v38 }
 0x124   : > { %v1820_v60 = vpop.permute.xlu1 %1819 }
 0x125   : > { %v1818_v61 = vpop.permute.xlu0 %1817  ;;  %1932 = vst.msk [vmem:[#allocation13 + $0x58] sm:$0xf] %vm1920_vm4, %v1820_v60 }
 0x126   : > { %1931 = vst.msk [vmem:[#allocation13 + $0x50] sm:$0xf] %vm1920_vm4, %v1818_v61  ;;  %3073 = vrot.lane.b32.xlu1 %v10359_v21, %s11402_s1  ;;  %v992_v21 = vld [vmem:[%s11543_s30 + $0xb1] sm:$0xff] }
 0x127   : > { %3071 = vrot.lane.b32.xlu0 %v10358_v22, %s11402_s1  ;;  %v10116_v57 = vpack.c.bf16 %v992_v21, %v992_v21 }
 0x128   : > { %v3058_v5 = vpop.permute.xlu1 %3057 }
 0x129   : > { %v3056_v10 = vpop.permute.xlu0 %3055  ;;  %3169 = vst.msk [vmem:[#allocation13 + $0x5c] sm:$0xf] %vm1589_vm3, %v3058_v5 }
 0x12a   : > { %3168 = vst.msk [vmem:[#allocation13 + $0x54] sm:$0xf] %vm1589_vm3, %v3056_v10  ;;  %2166 = vrot.lane.b32.xlu1 %v10236_v52, %s14308_s25  ;;  %v1654_v52 = vld [vmem:[%s11543_s30 + $0xc2] sm:$0xff] }
 0x12b   : > { %2164 = vrot.lane.b32.xlu0 %v10235_v63, %s14308_s25  ;;  %v10198_v41 = vpack.c.bf16 %v1654_v52, %v1654_v52  ;;  %v748_v52 = vld [vmem:[%s11543_s30 + $0xd8] sm:$0xff] }
 0x12c   : > { %v2151_v13 = vpop.permute.xlu1 %2150 }
 0x12d   : > { %v2149_v14 = vpop.permute.xlu0 %2148  ;;  %2263 = vst.msk [vmem:[#allocation13 + $0x58] sm:$0xf] %vm2251_vm5, %v2151_v13  ;;  %v2892_v13 = vld [vmem:[%s11543_s30 + $0xd5] sm:$0xff] }
 0x12e   : > { %2262 = vst.msk [vmem:[#allocation13 + $0x50] sm:$0xf] %vm2251_vm5, %v2149_v14  ;;  %3402 = vrot.lane.b32.xlu1 %v10400_v11, %s11404_s4 }
 0x12f   : > { %3400 = vrot.lane.b32.xlu0 %v10399_v40, %s11404_s4  ;;  %v10199_v40 = vpack.c.bf16 %v1655_v48, %v1655_v48  ;;  %v1987_v48 = vld [vmem:[%s11543_s30 + $0xd3] sm:$0xff] }
 0x130   : > { %v3387_v17 = vpop.permute.xlu1 %3386 }
 0x131   : > { %v3385_v18 = vpop.permute.xlu0 %3384  ;;  %3498 = vst.msk [vmem:[#allocation13 + $0x5c] sm:$0xf] %vm1920_vm4, %v3387_v17  ;;  %v1985_v17 = vld [vmem:[%s11543_s30 + $0xc3] sm:$0xff] }
 0x132   : > { %3497 = vst.msk [vmem:[#allocation13 + $0x54] sm:$0xf] %vm1920_vm4, %v3385_v18  ;;  %1177 = vrot.lane.b32.xlu1 %v10115_v15, %s11403_s22  ;;  %v746_v18 = vld [vmem:[%s11543_s30 + $0xc8] sm:$0xff] }
 0x133   : > { %1175 = vrot.lane.b32.xlu0 %v10114_v16, %s11403_s22  ;;  %v1986_v16 = vld [vmem:[%s11543_s30 + $0xcb] sm:$0xff]  ;;  %v10078_v24 = vpack.c.bf16 %v746_v18, %v746_v18 }
 0x134   : > { %v1162_v20 = vpop.permute.xlu1 %1161  ;;  %v2320_v18 = vld [vmem:[%s11543_s30 + $0xe4] sm:$0xff] }
 0x135   : > { %v1160_v19 = vpop.permute.xlu0 %1159  ;;  %1272 = vst.msk [vmem:[#allocation13 + $0x68] sm:$0xf] %vm1258_vm2, %v1162_v20  ;;  %v745_v20 = vld [vmem:[%s11543_s30 + $0xc0] sm:$0xff] }
 0x136   : > { %1271 = vst.msk [vmem:[#allocation13 + $0x60] sm:$0xf] %vm1258_vm2, %v1160_v19  ;;  %1508 = vrot.lane.b32.xlu1 %v10195_v51, %s11402_s1  ;;  %v3219_v51 = vld [vmem:[%s11543_s30 + $0xc6] sm:$0xff] }
 0x137   : > { %1506 = vrot.lane.b32.xlu0 %v10194_v8, %s11402_s1  ;;  %v10401_v54 = vpack.c.bf16 %v3219_v51, %v3219_v51  ;;  %953 = vst.msk [vmem:[#allocation13 + $0xc8] sm:$0xf] %vm927_vm1, %v10078_v24  ;;  %v10284_v24 = vpack.c.bf16 %v2320_v18, %v2320_v18 }
 0x138   : > { %v1493_v25 = vpop.permute.xlu1 %1492  ;;  %v3539_v1 = vld [vmem:[#allocation13 + $0x58] sm:$0xff] }
 0x139   : > { %v1491_v26 = vpop.permute.xlu0 %1490  ;;  %v3538_v27 = vld [vmem:[#allocation13 + $0x50] sm:$0xff]  ;;  %1603 = vst.msk [vmem:[#allocation13 + $0x68] sm:$0xf] %vm1589_vm3, %v1493_v25  ;;  %v10077_v25 = vpack.c.bf16 %v745_v20, %v745_v20 }
 0x13a   : > { %v11008_v3 = vld [vmem:[#allocation13 + $0x54] ss:$8 sps:$4 sm:$0xff]   ;;  %1602 = vst.msk [vmem:[#allocation13 + $0x60] sm:$0xf] %vm1589_vm3, %v1491_v26  ;;  %v9506_v28 = vcombine.low %v3538_v27, %v3539_v1  ;;  %2748 = vrot.lane.b32.xlu1 %v11996_v6, %s11403_s22  ;;  %v10361_v6 = vpack.c.bf16 %v2891_v33, %v2891_v33  ;;  %v10240_v26 = vpack.c.bf16 %v1986_v16, %v1986_v16  ;;  %v996_v16 = vld [vmem:[%s11543_s30 + $0xd1] sm:$0xff] }
 0x13b   : > { %2746 = vrot.lane.b32.xlu0 %v11998_v7, %s11403_s22  ;;  %9557 = vmatprep.mubr.msk.bf16.mxu0 %vm3874_vm6, %v11008_v3  ;;  %v10360_v7 = vpack.c.bf16 %v2890_v34, %v2890_v34  ;;  %v10239_v27 = vpack.c.bf16 %v1985_v17, %v1985_v17  ;;  %952 = vst.msk [vmem:[#allocation13 + $0xc0] sm:$0xf] %vm927_vm1, %v10077_v25  ;;  %v3222_v1 = vld [vmem:[%s11543_s30 + $0xde] sm:$0xff]  ;;  %v3221_v3 = vld [vmem:[%s11543_s30 + $0xd6] sm:$0xff]  ;;  %v995_v34 = vld [vmem:[%s11543_s30 + $0xc9] sm:$0xff] }
 0x13c   : > { %v2733_v35 = vpop.permute.xlu1 %2732  ;;  %4011 = vmatmul.mubr.bf16.gmra.mrb[20].mxu0 %v9506_v28  ;;  %v10403_v33 = vpack.c.bf16 %v3221_v3, %v3221_v3  ;;  %v2321_v17 = vld [vmem:[%s11543_s30 + $0xec] sm:$0xff]  ;;  %v12354_v25 = vld [vmem:[%s14292_s8] ss:$0 sm:$0xff]  ;;  %2526 = vst.msk [vmem:[#allocation13 + $0xd4] sm:$0xf] %vm927_vm1, %v10284_v24 }
 0x13d   : > { %v2731_v36 = vpop.permute.xlu0 %2730  ;;  %2842 = vst.msk [vmem:[#allocation13 + $0x6c] sm:$0xf] %vm1258_vm2, %v2733_v35  ;;  %v994_v35 = vld [vmem:[%s11543_s30 + $0xc1] sm:$0xff] }
 0x13e   : > { %2841 = vst.msk [vmem:[#allocation13 + $0x64] sm:$0xf] %vm1258_vm2, %v2731_v36  ;;  %1839 = vrot.lane.b32.xlu1 %v10197_v31, %s11404_s4  ;;  %v10118_v39 = vpack.c.bf16 %v994_v35, %v994_v35 }
 0x13f   : > { %1837 = vrot.lane.b32.xlu0 %v10196_v32, %s11404_s4 }
 0x140   : > { %v1824_v43 = vpop.permute.xlu1 %1823 }
 0x141   : > { %v1822_v44 = vpop.permute.xlu0 %1821  ;;  %1934 = vst.msk [vmem:[#allocation13 + $0x68] sm:$0xf] %vm1920_vm4, %v1824_v43  ;;  %v2565_v43 = vld [vmem:[%s11543_s30 + $0xe4] sm:$0xff] }
 0x142   : > { %1933 = vst.msk [vmem:[#allocation13 + $0x60] sm:$0xf] %vm1920_vm4, %v1822_v44  ;;  %3077 = vrot.lane.b32.xlu1 %v10361_v6, %s11402_s1 }
 0x143   : > { %3075 = vrot.lane.b32.xlu0 %v10360_v7, %s11402_s1  ;;  %v10119_v7 = vpack.c.bf16 %v995_v34, %v995_v34 }
 0x144   : > { %v3062_v8 = vpop.permute.xlu1 %3061 }
 0x145   : > { %v3060_v53 = vpop.permute.xlu0 %3059  ;;  %3171 = vst.msk [vmem:[#allocation13 + $0x6c] sm:$0xf] %vm1589_vm3, %v3062_v8 }
 0x146   : > { %3170 = vst.msk [vmem:[#allocation13 + $0x64] sm:$0xf] %vm1589_vm3, %v3060_v53  ;;  %2170 = vrot.lane.b32.xlu1 %v10238_v47, %s14308_s25  ;;  %v10323_v47 = vpack.c.bf16 %v2565_v43, %v2565_v43 }
 0x147   : > { %2168 = vrot.lane.b32.xlu0 %v10237_v49, %s14308_s25  ;;  %v1657_v49 = vld [vmem:[%s11543_s30 + $0xda] sm:$0xff] }
 0x148   : > { %v2155_v22 = vpop.permute.xlu1 %2154  ;;  %v12316_v21 = vpack.c.bf16 %v1657_v49, %v1657_v49 }
 0x149   : > { %v2153_v56 = vpop.permute.xlu0 %2152  ;;  %2265 = vst.msk [vmem:[#allocation13 + $0x68] sm:$0xf] %vm2251_vm5, %v2155_v22  ;;  %v12318_v22 = vpack.c.bf16 %v1656_v50, %v1656_v50 }
 0x14a   : > { %2264 = vst.msk [vmem:[#allocation13 + $0x60] sm:$0xf] %vm2251_vm5, %v2153_v56  ;;  %3406 = vrot.lane.b32.xlu1 %v10402_v9, %s11404_s4  ;;  %v2895_v56 = vld [vmem:[%s11543_s30 + $0xed] sm:$0xff] }
 0x14b   : > { %3404 = vrot.lane.b32.xlu0 %v10401_v54, %s11404_s4 }
 0x14c   : > { %v3391_v58 = vpop.permute.xlu1 %3390 }
 0x14d   : > { %v3389_v60 = vpop.permute.xlu0 %3388  ;;  %3500 = vst.msk [vmem:[#allocation13 + $0x6c] sm:$0xf] %vm1920_vm4, %v3391_v58 }
 0x14e   : > { %3499 = vst.msk [vmem:[#allocation13 + $0x64] sm:$0xf] %vm1920_vm4, %v3389_v60  ;;  %1181 = vrot.lane.b32.xlu1 %v10117_v29, %s11403_s22  ;;  %v2894_v29 = vld [vmem:[%s11543_s30 + $0xe5] sm:$0xff]  ;;  %v10365_v60 = vpack.c.bf16 %v2895_v56, %v2895_v56 }
 0x14f   : > { %1179 = vrot.lane.b32.xlu0 %v10116_v57, %s11403_s22 }
 0x150   : > { %v1166_v61 = vpop.permute.xlu1 %1165 }
 0x151   : > { %v1164_v62 = vpop.permute.xlu0 %1163  ;;  %1274 = vst.msk [vmem:[#allocation13 + $0x78] sm:$0xf] %vm1258_vm2, %v1166_v61  ;;  %v10364_v61 = vpack.c.bf16 %v2894_v29, %v2894_v29 }
 0x152   : > { %1273 = vst.msk [vmem:[#allocation13 + $0x70] sm:$0xf] %vm1258_vm2, %v1164_v62  ;;  %1512 = vrot.lane.b32.xlu1 %v10197_v31, %s11402_s1  ;;  %v1988_v62 = vld [vmem:[%s11543_s30 + $0xdb] sm:$0xff] }
 0x153   : > { %1510 = vrot.lane.b32.xlu0 %v10196_v32, %s11402_s1  ;;  %v10404_v32 = vpack.c.bf16 %v3222_v1, %v3222_v1 }
 0x154   : > { %v1497_v63 = vpop.permute.xlu1 %1496  ;;  %v3541_v5 = vld [vmem:[#allocation13 + $0x68] sm:$0xff] }
 0x155   : > { %v1495_v0 = vpop.permute.xlu0 %1494  ;;  %v3540_v4 = vld [vmem:[#allocation13 + $0x60] sm:$0xff]  ;;  %1605 = vst.msk [vmem:[#allocation13 + $0x78] sm:$0xf] %vm1589_vm3, %v1497_v63 }
 0x156   : > { %v11010_v10 = vld [vmem:[#allocation13 + $0x64] ss:$8 sps:$4 sm:$0xff]   ;;  %1604 = vst.msk [vmem:[#allocation13 + $0x70] sm:$0xf] %vm1589_vm3, %v1495_v0  ;;  %v9508_v11 = vcombine.low %v3540_v4, %v3541_v5  ;;  %2752 = vrot.lane.b32.xlu1 %v12059_v30, %s11403_s22  ;;  %v10363_v30 = vpack.c.bf16 %v2893_v12, %v2893_v12  ;;  %v10080_v5 = vpack.c.bf16 %v748_v52, %v748_v52  ;;  %v3223_v12 = vld [vmem:[%s11543_s30 + $0xe6] sm:$0xff] }
 0x157   : > { %2750 = vrot.lane.b32.xlu0 %v12061_v59, %s11403_s22  ;;  %9558 = vmatprep.mubr.msk.bf16.mxu0 %vm3874_vm6, %v11010_v10  ;;  %v10362_v59 = vpack.c.bf16 %v2892_v13, %v2892_v13  ;;  %v747_v63 = vld [vmem:[%s11543_s30 + $0xd0] sm:$0xff] }
 0x158   : > { %v2737_v14 = vpop.permute.xlu1 %2736  ;;  %4019 = vmatmul.mubr.bf16.gmra.mrb[24].mxu0 %v9508_v11  ;;  %v10079_v10 = vpack.c.bf16 %v747_v63, %v747_v63  ;;  %v10242_v11 = vpack.c.bf16 %v1988_v62, %v1988_v62  ;;  %955 = vst.msk [vmem:[#allocation13 + $0xd8] sm:$0xf] %vm927_vm1, %v10080_v5  ;;  %v749_v62 = vld [vmem:[%s11543_s30 + $0xe0] sm:$0xff] }
 0x159   : > { %v2735_v15 = vpop.permute.xlu0 %2734  ;;  %2844 = vst.msk [vmem:[#allocation13 + $0x7c] sm:$0xf] %vm1258_vm2, %v2737_v14 }
 0x15a   : > { %2843 = vst.msk [vmem:[#allocation13 + $0x74] sm:$0xf] %vm1258_vm2, %v2735_v15  ;;  %1843 = vrot.lane.b32.xlu1 %v10199_v40, %s11404_s4 }
 0x15b   : > { %1841 = vrot.lane.b32.xlu0 %v10198_v41, %s11404_s4  ;;  %954 = vst.msk [vmem:[#allocation13 + $0xd0] sm:$0xf] %vm927_vm1, %v10079_v10  ;;  %v3226_v10 = vld [vmem:[%s11543_s30 + $0xfe] sm:$0xff] }
 0x15c   : > { %v1828_v19 = vpop.permute.xlu1 %1827 }
 0x15d   : > { %v1826_v23 = vpop.permute.xlu0 %1825  ;;  %1936 = vst.msk [vmem:[#allocation13 + $0x78] sm:$0xf] %vm1920_vm4, %v1828_v19 }
 0x15e   : > { %1935 = vst.msk [vmem:[#allocation13 + $0x70] sm:$0xf] %vm1920_vm4, %v1826_v23  ;;  %3081 = vrot.lane.b32.xlu1 %v10363_v30, %s11402_s1  ;;  %v10405_v30 = vpack.c.bf16 %v3223_v12, %v3223_v12  ;;  %v10285_v23 = vpack.c.bf16 %v2321_v17, %v2321_v17  ;;  %v10408_v12 = vpack.c.bf16 %v3226_v10, %v3226_v10 }
 0x15f   : > { %3079 = vrot.lane.b32.xlu0 %v10362_v59, %s11402_s1  ;;  %v997_v59 = vld [vmem:[%s11543_s30 + $0xd9] sm:$0xff] }
 0x160   : > { %v3066_v28 = vpop.permute.xlu1 %3065  ;;  %2527 = vst.msk [vmem:[#allocation13 + $0xdc] sm:$0xf] %vm927_vm1, %v10285_v23 }
 0x161   : > { %v3064_v31 = vpop.permute.xlu0 %3063  ;;  %3173 = vst.msk [vmem:[#allocation13 + $0x7c] sm:$0xf] %vm1589_vm3, %v3066_v28 }
 0x162   : > { %3172 = vst.msk [vmem:[#allocation13 + $0x74] sm:$0xf] %vm1589_vm3, %v3064_v31  ;;  %2174 = vrot.lane.b32.xlu1 %v10240_v26, %s14308_s25  ;;  %v10121_v26 = vpack.c.bf16 %v997_v59, %v997_v59  ;;  %v2322_v59 = vld [vmem:[%s11543_s30 + $0xf4] sm:$0xff] }
 0x163   : > { %2172 = vrot.lane.b32.xlu0 %v10239_v27, %s14308_s25  ;;  %v10120_v27 = vpack.c.bf16 %v996_v16, %v996_v16 }
 0x164   : > { %v2159_v36 = vpop.permute.xlu1 %2158 }
 0x165   : > { %v2157_v6 = vpop.permute.xlu0 %2156  ;;  %2267 = vst.msk [vmem:[#allocation13 + $0x78] sm:$0xf] %vm2251_vm5, %v2159_v36 }
 0x166   : > { %2266 = vst.msk [vmem:[#allocation13 + $0x70] sm:$0xf] %vm2251_vm5, %v2157_v6  ;;  %3410 = vrot.lane.b32.xlu1 %v10404_v32, %s11404_s4  ;;  %v2568_v6 = vld [vmem:[%s11543_s30 + $0xfc] sm:$0xff] }
 0x167   : > { %3408 = vrot.lane.b32.xlu0 %v10403_v33, %s11404_s4  ;;  %v10326_v38 = vpack.c.bf16 %v2568_v6, %v2568_v6 }
 0x168   : > { %v3395_v37 = vpop.permute.xlu1 %3394 }
 0x169   : > { %v3393_v42 = vpop.permute.xlu0 %3392  ;;  %3502 = vst.msk [vmem:[#allocation13 + $0x7c] sm:$0xf] %vm1920_vm4, %v3395_v37 }
 0x16a   : > { %3501 = vst.msk [vmem:[#allocation13 + $0x74] sm:$0xf] %vm1920_vm4, %v3393_v42  ;;  %1185 = vrot.lane.b32.xlu1 %v10119_v7, %s11403_s22  ;;  %v2567_v7 = vld [vmem:[%s11543_s30 + $0xf4] sm:$0xff] }
 0x16b   : > { %1183 = vrot.lane.b32.xlu0 %v10118_v39, %s11403_s22  ;;  %v10325_v43 = vpack.c.bf16 %v2567_v7, %v2567_v7 }
 0x16c   : > { %v1170_v44 = vpop.permute.xlu1 %1169 }
 0x16d   : > { %v1168_v45 = vpop.permute.xlu0 %1167  ;;  %1276 = vst.msk [vmem:[#allocation13 + $0x88] sm:$0xf] %vm1258_vm2, %v1170_v44  ;;  %v1659_v44 = vld [vmem:[%s11543_s30 + $0xea] sm:$0xff] }
 0x16e   : > { %1275 = vst.msk [vmem:[#allocation13 + $0x80] sm:$0xf] %vm1258_vm2, %v1168_v45  ;;  %1516 = vrot.lane.b32.xlu1 %v10199_v40, %s11402_s1  ;;  %v10241_v40 = vpack.c.bf16 %v1987_v48, %v1987_v48  ;;  %v1658_v45 = vld [vmem:[%s11543_s30 + $0xe2] sm:$0xff] }
 0x16f   : > { %1514 = vrot.lane.b32.xlu0 %v10198_v41, %s11402_s1  ;;  %v3224_v41 = vld [vmem:[%s11543_s30 + $0xee] sm:$0xff] }
 0x170   : > { %v1501_v51 = vpop.permute.xlu1 %1500  ;;  %v3543_v9 = vld [vmem:[#allocation13 + $0x78] sm:$0xff]  ;;  %v10406_v15 = vpack.c.bf16 %v3224_v41, %v3224_v41 }
 0x171   : > { %v1499_v8 = vpop.permute.xlu0 %1498  ;;  %v3542_v53 = vld [vmem:[#allocation13 + $0x70] sm:$0xff]  ;;  %1607 = vst.msk [vmem:[#allocation13 + $0x88] sm:$0xf] %vm1589_vm3, %v1501_v51 }
 0x172   : > { %v11012_v54 = vld [vmem:[#allocation13 + $0x74] ss:$8 sps:$4 sm:$0xff]   ;;  %1606 = vst.msk [vmem:[#allocation13 + $0x80] sm:$0xf] %vm1589_vm3, %v1499_v8  ;;  %v9510_v55 = vcombine.low %v3542_v53, %v3543_v9  ;;  %2756 = vrot.lane.b32.xlu1 %v10324_v46, %s11403_s22  ;;  %v11406_v53 = vmov 0.0   ;;  %v12404_v9 = vpack.c.bf16 %v1659_v44, %v1659_v44 }
 0x173   : > { %2754 = vrot.lane.b32.xlu0 %v10323_v47, %s11403_s22  ;;  %9559 = vmatprep.mubr.msk.bf16.mxu0 %vm3874_vm6, %v11012_v54  ;;  %655 = vst.msk [vmem:[#allocation2 + $0xb] sm:$0xff] %vm654_vm7, %v11406_v53  ;;  %666 = vst.msk [vmem:[#allocation2 + $0x64] sm:$0xff] %vm654_vm7, %v11406_v53  ;;  %v12406_v54 = vpack.c.bf16 %v1658_v45, %v1658_v45 }
 0x174   : > { %v2741_v57 = vpop.permute.xlu1 %2740  ;;  %4027 = vmatmul.mubr.bf16.gmra.mrb[28].mxu0 %v9510_v55  ;;  %10872 = vmatprep.subr.bf16.mxu1 %v11406_v53  ;;  %675 = vst [vmem:[#allocation4 + $0x5] sm:$0x1f] %v11406_v53  ;;  %676 = vst [vmem:[#allocation4 + $0xc] sm:$0x3] %v11406_v53  ;;  %v2897_v55 = vld [vmem:[%s11543_s30 + $0xfd] sm:$0xff] }
 0x175   : > { %v2739_v58 = vpop.permute.xlu0 %2738  ;;  %2846 = vst.msk [vmem:[#allocation13 + $0x8c] sm:$0xf] %vm1258_vm2, %v2741_v57  ;;  %677 = vst [vmem:[#allocation4 + $0x10] sm:$0x1f] %v11406_v53  ;;  %v10367_v29 = vpack.c.bf16 %v2897_v55, %v2897_v55  ;;  %10876 = vmatprep.mubr.msk.bf16.mxu1 %vm11407_vm10, %v11406_v53 }
 0x176   : > { %2845 = vst.msk [vmem:[#allocation13 + $0x84] sm:$0xf] %vm1258_vm2, %v2739_v58  ;;  %1847 = vrot.lane.b32.xlu1 %v12316_v21, %s11404_s4  ;;  %v1990_v58 = vld [vmem:[%s11543_s30 + $0xeb] sm:$0xff] }
 0x177   : > { %1845 = vrot.lane.b32.xlu0 %v12318_v22, %s11404_s4  ;;  %659 = vst.msk [vmem:[#allocation2 + $0x1e] sm:$0x3] %vm658_vm8, %v11406_v53  ;;  %660 = vst.msk [vmem:[#allocation2 + $0x28] sm:$0x3] %vm658_vm8, %v11406_v53 }
 0x178   : > { %v1832_v0 = vpop.permute.xlu1 %1831  ;;  %661 = vst.msk [vmem:[#allocation2 + $0x32] sm:$0x3] %vm658_vm8, %v11406_v53  ;;  %662 = vst.msk [vmem:[#allocation2 + $0x3c] sm:$0x3] %vm658_vm8, %v11406_v53 }
 0x179   : > { %v1830_v4 = vpop.permute.xlu0 %1829  ;;  %1938 = vst.msk [vmem:[#allocation13 + $0x88] sm:$0xf] %vm1920_vm4, %v1832_v0  ;;  %v10081_v0 = vpack.c.bf16 %v749_v62, %v749_v62 }
 0x17a   : > { %1937 = vst.msk [vmem:[#allocation13 + $0x80] sm:$0xf] %vm1920_vm4, %v1830_v4  ;;  %3085 = vrot.lane.b32.xlu1 %v10365_v60, %s11402_s1  ;;  %v1989_v60 = vld [vmem:[%s11543_s30 + $0xe3] sm:$0xff]  ;;  %v10244_v4 = vpack.c.bf16 %v1990_v58, %v1990_v58  ;;  %v751_v58 = vld [vmem:[%s11543_s30 + $0xf0] sm:$0xff] }
 0x17b   : > { %3083 = vrot.lane.b32.xlu0 %v10364_v61, %s11402_s1  ;;  %663 = vst.msk [vmem:[#allocation2 + $0x46] sm:$0x3] %vm658_vm8, %v11406_v53  ;;  %664 = vst.msk [vmem:[#allocation2 + $0x50] sm:$0x3] %vm658_vm8, %v11406_v53  ;;  %v750_v61 = vld [vmem:[%s11543_s30 + $0xe8] sm:$0xff]  ;;  %v10243_v5 = vpack.c.bf16 %v1989_v60, %v1989_v60 }
 0x17c   : > { %v3070_v13 = vpop.permute.xlu1 %3069  ;;  %665 = vst.msk [vmem:[#allocation2 + $0x5a] sm:$0x3] %vm658_vm8, %v11406_v53  ;;  %v10082_v63 = vpack.c.bf16 %v750_v61, %v750_v61 }
 0x17d   : > { %v3068_v14 = vpop.permute.xlu0 %3067  ;;  %3175 = vst.msk [vmem:[#allocation13 + $0x8c] sm:$0xf] %vm1589_vm3, %v3070_v13 }
 0x17e   : > { %3174 = vst.msk [vmem:[#allocation13 + $0x84] sm:$0xf] %vm1589_vm3, %v3068_v14  ;;  %2178 = vrot.lane.b32.xlu1 %v10242_v11, %s14308_s25  ;;  %v3225_v11 = vld [vmem:[%s11543_s30 + $0xf6] sm:$0xff]  ;;  %v999_v14 = vld [vmem:[%s11543_s30 + $0xe9] sm:$0xff] }
 0x17f   : > { %2176 = vrot.lane.b32.xlu0 %v10241_v40, %s14308_s25  ;;  %657 = vst.msk [vmem:[#allocation2 + $0x13] sm:$0x7] %vm656_vm9, %v11406_v53  ;;  %667 = vst.msk [vmem:[#allocation2 + $0x6c] sm:$0x7] %vm656_vm9, %v11406_v53  ;;  %v10407_v13 = vpack.c.bf16 %v3225_v11, %v3225_v11  ;;  %vm4563_vm9 = vcmask 517376  }
 0x180   : > { %v2163_v20 = vpop.permute.xlu1 %2162  ;;  %957 = vst.msk [vmem:[#allocation13 + $0xe8] sm:$0xf] %vm927_vm1, %v10082_v63  ;;  %956 = vst.msk [vmem:[#allocation13 + $0xe0] sm:$0xf] %vm927_vm1, %v10081_v0  ;;  %v3228_v0 = vld [vmem:[%s11543_s30 + $0x10e] sm:$0xff] }
 0x181   : > { %v2161_v19 = vpop.permute.xlu0 %2160  ;;  %2269 = vst.msk [vmem:[#allocation13 + $0x88] sm:$0xf] %vm2251_vm5, %v2163_v20  ;;  %v10286_v20 = vpack.c.bf16 %v2322_v59, %v2322_v59  ;;  %v10410_v11 = vpack.c.bf16 %v3228_v0, %v3228_v0  ;;  %v3230_v0 = vld [vmem:[%s11543_s30 + $0x11e] sm:$0xff] }
 0x182   : > { %2268 = vst.msk [vmem:[#allocation13 + $0x80] sm:$0xf] %vm2251_vm5, %v2161_v19  ;;  %3414 = vrot.lane.b32.xlu1 %v10406_v15, %s11404_s4  ;;  %v3972_v1 = vpop.f32.mrb[0].mxu0  ;;  %v998_v15 = vld [vmem:[%s11543_s30 + $0xe1] sm:$0xff]  ;;  %v10123_v19 = vpack.c.bf16 %v999_v14, %v999_v14 }
 0x183   : > { %3412 = vrot.lane.b32.xlu0 %v10405_v30, %s11404_s4  ;;  %v3973_v3 = vadd.f32 %v12354_v25, %v3972_v1  ;;  %v3974_v32 = vpop.f32.mrb[1].mxu0  ;;  %v2323_v30 = vld [vmem:[%s11543_s30 + $0xfc] sm:$0xff]  ;;  %v10122_v23 = vpack.c.bf16 %v998_v15, %v998_v15  ;;  %2528 = vst.msk [vmem:[#allocation13 + $0xe4] sm:$0xf] %vm927_vm1, %v10286_v20  ;;  %v2324_v14 = vld [vmem:[%s11543_s30 + $0x104] sm:$0xff] }
 0x184   : > { %v3399_v28 = vpop.permute.xlu1 %3398  ;;  %v3975_v34 = vpop.f32.mrb[2].mxu0  ;;  %v10287_v18 = vpack.c.bf16 %v2323_v30, %v2323_v30 }
 0x185   : > { %v3397_v31 = vpop.permute.xlu0 %3396  ;;  %3504 = vst.msk [vmem:[#allocation13 + $0x8c] sm:$0xf] %vm1920_vm4, %v3399_v28  ;;  %v4138_v33 = vmax.f32 %v3973_v3, 0.0  ;;  %v3976_v35 = vadd.f32 %v12354_v25, %v3975_v34  ;;  %v3977_v36 = vpop.f32.mrb[3].mxu0  ;;  %v2570_v34 = vld [vmem:[%s11543_s30 + $0x10c] sm:$0xff] }
 0x186   : > { %3503 = vst.msk [vmem:[#allocation13 + $0x84] sm:$0xf] %vm1920_vm4, %v3397_v31  ;;  %1189 = vrot.lane.b32.xlu1 %v10121_v26, %s11403_s22 }
 0x187   : > { %1187 = vrot.lane.b32.xlu0 %v10120_v27, %s11403_s22  ;;  %4179 = vst.msk [vmem:[#allocation6] sm:$0xff] %vm654_vm7, %v4138_v33  ;;  %v4139_v42 = vmax.f32 %v3976_v35, 0.0  ;;  %v2569_v35 = vld [vmem:[%s11543_s30 + $0x104] sm:$0xff] }
 0x188   : > { %v1174_v39 = vpop.permute.xlu1 %1173  ;;  %2529 = vst.msk [vmem:[#allocation13 + $0xec] sm:$0xf] %vm927_vm1, %v10287_v18 }
 0x189   : > { %v1172_v37 = vpop.permute.xlu0 %1171  ;;  %1278 = vst.msk [vmem:[#allocation13 + $0x98] sm:$0xf] %vm1258_vm2, %v1174_v39  ;;  %v10328_v39 = vpack.c.bf16 %v2570_v34, %v2570_v34 }
 0x18a   : > { %1277 = vst.msk [vmem:[#allocation13 + $0x90] sm:$0xf] %vm1258_vm2, %v1172_v37  ;;  %1520 = vrot.lane.b32.xlu1 %v12316_v21, %s11402_s1  ;;  %v2896_v21 = vld [vmem:[%s11543_s30 + $0xf5] sm:$0xff]  ;;  %v10327_v37 = vpack.c.bf16 %v2569_v35, %v2569_v35 }
 0x18b   : > { %1518 = vrot.lane.b32.xlu0 %v12318_v22, %s11402_s1  ;;  %4180 = vst.msk [vmem:[#allocation6 + $0x8] sm:$0xff] %vm654_vm7, %v4139_v42  ;;  %v10366_v57 = vpack.c.bf16 %v2896_v21, %v2896_v21  ;;  %v1661_v42 = vld [vmem:[%s11543_s30 + $0xfa] sm:$0xff] }
 0x18c   : > { %v1505_v46 = vpop.permute.xlu1 %1504  ;;  %v3545_v50 = vld [vmem:[#allocation13 + $0x88] sm:$0xff] }
 0x18d   : > { %v1503_v47 = vpop.permute.xlu0 %1502  ;;  %v3544_v49 = vld [vmem:[#allocation13 + $0x80] sm:$0xff]  ;;  %1609 = vst.msk [vmem:[#allocation13 + $0x98] sm:$0xf] %vm1589_vm3, %v1505_v46 }
 0x18e   : > { %v11014_v51 = vld [vmem:[#allocation13 + $0x84] ss:$8 sps:$4 sm:$0xff]   ;;  %1608 = vst.msk [vmem:[#allocation13 + $0x90] sm:$0xf] %vm1589_vm3, %v1503_v47  ;;  %v9512_v8 = vcombine.low %v3544_v49, %v3545_v50  ;;  %2760 = vrot.lane.b32.xlu1 %v10326_v38, %s11403_s22  ;;  %v12467_v50 = vpack.c.bf16 %v1661_v42, %v1661_v42 }
 0x18f   : > { %2758 = vrot.lane.b32.xlu0 %v10325_v43, %s11403_s22  ;;  %9560 = vmatprep.mubr.msk.bf16.mxu0 %vm3874_vm6, %v11014_v51  ;;  %v1660_v38 = vld [vmem:[%s11543_s30 + $0xf2] sm:$0xff] }
 0x190   : > { %v2745_v22 = vpop.permute.xlu1 %2744  ;;  %4035 = vmatmul.mubr.bf16.gmra.mrb[32].mxu0 %v9512_v8  ;;  %v12469_v51 = vpack.c.bf16 %v1660_v38, %v1660_v38  ;;  %v2899_v8 = vld [vmem:[%s11543_s30 + $0x10d] sm:$0xff] }
 0x191   : > { %v2743_v56 = vpop.permute.xlu0 %2742  ;;  %2848 = vst.msk [vmem:[#allocation13 + $0x9c] sm:$0xf] %vm1258_vm2, %v2745_v22  ;;  %v10369_v21 = vpack.c.bf16 %v2899_v8, %v2899_v8  ;;  %v2900_v8 = vld [vmem:[%s11543_s30 + $0x115] sm:$0xff] }
 0x192   : > { %2847 = vst.msk [vmem:[#allocation13 + $0x94] sm:$0xf] %vm1258_vm2, %v2743_v56  ;;  %1851 = vrot.lane.b32.xlu1 %v12404_v9, %s11404_s4  ;;  %v1992_v56 = vld [vmem:[%s11543_s30 + $0xfb] sm:$0xff] }
 0x193   : > { %1849 = vrot.lane.b32.xlu0 %v12406_v54, %s11404_s4 }
 0x194   : > { %v1836_v48 = vpop.permute.xlu1 %1835 }
 0x195   : > { %v1834_v52 = vpop.permute.xlu0 %1833  ;;  %1940 = vst.msk [vmem:[#allocation13 + $0x98] sm:$0xf] %vm1920_vm4, %v1836_v48  ;;  %v10083_v48 = vpack.c.bf16 %v751_v58, %v751_v58  ;;  %v753_v58 = vld [vmem:[%s11543_s30 + $0x100] sm:$0xff] }
 0x196   : > { %1939 = vst.msk [vmem:[#allocation13 + $0x90] sm:$0xf] %vm1920_vm4, %v1834_v52  ;;  %3089 = vrot.lane.b32.xlu1 %v10367_v29, %s11402_s1  ;;  %v1991_v29 = vld [vmem:[%s11543_s30 + $0xf3] sm:$0xff]  ;;  %v10246_v52 = vpack.c.bf16 %v1992_v56, %v1992_v56  ;;  %v1994_v56 = vld [vmem:[%s11543_s30 + $0x10b] sm:$0xff] }
 0x197   : > { %3087 = vrot.lane.b32.xlu0 %v10366_v57, %s11402_s1  ;;  %v752_v57 = vld [vmem:[%s11543_s30 + $0xf8] sm:$0xff]  ;;  %v10245_v63 = vpack.c.bf16 %v1991_v29, %v1991_v29  ;;  %958 = vst.msk [vmem:[#allocation13 + $0xf0] sm:$0xf] %vm927_vm1, %v10083_v48  ;;  %v1993_v29 = vld [vmem:[%s11543_s30 + $0x103] sm:$0xff]  ;;  %v10085_v48 = vpack.c.bf16 %v753_v58, %v753_v58 }
 0x198   : > { %v3074_v40 = vpop.permute.xlu1 %3073  ;;  %v10084_v62 = vpack.c.bf16 %v752_v57, %v752_v57  ;;  %v754_v57 = vld [vmem:[%s11543_s30 + $0x108] sm:$0xff]  ;;  %v1995_v58 = vld [vmem:[%s11543_s30 + $0x113] sm:$0xff] }
 0x199   : > { %v3072_v41 = vpop.permute.xlu0 %3071  ;;  %3177 = vst.msk [vmem:[#allocation13 + $0x9c] sm:$0xf] %vm1589_vm3, %v3074_v40 }
 0x19a   : > { %3176 = vst.msk [vmem:[#allocation13 + $0x94] sm:$0xf] %vm1589_vm3, %v3072_v41  ;;  %2182 = vrot.lane.b32.xlu1 %v10244_v4, %s14308_s25  ;;  %v3227_v4 = vld [vmem:[%s11543_s30 + $0x106] sm:$0xff]  ;;  %v1001_v41 = vld [vmem:[%s11543_s30 + $0xf9] sm:$0xff] }
 0x19b   : > { %2180 = vrot.lane.b32.xlu0 %v10243_v5, %s14308_s25  ;;  %959 = vst.msk [vmem:[#allocation13 + $0xf8] sm:$0xf] %vm927_vm1, %v10084_v62  ;;  %v10409_v40 = vpack.c.bf16 %v3227_v4, %v3227_v4  ;;  %v10086_v62 = vpack.c.bf16 %v754_v57, %v754_v57  ;;  %960 = vst.msk [vmem:[#allocation13 + $0x100] sm:$0xf] %vm927_vm1, %v10085_v48  ;;  %v3229_v4 = vld [vmem:[%s11543_s30 + $0x116] sm:$0xff] }
 0x19c   : > { %v2167_v16 = vpop.permute.xlu1 %2166  ;;  %v1996_v57 = vld [vmem:[%s11543_s30 + $0x11b] sm:$0xff] }
 0x19d   : > { %v2165_v17 = vpop.permute.xlu0 %2164  ;;  %2271 = vst.msk [vmem:[#allocation13 + $0x98] sm:$0xf] %vm2251_vm5, %v2167_v16  ;;  %v10288_v16 = vpack.c.bf16 %v2324_v14, %v2324_v14  ;;  %v2327_v14 = vld [vmem:[%s11543_s30 + $0x11c] sm:$0xff] }
 0x19e   : > { %2270 = vst.msk [vmem:[#allocation13 + $0x90] sm:$0xf] %vm2251_vm5, %v2165_v17  ;;  %3418 = vrot.lane.b32.xlu1 %v10408_v12, %s11404_s4  ;;  %v1000_v12 = vld [vmem:[%s11543_s30 + $0xf1] sm:$0xff]  ;;  %v10125_v17 = vpack.c.bf16 %v1001_v41, %v1001_v41  ;;  %v10411_v41 = vpack.c.bf16 %v3229_v4, %v3229_v4  ;;  %v10249_v4 = vpack.c.bf16 %v1995_v58, %v1995_v58  ;;  %v758_v58 = vld [vmem:[%s11543_s30 + $0x128] sm:$0xff] }
 0x19f   : > { %3416 = vrot.lane.b32.xlu0 %v10407_v13, %s11404_s4  ;;  %v3980_v24 = vpop.f32.mrb[4].mxu0  ;;  %v2325_v13 = vld [vmem:[%s11543_s30 + $0x10c] sm:$0xff]  ;;  %v10124_v18 = vpack.c.bf16 %v1000_v12, %v1000_v12  ;;  %2530 = vst.msk [vmem:[#allocation13 + $0xf4] sm:$0xf] %vm927_vm1, %v10288_v16  ;;  %961 = vst.msk [vmem:[#allocation13 + $0x108] sm:$0xf] %vm927_vm1, %v10086_v62 }
 0x1a0   : > { %v3981_v26 = vadd.f32 %v12354_v25, %v3980_v24  ;;  %v3403_v27 = vpop.permute.xlu1 %3402  ;;  %v3982_v3 = vpop.f32.mrb[5].mxu0  ;;  %v10289_v59 = vpack.c.bf16 %v2325_v13, %v2325_v13  ;;  %v1003_v12 = vld [vmem:[%s11543_s30 + $0x109] sm:$0xff]  ;;  %v1002_v13 = vld [vmem:[%s11543_s30 + $0x101] sm:$0xff] }
 0x1a1   : > { %v3401_v1 = vpop.permute.xlu0 %3400  ;;  %3506 = vst.msk [vmem:[#allocation13 + $0x9c] sm:$0xf] %vm1920_vm4, %v3403_v27  ;;  %v3983_v31 = vpop.f32.mrb[6].mxu0 }
 0x1a2   : > { %3505 = vst.msk [vmem:[#allocation13 + $0x94] sm:$0xf] %vm1920_vm4, %v3401_v1  ;;  %v4140_v28 = vmax.f32 %v3981_v26, 0.0  ;;  %1193 = vrot.lane.b32.xlu1 %v10123_v19, %s11403_s22  ;;  %v3984_v32 = vadd.f32 %v12354_v25, %v3983_v31  ;;  %v3985_v33 = vpop.f32.mrb[7].mxu0  ;;  %v2572_v31 = vld [vmem:[%s11543_s30 + $0x11c] sm:$0xff] }
 0x1a3   : > { %1191 = vrot.lane.b32.xlu0 %v10122_v23, %s11403_s22  ;;  %2531 = vst.msk [vmem:[#allocation13 + $0xfc] sm:$0xf] %vm927_vm1, %v10289_v59 }
 0x1a4   : > { %4181 = vst.msk [vmem:[#allocation6 + $0x10] sm:$0xff] %vm654_vm7, %v4140_v28  ;;  %v1178_v36 = vpop.permute.xlu1 %1177  ;;  %v4141_v7 = vmax.f32 %v3984_v32, 0.0  ;;  %v2571_v32 = vld [vmem:[%s11543_s30 + $0x114] sm:$0xff] }
 0x1a5   : > { %v1176_v6 = vpop.permute.xlu0 %1175  ;;  %1280 = vst.msk [vmem:[#allocation13 + $0xa8] sm:$0xf] %vm1258_vm2, %v1178_v36  ;;  %v10330_v36 = vpack.c.bf16 %v2572_v31, %v2572_v31 }
 0x1a6   : > { %1279 = vst.msk [vmem:[#allocation13 + $0xa0] sm:$0xf] %vm1258_vm2, %v1176_v6  ;;  %1524 = vrot.lane.b32.xlu1 %v12404_v9, %s11402_s1  ;;  %v2898_v9 = vld [vmem:[%s11543_s30 + $0x105] sm:$0xff]  ;;  %v10329_v6 = vpack.c.bf16 %v2571_v32, %v2571_v32 }
 0x1a7   : > { %1522 = vrot.lane.b32.xlu0 %v12406_v54, %s11402_s1  ;;  %4182 = vst.msk [vmem:[#allocation6 + $0x18] sm:$0xff] %vm654_vm7, %v4141_v7  ;;  %v10368_v22 = vpack.c.bf16 %v2898_v9, %v2898_v9  ;;  %v1663_v7 = vld [vmem:[%s11543_s30 + $0x10a] sm:$0xff] }
 0x1a8   : > { %v1509_v43 = vpop.permute.xlu1 %1508  ;;  %v3547_v46 = vld [vmem:[#allocation13 + $0x98] sm:$0xff] }
 0x1a9   : > { %v1507_v44 = vpop.permute.xlu0 %1506  ;;  %v3546_v45 = vld [vmem:[#allocation13 + $0x90] sm:$0xff]  ;;  %1611 = vst.msk [vmem:[#allocation13 + $0xa8] sm:$0xf] %vm1589_vm3, %v1509_v43 }
 0x1aa   : > { %v11016_v47 = vld [vmem:[#allocation13 + $0x94] ss:$8 sps:$4 sm:$0xff]   ;;  %1610 = vst.msk [vmem:[#allocation13 + $0xa0] sm:$0xf] %vm1589_vm3, %v1507_v44  ;;  %v9514_v49 = vcombine.low %v3546_v45, %v3547_v46  ;;  %2764 = vrot.lane.b32.xlu1 %v10328_v39, %s11403_s22  ;;  %v12528_v46 = vpack.c.bf16 %v1663_v7, %v1663_v7 }
 0x1ab   : > { %2762 = vrot.lane.b32.xlu0 %v10327_v37, %s11403_s22  ;;  %9561 = vmatprep.mubr.msk.bf16.mxu0 %vm3874_vm6, %v11016_v47  ;;  %v1662_v39 = vld [vmem:[%s11543_s30 + $0x102] sm:$0xff] }
 0x1ac   : > { %v2749_v54 = vpop.permute.xlu1 %2748  ;;  %4043 = vmatmul.mubr.bf16.gmra.mrb[36].mxu0 %v9514_v49  ;;  %v12530_v47 = vpack.c.bf16 %v1662_v39, %v1662_v39  ;;  %v2901_v49 = vld [vmem:[%s11543_s30 + $0x11d] sm:$0xff] }
 0x1ad   : > { %v2747_v55 = vpop.permute.xlu0 %2746  ;;  %2850 = vst.msk [vmem:[#allocation13 + $0xac] sm:$0xf] %vm1258_vm2, %v2749_v54 }
 0x1ae   : > { %2849 = vst.msk [vmem:[#allocation13 + $0xa4] sm:$0xf] %vm1258_vm2, %v2747_v55  ;;  %1855 = vrot.lane.b32.xlu1 %v12467_v50, %s11404_s4 }
 0x1af   : > { %1853 = vrot.lane.b32.xlu0 %v12469_v51, %s11404_s4 }
 0x1b0   : > { %v1840_v60 = vpop.permute.xlu1 %1839 }
 0x1b1   : > { %v1838_v61 = vpop.permute.xlu0 %1837  ;;  %1942 = vst.msk [vmem:[#allocation13 + $0xa8] sm:$0xf] %vm1920_vm4, %v1840_v60 }
 0x1b2   : > { %1941 = vst.msk [vmem:[#allocation13 + $0xa0] sm:$0xf] %vm1920_vm4, %v1838_v61  ;;  %3093 = vrot.lane.b32.xlu1 %v10369_v21, %s11402_s1  ;;  %v10371_v21 = vpack.c.bf16 %v2901_v49, %v2901_v49 }
 0x1b3   : > { %3091 = vrot.lane.b32.xlu0 %v10368_v22, %s11402_s1  ;;  %v10370_v22 = vpack.c.bf16 %v2900_v8, %v2900_v8 }
 0x1b4   : > { %v3078_v5 = vpop.permute.xlu1 %3077 }
 0x1b5   : > { %v3076_v10 = vpop.permute.xlu0 %3075  ;;  %3179 = vst.msk [vmem:[#allocation13 + $0xac] sm:$0xf] %vm1589_vm3, %v3078_v5  ;;  %v11028_v5 = vld [vmem:[%s14321_s3 + $0x80] sm:$0xff]  }
 0x1b6   : > { %3178 = vst.msk [vmem:[#allocation13 + $0xa4] sm:$0xf] %vm1589_vm3, %v3076_v10  ;;  %2186 = vrot.lane.b32.xlu1 %v10246_v52, %s14308_s25  ;;  %v10248_v52 = vpack.c.bf16 %v1994_v56, %v1994_v56  ;;  %10873 = vmatpush3.bf16.msra.mxu1 %v11028_v5  ;;  %v3232_v5 = vld [vmem:[%s11543_s30 + $0x12e] sm:$0xff] }
 0x1b7   : > { %2184 = vrot.lane.b32.xlu0 %v10245_v63, %s14308_s25  ;;  %v10247_v63 = vpack.c.bf16 %v1993_v29, %v1993_v29  ;;  %10874 = vmatprep.subr.bf16.mxu1 %v11406_v53 }
 0x1b8   : > { %v2171_v15 = vpop.permute.xlu1 %2170 }
 0x1b9   : > { %v2169_v30 = vpop.permute.xlu0 %2168  ;;  %2273 = vst.msk [vmem:[#allocation13 + $0xa8] sm:$0xf] %vm2251_vm5, %v2171_v15  ;;  %v2326_v15 = vld [vmem:[%s11543_s30 + $0x114] sm:$0xff] }
 0x1ba   : > { %2272 = vst.msk [vmem:[#allocation13 + $0xa0] sm:$0xf] %vm2251_vm5, %v2169_v30  ;;  %3422 = vrot.lane.b32.xlu1 %v10410_v11, %s11404_s4  ;;  %v11031_v30 = vld [vmem:[%s14321_s3 + $0x88] sm:$0xff]  }
 0x1bb   : > { %3420 = vrot.lane.b32.xlu0 %v10409_v40, %s11404_s4  ;;  %v3988_v20 = vpop.f32.mrb[8].mxu0  ;;  %v10412_v40 = vpack.c.bf16 %v3230_v0, %v3230_v0  ;;  %10875 = vmatpush3.bf16.msra.mxu1 %v11031_v30  ;;  %v10250_v0 = vpack.c.bf16 %v1996_v57, %v1996_v57  ;;  %v2328_v30 = vld [vmem:[%s11543_s30 + $0x124] sm:$0xff] }
 0x1bc   : > { %v3989_v19 = vadd.f32 %v12354_v25, %v3988_v20  ;;  %v3407_v23 = vpop.permute.xlu1 %3406  ;;  %v3990_v26 = vpop.f32.mrb[9].mxu0  ;;  %v10127_v20 = vpack.c.bf16 %v1003_v12, %v1003_v12  ;;  %v1997_v57 = vld [vmem:[%s11543_s30 + $0x123] sm:$0xff] }
 0x1bd   : > { %v3405_v24 = vpop.permute.xlu0 %3404  ;;  %3508 = vst.msk [vmem:[#allocation13 + $0xac] sm:$0xf] %vm1920_vm4, %v3407_v23  ;;  %v3991_v1 = vpop.f32.mrb[10].mxu0 }
 0x1be   : > { %3507 = vst.msk [vmem:[#allocation13 + $0xa4] sm:$0xf] %vm1920_vm4, %v3405_v24  ;;  %v4142_v27 = vmax.f32 %v3989_v19, 0.0  ;;  %1197 = vrot.lane.b32.xlu1 %v10125_v17, %s11403_s22  ;;  %v3992_v3 = vadd.f32 %v12354_v25, %v3991_v1  ;;  %v3993_v28 = vpop.f32.mrb[11].mxu0  ;;  %v10291_v17 = vpack.c.bf16 %v2327_v14, %v2327_v14  ;;  %v10126_v19 = vpack.c.bf16 %v1002_v13, %v1002_v13  ;;  %v1005_v13 = vld [vmem:[%s11543_s30 + $0x119] sm:$0xff]  ;;  %v1004_v14 = vld [vmem:[%s11543_s30 + $0x111] sm:$0xff] }
 0x1bf   : > { %1195 = vrot.lane.b32.xlu0 %v10124_v18, %s11403_s22  ;;  %v10290_v18 = vpack.c.bf16 %v2326_v15, %v2326_v15  ;;  %v2329_v15 = vld [vmem:[%s11543_s30 + $0x12c] sm:$0xff] }
 0x1c0   : > { %4183 = vst.msk [vmem:[#allocation6 + $0x20] sm:$0xff] %vm654_vm7, %v4142_v27  ;;  %v1182_v33 = vpop.permute.xlu1 %1181  ;;  %v4143_v35 = vmax.f32 %v3992_v3, 0.0 }
 0x1c1   : > { %v1180_v34 = vpop.permute.xlu0 %1179  ;;  %1282 = vst.msk [vmem:[#allocation13 + $0xb8] sm:$0xf] %vm1258_vm2, %v1182_v33  ;;  %v2574_v33 = vld [vmem:[%s11543_s30 + $0x12c] sm:$0xff] }
 0x1c2   : > { %1281 = vst.msk [vmem:[#allocation13 + $0xb0] sm:$0xf] %vm1258_vm2, %v1180_v34  ;;  %1528 = vrot.lane.b32.xlu1 %v12467_v50, %s11402_s1  ;;  %v4224_v50 = vld [vmem:[#allocation6 + $0x11] ss:$2 sm:$0xff]  ;;  %v10332_v7 = vpack.c.bf16 %v2574_v33, %v2574_v33  ;;  %v2576_v33 = vld [vmem:[%s11543_s30 + $0x13c] sm:$0xff] }
 0x1c3   : > { %1526 = vrot.lane.b32.xlu0 %v12469_v51, %s11402_s1  ;;  %4184 = vst.msk [vmem:[#allocation6 + $0x28] sm:$0xff] %vm654_vm7, %v4143_v35  ;;  %v2573_v34 = vld [vmem:[%s11543_s30 + $0x124] sm:$0xff] }
 0x1c4   : > { %v1513_v37 = vpop.permute.xlu1 %1512  ;;  %v3549_v43 = vld [vmem:[#allocation13 + $0xa8] sm:$0xff]  ;;  %2533 = vst.msk [vmem:[#allocation13 + $0x10c] sm:$0xf] %vm927_vm1, %v10291_v17  ;;  %2532 = vst.msk [vmem:[#allocation13 + $0x104] sm:$0xf] %vm927_vm1, %v10290_v18  ;;  %v10331_v39 = vpack.c.bf16 %v2573_v34, %v2573_v34  ;;  %v10293_v17 = vpack.c.bf16 %v2329_v15, %v2329_v15  ;;  %v10292_v18 = vpack.c.bf16 %v2328_v30, %v2328_v30  ;;  %v1007_v15 = vld [vmem:[%s11543_s30 + $0x129] sm:$0xff] }
 0x1c5   : > { %v1511_v42 = vpop.permute.xlu0 %1510  ;;  %v3548_v38 = vld [vmem:[#allocation13 + $0xa0] sm:$0xff]  ;;  %1613 = vst.msk [vmem:[#allocation13 + $0xb8] sm:$0xf] %vm1589_vm3, %v1513_v37  ;;  %v1665_v37 = vld [vmem:[%s11543_s30 + $0x11a] sm:$0xff] }
 0x1c6   : > { %v11018_v44 = vld [vmem:[#allocation13 + $0xa4] ss:$8 sps:$4 sm:$0xff]   ;;  %1612 = vst.msk [vmem:[#allocation13 + $0xb0] sm:$0xf] %vm1589_vm3, %v1511_v42  ;;  %v9516_v45 = vcombine.low %v3548_v38, %v3549_v43  ;;  %2768 = vrot.lane.b32.xlu1 %v10330_v36, %s11403_s22  ;;  %v1006_v30 = vld [vmem:[%s11543_s30 + $0x121] sm:$0xff] }
 0x1c7   : > { %2766 = vrot.lane.b32.xlu0 %v10329_v6, %s11403_s22  ;;  %v4266_v51 = vld [vmem:[#allocation6 + $0x12] ss:$2 sm:$0xff]  ;;  %9562 = vmatprep.mubr.msk.bf16.mxu0 %vm3874_vm6, %v11018_v44  ;;  %2535 = vst.msk [vmem:[#allocation13 + $0x11c] sm:$0xf] %vm927_vm1, %v10293_v17  ;;  %2534 = vst.msk [vmem:[#allocation13 + $0x114] sm:$0xf] %vm927_vm1, %v10292_v18 }
 0x1c8   : > { %v4306_v9 = vmax.f32 %v4224_v50, %v4266_v51  ;;  %v2753_v54 = vpop.permute.xlu1 %2752  ;;  %4051 = vmatmul.mubr.bf16.gmra.mrb[40].mxu0 %v9516_v45  ;;  %v1664_v42 = vld [vmem:[%s11543_s30 + $0x112] sm:$0xff] }
 0x1c9   : > { %v2751_v55 = vpop.permute.xlu0 %2750  ;;  %2852 = vst.msk [vmem:[#allocation13 + $0xbc] sm:$0xf] %vm1258_vm2, %v2753_v54  ;;  %v12601_v50 = vpack.c.bf16 %v1664_v42, %v1664_v42  ;;  %v2903_v51 = vld [vmem:[%s11543_s30 + $0x12d] sm:$0xff]  ;;  %v2902_v54 = vld [vmem:[%s11543_s30 + $0x125] sm:$0xff] }
 0x1ca   : > { %2851 = vst.msk [vmem:[#allocation13 + $0xb4] sm:$0xf] %vm1258_vm2, %v2751_v55  ;;  %1859 = vrot.lane.b32.xlu1 %v12528_v46, %s11404_s4  ;;  %v4226_v8 = vld [vmem:[#allocation6 + $0x21] ss:$2 sm:$0xff]  ;;  %v10373_v56 = vpack.c.bf16 %v2903_v51, %v2903_v51  ;;  %v10372_v29 = vpack.c.bf16 %v2902_v54, %v2902_v54 }
 0x1cb   : > { %4327 = vst.msk [vmem:[#allocation10 + $0x8] sm:$0xff] %vm654_vm7, %v4306_v9  ;;  %1857 = vrot.lane.b32.xlu0 %v12530_v47, %s11404_s4  ;;  %v2575_v34 = vld [vmem:[%s11543_s30 + $0x134] sm:$0xff] }
 0x1cc   : > { %v1844_v60 = vpop.permute.xlu1 %1843 }
 0x1cd   : > { %v1842_v61 = vpop.permute.xlu0 %1841  ;;  %1944 = vst.msk [vmem:[#allocation13 + $0xb8] sm:$0xf] %vm1920_vm4, %v1844_v60  ;;  %v756_v60 = vld [vmem:[%s11543_s30 + $0x118] sm:$0xff] }
 0x1ce   : > { %1943 = vst.msk [vmem:[#allocation13 + $0xb0] sm:$0xf] %vm1920_vm4, %v1842_v61  ;;  %3097 = vrot.lane.b32.xlu1 %v10371_v21, %s11402_s1  ;;  %v755_v61 = vld [vmem:[%s11543_s30 + $0x110] sm:$0xff] }
 0x1cf   : > { %3095 = vrot.lane.b32.xlu0 %v10370_v22, %s11402_s1 }
 0x1d0   : > { %v3082_v10 = vpop.permute.xlu1 %3081 }
 0x1d1   : > { %v3080_v11 = vpop.permute.xlu0 %3079  ;;  %3181 = vst.msk [vmem:[#allocation13 + $0xbc] sm:$0xf] %vm1589_vm3, %v3082_v10  ;;  %v3231_v10 = vld [vmem:[%s11543_s30 + $0x126] sm:$0xff] }
 0x1d2   : > { %3180 = vst.msk [vmem:[#allocation13 + $0xb4] sm:$0xf] %vm1589_vm3, %v3080_v11  ;;  %2190 = vrot.lane.b32.xlu1 %v10248_v52, %s14308_s25  ;;  %v10088_v52 = vpack.c.bf16 %v756_v60, %v756_v60  ;;  %v10413_v12 = vpack.c.bf16 %v3231_v10, %v3231_v10  ;;  %v757_v60 = vld [vmem:[%s11543_s30 + $0x120] sm:$0xff] }
 0x1d3   : > { %2188 = vrot.lane.b32.xlu0 %v10247_v63, %s14308_s25  ;;  %v10087_v63 = vpack.c.bf16 %v755_v61, %v755_v61 }
 0x1d4   : > { %v2175_v59 = vpop.permute.xlu1 %2174  ;;  %963 = vst.msk [vmem:[#allocation13 + $0x118] sm:$0xf] %vm927_vm1, %v10088_v52  ;;  %v10089_v52 = vpack.c.bf16 %v757_v60, %v757_v60 }
 0x1d5   : > { %v2173_v16 = vpop.permute.xlu0 %2172  ;;  %2275 = vst.msk [vmem:[#allocation13 + $0xb8] sm:$0xf] %vm2251_vm5, %v2175_v59 }
 0x1d6   : > { %2274 = vst.msk [vmem:[#allocation13 + $0xb0] sm:$0xf] %vm2251_vm5, %v2173_v16  ;;  %3426 = vrot.lane.b32.xlu1 %v10412_v40, %s11404_s4 }
 0x1d7   : > { %3424 = vrot.lane.b32.xlu0 %v10411_v41, %s11404_s4  ;;  %v3996_v23 = vpop.f32.mrb[12].mxu0  ;;  %962 = vst.msk [vmem:[#allocation13 + $0x110] sm:$0xf] %vm927_vm1, %v10087_v63  ;;  %v10414_v41 = vpack.c.bf16 %v3232_v5, %v3232_v5  ;;  %964 = vst.msk [vmem:[#allocation13 + $0x120] sm:$0xf] %vm927_vm1, %v10089_v52  ;;  %v3233_v5 = vld [vmem:[%s11543_s30 + $0x136] sm:$0xff] }
 0x1d8   : > { %v3997_v24 = vadd.f32 %v12354_v25, %v3996_v23  ;;  %v3411_v26 = vpop.permute.xlu1 %3410  ;;  %v3998_v1 = vpop.f32.mrb[13].mxu0 }
 0x1d9   : > { %v3409_v27 = vpop.permute.xlu0 %3408  ;;  %3510 = vst.msk [vmem:[#allocation13 + $0xbc] sm:$0xf] %vm1920_vm4, %v3411_v26  ;;  %v3999_v28 = vpop.f32.mrb[14].mxu0 }
 0x1da   : > { %3509 = vst.msk [vmem:[#allocation13 + $0xb4] sm:$0xf] %vm1920_vm4, %v3409_v27  ;;  %v4144_v3 = vmax.f32 %v3997_v24, 0.0  ;;  %1201 = vrot.lane.b32.xlu1 %v10127_v20, %s11403_s22  ;;  %v4000_v31 = vadd.f32 %v12354_v25, %v3999_v28  ;;  %v4001_v32 = vpop.f32.mrb[15].mxu0  ;;  %v10129_v20 = vpack.c.bf16 %v1005_v13, %v1005_v13 }
 0x1db   : > { %1199 = vrot.lane.b32.xlu0 %v10126_v19, %s11403_s22  ;;  %v10128_v19 = vpack.c.bf16 %v1004_v14, %v1004_v14  ;;  %v10415_v14 = vpack.c.bf16 %v3233_v5, %v3233_v5  ;;  %v2000_v5 = vld [vmem:[%s11543_s30 + $0x13b] sm:$0xff] }
 0x1dc   : > { %4185 = vst.msk [vmem:[#allocation6 + $0x30] sm:$0xff] %vm654_vm7, %v4144_v3  ;;  %v1186_v35 = vpop.permute.xlu1 %1185  ;;  %v4145_v6 = vmax.f32 %v4000_v31, 0.0 }
 0x1dd   : > { %v1184_v36 = vpop.permute.xlu0 %1183  ;;  %1284 = vst.msk [vmem:[#allocation13 + $0xc8] sm:$0xf] %vm1258_vm2, %v1186_v35 }
 0x1de   : > { %1283 = vst.msk [vmem:[#allocation13 + $0xc0] sm:$0xf] %vm1258_vm2, %v1184_v36  ;;  %1532 = vrot.lane.b32.xlu1 %v12528_v46, %s11402_s1 }
 0x1df   : > { %1530 = vrot.lane.b32.xlu0 %v12530_v47, %s11402_s1  ;;  %4186 = vst.msk [vmem:[#allocation6 + $0x38] sm:$0xff] %vm654_vm7, %v4145_v6  ;;  %v12599_v47 = vpack.c.bf16 %v1665_v37, %v1665_v37  ;;  %v1666_v37 = vld [vmem:[%s11543_s30 + $0x122] sm:$0xff] }
 0x1e0   : > { %v1517_v38 = vpop.permute.xlu1 %1516  ;;  %v3551_v45 = vld [vmem:[#allocation13 + $0xb8] sm:$0xff] }
 0x1e1   : > { %v1515_v43 = vpop.permute.xlu0 %1514  ;;  %v3550_v44 = vld [vmem:[#allocation13 + $0xb0] sm:$0xff]  ;;  %1615 = vst.msk [vmem:[#allocation13 + $0xc8] sm:$0xf] %vm1589_vm3, %v1517_v38 }
 0x1e2   : > { %v11020_v49 = vld [vmem:[#allocation13 + $0xb4] ss:$8 sps:$4 sm:$0xff]   ;;  %1614 = vst.msk [vmem:[#allocation13 + $0xc0] sm:$0xf] %vm1589_vm3, %v1515_v43  ;;  %v9518_v46 = vcombine.low %v3550_v44, %v3551_v45  ;;  %2772 = vrot.lane.b32.xlu1 %v10332_v7, %s11403_s22  ;;  %v10333_v7 = vpack.c.bf16 %v2575_v34, %v2575_v34 }
 0x1e3   : > { %2770 = vrot.lane.b32.xlu0 %v10331_v39, %s11403_s22  ;;  %v4268_v9 = vld [vmem:[#allocation6 + $0x22] ss:$2 sm:$0xff]  ;;  %9563 = vmatprep.mubr.msk.bf16.mxu0 %vm3874_vm6, %v11020_v49  ;;  %v1667_v39 = vld [vmem:[%s11543_s30 + $0x12a] sm:$0xff] }
 0x1e4   : > { %v4307_v55 = vmax.f32 %v4226_v8, %v4268_v9  ;;  %v2757_v21 = vpop.permute.xlu1 %2756  ;;  %4059 = vmatmul.mubr.bf16.gmra.mrb[44].mxu0 %v9518_v46  ;;  %v12661_v46 = vpack.c.bf16 %v1667_v39, %v1667_v39  ;;  %v2904_v9 = vld [vmem:[%s11543_s30 + $0x135] sm:$0xff]  ;;  %v2578_v34 = vld [vmem:[%s11543_s30 + $0x14c] sm:$0xff] }
 0x1e5   : > { %v2755_v22 = vpop.permute.xlu0 %2754  ;;  %2854 = vst.msk [vmem:[#allocation13 + $0xcc] sm:$0xf] %vm1258_vm2, %v2757_v21 }
 0x1e6   : > { %2853 = vst.msk [vmem:[#allocation13 + $0xc4] sm:$0xf] %vm1258_vm2, %v2755_v22  ;;  %1863 = vrot.lane.b32.xlu1 %v12599_v47, %s11404_s4  ;;  %v4228_v51 = vld [vmem:[#allocation6 + $0x31] ss:$2 sm:$0xff] }
 0x1e7   : > { %4328 = vst.msk [vmem:[#allocation10 + $0x10] sm:$0xff] %vm654_vm7, %v4307_v55  ;;  %1861 = vrot.lane.b32.xlu0 %v12601_v50, %s11404_s4 }
 0x1e8   : > { %v1848_v62 = vpop.permute.xlu1 %1847 }
 0x1e9   : > { %v1846_v48 = vpop.permute.xlu0 %1845  ;;  %1946 = vst.msk [vmem:[#allocation13 + $0xc8] sm:$0xf] %vm1920_vm4, %v1848_v62 }
 0x1ea   : > { %1945 = vst.msk [vmem:[#allocation13 + $0xc0] sm:$0xf] %vm1920_vm4, %v1846_v48  ;;  %3101 = vrot.lane.b32.xlu1 %v10373_v56, %s11402_s1  ;;  %v10374_v56 = vpack.c.bf16 %v2904_v9, %v2904_v9  ;;  %v10090_v48 = vpack.c.bf16 %v758_v58, %v758_v58  ;;  %v1669_v9 = vld [vmem:[%s11543_s30 + $0x13a] sm:$0xff]  ;;  %v2907_v58 = vld [vmem:[%s11543_s30 + $0x14d] sm:$0xff] }
 0x1eb   : > { %3099 = vrot.lane.b32.xlu0 %v10372_v29, %s11402_s1  ;;  %v1998_v29 = vld [vmem:[%s11543_s30 + $0x12b] sm:$0xff] }
 0x1ec   : > { %v3086_v11 = vpop.permute.xlu1 %3085  ;;  %v10252_v63 = vpack.c.bf16 %v1998_v29, %v1998_v29  ;;  %965 = vst.msk [vmem:[#allocation13 + $0x128] sm:$0xf] %vm927_vm1, %v10090_v48  ;;  %v12733_v29 = vpack.c.bf16 %v1669_v9, %v1669_v9  ;;  %v1671_v9 = vld [vmem:[%s11543_s30 + $0x14a] sm:$0xff] }
 0x1ed   : > { %v3084_v40 = vpop.permute.xlu0 %3083  ;;  %3183 = vst.msk [vmem:[#allocation13 + $0xcc] sm:$0xf] %vm1589_vm3, %v3086_v11 }
 0x1ee   : > { %3182 = vst.msk [vmem:[#allocation13 + $0xc4] sm:$0xf] %vm1589_vm3, %v3084_v40  ;;  %2194 = vrot.lane.b32.xlu1 %v10250_v0, %s14308_s25  ;;  %v10251_v0 = vpack.c.bf16 %v1997_v57, %v1997_v57  ;;  %v4347_v40 = vld [vmem:[#allocation10 + $0x9] sm:$0xff] }
 0x1ef   : > { %2192 = vrot.lane.b32.xlu0 %v10249_v4, %s14308_s25  ;;  %v3234_v4 = vld [vmem:[%s11543_s30 + $0x13e] sm:$0xff] }
 0x1f0   : > { %v2179_v59 = vpop.permute.xlu1 %2178  ;;  %v10416_v13 = vpack.c.bf16 %v3234_v4, %v3234_v4 }
 0x1f1   : > { %v2177_v16 = vpop.permute.xlu0 %2176  ;;  %2277 = vst.msk [vmem:[#allocation13 + $0xc8] sm:$0xf] %vm2251_vm5, %v2179_v59  ;;  %v2331_v59 = vld [vmem:[%s11543_s30 + $0x13c] sm:$0xff] }
 0x1f2   : > { %2276 = vst.msk [vmem:[#allocation13 + $0xc0] sm:$0xf] %vm2251_vm5, %v2177_v16  ;;  %3430 = vrot.lane.b32.xlu1 %v10414_v41, %s11404_s4  ;;  %v2330_v16 = vld [vmem:[%s11543_s30 + $0x134] sm:$0xff] }
 0x1f3   : > { %3428 = vrot.lane.b32.xlu0 %v10413_v12, %s11404_s4  ;;  %v4004_v23 = vpop.f32.mrb[16].mxu0 }
 0x1f4   : > { %v4005_v24 = vadd.f32 %v12354_v25, %v4004_v23  ;;  %v3415_v26 = vpop.permute.xlu1 %3414  ;;  %v4006_v1 = vpop.f32.mrb[17].mxu0  ;;  %v10131_v23 = vpack.c.bf16 %v1007_v15, %v1007_v15  ;;  %v10254_v15 = vpack.c.bf16 %v2000_v5, %v2000_v5  ;;  %v2002_v5 = vld [vmem:[%s11543_s30 + $0x14b] sm:$0xff] }
 0x1f5   : > { %v3413_v27 = vpop.permute.xlu0 %3412  ;;  %3512 = vst.msk [vmem:[#allocation13 + $0xcc] sm:$0xf] %vm1920_vm4, %v3415_v26  ;;  %v4007_v28 = vpop.f32.mrb[18].mxu0 }
 0x1f6   : > { %3511 = vst.msk [vmem:[#allocation13 + $0xc4] sm:$0xf] %vm1920_vm4, %v3413_v27  ;;  %v4146_v3 = vmax.f32 %v4005_v24, 0.0  ;;  %1205 = vrot.lane.b32.xlu1 %v10129_v20, %s11403_s22  ;;  %v4008_v31 = vadd.f32 %v12354_v25, %v4007_v28  ;;  %v4009_v32 = vpop.f32.mrb[19].mxu0  ;;  %v10334_v25 = vpack.c.bf16 %v2576_v33, %v2576_v33  ;;  %v10295_v20 = vpack.c.bf16 %v2331_v59, %v2331_v59  ;;  %v12705_v27 = vld [vmem:[%s14292_s8] ss:$0 sm:$0xff] }
 0x1f7   : > { %1203 = vrot.lane.b32.xlu0 %v10128_v19, %s11403_s22  ;;  %v10294_v19 = vpack.c.bf16 %v2330_v16, %v2330_v16  ;;  %v10130_v24 = vpack.c.bf16 %v1006_v30, %v1006_v30  ;;  %v3236_v59 = vld [vmem:[%s11543_s30 + $0x14e] sm:$0xff]  ;;  %v3235_v16 = vld [vmem:[%s11543_s30 + $0x146] sm:$0xff] }
 0x1f8   : > { %4187 = vst.msk [vmem:[#allocation6 + $0x40] sm:$0xff] %vm654_vm7, %v4146_v3  ;;  %v1190_v35 = vpop.permute.xlu1 %1189  ;;  %v4147_v6 = vmax.f32 %v4008_v31, 0.0 }
 0x1f9   : > { %v1188_v36 = vpop.permute.xlu0 %1187  ;;  %1286 = vst.msk [vmem:[#allocation13 + $0xd8] sm:$0xf] %vm1258_vm2, %v1190_v35 }
 0x1fa   : > { %1285 = vst.msk [vmem:[#allocation13 + $0xd0] sm:$0xf] %vm1258_vm2, %v1188_v36  ;;  %1536 = vrot.lane.b32.xlu1 %v12599_v47, %s11402_s1  ;;  %v12663_v47 = vpack.c.bf16 %v1666_v37, %v1666_v37 }
 0x1fb   : > { %1534 = vrot.lane.b32.xlu0 %v12601_v50, %s11402_s1  ;;  %4188 = vst.msk [vmem:[#allocation6 + $0x48] sm:$0xff] %vm654_vm7, %v4147_v6  ;;  %v2905_v50 = vld [vmem:[%s11543_s30 + $0x13d] sm:$0xff] }
 0x1fc   : > { %v1521_v42 = vpop.permute.xlu1 %1520  ;;  %v3553_v44 = vld [vmem:[#allocation13 + $0xc8] sm:$0xff]  ;;  %v10375_v22 = vpack.c.bf16 %v2905_v50, %v2905_v50  ;;  %2537 = vst.msk [vmem:[#allocation13 + $0x12c] sm:$0xf] %vm927_vm1, %v10295_v20  ;;  %2536 = vst.msk [vmem:[#allocation13 + $0x124] sm:$0xf] %vm927_vm1, %v10294_v19  ;;  %v2577_v6 = vld [vmem:[%s11543_s30 + $0x144] sm:$0xff]  ;;  %v10418_v20 = vpack.c.bf16 %v3236_v59, %v3236_v59  ;;  %v10417_v19 = vpack.c.bf16 %v3235_v16, %v3235_v16 }
 0x1fd   : > { %v1519_v38 = vpop.permute.xlu0 %1518  ;;  %v3552_v43 = vld [vmem:[#allocation13 + $0xc0] sm:$0xff]  ;;  %1617 = vst.msk [vmem:[#allocation13 + $0xd8] sm:$0xf] %vm1589_vm3, %v1521_v42  ;;  %v10335_v50 = vpack.c.bf16 %v2577_v6, %v2577_v6 }
 0x1fe   : > { %v11022_v45 = vld [vmem:[#allocation13 + $0xc4] ss:$8 sps:$4 sm:$0xff]   ;;  %1616 = vst.msk [vmem:[#allocation13 + $0xd0] sm:$0xf] %vm1589_vm3, %v1519_v38  ;;  %v9520_v49 = vcombine.low %v3552_v43, %v3553_v44  ;;  %2776 = vrot.lane.b32.xlu1 %v10334_v25, %s11403_s22  ;;  %v10336_v43 = vpack.c.bf16 %v2578_v34, %v2578_v34 }
 0x1ff   : > { %2774 = vrot.lane.b32.xlu0 %v10333_v7, %s11403_s22  ;;  %v4270_v8 = vld [vmem:[#allocation6 + $0x32] ss:$2 sm:$0xff]  ;;  %9564 = vmatprep.mubr.msk.bf16.mxu0 %vm3874_vm6, %v11022_v45 }
 0x200   : > { %v4308_v54 = vmax.f32 %v4228_v51, %v4270_v8  ;;  %v2761_v55 = vpop.permute.xlu1 %2760  ;;  %4067 = vmatmul.mubr.bf16.gmra.mrb[48].mxu0 %v9520_v49 }
 0x201   : > { %v2759_v21 = vpop.permute.xlu0 %2758  ;;  %2856 = vst.msk [vmem:[#allocation13 + $0xdc] sm:$0xf] %vm1258_vm2, %v2761_v55 }
 0x202   : > { %2855 = vst.msk [vmem:[#allocation13 + $0xd4] sm:$0xf] %vm1258_vm2, %v2759_v21  ;;  %1867 = vrot.lane.b32.xlu1 %v12661_v46, %s11404_s4  ;;  %v4230_v60 = vld [vmem:[#allocation6 + $0x41] ss:$2 sm:$0xff] }
 0x203   : > { %4329 = vst.msk [vmem:[#allocation10 + $0x18] sm:$0xff] %vm654_vm7, %v4308_v54  ;;  %1865 = vrot.lane.b32.xlu0 %v12663_v47, %s11404_s4  ;;  %v1668_v54 = vld [vmem:[%s11543_s30 + $0x132] sm:$0xff] }
 0x204   : > { %v1852_v61 = vpop.permute.xlu1 %1851  ;;  %v12735_v57 = vpack.c.bf16 %v1668_v54, %v1668_v54  ;;  %v1670_v54 = vld [vmem:[%s11543_s30 + $0x142] sm:$0xff] }
 0x205   : > { %v1850_v62 = vpop.permute.xlu0 %1849  ;;  %1948 = vst.msk [vmem:[#allocation13 + $0xd8] sm:$0xf] %vm1920_vm4, %v1852_v61 }
 0x206   : > { %1947 = vst.msk [vmem:[#allocation13 + $0xd0] sm:$0xf] %vm1920_vm4, %v1850_v62  ;;  %3105 = vrot.lane.b32.xlu1 %v10375_v22, %s11402_s1  ;;  %v2906_v62 = vld [vmem:[%s11543_s30 + $0x145] sm:$0xff] }
 0x207   : > { %3103 = vrot.lane.b32.xlu0 %v10374_v56, %s11402_s1  ;;  %v10376_v4 = vpack.c.bf16 %v2906_v62, %v2906_v62  ;;  %v2908_v62 = vld [vmem:[%s11543_s30 + $0x155] sm:$0xff] }
 0x208   : > { %v3090_v10 = vpop.permute.xlu1 %3089 }
 0x209   : > { %v3088_v11 = vpop.permute.xlu0 %3087  ;;  %3185 = vst.msk [vmem:[#allocation13 + $0xdc] sm:$0xf] %vm1589_vm3, %v3090_v10  ;;  %v1999_v10 = vld [vmem:[%s11543_s30 + $0x133] sm:$0xff] }
 0x20a   : > { %v4348_v41 = vld [vmem:[#allocation10 + $0x12] sm:$0xff]  ;;  %3184 = vst.msk [vmem:[#allocation13 + $0xd4] sm:$0xf] %vm1589_vm3, %v3088_v11  ;;  %2198 = vrot.lane.b32.xlu1 %v10252_v63, %s14308_s25  ;;  %v10253_v30 = vpack.c.bf16 %v1999_v10, %v1999_v10 }
 0x20b   : > { %v4349_v12 = vmax.f32 %v4347_v40, %v4348_v41  ;;  %2196 = vrot.lane.b32.xlu0 %v10251_v0, %s14308_s25  ;;  %v10377_v0 = vpack.c.bf16 %v2907_v58, %v2907_v58  ;;  %v760_v41 = vld [vmem:[%s11543_s30 + $0x138] sm:$0xff]  ;;  %v2001_v10 = vld [vmem:[%s11543_s30 + $0x143] sm:$0xff] }
 0x20c   : > { %v2183_v17 = vpop.permute.xlu1 %2182  ;;  %v2909_v58 = vld [vmem:[%s11543_s30 + $0x15d] sm:$0xff] }
 0x20d   : > { %4350 = vst.msk [vmem:[#allocation2 + $0x16] sm:$0xff] %vm654_vm7, %v4349_v12  ;;  %v2181_v18 = vpop.permute.xlu0 %2180  ;;  %v759_v12 = vld [vmem:[%s11543_s30 + $0x130] sm:$0xff] }
 0x20e   : > { %2279 = vst.msk [vmem:[#allocation13 + $0xd8] sm:$0xf] %vm2251_vm5, %v2183_v17  ;;  %2278 = vst.msk [vmem:[#allocation13 + $0xd0] sm:$0xf] %vm2251_vm5, %v2181_v18  ;;  %3434 = vrot.lane.b32.xlu1 %v10416_v13, %s11404_s4  ;;  %v10092_v13 = vpack.c.bf16 %v760_v41, %v760_v41  ;;  %v10256_v41 = vpack.c.bf16 %v2002_v5, %v2002_v5 }
 0x20f   : > { %3432 = vrot.lane.b32.xlu0 %v10415_v14, %s11404_s4  ;;  %v4012_v26 = vpop.f32.mrb[20].mxu0  ;;  %v10091_v14 = vpack.c.bf16 %v759_v12, %v759_v12  ;;  %v10255_v12 = vpack.c.bf16 %v2001_v10, %v2001_v10 }
 0x210   : > { %v4013_v1 = vadd.f32 %v12705_v27, %v4012_v26  ;;  %v3419_v3 = vpop.permute.xlu1 %3418  ;;  %v4014_v31 = vpop.f32.mrb[21].mxu0  ;;  %967 = vst.msk [vmem:[#allocation13 + $0x138] sm:$0xf] %vm927_vm1, %v10092_v13  ;;  %v3238_v13 = vld [vmem:[%s11543_s30 + $0x15e] sm:$0xff] }
 0x211   : > { %v3417_v28 = vpop.permute.xlu0 %3416  ;;  %3514 = vst.msk [vmem:[#allocation13 + $0xdc] sm:$0xf] %vm1920_vm4, %v3419_v3  ;;  %v4015_v33 = vpop.f32.mrb[22].mxu0  ;;  %v2333_v3 = vld [vmem:[%s11543_s30 + $0x14c] sm:$0xff] }
 0x212   : > { %3513 = vst.msk [vmem:[#allocation13 + $0xd4] sm:$0xf] %vm1920_vm4, %v3417_v28  ;;  %v4148_v32 = vmax.f32 %v4013_v1, 0.0  ;;  %1209 = vrot.lane.b32.xlu1 %v10131_v23, %s11403_s22  ;;  %v4016_v35 = vadd.f32 %v12705_v27, %v4015_v33  ;;  %v4017_v36 = vpop.f32.mrb[23].mxu0  ;;  %v1009_v23 = vld [vmem:[%s11543_s30 + $0x139] sm:$0xff]  ;;  %v2332_v28 = vld [vmem:[%s11543_s30 + $0x144] sm:$0xff]  ;;  %v10297_v31 = vpack.c.bf16 %v2333_v3, %v2333_v3 }
 0x213   : > { %1207 = vrot.lane.b32.xlu0 %v10130_v24, %s11403_s22  ;;  %966 = vst.msk [vmem:[#allocation13 + $0x130] sm:$0xf] %vm927_vm1, %v10091_v14  ;;  %v1008_v24 = vld [vmem:[%s11543_s30 + $0x131] sm:$0xff]  ;;  %v10133_v33 = vpack.c.bf16 %v1009_v23, %v1009_v23  ;;  %v1010_v23 = vld [vmem:[%s11543_s30 + $0x141] sm:$0xf] }
 0x214   : > { %v5173_v25 = vld [vmem:[#allocation2 + $0x16] sm:$0xff]  ;;  %4189 = vst.msk [vmem:[#allocation6 + $0x50] sm:$0xff] %vm654_vm7, %v4148_v32  ;;  %v1194_v7 = vpop.permute.xlu1 %1193  ;;  %v4149_v38 = vmax.f32 %v4016_v35, 0.0  ;;  %v10296_v32 = vpack.c.bf16 %v2332_v28, %v2332_v28  ;;  %v10132_v34 = vpack.c.bf16 %v1008_v24, %v1008_v24  ;;  %v761_v3 = vld [vmem:[%s11543_s30 + $0x140] sm:$0xf]  ;;  %v10134_v28 = vpack.c.bf16 %v1010_v23, %v1010_v23 }
 0x215   : > { %v1192_v39 = vpop.permute.xlu0 %1191  ;;  %v10526_v37 = vpack.c.bf16 %v5173_v25, %v5173_v25  ;;  %v4780_v42 = vld [vmem:[#allocation2 + $0x13] sm:$0xff]  ;;  %1288 = vst.msk [vmem:[#allocation13 + $0xe8] sm:$0xf] %vm1258_vm2, %v1194_v7 }
 0x216   : > { %1287 = vst.msk [vmem:[#allocation13 + $0xe0] sm:$0xf] %vm1258_vm2, %v1192_v39  ;;  %v10475_v44 = vpack.c.bf16 %v4780_v42, %v4780_v42  ;;  %v4381_v45 = vld [vmem:[#allocation2 + $0x10] sm:$0xff]  ;;  %v4382_v49 = vld [vmem:[#allocation2 + $0x18] sm:$0xff]  ;;  %1540 = vrot.lane.b32.xlu1 %v12661_v46, %s11402_s1 }
 0x217   : > { %1538 = vrot.lane.b32.xlu0 %v12663_v47, %s11402_s1  ;;  %5239 = vst.msk [vmem:[#allocation14 + $0x8] sm:$0xf] %vm4219_vm11, %v10526_v37  ;;  %v10424_v51 = vpack.c.bf16 %v4381_v45, %v4381_v45  ;;  %v10425_v8 = vpack.c.bf16 %v4382_v49, %v4382_v49  ;;  %v3237_v14 = vld [vmem:[%s11543_s30 + $0x156] sm:$0xff] }
 0x218   : > { %4190 = vst.msk [vmem:[#allocation6 + $0x58] sm:$0xff] %vm654_vm7, %v4149_v38  ;;  %v1525_v55 = vpop.permute.xlu1 %1524  ;;  %v3555_v46 = vld [vmem:[#allocation13 + $0xd8] sm:$0xff] }
 0x219   : > { %4846 = vst.msk [vmem:[#allocation14 + $0x10] sm:$0xf] %vm4219_vm11, %v10475_v44  ;;  %v1523_v21 = vpop.permute.xlu0 %1522  ;;  %v3554_v22 = vld [vmem:[#allocation13 + $0xd0] sm:$0xff]  ;;  %4447 = vst.msk [vmem:[#allocation14 + $0x18] sm:$0xf] %vm4219_vm11, %v10424_v51  ;;  %v2579_v44 = vld [vmem:[%s11543_s30 + $0x154] sm:$0xff] }
 0x21a   : > { %v11024_v56 = vld [vmem:[#allocation13 + $0xd4] ss:$8 sps:$4 sm:$0xff]   ;;  %4448 = vst.msk [vmem:[#allocation14 + $0x24] sm:$0xf] %vm4219_vm11, %v10425_v8  ;;  %v9522_v47 = vcombine.low %v3554_v22, %v3555_v46  ;;  %2780 = vrot.lane.b32.xlu1 %v10336_v43, %s11403_s22  ;;  %v2580_v43 = vld [vmem:[%s11543_s30 + $0x15c] sm:$0xff]  ;;  %v10337_v8 = vpack.c.bf16 %v2579_v44, %v2579_v44 }
 0x21b   : > { %1619 = vst.msk [vmem:[#allocation13 + $0xe8] sm:$0xf] %vm1589_vm3, %v1525_v55  ;;  %1618 = vst.msk [vmem:[#allocation13 + $0xe0] sm:$0xf] %vm1589_vm3, %v1523_v21  ;;  %2778 = vrot.lane.b32.xlu0 %v10335_v50, %s11403_s22  ;;  %v4272_v61 = vld [vmem:[#allocation6 + $0x42] ss:$2 sm:$0xff]  ;;  %9565 = vmatprep.mubr.msk.bf16.mxu0 %vm3874_vm6, %v11024_v56  ;;  %v10338_v51 = vpack.c.bf16 %v2580_v43, %v2580_v43 }
 0x21c   : > { %v4309_v48 = vmax.f32 %v4230_v60, %v4272_v61  ;;  %v2765_v52 = vpop.permute.xlu1 %2764  ;;  %4075 = vmatmul.mubr.bf16.gmra.mrb[52].mxu0 %v9522_v47  ;;  %2539 = vst.msk [vmem:[#allocation13 + $0x13c] sm:$0xf] %vm927_vm1, %v10297_v31  ;;  %2538 = vst.msk [vmem:[#allocation13 + $0x134] sm:$0xf] %vm927_vm1, %v10296_v32  ;;  %v10093_v31 = vpack.c.bf16 %v761_v3, %v761_v3  ;;  %v2334_v32 = vld [vmem:[%s11543_s30 + $0x154] sm:$0xf] }
 0x21d   : > { %v2763_v63 = vpop.permute.xlu0 %2762  ;;  %2858 = vst.msk [vmem:[#allocation13 + $0xec] sm:$0xf] %vm1258_vm2, %v2765_v52  ;;  %vm2292_vm1 = vcmask 976640  }
 0x21e   : > { %2857 = vst.msk [vmem:[#allocation13 + $0xe4] sm:$0xf] %vm1258_vm2, %v2763_v63  ;;  %1871 = vrot.lane.b32.xlu1 %v12733_v29, %s11404_s4 }
 0x21f   : > { %4330 = vst.msk [vmem:[#allocation10 + $0x20] sm:$0xff] %vm654_vm7, %v4309_v48  ;;  %1869 = vrot.lane.b32.xlu0 %v12735_v57, %s11404_s4  ;;  %v4232_v60 = vld [vmem:[#allocation6 + $0x51] ss:$2 sm:$0xff] }
 0x220   : > { %v1856_v11 = vpop.permute.xlu1 %1855  ;;  %969 = vst.msk [vmem:[#allocation13 + $0x140] sm:$0x3] %vm968_vm13, %v10093_v31  ;;  %v4565_v31 = vld [vmem:[#allocation2 + $0x2] sm:$0xff] }
 0x221   : > { %v1854_v40 = vpop.permute.xlu0 %1853  ;;  %1950 = vst.msk [vmem:[#allocation13 + $0xe8] sm:$0xf] %vm1920_vm4, %v1856_v11 }
 0x222   : > { %1949 = vst.msk [vmem:[#allocation13 + $0xe0] sm:$0xf] %vm1920_vm4, %v1854_v40  ;;  %3109 = vrot.lane.b32.xlu1 %v10377_v0, %s11402_s1  ;;  %v10379_v0 = vpack.c.bf16 %v2909_v58, %v2909_v58 }
 0x223   : > { %3107 = vrot.lane.b32.xlu0 %v10376_v4, %s11402_s1  ;;  %v10378_v4 = vpack.c.bf16 %v2908_v62, %v2908_v62 }
 0x224   : > { %v3094_v17 = vpop.permute.xlu1 %3093 }
 0x225   : > { %v3092_v18 = vpop.permute.xlu0 %3091  ;;  %3187 = vst.msk [vmem:[#allocation13 + $0xec] sm:$0xf] %vm1589_vm3, %v3094_v17 }
 0x226   : > { %3186 = vst.msk [vmem:[#allocation13 + $0xe4] sm:$0xf] %vm1589_vm3, %v3092_v18  ;;  %2202 = vrot.lane.b32.xlu1 %v10254_v15, %s14308_s25  ;;  %v4351_v59 = vld [vmem:[#allocation10 + $0x1b] sm:$0xff]  ;;  %v10420_v18 = vpack.c.bf16 %v3238_v13, %v3238_v13  ;;  %v11044_v13 = vld [vmem:[%s14321_s3 + $0x48] sm:$0xff]  }
 0x227   : > { %2200 = vrot.lane.b32.xlu0 %v10253_v30, %s14308_s25 }
 0x228   : > { %v2187_v26 = vpop.permute.xlu1 %2186 }
 0x229   : > { %v2185_v1 = vpop.permute.xlu0 %2184  ;;  %2281 = vst.msk [vmem:[#allocation13 + $0xe8] sm:$0xf] %vm2251_vm5, %v2187_v26 }
 0x22a   : > { %2280 = vst.msk [vmem:[#allocation13 + $0xe0] sm:$0xf] %vm2251_vm5, %v2185_v1  ;;  %3438 = vrot.lane.b32.xlu1 %v10418_v20, %s11404_s4  ;;  %v10419_v20 = vpack.c.bf16 %v3237_v14, %v3237_v14  ;;  %v11045_v14 = vld [vmem:[%s14321_s3 + $0x8] sm:$0xff]  }
 0x22b   : > { %3436 = vrot.lane.b32.xlu0 %v10417_v19, %s11404_s4  ;;  %v4020_v35 = vpop.f32.mrb[24].mxu0  ;;  %v1341_v19 = vld [vmem:[%s11543_s30 + $0x142] sm:$0xf] }
 0x22c   : > { %v4021_v36 = vadd.f32 %v12705_v27, %v4020_v35  ;;  %v3423_v6 = vpop.permute.xlu1 %3422  ;;  %v4022_v7 = vpop.f32.mrb[25].mxu0  ;;  %v10175_v1 = vpack.c.bf16 %v1341_v19, %v1341_v19  ;;  %v1672_v35 = vld [vmem:[%s11543_s30 + $0x152] sm:$0xf] }
 0x22d   : > { %v3421_v25 = vpop.permute.xlu0 %3420  ;;  %3516 = vst.msk [vmem:[#allocation13 + $0xec] sm:$0xf] %vm1920_vm4, %v3423_v6  ;;  %v4023_v37 = vpop.f32.mrb[26].mxu0  ;;  %v10298_v6 = vpack.c.bf16 %v2334_v32, %v2334_v32  ;;  %v10216_v44 = vpack.c.bf16 %v1672_v35, %v1672_v35  ;;  %v4859_v35 = vld [vmem:[#allocation2 + $0x14] sm:$0xff] }
 0x22e   : > { %3515 = vst.msk [vmem:[#allocation13 + $0xe4] sm:$0xf] %vm1920_vm4, %v3421_v25  ;;  %v4150_v39 = vmax.f32 %v4021_v36, 0.0  ;;  %1213 = vrot.lane.b32.xlu1 %v10133_v33, %s11403_s22  ;;  %v4024_v42 = vadd.f32 %v12705_v27, %v4023_v37  ;;  %v4025_v38 = vpop.f32.mrb[27].mxu0  ;;  %v4379_v33 = vld [vmem:[#allocation2] sm:$0xff] }
 0x22f   : > { %1211 = vrot.lane.b32.xlu0 %v10132_v34, %s11403_s22  ;;  %v2581_v36 = vld [vmem:[%s11543_s30 + $0x164] sm:$0xf]  ;;  %v10422_v37 = vpack.c.bf16 %v4379_v33, %v4379_v33  ;;  %2540 = vst.msk [vmem:[#allocation13 + $0x144] sm:$0x3] %vm968_vm13, %v10298_v6  ;;  %v10448_v6 = vpack.c.bf16 %v4565_v31, %v4565_v31  ;;  %vm5752_vm13 = vcmask 519168  }
 0x230   : > { %4191 = vst.msk [vmem:[#allocation6 + $0x60] sm:$0xff] %vm654_vm7, %v4150_v39  ;;  %v1198_v45 = vpop.permute.xlu1 %1197  ;;  %v4151_v50 = vmax.f32 %v4024_v42, 0.0 }
 0x231   : > { %v1196_v49 = vpop.permute.xlu0 %1195  ;;  %1290 = vst.msk [vmem:[#allocation13 + $0xf8] sm:$0xf] %vm1258_vm2, %v1198_v45  ;;  %v10339_v45 = vpack.c.bf16 %v2581_v36, %v2581_v36  ;;  %v11051_v36 = vld [vmem:[%s14321_s3 + $0x18] sm:$0xff]  }
 0x232   : > { %1289 = vst.msk [vmem:[#allocation13 + $0xf0] sm:$0xf] %vm1258_vm2, %v1196_v49  ;;  %1544 = vrot.lane.b32.xlu1 %v12733_v29, %s11402_s1  ;;  %v10215_v29 = vpack.c.bf16 %v1671_v9, %v1671_v9  ;;  %v11042_v49 = vld [vmem:[%s14321_s3 + $0x40] sm:$0xff]   ;;  %v2003_v9 = vld [vmem:[%s11543_s30 + $0x153] sm:$0xf] }
 0x233   : > { %1542 = vrot.lane.b32.xlu0 %v12735_v57, %s11402_s1  ;;  %4192 = vst.msk [vmem:[#allocation6 + $0x68] sm:$0xff] %vm654_vm7, %v4151_v50  ;;  %v10214_v57 = vpack.c.bf16 %v1670_v54, %v1670_v54  ;;  %v4779_v50 = vld [vmem:[#allocation2 + $0xb] sm:$0xff]  ;;  %v2910_v54 = vld [vmem:[%s11543_s30 + $0x165] sm:$0xf]  ;;  %10584 = vmatprep.subr.bf16.mxu0 %v11042_v49  ;;  %v10257_v58 = vpack.c.bf16 %v2003_v9, %v2003_v9 }
 0x234   : > { %v1529_v55 = vpop.permute.xlu1 %1528  ;;  %v3557_v46 = vld [vmem:[#allocation13 + $0xe8] sm:$0xff]  ;;  %4445 = vst.msk [vmem:[#allocation14] sm:$0xf] %vm4219_vm11, %v10422_v37  ;;  %v10488_v37 = vpack.c.bf16 %v4859_v35, %v4859_v35  ;;  %v11054_v49 = vld [vmem:[%s14321_s3 + $0x68] sm:$0xff]   ;;  %v11056_v9 = vld [vmem:[%s14321_s3 + $0x70] sm:$0xff]  }
 0x235   : > { %v1527_v21 = vpop.permute.xlu0 %1526  ;;  %v3556_v22 = vld [vmem:[#allocation13 + $0xe0] sm:$0xff]  ;;  %1621 = vst.msk [vmem:[#allocation13 + $0xf8] sm:$0xf] %vm1589_vm3, %v1529_v55 }
 0x236   : > { %v11026_v56 = vld [vmem:[#allocation13 + $0xe4] ss:$8 sps:$4 sm:$0xff]   ;;  %1620 = vst.msk [vmem:[#allocation13 + $0xf0] sm:$0xf] %vm1589_vm3, %v1527_v21  ;;  %v9524_v47 = vcombine.low %v3556_v22, %v3557_v46  ;;  %2784 = vrot.lane.b32.xlu1 %v10338_v51, %s11403_s22  ;;  %v10474_v21 = vpack.c.bf16 %v4779_v50, %v4779_v50 }
 0x237   : > { %2782 = vrot.lane.b32.xlu0 %v10337_v8, %s11403_s22  ;;  %v4274_v61 = vld [vmem:[#allocation6 + $0x52] ss:$2 sm:$0xff]  ;;  %9566 = vmatprep.mubr.msk.bf16.mxu0 %vm3874_vm6, %v11026_v56 }
 0x238   : > { %v4310_v48 = vmax.f32 %v4232_v60, %v4274_v61  ;;  %v2769_v52 = vpop.permute.xlu1 %2768  ;;  %4083 = vmatmul.mubr.bf16.gmra.mrb[56].mxu0 %v9524_v47  ;;  %4845 = vst.msk [vmem:[#allocation14 + $0x4] sm:$0xf] %vm4219_vm11, %v10474_v21  ;;  %v10380_v60 = vpack.c.bf16 %v2910_v54, %v2910_v54 }
 0x239   : > { %v2767_v63 = vpop.permute.xlu0 %2766  ;;  %2860 = vst.msk [vmem:[#allocation13 + $0xfc] sm:$0xf] %vm1258_vm2, %v2769_v52  ;;  %v4458_v52 = vld [vmem:[#allocation2 + $0x1] sm:$0xff] }
 0x23a   : > { %2859 = vst.msk [vmem:[#allocation13 + $0xf4] sm:$0xf] %vm1258_vm2, %v2767_v63  ;;  %1875 = vrot.lane.b32.xlu1 %v10215_v29, %s11404_s4  ;;  %v4380_v29 = vld [vmem:[#allocation2 + $0x8] sm:$0xff] }
 0x23b   : > { %4331 = vst.msk [vmem:[#allocation10 + $0x28] sm:$0xff] %vm654_vm7, %v4310_v48  ;;  %1873 = vrot.lane.b32.xlu0 %v10214_v57, %s11404_s4  ;;  %v11043_v57 = vld [vmem:[%s14321_s3] sm:$0xff]   ;;  %v10423_v61 = vpack.c.bf16 %v4380_v29, %v4380_v29 }
 0x23c   : > { %v1860_v11 = vpop.permute.xlu1 %1859  ;;  %v3239_v63 = vld [vmem:[%s11543_s30 + $0x166] sm:$0xf]  ;;  %10585 = vmatpush3.bf16.msra.mxu0 %v11043_v57 }
 0x23d   : > { %v1858_v40 = vpop.permute.xlu0 %1857  ;;  %1952 = vst.msk [vmem:[#allocation13 + $0xf8] sm:$0xf] %vm1920_vm4, %v1860_v11  ;;  %10586 = vmatprep.subr.bf16.mxu0 %v11044_v13 }
 0x23e   : > { %1951 = vst.msk [vmem:[#allocation13 + $0xf0] sm:$0xf] %vm1920_vm4, %v1858_v40  ;;  %3113 = vrot.lane.b32.xlu1 %v10379_v0, %s11402_s1 }
 0x23f   : > { %3111 = vrot.lane.b32.xlu0 %v10378_v4, %s11402_s1  ;;  %4446 = vst.msk [vmem:[#allocation14 + $0xc] sm:$0xf] %vm4219_vm11, %v10423_v61 }
 0x240   : > { %v3098_v15 = vpop.permute.xlu1 %3097  ;;  %10587 = vmatpush3.bf16.msra.mxu0 %v11045_v14 }
 0x241   : > { %v3096_v30 = vpop.permute.xlu0 %3095  ;;  %3189 = vst.msk [vmem:[#allocation13 + $0xfc] sm:$0xf] %vm1589_vm3, %v3098_v15  ;;  %v10435_v15 = vpack.c.bf16 %v4458_v52, %v4458_v52 }
 0x242   : > { %v4352_v16 = vld [vmem:[#allocation10 + $0x24] sm:$0xff]  ;;  %3188 = vst.msk [vmem:[#allocation13 + $0xf4] sm:$0xf] %vm1589_vm3, %v3096_v30  ;;  %2206 = vrot.lane.b32.xlu1 %v10256_v41, %s14308_s25  ;;  %v10421_v30 = vpack.c.bf16 %v3239_v63, %v3239_v63 }
 0x243   : > { %v4353_v17 = vmax.f32 %v4351_v59, %v4352_v16  ;;  %2204 = vrot.lane.b32.xlu0 %v10255_v12, %s14308_s25  ;;  %v4858_v59 = vld [vmem:[#allocation2 + $0xc] sm:$0xff]  ;;  %v4234_v16 = vld [vmem:[#allocation6 + $0x61] ss:$2 sm:$0xff] }
 0x244   : > { %v2191_v24 = vpop.permute.xlu1 %2190  ;;  %v10487_v3 = vpack.c.bf16 %v4858_v59, %v4858_v59 }
 0x245   : > { %4354 = vst.msk [vmem:[#allocation2 + $0x20] sm:$0xff] %vm654_vm7, %v4353_v17  ;;  %v2189_v26 = vpop.permute.xlu0 %2188 }
 0x246   : > { %2283 = vst.msk [vmem:[#allocation13 + $0xf8] sm:$0xf] %vm2251_vm5, %v2191_v24  ;;  %2282 = vst.msk [vmem:[#allocation13 + $0xf0] sm:$0xf] %vm2251_vm5, %v2189_v26  ;;  %3442 = vrot.lane.b32.xlu1 %v10420_v18, %s11404_s4  ;;  %v4459_v18 = vld [vmem:[#allocation2 + $0x9] sm:$0xff] }
 0x247   : > { %3440 = vrot.lane.b32.xlu0 %v10419_v20, %s11404_s4  ;;  %v4028_v34 = vpop.f32.mrb[28].mxu0  ;;  %v11048_v24 = vld [vmem:[%s14321_s3 + $0x50] sm:$0xff]  }
 0x248   : > { %v4029_v25 = vadd.f32 %v12705_v27, %v4028_v34  ;;  %v3427_v7 = vpop.permute.xlu1 %3426  ;;  %v4030_v42 = vpop.f32.mrb[29].mxu0  ;;  %10588 = vmatprep.subr.bf16.mxu0 %v11048_v24  ;;  %v11050_v34 = vld [vmem:[%s14321_s3 + $0x58] sm:$0xff]  }
 0x249   : > { %v3425_v39 = vpop.permute.xlu0 %3424  ;;  %3518 = vst.msk [vmem:[#allocation13 + $0xfc] sm:$0xf] %vm1920_vm4, %v3427_v7  ;;  %v4031_v43 = vpop.f32.mrb[30].mxu0  ;;  %v11052_v42 = vld [vmem:[%s14321_s3 + $0x60] sm:$0xff]  }
 0x24a   : > { %3517 = vst.msk [vmem:[#allocation13 + $0xf4] sm:$0xf] %vm1920_vm4, %v3425_v39  ;;  %v4152_v38 = vmax.f32 %v4029_v25, 0.0  ;;  %1546 = vrot.lane.b32.xlu1 %v10175_v1, %s11402_s1  ;;  %v4032_v51 = vadd.f32 %v12705_v27, %v4031_v43  ;;  %v4033_v8 = vpop.f32.mrb[31].mxu0  ;;  %v11049_v1 = vld [vmem:[%s14321_s3 + $0x10] sm:$0xff]  }
 0x24b   : > { %1215 = vrot.lane.b32.xlu0 %v10134_v28, %s11403_s22  ;;  %v10436_v28 = vpack.c.bf16 %v4459_v18, %v4459_v18  ;;  %10589 = vmatpush3.bf16.msra.mxu0 %v11049_v1  ;;  %v4566_v25 = vld [vmem:[#allocation2 + $0xa] sm:$0xff] }
 0x24c   : > { %v5174_v55 = vld [vmem:[#allocation2 + $0x1e] sm:$0xff]  ;;  %4193 = vst.msk [vmem:[#allocation6 + $0x70] sm:$0xff] %vm654_vm7, %v4152_v38  ;;  %v1202_v22 = vpop.permute.xlu1 %1201  ;;  %v4153_v47 = vmax.f32 %v4032_v51, 0.0  ;;  %10590 = vmatprep.subr.bf16.mxu0 %v11050_v34  ;;  %v10449_v43 = vpack.c.bf16 %v4566_v25, %v4566_v25  ;;  %v11055_v51 = vld [vmem:[%s14321_s3 + $0x28] sm:$0xff]  }
 0x24d   : > { %v1200_v46 = vpop.permute.xlu0 %1199  ;;  %v10527_v56 = vpack.c.bf16 %v5174_v55, %v5174_v55  ;;  %1292 = vst.msk [vmem:[#allocation13 + $0x108] sm:$0xf] %vm1258_vm2, %v1202_v22  ;;  %v4781_v62 = vld [vmem:[#allocation2 + $0x1b] sm:$0xff] }
 0x24e   : > { %1291 = vst.msk [vmem:[#allocation13 + $0x100] sm:$0xf] %vm1258_vm2, %v1200_v46  ;;  %1877 = vrot.lane.b32.xlu1 %v10216_v44, %s11404_s4  ;;  %v4383_v48 = vld [vmem:[#allocation2 + $0x20] sm:$0xff]  ;;  %v10476_v0 = vpack.c.bf16 %v4781_v62, %v4781_v62  ;;  %v11058_v62 = vld [vmem:[%s14321_s3 + $0x78] sm:$0xff]  }
 0x24f   : > { %2786 = vrot.lane.b32.xlu0 %v10339_v45, %s11403_s22  ;;  %5240 = vst.msk [vmem:[#allocation14 + $0x14] sm:$0xf] %vm4219_vm11, %v10527_v56  ;;  %v10426_v4 = vpack.c.bf16 %v4383_v48, %v4383_v48  ;;  %10591 = vmatpush3.bf16.msra.mxu0 %v11051_v36  ;;  %v11053_v38 = vld [vmem:[%s14321_s3 + $0x20] sm:$0xff]   ;;  %v5068_v56 = vld [vmem:[#allocation2 + $0x15] sm:$0xff] }
 0x250   : > { %4194 = vst.msk [vmem:[#allocation6 + $0x78] sm:$0xff] %vm654_vm7, %v4153_v47  ;;  %v1533_v5 = vpop.permute.xlu1 %1532  ;;  %v3559_v40 = vld [vmem:[#allocation13 + $0xf8] sm:$0xff]  ;;  %10592 = vmatprep.subr.bf16.mxu0 %v11052_v42  ;;  %v4964_v50 = vld [vmem:[#allocation2 + $0x1c] sm:$0xff]  ;;  %v4673_v47 = vld [vmem:[#allocation2 + $0x12] sm:$0xff]  ;;  %v10513_v63 = vpack.c.bf16 %v5068_v56, %v5068_v56 }
 0x251   : > { %v1531_v10 = vpop.permute.xlu0 %1530  ;;  %v3558_v11 = vld [vmem:[#allocation13 + $0xf0] sm:$0xff]  ;;  %1623 = vst.msk [vmem:[#allocation13 + $0x108] sm:$0xf] %vm1589_vm3, %v1533_v5  ;;  %v10501_v22 = vpack.c.bf16 %v4964_v50, %v4964_v50 }
 0x252   : > { %v11029_v41 = vld [vmem:[#allocation13 + $0xf4] ss:$8 sps:$4 sm:$0xff]   ;;  %1622 = vst.msk [vmem:[#allocation13 + $0x100] sm:$0xf] %vm1589_vm3, %v1531_v10  ;;  %v9526_v12 = vcombine.low %v3558_v11, %v3559_v40  ;;  %2208 = vrot.lane.b32.xlu1 %v10257_v58, %s14308_s25  ;;  %v11057_v58 = vld [vmem:[%s14321_s3 + $0x30] sm:$0xff]   ;;  %v11059_v11 = vld [vmem:[%s14321_s3 + $0x38] sm:$0xff]   ;;  %s648_s3 = scalar_lea.vmem %s14303_s19, %s14331_s24 }
 0x253   : > { %4847 = vst.msk [vmem:[#allocation14 + $0x1c] sm:$0xf] %vm4219_vm11, %v10476_v0  ;;  %4449 = vst.msk [vmem:[#allocation14 + $0x30] sm:$0xf] %vm4219_vm11, %v10426_v4  ;;  %3115 = vrot.lane.b32.xlu0 %v10380_v60, %s11402_s1  ;;  %v4276_v17 = vld [vmem:[#allocation6 + $0x62] ss:$2 sm:$0xff]  ;;  %9567 = vmatprep.mubr.msk.bf16.mxu0 %vm3874_vm6, %v11029_v41  ;;  %v10462_v0 = vpack.c.bf16 %v4673_v47, %v4673_v47 }
 0x254   : > { %v4311_v20 = vmax.f32 %v4234_v16, %v4276_v17  ;;  %v2773_v19 = vpop.permute.xlu1 %2772  ;;  %4091 = vmatmul.mubr.bf16.gmra.mrb[60].mxu0 %v9526_v12  ;;  %s14310_s1 = smov 64   ;;  %v5069_v5 = vld [vmem:[#allocation2 + $0x1d] sm:$0xff]  ;;  %v4460_v10 = vld [vmem:[#allocation2 + $0x11] sm:$0xff] }
 0x255   : > { %v2771_v23 = vpop.permute.xlu0 %2770  ;;  %2862 = vst.msk [vmem:[#allocation13 + $0x10c] sm:$0xf] %vm1258_vm2, %v2773_v19  ;;  %10593 = vmatpush3.bf16.msra.mxu0 %v11053_v38  ;;  %v10514_v12 = vpack.c.bf16 %v5069_v5, %v5069_v5  ;;  %v10437_v13 = vpack.c.bf16 %v4460_v10, %v4460_v10  ;;  %v4461_v16 = vld [vmem:[#allocation2 + $0x19] sm:$0xff] }
 0x256   : > { %2861 = vst.msk [vmem:[#allocation13 + $0x104] sm:$0xf] %vm1258_vm2, %v2771_v23  ;;  %v11032_v26 = vld [vmem:[#allocation14 + $0x8] ss:$12 sps:$4 sm:$0xff]   ;;  %4511 = vrot.lane.b32.xlu1 %v10435_v15, %s14309_s2  ;;  %10594 = vmatprep.subr.bf16.mxu0 %v11054_v49  ;;  %v10438_v24 = vpack.c.bf16 %v4461_v16, %v4461_v16 }
 0x257   : > { %4332 = vst.msk [vmem:[#allocation10 + $0x30] sm:$0xff] %vm654_vm7, %v4311_v20  ;;  %3444 = vrot.lane.b32.xlu0 %v10421_v30, %s11404_s4  ;;  %10877 = vmatmul.mubr.msk.bf16.vlgmr.msra.gmra.mrb[0].mxu1 %vm654_vm7, %v11032_v26  ;;  %v4236_v17 = vld [vmem:[#allocation6 + $0x71] ss:$2 sm:$0xff]  ;;  %s9125_s4 = sshll.u32 %s14331_s24, 1 }
 0x258   : > { %v1864_v32 = vpop.permute.xlu1 %1863  ;;  %10880 = vmatprep.mubr.msk.bf16.mxu1 %vm11407_vm10, %v11406_v53  ;;  %s652_s30 = scalar_lea.vmem %s14304_s20, %s9125_s4 }
 0x259   : > { %v1862_v33 = vpop.permute.xlu0 %1861  ;;  %1954 = vst.msk [vmem:[#allocation13 + $0x108] sm:$0xf] %vm1920_vm4, %v1864_v32  ;;  %10595 = vmatpush3.bf16.msra.mxu0 %v11055_v51  ;;  %v4568_v51 = vld [vmem:[#allocation2 + $0x1a] sm:$0xff] }
 0x25a   : > { %1953 = vst.msk [vmem:[#allocation13 + $0x100] sm:$0xf] %vm1920_vm4, %v1862_v33  ;;  %4911 = vrot.lane.b32.xlu1 %v10487_v3, %s14309_s2  ;;  %10596 = vmatprep.subr.bf16.mxu0 %v11056_v9 }
 0x25b   : > { %4513 = vrot.lane.b32.xlu0 %v10436_v28, %s14309_s2 }
 0x25c   : > { %v3102_v7 = vpop.permute.xlu1 %3101 }
 0x25d   : > { %v3100_v39 = vpop.permute.xlu0 %3099  ;;  %3191 = vst.msk [vmem:[#allocation13 + $0x10c] sm:$0xf] %vm1589_vm3, %v3102_v7  ;;  %10597 = vmatpush3.bf16.msra.mxu0 %v11057_v58  ;;  %v10451_v58 = vpack.c.bf16 %v4568_v51, %v4568_v51 }
 0x25e   : > { %3190 = vst.msk [vmem:[#allocation13 + $0x104] sm:$0xf] %vm1589_vm3, %v3100_v39  ;;  %4618 = vrot.lane.b32.xlu1 %v10448_v6, %s14310_s1  ;;  %10598 = vmatprep.subr.bf16.mxu0 %v11058_v62  ;;  %v4355_v31 = vld [vmem:[#allocation10 + $0x2d] sm:$0xff] }
 0x25f   : > { %4913 = vrot.lane.b32.xlu0 %v10488_v37, %s14309_s2 }
 0x260   : > { %v2195_v44 = vpop.permute.xlu1 %2194 }
 0x261   : > { %v2193_v45 = vpop.permute.xlu0 %2192  ;;  %2285 = vst.msk [vmem:[#allocation13 + $0x108] sm:$0xf] %vm2251_vm5, %v2195_v44  ;;  %10599 = vmatpush3.bf16.msra.mxu0 %v11059_v11 }
 0x262   : > { %2284 = vst.msk [vmem:[#allocation13 + $0x100] sm:$0xf] %vm2251_vm5, %v2193_v45  ;;  %5016 = vrot.lane.b32.xlu1 %v10488_v37, %s14310_s1 }
 0x263   : > { %4620 = vrot.lane.b32.xlu0 %v10449_v43, %s14310_s1  ;;  %v4036_v8 = vpop.f32.mrb[32].mxu0 }
 0x264   : > { %v4037_v54 = vadd.f32 %v12705_v27, %v4036_v8  ;;  %v3431_v55 = vpop.permute.xlu1 %3430  ;;  %v4038_v46 = vpop.f32.mrb[33].mxu0 }
 0x265   : > { %v3429_v21 = vpop.permute.xlu0 %3428  ;;  %3520 = vst.msk [vmem:[#allocation13 + $0x10c] sm:$0xf] %vm1920_vm4, %v3431_v55  ;;  %v4039_v57 = vpop.f32.mrb[34].mxu0 }
 0x266   : > { %3519 = vst.msk [vmem:[#allocation13 + $0x104] sm:$0xf] %vm1920_vm4, %v3429_v21  ;;  %v4154_v29 = vmax.f32 %v4037_v54, 0.0  ;;  %4725 = vrot.lane.b32.xlu1 %v10449_v43, %s14308_s25  ;;  %v4040_v60 = vadd.f32 %v12705_v27, %v4039_v57  ;;  %v4041_v61 = vpop.f32.mrb[35].mxu0 }
 0x267   : > { %5018 = vrot.lane.b32.xlu0 %v10501_v22, %s14310_s1 }
 0x268   : > { %4195 = vst.msk [vmem:[#allocation6 + $0x80] sm:$0xff] %vm654_vm7, %v4154_v29  ;;  %v1206_v48 = vpop.permute.xlu1 %1205  ;;  %v4155_v4 = vmax.f32 %v4040_v60, 0.0 }
 0x269   : > { %v1204_v52 = vpop.permute.xlu0 %1203  ;;  %1294 = vst.msk [vmem:[#allocation13 + $0x118] sm:$0xf] %vm1258_vm2, %v1206_v48 }
 0x26a   : > { %1293 = vst.msk [vmem:[#allocation13 + $0x110] sm:$0xf] %vm1258_vm2, %v1204_v52  ;;  %5121 = vrot.lane.b32.xlu1 %v10513_v63, %s14308_s25 }
 0x26b   : > { %4727 = vrot.lane.b32.xlu0 %v10462_v0, %s14308_s25  ;;  %4196 = vst.msk [vmem:[#allocation6 + $0x88] sm:$0xff] %vm654_vm7, %v4155_v4 }
 0x26c   : > { %v1537_v40 = vpop.permute.xlu1 %1536  ;;  %v3561_v15 = vld [vmem:[#allocation13 + $0x108] sm:$0xff] }
 0x26d   : > { %v1535_v41 = vpop.permute.xlu0 %1534  ;;  %v3560_v14 = vld [vmem:[#allocation13 + $0x100] sm:$0xff]  ;;  %1625 = vst.msk [vmem:[#allocation13 + $0x118] sm:$0xf] %vm1589_vm3, %v1537_v40 }
 0x26e   : > { %v11033_v30 = vld [vmem:[#allocation13 + $0x104] ss:$8 sps:$4 sm:$0xff]   ;;  %1624 = vst.msk [vmem:[#allocation13 + $0x110] sm:$0xf] %vm1589_vm3, %v1535_v41  ;;  %v9528_v59 = vcombine.low %v3560_v14, %v3561_v15  ;;  %4515 = vrot.lane.b32.xlu1 %v10437_v13, %s14309_s2  ;;  %v4462_v13 = vld [vmem:[#allocation2 + $0x21] sm:$0xff] }
 0x26f   : > { %5123 = vrot.lane.b32.xlu0 %v10514_v12, %s14308_s25  ;;  %v4278_v18 = vld [vmem:[#allocation6 + $0x72] ss:$2 sm:$0xff]  ;;  %9568 = vmatprep.mubr.msk.bf16.mxu0 %vm3874_vm6, %v11033_v30  ;;  %v4675_v12 = vld [vmem:[#allocation2 + $0x22] sm:$0xff] }
 0x270   : > { %v4312_v20 = vmax.f32 %v4236_v17, %v4278_v18  ;;  %v2777_v19 = vpop.permute.xlu1 %2776  ;;  %4099 = vmatmul.mubr.bf16.gmra.mrb[64].mxu0 %v9528_v59  ;;  %v10464_v30 = vpack.c.bf16 %v4675_v12, %v4675_v12  ;;  %v10439_v59 = vpack.c.bf16 %v4462_v13, %v4462_v13 }
 0x271   : > { %v2775_v23 = vpop.permute.xlu0 %2774  ;;  %2864 = vst.msk [vmem:[#allocation13 + $0x11c] sm:$0xf] %vm1258_vm2, %v2777_v19 }
 0x272   : > { %2863 = vst.msk [vmem:[#allocation13 + $0x114] sm:$0xf] %vm1258_vm2, %v2775_v23  ;;  %4915 = vrot.lane.b32.xlu1 %v10501_v22, %s14309_s2 }
 0x273   : > { %4333 = vst.msk [vmem:[#allocation10 + $0x38] sm:$0xff] %vm654_vm7, %v4312_v20  ;;  %4517 = vrot.lane.b32.xlu0 %v10438_v24, %s14309_s2 }
 0x274   : > { %v1868_v26 = vpop.permute.xlu1 %1867 }
 0x275   : > { %v1866_v1 = vpop.permute.xlu0 %1865  ;;  %1956 = vst.msk [vmem:[#allocation13 + $0x118] sm:$0xf] %vm1920_vm4, %v1868_v26 }
 0x276   : > { %1955 = vst.msk [vmem:[#allocation13 + $0x110] sm:$0xf] %vm1920_vm4, %v1866_v1  ;;  %4622 = vrot.lane.b32.xlu1 %v10462_v0, %s14310_s1  ;;  %v4238_v0 = vld [vmem:[#allocation6 + $0x81] ss:$2 sm:$0xff] }
 0x278   : > { %v3106_v3 = vpop.permute.xlu1 %3105 }
 0x279   : > { %v3104_v28 = vpop.permute.xlu0 %3103  ;;  %3193 = vst.msk [vmem:[#allocation13 + $0x11c] sm:$0xf] %vm1589_vm3, %v3106_v3 }
 0x27a   : > { %3192 = vst.msk [vmem:[#allocation13 + $0x114] sm:$0xf] %vm1589_vm3, %v3104_v28  ;;  %v4356_v32 = vld [vmem:[#allocation10 + $0x36] sm:$0xff] }
 0x27b   : > { %v4357_v33 = vmax.f32 %v4355_v31, %v4356_v32  ;;  %v12993_v31 = vld [vmem:[%s14292_s8] ss:$0 sm:$0xff] }
 0x27c   : > { %v2199_v34 = vpop.permute.xlu1 %2198 }
 0x27d   : > { %v2197_v35 = vpop.permute.xlu0 %2196  ;;  %4358 = vst.msk [vmem:[#allocation2 + $0x2a] sm:$0xff] %vm654_vm7, %v4357_v33 }
 0x27e   : > { %2287 = vst.msk [vmem:[#allocation13 + $0x118] sm:$0xf] %vm2251_vm5, %v2199_v34  ;;  %2286 = vst.msk [vmem:[#allocation13 + $0x110] sm:$0xf] %vm2251_vm5, %v2197_v35 }
 0x27f   : > { %v4044_v36 = vpop.f32.mrb[36].mxu0 }
 0x280   : > { %v4045_v6 = vadd.f32 %v12705_v27, %v4044_v36  ;;  %v3435_v25 = vpop.permute.xlu1 %3434  ;;  %v4046_v39 = vpop.f32.mrb[37].mxu0 }
 0x281   : > { %v3433_v7 = vpop.permute.xlu0 %3432  ;;  %3522 = vst.msk [vmem:[#allocation13 + $0x11c] sm:$0xf] %vm1920_vm4, %v3435_v25  ;;  %v4047_v42 = vpop.f32.mrb[38].mxu0 }
 0x282   : > { %3521 = vst.msk [vmem:[#allocation13 + $0x114] sm:$0xf] %vm1920_vm4, %v3433_v7  ;;  %v4156_v37 = vmax.f32 %v4045_v6, 0.0  ;;  %v4048_v38 = vadd.f32 %v12705_v27, %v4047_v42  ;;  %v4049_v43 = vpop.f32.mrb[39].mxu0 }
 0x284   : > { %v4861_v44 = vld [vmem:[#allocation2 + $0x24] sm:$0xff]  ;;  %4197 = vst.msk [vmem:[#allocation6 + $0x90] sm:$0xff] %vm654_vm7, %v4156_v37  ;;  %v1210_v45 = vpop.permute.xlu1 %1209  ;;  %v4157_v9 = vmax.f32 %v4048_v38, 0.0  ;;  %v4966_v52 = vld [vmem:[#allocation2 + $0x2c] sm:$0xff] }
 0x285   : > { %v1208_v49 = vpop.permute.xlu0 %1207  ;;  %v10490_v50 = vpack.c.bf16 %v4861_v44, %v4861_v44  ;;  %v5175_v8 = vld [vmem:[#allocation2 + $0x26] sm:$0xff]  ;;  %1296 = vst.msk [vmem:[#allocation13 + $0x128] sm:$0xf] %vm1258_vm2, %v1210_v45  ;;  %v10503_v40 = vpack.c.bf16 %v4966_v52, %v4966_v52 }
 0x286   : > { %1295 = vst.msk [vmem:[#allocation13 + $0x120] sm:$0xf] %vm1258_vm2, %v1208_v49  ;;  %v10528_v54 = vpack.c.bf16 %v5175_v8, %v5175_v8  ;;  %v4782_v55 = vld [vmem:[#allocation2 + $0x23] sm:$0xff]  ;;  %v4783_v21 = vld [vmem:[#allocation2 + $0x2b] sm:$0xff] }
 0x287   : > { %v4384_v22 = vld [vmem:[#allocation2 + $0x28] sm:$0xff]  ;;  %4917 = vrot.lane.b32.xlu0 %v10490_v50, %s14309_s2  ;;  %5020 = vrot.lane.b32.xlu1 %v10490_v50, %s14310_s1  ;;  %v10477_v46 = vpack.c.bf16 %v4782_v55, %v4782_v55  ;;  %v10478_v56 = vpack.c.bf16 %v4783_v21, %v4783_v21  ;;  %4198 = vst.msk [vmem:[#allocation6 + $0x98] sm:$0xff] %vm654_vm7, %v4157_v9 }
 0x288   : > { %v10427_v47 = vpack.c.bf16 %v4384_v22, %v4384_v22  ;;  %5241 = vst.msk [vmem:[#allocation14 + $0x20] sm:$0xf] %vm4219_vm11, %v10528_v54  ;;  %v1541_v29 = vpop.permute.xlu1 %1540  ;;  %v3563_v61 = vld [vmem:[#allocation13 + $0x118] sm:$0xff] }
 0x289   : > { %v1539_v57 = vpop.permute.xlu0 %1538  ;;  %v3562_v60 = vld [vmem:[#allocation13 + $0x110] sm:$0xff]  ;;  %4848 = vst.msk [vmem:[#allocation14 + $0x28] sm:$0xf] %vm4219_vm11, %v10477_v46  ;;  %4849 = vst.msk [vmem:[#allocation14 + $0x34] sm:$0xf] %vm4219_vm11, %v10478_v56 }
 0x28a   : > { %v11035_v62 = vld [vmem:[#allocation13 + $0x114] ss:$8 sps:$4 sm:$0xff]   ;;  %4450 = vst.msk [vmem:[#allocation14 + $0x3c] sm:$0xf] %vm4219_vm11, %v10427_v47  ;;  %v9530_v48 = vcombine.low %v3562_v60, %v3563_v61 }
 0x28b   : > { %1627 = vst.msk [vmem:[#allocation13 + $0x128] sm:$0xf] %vm1589_vm3, %v1541_v29  ;;  %1626 = vst.msk [vmem:[#allocation13 + $0x120] sm:$0xf] %vm1589_vm3, %v1539_v57  ;;  %v5070_v63 = vld [vmem:[#allocation2 + $0x25] sm:$0xff]  ;;  %4624 = vrot.lane.b32.xlu0 %v10451_v58, %s14310_s1  ;;  %4729 = vrot.lane.b32.xlu1 %v10451_v58, %s14308_s25 }
 0x28c   : > { %v4280_v4 = vld [vmem:[#allocation6 + $0x82] ss:$2 sm:$0xff]  ;;  %9569 = vmatprep.mubr.msk.bf16.mxu0 %vm3874_vm6, %v11035_v62  ;;  %v2781_v10 = vpop.permute.xlu1 %2780  ;;  %v10515_v41 = vpack.c.bf16 %v5070_v63, %v5070_v63 }
 0x28d   : > { %v4313_v5 = vmax.f32 %v4238_v0, %v4280_v4  ;;  %v2779_v11 = vpop.permute.xlu0 %2778  ;;  %4107 = vmatmul.mubr.bf16.gmra.mrb[68].mxu0 %v9530_v48  ;;  %2866 = vst.msk [vmem:[#allocation13 + $0x12c] sm:$0xf] %vm1258_vm2, %v2781_v10  ;;  %v4463_v10 = vld [vmem:[#allocation2 + $0x29] sm:$0xff] }
 0x28e   : > { %2865 = vst.msk [vmem:[#allocation13 + $0x124] sm:$0xf] %vm1258_vm2, %v2779_v11  ;;  %v4240_v42 = vld [vmem:[#allocation6 + $0x91] ss:$2 sm:$0xff] }
 0x28f   : > { %4334 = vst.msk [vmem:[#allocation10 + $0x40] sm:$0xff] %vm654_vm7, %v4313_v5  ;;  %5022 = vrot.lane.b32.xlu0 %v10503_v40, %s14310_s1  ;;  %5125 = vrot.lane.b32.xlu1 %v10515_v41, %s14308_s25  ;;  %v4676_v11 = vld [vmem:[#allocation2 + $0x2a] sm:$0xff] }
 0x290   : > { %v1872_v14 = vpop.permute.xlu1 %1871 }
 0x291   : > { %v1870_v15 = vpop.permute.xlu0 %1869  ;;  %1958 = vst.msk [vmem:[#allocation13 + $0x128] sm:$0xf] %vm1920_vm4, %v1872_v14 }
 0x292   : > { %1957 = vst.msk [vmem:[#allocation13 + $0x120] sm:$0xf] %vm1920_vm4, %v1870_v15 }
 0x293   : > { %4731 = vrot.lane.b32.xlu0 %v10464_v30, %s14308_s25  ;;  %4519 = vrot.lane.b32.xlu1 %v10439_v59, %s14309_s2 }
 0x294   : > { %v3110_v16 = vpop.permute.xlu1 %3109 }
 0x295   : > { %v3108_v17 = vpop.permute.xlu0 %3107  ;;  %3195 = vst.msk [vmem:[#allocation13 + $0x12c] sm:$0xf] %vm1589_vm3, %v3110_v16 }
 0x296   : > { %3194 = vst.msk [vmem:[#allocation13 + $0x124] sm:$0xf] %vm1589_vm3, %v3108_v17  ;;  %v4359_v9 = vld [vmem:[#allocation10 + $0x3f] sm:$0xff] }
 0x297   : > { %4919 = vrot.lane.b32.xlu1 %v10503_v40, %s14309_s2 }
 0x298   : > { %v2203_v18 = vpop.permute.xlu1 %2202 }
 0x299   : > { %v2201_v20 = vpop.permute.xlu0 %2200  ;;  %2289 = vst.msk [vmem:[#allocation13 + $0x128] sm:$0xf] %vm2251_vm5, %v2203_v18 }
 0x29a   : > { %2288 = vst.msk [vmem:[#allocation13 + $0x120] sm:$0xf] %vm2251_vm5, %v2201_v20  ;;  %v10440_v20 = vpack.c.bf16 %v4463_v10, %v4463_v10 }
 0x29b   : > { %4626 = vrot.lane.b32.xlu1 %v10464_v30, %s14310_s1  ;;  %v4052_v19 = vpop.f32.mrb[40].mxu0 }
 0x29c   : > { %v4053_v23 = vadd.f32 %v12705_v27, %v4052_v19  ;;  %v3439_v24 = vpop.permute.xlu1 %3438  ;;  %v4054_v1 = vpop.f32.mrb[41].mxu0  ;;  %v10465_v19 = vpack.c.bf16 %v4676_v11, %v4676_v11 }
 0x29d   : > { %v3437_v26 = vpop.permute.xlu0 %3436  ;;  %3524 = vst.msk [vmem:[#allocation13 + $0x12c] sm:$0xf] %vm1920_vm4, %v3439_v24  ;;  %v4055_v28 = vpop.f32.mrb[42].mxu0 }
 0x29e   : > { %3523 = vst.msk [vmem:[#allocation13 + $0x124] sm:$0xf] %vm1920_vm4, %v3437_v26  ;;  %v4158_v3 = vmax.f32 %v4053_v23, 0.0  ;;  %v4056_v32 = vadd.f32 %v12993_v31, %v4055_v28  ;;  %v4057_v33 = vpop.f32.mrb[43].mxu0 }
 0x2a0   : > { %4199 = vst.msk [vmem:[#allocation6 + $0xa0] sm:$0xff] %vm654_vm7, %v4158_v3  ;;  %v1214_v27 = vpop.permute.xlu1 %1213  ;;  %v4159_v35 = vmax.f32 %v4056_v32, 0.0 }
 0x2a1   : > { %v1212_v34 = vpop.permute.xlu0 %1211  ;;  %1298 = vst.msk [vmem:[#allocation13 + $0x138] sm:$0xf] %vm1258_vm2, %v1214_v27 }
 0x2a2   : > { %1297 = vst.msk [vmem:[#allocation13 + $0x130] sm:$0xf] %vm1258_vm2, %v1212_v34 }
 0x2a3   : > { %4200 = vst.msk [vmem:[#allocation6 + $0xa8] sm:$0xff] %vm654_vm7, %v4159_v35 }
 0x2a4   : > { %v1545_v36 = vpop.permute.xlu1 %1544  ;;  %v3565_v7 = vld [vmem:[#allocation13 + $0x128] sm:$0xff] }
 0x2a5   : > { %v1543_v6 = vpop.permute.xlu0 %1542  ;;  %v3564_v25 = vld [vmem:[#allocation13 + $0x120] sm:$0xff]  ;;  %1629 = vst.msk [vmem:[#allocation13 + $0x138] sm:$0xf] %vm1589_vm3, %v1545_v36 }
 0x2a6   : > { %v11037_v39 = vld [vmem:[#allocation13 + $0x124] ss:$8 sps:$4 sm:$0xff]   ;;  %1628 = vst.msk [vmem:[#allocation13 + $0x130] sm:$0xf] %vm1589_vm3, %v1543_v6  ;;  %v9532_v37 = vcombine.low %v3564_v25, %v3565_v7 }
 0x2a7   : > { %9570 = vmatprep.mubr.msk.bf16.mxu0 %vm3874_vm6, %v11037_v39  ;;  %v4282_v38 = vld [vmem:[#allocation6 + $0x92] ss:$2 sm:$0xff] }
 0x2a8   : > { %4115 = vmatmul.mubr.bf16.gmra.mrb[72].mxu0 %v9532_v37  ;;  %v4314_v43 = vmax.f32 %v4240_v42, %v4282_v38  ;;  %v2785_v44 = vpop.permute.xlu1 %2784 }
 0x2a9   : > { %v2783_v45 = vpop.permute.xlu0 %2782  ;;  %2868 = vst.msk [vmem:[#allocation13 + $0x13c] sm:$0xf] %vm1258_vm2, %v2785_v44 }
 0x2aa   : > { %2867 = vst.msk [vmem:[#allocation13 + $0x134] sm:$0xf] %vm1258_vm2, %v2783_v45  ;;  %v4242_v28 = vld [vmem:[#allocation6 + $0xa1] ss:$2 sm:$0xff]  ;;  %vm4550_vm2 = vcmask 519424  }
 0x2ab   : > { %4335 = vst.msk [vmem:[#allocation10 + $0x48] sm:$0xff] %vm654_vm7, %v4314_v43 }
 0x2ac   : > { %v1876_v49 = vpop.permute.xlu1 %1875 }
 0x2ad   : > { %v1874_v50 = vpop.permute.xlu0 %1873  ;;  %1960 = vst.msk [vmem:[#allocation13 + $0x138] sm:$0xf] %vm1920_vm4, %v1876_v49 }
 0x2ae   : > { %1959 = vst.msk [vmem:[#allocation13 + $0x130] sm:$0xf] %vm1920_vm4, %v1874_v50 }
 0x2b0   : > { %v3114_v51 = vpop.permute.xlu1 %3113 }
 0x2b1   : > { %v3112_v8 = vpop.permute.xlu0 %3111  ;;  %3197 = vst.msk [vmem:[#allocation13 + $0x13c] sm:$0xf] %vm1589_vm3, %v3114_v51 }
 0x2b2   : > { %3196 = vst.msk [vmem:[#allocation13 + $0x134] sm:$0xf] %vm1589_vm3, %v3112_v8  ;;  %v4360_v54 = vld [vmem:[#allocation10 + $0x48] sm:$0xff]  ;;  %vm4657_vm3 = vcmask 781824  }
 0x2b3   : > { %v4361_v55 = vmax.f32 %v4359_v9, %v4360_v54 }
 0x2b4   : > { %v2207_v21 = vpop.permute.xlu1 %2206 }
 0x2b5   : > { %v2205_v22 = vpop.permute.xlu0 %2204  ;;  %4362 = vst.msk [vmem:[#allocation2 + $0x34] sm:$0xff] %vm654_vm7, %v4361_v55 }
 0x2b6   : > { %2291 = vst.msk [vmem:[#allocation13 + $0x138] sm:$0xf] %vm2251_vm5, %v2207_v21  ;;  %2290 = vst.msk [vmem:[#allocation13 + $0x130] sm:$0xf] %vm2251_vm5, %v2205_v22  ;;  %vm5739_vm5 = vcmask 523264  }
 0x2b7   : > { %v4060_v46 = vpop.f32.mrb[44].mxu0 }
 0x2b8   : > { %v4061_v56 = vadd.f32 %v12993_v31, %v4060_v46  ;;  %v3443_v47 = vpop.permute.xlu1 %3442  ;;  %v4062_v57 = vpop.f32.mrb[45].mxu0 }
 0x2b9   : > { %v3441_v29 = vpop.permute.xlu0 %3440  ;;  %3526 = vst.msk [vmem:[#allocation13 + $0x13c] sm:$0xf] %vm1920_vm4, %v3443_v47  ;;  %v4063_v60 = vpop.f32.mrb[46].mxu0 }
 0x2ba   : > { %3525 = vst.msk [vmem:[#allocation13 + $0x134] sm:$0xf] %vm1920_vm4, %v3441_v29  ;;  %v4160_v58 = vmax.f32 %v4061_v56, 0.0  ;;  %v4064_v61 = vadd.f32 %v12993_v31, %v4063_v60  ;;  %v4065_v62 = vpop.f32.mrb[47].mxu0  ;;  %vm4764_vm4 = vcmask 1044224  }
 0x2bc   : > { %v5071_v48 = vld [vmem:[#allocation2 + $0x2d] sm:$0xff]  ;;  %4201 = vst.msk [vmem:[#allocation6 + $0xb0] sm:$0xff] %vm654_vm7, %v4160_v58  ;;  %v1547_v63 = vpop.permute.xlu1 %1546  ;;  %v4161_v41 = vmax.f32 %v4064_v61, 0.0  ;;  %v5177_v13 = vld [vmem:[#allocation2 + $0x36] sm:$0xff] }
 0x2bd   : > { %v4967_v52 = vld [vmem:[#allocation2 + $0x34] sm:$0xff]  ;;  %v1216_v0 = vpop.permute.xlu0 %1215  ;;  %v10516_v4 = vpack.c.bf16 %v5071_v48, %v5071_v48  ;;  %v10530_v30 = vpack.c.bf16 %v5177_v13, %v5177_v13 }
 0x2be   : > { %v10504_v5 = vpack.c.bf16 %v4967_v52, %v4967_v52  ;;  %v5176_v40 = vld [vmem:[#allocation2 + $0x2e] sm:$0xff]  ;;  %1300 = vst.msk [vmem:[#allocation13 + $0x140] sm:$0x3] %vm1299_vm14, %v1216_v0 }
 0x2bf   : > { %v10529_v12 = vpack.c.bf16 %v5176_v40, %v5176_v40  ;;  %v4784_v14 = vld [vmem:[#allocation2 + $0x33] sm:$0xff]  ;;  %5127 = vrot.lane.b32.xlu0 %v10516_v4, %s14308_s25  ;;  %1631 = vst.msk [vmem:[#allocation13 + $0x140] sm:$0x3] %vm1630_vm15, %v1547_v63 }
 0x2c0   : > { %v4385_v15 = vld [vmem:[#allocation2 + $0x30] sm:$0xff]  ;;  %5024 = vrot.lane.b32.xlu1 %v10504_v5, %s14310_s1  ;;  %v10479_v59 = vpack.c.bf16 %v4784_v14, %v4784_v14  ;;  %4202 = vst.msk [vmem:[#allocation6 + $0xb8] sm:$0xff] %vm654_vm7, %v4161_v41  ;;  %v1878_v17 = vpop.permute.xlu1 %1877  ;;  %v3567_v24 = vld [vmem:[#allocation13 + $0x138] sm:$0xff] }
 0x2c1   : > { %v10428_v16 = vpack.c.bf16 %v4385_v15, %v4385_v15  ;;  %5242 = vst.msk [vmem:[#allocation14 + $0x2c] sm:$0xf] %vm4219_vm11, %v10529_v12  ;;  %v2787_v18 = vpop.permute.xlu0 %2786  ;;  %v3566_v23 = vld [vmem:[#allocation13 + $0x130] sm:$0xff]  ;;  %5243 = vst.msk [vmem:[#allocation14 + $0x38] sm:$0xf] %vm4219_vm11, %v10530_v30  ;;  %v5072_v3 = vld [vmem:[#allocation2 + $0x35] sm:$0xff] }
 0x2c2   : > { %v11039_v26 = vld [vmem:[#allocation13 + $0x134] ss:$8 sps:$4 sm:$0xff]   ;;  %4850 = vst.msk [vmem:[#allocation14 + $0x40] sm:$0xf] %vm4219_vm11, %v10479_v59  ;;  %v9534_v1 = vcombine.low %v3566_v23, %v3567_v24  ;;  %v10517_v35 = vpack.c.bf16 %v5072_v3, %v5072_v3  ;;  %v4464_v36 = vld [vmem:[#allocation2 + $0x31] sm:$0xff] }
 0x2c3   : > { %4451 = vst.msk [vmem:[#allocation14 + $0x48] sm:$0xf] %vm4219_vm11, %v10428_v16  ;;  %4521 = vrot.lane.b32.xlu0 %v10440_v20, %s14309_s2  ;;  %v4284_v32 = vld [vmem:[#allocation6 + $0xa2] ss:$2 sm:$0xff]  ;;  %9571 = vmatprep.mubr.msk.bf16.mxu0 %vm3874_vm6, %v11039_v26  ;;  %v10441_v39 = vpack.c.bf16 %v4464_v36, %v4464_v36 }
 0x2c4   : > { %1962 = vst.msk [vmem:[#allocation13 + $0x140] sm:$0x3] %vm1961_vm0, %v1878_v17  ;;  %4733 = vrot.lane.b32.xlu1 %v10465_v19, %s14308_s25  ;;  %v4315_v33 = vmax.f32 %v4242_v28, %v4284_v32  ;;  %v2209_v27 = vpop.permute.xlu1 %2208  ;;  %4123 = vmatmul.mubr.bf16.gmra.mrb[76].mxu0 %v9534_v1 }
 0x2c5   : > { %2869 = vst.msk [vmem:[#allocation13 + $0x144] sm:$0x3] %vm1299_vm14, %v2787_v18  ;;  %v3116_v34 = vpop.permute.xlu0 %3115  ;;  %vm5879_vm14 = vcmask 1043968  }
 0x2c6   : > { %2293 = vst.msk [vmem:[#allocation13 + $0x140] sm:$0x3] %vm2292_vm1, %v2209_v27 }
 0x2c7   : > { %3198 = vst.msk [vmem:[#allocation13 + $0x144] sm:$0x3] %vm1630_vm15, %v3116_v34  ;;  %4921 = vrot.lane.b32.xlu0 %v10504_v5, %s14309_s2  ;;  %v4244_v60 = vld [vmem:[#allocation6 + $0xb1] ss:$2 sm:$0xff]  ;;  %vm5884_vm15 = vcmask 1041920  }
 0x2c8   : > { %4336 = vst.msk [vmem:[#allocation10 + $0x50] sm:$0xff] %vm654_vm7, %v4315_v33  ;;  %5129 = vrot.lane.b32.xlu1 %v10517_v35, %s14308_s25  ;;  %v11041_v6 = vld [vmem:[#allocation14 + $0x20] ss:$12 sps:$4 sm:$0xff]   ;;  %v4512_v25 = vpop.permute.xlu1 %4511 }
 0x2c9   : > { %v3445_v7 = vpop.permute.xlu0 %3444  ;;  %10881 = vmatmul.mubr.msk.bf16.gmra.mrb[4].mxu1 %vm654_vm7, %v11041_v6  ;;  %4551 = vst.msk [vmem:[#allocation14] sm:$0xf] %vm4550_vm2, %v4512_v25 }
 0x2ca   : > { %3527 = vst.msk [vmem:[#allocation13 + $0x144] sm:$0x3] %vm1961_vm0, %v3445_v7  ;;  %10884 = vmatprep.mubr.msk.bf16.mxu1 %vm11407_vm10, %v11406_v53 }
 0x2cb   : > { %4628 = vrot.lane.b32.xlu0 %v10465_v19, %s14310_s1 }
 0x2cc   : > { %4523 = vrot.lane.b32.xlu1 %v10441_v39, %s14309_s2  ;;  %v4912_v37 = vpop.permute.xlu1 %4911 }
 0x2cd   : > { %v4514_v42 = vpop.permute.xlu0 %4513  ;;  %4950 = vst.msk [vmem:[#allocation14 + $0x4] sm:$0xf] %vm4550_vm2, %v4912_v37 }
 0x2ce   : > { %4552 = vst.msk [vmem:[#allocation14 + $0xc] sm:$0xf] %vm4550_vm2, %v4514_v42 }
 0x2d0   : > { %v4619_v38 = vpop.permute.xlu1 %4618 }
 0x2d1   : > { %v4914_v43 = vpop.permute.xlu0 %4913  ;;  %v3568_v44 = vld [vmem:[#allocation13 + $0x140] sm:$0x33]  ;;  %4658 = vst.msk [vmem:[#allocation14] sm:$0xf] %vm4657_vm3, %v4619_v38 }
 0x2d2   : > { %4951 = vst.msk [vmem:[#allocation14 + $0x10] sm:$0xf] %vm4550_vm2, %v4914_v43  ;;  %v9537_v45 = vcombine.high %v3568_v44, %v3568_v44  ;;  %v9536_v49 = vcombine.low %v3568_v44, %v3568_v44 }
 0x2d3   : > { %v4068_v50 = vpop.f32.mrb[48].mxu0 }
 0x2d4   : > { %9572 = vmatprep.mubr.msk.bf16.mxu0 %vm3874_vm6, %v9537_v45  ;;  %v4069_v51 = vadd.f32 %v12993_v31, %v4068_v50  ;;  %v4070_v8 = vpop.f32.mrb[49].mxu0  ;;  %v5017_v9 = vpop.permute.xlu1 %5016  ;;  %v4677_v50 = vld [vmem:[#allocation2 + $0x32] sm:$0xff]  ;;  %vm668_vm6 = vcmask 522240  }
 0x2d5   : > { %4131 = vmatmul.mubr.bf16.gmra.mrb[80].mxu0 %v9536_v49  ;;  %5055 = vst.msk [vmem:[#allocation14 + $0x4] sm:$0xf] %vm4657_vm3, %v5017_v9  ;;  %v4621_v54 = vpop.permute.xlu0 %4620  ;;  %v4071_v55 = vpop.f32.mrb[50].mxu0 }
 0x2d6   : > { %v4162_v21 = vmax.f32 %v4069_v51, 0.0  ;;  %4659 = vst.msk [vmem:[#allocation14 + $0xc] sm:$0xf] %vm4657_vm3, %v4621_v54  ;;  %v4072_v22 = vadd.f32 %v12993_v31, %v4071_v55  ;;  %v4073_v46 = vpop.f32.mrb[51].mxu0 }
 0x2d7   : > { %669 = vst.msk [vmem:[#allocation3 + $0x7] sm:$0x7f] %vm668_vm6, %v11406_v53  ;;  %674 = vst.msk [vmem:[#allocation3 + $0x24] sm:$0x7f] %vm668_vm6, %v11406_v53 }
 0x2d8   : > { %4203 = vst.msk [vmem:[#allocation6 + $0xc0] sm:$0xff] %vm654_vm7, %v4162_v21  ;;  %v4163_v56 = vmax.f32 %v4072_v22, 0.0  ;;  %v4726_v47 = vpop.permute.xlu1 %4725  ;;  %v10466_v21 = vpack.c.bf16 %v4677_v50, %v4677_v50 }
 0x2d9   : > { %4765 = vst.msk [vmem:[#allocation14] sm:$0xf] %vm4764_vm4, %v4726_v47  ;;  %v5019_v29 = vpop.permute.xlu0 %5018 }
 0x2da   : > { %4204 = vst.msk [vmem:[#allocation6 + $0xc8] sm:$0xff] %vm654_vm7, %v4163_v56 }
 0x2db   : > { %5056 = vst.msk [vmem:[#allocation14 + $0x10] sm:$0xf] %vm4657_vm3, %v5019_v29 }
 0x2dc   : > { %v5122_v57 = vpop.permute.xlu1 %5121 }
 0x2dd   : > { %5160 = vst.msk [vmem:[#allocation14 + $0x4] sm:$0xf] %vm4764_vm4, %v5122_v57  ;;  %v4728_v58 = vpop.permute.xlu0 %4727 }
 0x2de   : > { %4766 = vst.msk [vmem:[#allocation14 + $0xc] sm:$0xf] %vm4764_vm4, %v4728_v58 }
 0x2df   : > { %v4286_v61 = vld [vmem:[#allocation6 + $0xb2] ss:$2 sm:$0xff] }
 0x2e0   : > { %v4316_v62 = vmax.f32 %v4244_v60, %v4286_v61  ;;  %v4516_v48 = vpop.permute.xlu1 %4515 }
 0x2e1   : > { %v5124_v52 = vpop.permute.xlu0 %5123  ;;  %4553 = vst.msk [vmem:[#allocation14 + $0x18] sm:$0xf] %vm4550_vm2, %v4516_v48  ;;  %v4246_v17 = vld [vmem:[#allocation6 + $0xc1] ss:$2 sm:$0xff] }
 0x2e2   : > { %4337 = vst.msk [vmem:[#allocation10 + $0x58] sm:$0xff] %vm654_vm7, %v4316_v62 }
 0x2e3   : > { %5161 = vst.msk [vmem:[#allocation14 + $0x10] sm:$0xf] %vm4764_vm4, %v5124_v52 }
 0x2e4   : > { %v4916_v63 = vpop.permute.xlu1 %4915 }
 0x2e5   : > { %v4518_v0 = vpop.permute.xlu0 %4517  ;;  %4952 = vst.msk [vmem:[#allocation14 + $0x1c] sm:$0xf] %vm4550_vm2, %v4916_v63  ;;  %v11060_v5 = vld [vmem:[#allocation14] ss:$12 sps:$4 sm:$0xff]  }
 0x2e6   : > { %4554 = vst.msk [vmem:[#allocation14 + $0x24] sm:$0xf] %vm4550_vm2, %v4518_v0 }
 0x2e8   : > { %v4623_v4 = vpop.permute.xlu1 %4622 }
 0x2e9   : > { %4660 = vst.msk [vmem:[#allocation14 + $0x18] sm:$0xf] %vm4657_vm3, %v4623_v4  ;;  %v4363_v28 = vld [vmem:[#allocation10 + $0x51] sm:$0xff] }
 0x2ea   : > { %v11062_v10 = vld [vmem:[#allocation14 + $0x4] ss:$12 sps:$4 sm:$0xff]  }
 0x2eb   : > { %5582 = vmatprep.mubr.bf16.mxu0 %v11062_v10 }
 0x2ec   : > { %5583 = vmatmul.mubr.bf16.vlgmr.msra.gmra.mrb[84].mxu0 %v11060_v5 }
 0x2ef   : > { %v4076_v11 = vpop.f32.mrb[52].mxu0 }
 0x2f0   : > { %v4077_v40 = vadd.f32 %v12993_v31, %v4076_v11  ;;  %v4078_v41 = vpop.f32.mrb[53].mxu0 }
 0x2f1   : > { %v4079_v12 = vpop.f32.mrb[54].mxu0 }
 0x2f2   : > { %v4164_v13 = vmax.f32 %v4077_v40, 0.0  ;;  %v4080_v14 = vadd.f32 %v12993_v31, %v4079_v12  ;;  %v4081_v15 = vpop.f32.mrb[55].mxu0 }
 0x2f4   : > { %4205 = vst.msk [vmem:[#allocation6 + $0xd0] sm:$0xff] %vm654_vm7, %v4164_v13  ;;  %v4165_v30 = vmax.f32 %v4080_v14, 0.0 }
 0x2f6   : > { %4206 = vst.msk [vmem:[#allocation6 + $0xd8] sm:$0xff] %vm654_vm7, %v4165_v30 }
 0x2f9   : > { %v4918_v59 = vpop.permute.xlu0 %4917  ;;  %v5021_v16 = vpop.permute.xlu1 %5020 }
 0x2fa   : > { %4953 = vst.msk [vmem:[#allocation14 + $0x28] sm:$0xf] %vm4550_vm2, %v4918_v59 }
 0x2fb   : > { %5057 = vst.msk [vmem:[#allocation14 + $0x1c] sm:$0xf] %vm4657_vm3, %v5021_v16  ;;  %v4288_v18 = vld [vmem:[#allocation6 + $0xc2] ss:$2 sm:$0xff] }
 0x2fc   : > { %v4317_v20 = vmax.f32 %v4246_v17, %v4288_v18 }
 0x2fd   : > { %v4625_v19 = vpop.permute.xlu0 %4624  ;;  %v4730_v23 = vpop.permute.xlu1 %4729  ;;  %v4248_v46 = vld [vmem:[#allocation6 + $0xd1] ss:$2 sm:$0xff] }
 0x2fe   : > { %4661 = vst.msk [vmem:[#allocation14 + $0x24] sm:$0xf] %vm4657_vm3, %v4625_v19 }
 0x2ff   : > { %4767 = vst.msk [vmem:[#allocation14 + $0x18] sm:$0xf] %vm4764_vm4, %v4730_v23 }
 0x300   : > { %4338 = vst.msk [vmem:[#allocation10 + $0x60] sm:$0xff] %vm654_vm7, %v4317_v20 }
 0x301   : > { %v5023_v24 = vpop.permute.xlu0 %5022  ;;  %v5126_v26 = vpop.permute.xlu1 %5125 }
 0x302   : > { %5058 = vst.msk [vmem:[#allocation14 + $0x28] sm:$0xf] %vm4657_vm3, %v5023_v24 }
 0x303   : > { %5162 = vst.msk [vmem:[#allocation14 + $0x1c] sm:$0xf] %vm4764_vm4, %v5126_v26 }
 0x305   : > { %v4732_v1 = vpop.permute.xlu0 %4731  ;;  %v4520_v3 = vpop.permute.xlu1 %4519 }
 0x306   : > { %4768 = vst.msk [vmem:[#allocation14 + $0x24] sm:$0xf] %vm4764_vm4, %v4732_v1 }
 0x307   : > { %4555 = vst.msk [vmem:[#allocation14 + $0x30] sm:$0xf] %vm4550_vm2, %v4520_v3  ;;  %v4364_v32 = vld [vmem:[#allocation10 + $0x5a] sm:$0xff] }
 0x308   : > { %v4365_v33 = vmax.f32 %v4363_v28, %v4364_v32 }
 0x309   : > { %v4920_v27 = vpop.permute.xlu1 %4919 }
 0x30a   : > { %4366 = vst.msk [vmem:[#allocation2 + $0x3e] sm:$0xff] %vm654_vm7, %v4365_v33  ;;  %v5256_v20 = vld [vmem:[#allocation14 + $0x18] sm:$0xff] }
 0x30b   : > { %4954 = vst.msk [vmem:[#allocation14 + $0x34] sm:$0xf] %vm4550_vm2, %v4920_v27  ;;  %v4084_v34 = vpop.f32.mrb[56].mxu0 }
 0x30c   : > { %v4085_v35 = vadd.f32 %v12993_v31, %v4084_v34  ;;  %v4086_v36 = vpop.f32.mrb[57].mxu0 }
 0x30d   : > { %v4627_v6 = vpop.permute.xlu1 %4626  ;;  %v4087_v25 = vpop.f32.mrb[58].mxu0 }
 0x30e   : > { %4662 = vst.msk [vmem:[#allocation14 + $0x30] sm:$0xf] %vm4657_vm3, %v4627_v6  ;;  %v4166_v7 = vmax.f32 %v4085_v35, 0.0  ;;  %v4088_v39 = vadd.f32 %v12993_v31, %v4087_v25  ;;  %v4089_v37 = vpop.f32.mrb[59].mxu0 }
 0x310   : > { %4207 = vst.msk [vmem:[#allocation6 + $0xe0] sm:$0xff] %vm654_vm7, %v4166_v7  ;;  %v4167_v43 = vmax.f32 %v4088_v39, 0.0 }
 0x311   : > { %v4968_v42 = vld [vmem:[#allocation2 + $0x3c] sm:$0xff] }
 0x312   : > { %v5178_v38 = vld [vmem:[#allocation2 + $0x3e] sm:$0xff]  ;;  %v10505_v44 = vpack.c.bf16 %v4968_v42, %v4968_v42  ;;  %4208 = vst.msk [vmem:[#allocation6 + $0xe8] sm:$0xff] %vm654_vm7, %v4167_v43 }
 0x313   : > { %v10531_v45 = vpack.c.bf16 %v5178_v38, %v5178_v38  ;;  %v4785_v49 = vld [vmem:[#allocation2 + $0x3b] sm:$0xff] }
 0x314   : > { %v10480_v51 = vpack.c.bf16 %v4785_v49, %v4785_v49  ;;  %v4386_v8 = vld [vmem:[#allocation2 + $0x38] sm:$0xff]  ;;  %v4387_v9 = vld [vmem:[#allocation2 + $0x40] sm:$0xff]  ;;  %5026 = vrot.lane.b32.xlu0 %v10505_v44, %s14310_s1  ;;  %4923 = vrot.lane.b32.xlu1 %v10505_v44, %s14309_s2 }
 0x315   : > { %5244 = vst.msk [vmem:[#allocation14 + $0x44] sm:$0xf] %vm4219_vm11, %v10531_v45  ;;  %v10429_v54 = vpack.c.bf16 %v4386_v8, %v4386_v8  ;;  %v10430_v55 = vpack.c.bf16 %v4387_v9, %v4387_v9  ;;  %v5073_v22 = vld [vmem:[#allocation2 + $0x3d] sm:$0xff] }
 0x316   : > { %4851 = vst.msk [vmem:[#allocation14 + $0x4c] sm:$0xf] %vm4219_vm11, %v10480_v51  ;;  %v10518_v29 = vpack.c.bf16 %v5073_v22, %v5073_v22  ;;  %v4465_v58 = vld [vmem:[#allocation2 + $0x39] sm:$0xff] }
 0x317   : > { %4452 = vst.msk [vmem:[#allocation14 + $0x54] sm:$0xf] %vm4219_vm11, %v10429_v54  ;;  %4453 = vst.msk [vmem:[#allocation14 + $0x60] sm:$0xf] %vm4219_vm11, %v10430_v55  ;;  %v4290_v56 = vld [vmem:[#allocation6 + $0xd2] ss:$2 sm:$0xff]  ;;  %v10442_v60 = vpack.c.bf16 %v4465_v58, %v4465_v58 }
 0x318   : > { %4735 = vrot.lane.b32.xlu0 %v10466_v21, %s14308_s25  ;;  %4630 = vrot.lane.b32.xlu1 %v10466_v21, %s14310_s1  ;;  %v4318_v47 = vmax.f32 %v4248_v46, %v4290_v56  ;;  %v4572_v38 = vld [vmem:[#allocation2 + $0x3a] sm:$0xff] }
 0x319   : > { %v4250_v14 = vld [vmem:[#allocation6 + $0xe1] ss:$2 sm:$0xff]  ;;  %v10455_v51 = vpack.c.bf16 %v4572_v38, %v4572_v38 }
 0x31a   : > { %4339 = vst.msk [vmem:[#allocation10 + $0x68] sm:$0xff] %vm654_vm7, %v4318_v47 }
 0x31c   : > { %v11063_v57 = vld [vmem:[#allocation14 + $0x38] ss:$12 sps:$4 sm:$0xff]   ;;  %5131 = vrot.lane.b32.xlu0 %v10518_v29, %s14308_s25 }
 0x31d   : > { %10885 = vmatmul.mubr.msk.bf16.gmra.mrb[8].mxu1 %vm654_vm7, %v11063_v57 }
 0x31e   : > { %10888 = vmatprep.mubr.msk.bf16.mxu1 %vm11407_vm10, %v11406_v53 }
 0x320   : > { %4525 = vrot.lane.b32.xlu0 %v10442_v60, %s14309_s2 }
 0x321   : > { %v4367_v3 = vld [vmem:[#allocation10 + $0x63] sm:$0xff] }
 0x327   : > { %v4092_v61 = vpop.f32.mrb[60].mxu0 }
 0x328   : > { %v4093_v62 = vadd.f32 %v12993_v31, %v4092_v61  ;;  %v4094_v48 = vpop.f32.mrb[61].mxu0 }
 0x329   : > { %v4095_v52 = vpop.f32.mrb[62].mxu0 }
 0x32a   : > { %v4168_v63 = vmax.f32 %v4093_v62, 0.0  ;;  %v4096_v0 = vadd.f32 %v12993_v31, %v4095_v52  ;;  %v4097_v4 = vpop.f32.mrb[63].mxu0  ;;  %v13100_v5 = vpop.f32.mrb[0].mxu1 }
 0x32b   : > { %v10878_v10 = vpop.f32.mrb[1].mxu1 }
 0x32c   : > { %4209 = vst.msk [vmem:[#allocation6 + $0xf0] sm:$0xff] %vm654_vm7, %v4168_v63  ;;  %v4169_v11 = vmax.f32 %v4096_v0, 0.0  ;;  %v13103_v40 = vpop.f32.mrb[2].mxu1 }
 0x32d   : > { %v10879_v41 = vpop.f32.mrb[3].mxu1 }
 0x32e   : > { %4210 = vst.msk [vmem:[#allocation6 + $0xf8] sm:$0xff] %vm654_vm7, %v4169_v11 }
 0x331   : > { %v5128_v12 = vpop.permute.xlu0 %5127 }
 0x332   : > { %v5025_v13 = vpop.permute.xlu1 %5024  ;;  %5163 = vst.msk [vmem:[#allocation14 + $0x28] sm:$0xf] %vm4764_vm4, %v5128_v12 }
 0x333   : > { %5059 = vst.msk [vmem:[#allocation14 + $0x34] sm:$0xf] %vm4657_vm3, %v5025_v13  ;;  %v4292_v15 = vld [vmem:[#allocation6 + $0xe2] ss:$2 sm:$0xff] }
 0x334   : > { %v4319_v30 = vmax.f32 %v4250_v14, %v4292_v15 }
 0x335   : > { %v4522_v59 = vpop.permute.xlu0 %4521  ;;  %v4252_v9 = vld [vmem:[#allocation6 + $0xf1] ss:$2 sm:$0xff] }
 0x336   : > { %v4734_v16 = vpop.permute.xlu1 %4733  ;;  %4556 = vst.msk [vmem:[#allocation14 + $0x3c] sm:$0xf] %vm4550_vm2, %v4522_v59 }
 0x337   : > { %4769 = vst.msk [vmem:[#allocation14 + $0x30] sm:$0xf] %vm4764_vm4, %v4734_v16 }
 0x338   : > { %4340 = vst.msk [vmem:[#allocation10 + $0x70] sm:$0xff] %vm654_vm7, %v4319_v30 }
 0x339   : > { %v4922_v17 = vpop.permute.xlu0 %4921  ;;  %v5258_v19 = vld [vmem:[#allocation14 + $0x24] sm:$0xff] }
 0x33a   : > { %v5130_v18 = vpop.permute.xlu1 %5129  ;;  %v11064_v23 = vld [vmem:[#allocation14 + $0x1c] ss:$12 sps:$4 sm:$0xff]   ;;  %4955 = vst.msk [vmem:[#allocation14 + $0x40] sm:$0xf] %vm4550_vm2, %v4922_v17  ;;  %v9694_v24 = vcombine.low %v5256_v20, %v5258_v19 }
 0x33b   : > { %5164 = vst.msk [vmem:[#allocation14 + $0x34] sm:$0xf] %vm4764_vm4, %v5130_v18  ;;  %5590 = vmatprep.mubr.bf16.mxu0 %v11064_v23 }
 0x33c   : > { %5591 = vmatmul.mubr.bf16.gmra.mrb[88].mxu0 %v9694_v24 }
 0x33d   : > { %v4629_v26 = vpop.permute.xlu0 %4628 }
 0x33e   : > { %v4524_v1 = vpop.permute.xlu1 %4523  ;;  %4663 = vst.msk [vmem:[#allocation14 + $0x3c] sm:$0xf] %vm4657_vm3, %v4629_v26 }
 0x33f   : > { %4557 = vst.msk [vmem:[#allocation14 + $0x48] sm:$0xf] %vm4550_vm2, %v4524_v1  ;;  %v4368_v28 = vld [vmem:[#allocation10 + $0x6c] sm:$0xff] }
 0x340   : > { %v4369_v32 = vmax.f32 %v4367_v3, %v4368_v28 }
 0x342   : > { %4370 = vst.msk [vmem:[#allocation2 + $0x48] sm:$0xff] %vm654_vm7, %v4369_v32 }
 0x343   : > { %v4100_v33 = vpop.f32.mrb[64].mxu0 }
 0x344   : > { %v4101_v27 = vadd.f32 %v12993_v31, %v4100_v33  ;;  %v4102_v34 = vpop.f32.mrb[65].mxu0 }
 0x345   : > { %v4103_v35 = vpop.f32.mrb[66].mxu0 }
 0x346   : > { %v4170_v36 = vmax.f32 %v4101_v27, 0.0  ;;  %v4104_v6 = vadd.f32 %v12993_v31, %v4103_v35  ;;  %v4105_v25 = vpop.f32.mrb[67].mxu0 }
 0x348   : > { %4211 = vst.msk [vmem:[#allocation6 + $0x100] sm:$0xff] %vm654_vm7, %v4170_v36  ;;  %v4171_v39 = vmax.f32 %v4104_v6, 0.0 }
 0x349   : > { %v4865_v7 = vld [vmem:[#allocation2 + $0x44] sm:$0xff] }
 0x34a   : > { %v10494_v37 = vpack.c.bf16 %v4865_v7, %v4865_v7  ;;  %v5179_v42 = vld [vmem:[#allocation2 + $0x46] sm:$0xff]  ;;  %4212 = vst.msk [vmem:[#allocation6 + $0x108] sm:$0xff] %vm654_vm7, %v4171_v39 }
 0x34b   : > { %v10532_v43 = vpack.c.bf16 %v5179_v42, %v5179_v42  ;;  %v4786_v44 = vld [vmem:[#allocation2 + $0x43] sm:$0xff] }
 0x34c   : > { %v4388_v45 = vld [vmem:[#allocation2 + $0x48] sm:$0xff]  ;;  %4925 = vrot.lane.b32.xlu0 %v10494_v37, %s14309_s2  ;;  %5028 = vrot.lane.b32.xlu1 %v10494_v37, %s14310_s1  ;;  %v10481_v49 = vpack.c.bf16 %v4786_v44, %v4786_v44 }
 0x34d   : > { %v10431_v50 = vpack.c.bf16 %v4388_v45, %v4388_v45  ;;  %5245 = vst.msk [vmem:[#allocation14 + $0x50] sm:$0xf] %vm4219_vm11, %v10532_v43  ;;  %v5074_v8 = vld [vmem:[#allocation2 + $0x45] sm:$0xff] }
 0x34e   : > { %4852 = vst.msk [vmem:[#allocation14 + $0x58] sm:$0xf] %vm4219_vm11, %v10481_v49  ;;  %v10519_v21 = vpack.c.bf16 %v5074_v8, %v5074_v8  ;;  %v4466_v22 = vld [vmem:[#allocation2 + $0x41] sm:$0xff]  ;;  %v4467_v38 = vld [vmem:[#allocation2 + $0x49] sm:$0xff] }
 0x34f   : > { %4454 = vst.msk [vmem:[#allocation14 + $0x6c] sm:$0xf] %vm4219_vm11, %v10431_v50  ;;  %v4294_v54 = vld [vmem:[#allocation6 + $0xf2] ss:$2 sm:$0xff]  ;;  %v10443_v46 = vpack.c.bf16 %v4466_v22, %v4466_v22  ;;  %v4679_v18 = vld [vmem:[#allocation2 + $0x42] sm:$0xff]  ;;  %v10444_v49 = vpack.c.bf16 %v4467_v38, %v4467_v38 }
 0x350   : > { %4632 = vrot.lane.b32.xlu0 %v10455_v51, %s14310_s1  ;;  %4737 = vrot.lane.b32.xlu1 %v10455_v51, %s14308_s25  ;;  %v4320_v55 = vmax.f32 %v4252_v9, %v4294_v54  ;;  %v10468_v27 = vpack.c.bf16 %v4679_v18, %v4679_v18  ;;  %v4680_v43 = vld [vmem:[#allocation2 + $0x4a] sm:$0xff] }
 0x351   : > { %v4254_v48 = vld [vmem:[#allocation6 + $0x101] ss:$2 sm:$0xff]  ;;  %v10469_v50 = vpack.c.bf16 %v4680_v43, %v4680_v43 }
 0x352   : > { %4341 = vst.msk [vmem:[#allocation10 + $0x78] sm:$0xff] %vm654_vm7, %v4320_v55 }
 0x354   : > { %5133 = vrot.lane.b32.xlu1 %v10519_v21, %s14308_s25 }
 0x358   : > { %4527 = vrot.lane.b32.xlu1 %v10443_v46, %s14309_s2 }
 0x359   : > { %v4371_v0 = vld [vmem:[#allocation10 + $0x75] sm:$0xff] }
 0x360   : > { %v4108_v56 = vpop.f32.mrb[68].mxu0 }
 0x361   : > { %v4109_v47 = vadd.f32 %v12993_v31, %v4108_v56  ;;  %v4110_v29 = vpop.f32.mrb[69].mxu0 }
 0x362   : > { %v4111_v57 = vpop.f32.mrb[70].mxu0 }
 0x363   : > { %v4172_v58 = vmax.f32 %v4109_v47, 0.0  ;;  %v4112_v60 = vadd.f32 %v12993_v31, %v4111_v57  ;;  %v4113_v61 = vpop.f32.mrb[71].mxu0 }
 0x365   : > { %4213 = vst.msk [vmem:[#allocation6 + $0x110] sm:$0xff] %vm654_vm7, %v4172_v58  ;;  %v4173_v62 = vmax.f32 %v4112_v60, 0.0 }
 0x367   : > { %4214 = vst.msk [vmem:[#allocation6 + $0x118] sm:$0xff] %vm654_vm7, %v4173_v62 }
 0x36c   : > { %v4296_v52 = vld [vmem:[#allocation6 + $0x102] ss:$2 sm:$0xff] }
 0x36d   : > { %v4321_v63 = vmax.f32 %v4254_v48, %v4296_v52 }
 0x36e   : > { %v4256_v36 = vld [vmem:[#allocation6 + $0x111] ss:$2 sm:$0xff] }
 0x36f   : > { %4342 = vst.msk [vmem:[#allocation10 + $0x80] sm:$0xff] %vm654_vm7, %v4321_v63 }
 0x376   : > { %v4372_v4 = vld [vmem:[#allocation10 + $0x7e] sm:$0xff] }
 0x377   : > { %v4373_v10 = vmax.f32 %v4371_v0, %v4372_v4 }
 0x379   : > { %4374 = vst.msk [vmem:[#allocation2 + $0x52] sm:$0xff] %vm654_vm7, %v4373_v10 }
 0x37b   : > { %v4116_v11 = vpop.f32.mrb[72].mxu0 }
 0x37c   : > { %v4117_v41 = vadd.f32 %v12993_v31, %v4116_v11  ;;  %v4118_v12 = vpop.f32.mrb[73].mxu0 }
 0x37d   : > { %v4119_v13 = vpop.f32.mrb[74].mxu0 }
 0x37e   : > { %v4174_v14 = vmax.f32 %v4117_v41, 0.0  ;;  %v4120_v15 = vadd.f32 %v12993_v31, %v4119_v13  ;;  %v4121_v30 = vpop.f32.mrb[75].mxu0 }
 0x380   : > { %4215 = vst.msk [vmem:[#allocation6 + $0x120] sm:$0xff] %vm654_vm7, %v4174_v14  ;;  %v4175_v59 = vmax.f32 %v4120_v15, 0.0  ;;  %v4970_v16 = vld [vmem:[#allocation2 + $0x4c] sm:$0xff]  ;;  %v4971_v35 = vld [vmem:[#allocation2 + $0x54] sm:$0xff] }
 0x381   : > { %v10507_v17 = vpack.c.bf16 %v4970_v16, %v4970_v16  ;;  %v5180_v20 = vld [vmem:[#allocation2 + $0x4e] sm:$0xff]  ;;  %v10508_v42 = vpack.c.bf16 %v4971_v35, %v4971_v35 }
 0x382   : > { %4216 = vst.msk [vmem:[#allocation6 + $0x128] sm:$0xff] %vm654_vm7, %v4175_v59  ;;  %v10533_v19 = vpack.c.bf16 %v5180_v20, %v5180_v20  ;;  %v4787_v23 = vld [vmem:[#allocation2 + $0x4b] sm:$0xff]  ;;  %v4788_v24 = vld [vmem:[#allocation2 + $0x53] sm:$0xff] }
 0x383   : > { %v4389_v26 = vld [vmem:[#allocation2 + $0x50] sm:$0xff]  ;;  %5030 = vrot.lane.b32.xlu0 %v10507_v17, %s14310_s1  ;;  %4927 = vrot.lane.b32.xlu1 %v10507_v17, %s14309_s2  ;;  %v10482_v1 = vpack.c.bf16 %v4787_v23, %v4787_v23  ;;  %v10483_v3 = vpack.c.bf16 %v4788_v24, %v4788_v24 }
 0x384   : > { %v10432_v28 = vpack.c.bf16 %v4389_v26, %v4389_v26  ;;  %5246 = vst.msk [vmem:[#allocation14 + $0x5c] sm:$0xf] %vm4219_vm11, %v10533_v19  ;;  %v5075_v34 = vld [vmem:[#allocation2 + $0x4d] sm:$0xff] }
 0x385   : > { %4853 = vst.msk [vmem:[#allocation14 + $0x64] sm:$0xf] %vm4219_vm11, %v10482_v1  ;;  %4854 = vst.msk [vmem:[#allocation14 + $0x70] sm:$0xf] %vm4219_vm11, %v10483_v3  ;;  %v10520_v37 = vpack.c.bf16 %v5075_v34, %v5075_v34  ;;  %v4681_v20 = vld [vmem:[#allocation2 + $0x52] sm:$0xff] }
 0x386   : > { %v5027_v32 = vpop.permute.xlu0 %5026  ;;  %v4924_v33 = vpop.permute.xlu1 %4923  ;;  %4455 = vst.msk [vmem:[#allocation14 + $0x78] sm:$0xf] %vm4219_vm11, %v10432_v28  ;;  %v4468_v19 = vld [vmem:[#allocation2 + $0x51] sm:$0xff]  ;;  %v10470_v34 = vpack.c.bf16 %v4681_v20, %v4681_v20  ;;  %v4684_v20 = vld [vmem:[#allocation2 + $0x6a] sm:$0xf] }
 0x387   : > { %5060 = vst.msk [vmem:[#allocation14 + $0x40] sm:$0xf] %vm4657_vm3, %v5027_v32  ;;  %v4298_v6 = vld [vmem:[#allocation6 + $0x112] ss:$2 sm:$0xff]  ;;  %4739 = vrot.lane.b32.xlu0 %v10468_v27, %s14308_s25  ;;  %4634 = vrot.lane.b32.xlu1 %v10468_v27, %s14310_s1  ;;  %v10445_v35 = vpack.c.bf16 %v4468_v19, %v4468_v19 }
 0x388   : > { %4956 = vst.msk [vmem:[#allocation14 + $0x4c] sm:$0xf] %vm4550_vm2, %v4924_v33  ;;  %v4322_v25 = vmax.f32 %v4256_v36, %v4298_v6 }
 0x389   : > { %v4258_v62 = vld [vmem:[#allocation6 + $0x121] ss:$2 sm:$0xff] }
 0x38a   : > { %v4736_v7 = vpop.permute.xlu0 %4735  ;;  %v4631_v39 = vpop.permute.xlu1 %4630  ;;  %4343 = vst.msk [vmem:[#allocation10 + $0x88] sm:$0xff] %vm654_vm7, %v4322_v25 }
 0x38b   : > { %4770 = vst.msk [vmem:[#allocation14 + $0x3c] sm:$0xf] %vm4764_vm4, %v4736_v7  ;;  %5135 = vrot.lane.b32.xlu0 %v10520_v37, %s14308_s25  ;;  %5032 = vrot.lane.b32.xlu1 %v10508_v42, %s14310_s1  ;;  %v11066_v44 = vld [vmem:[#allocation14 + $0x50] ss:$12 sps:$4 sm:$0xff]  }
 0x38c   : > { %4664 = vst.msk [vmem:[#allocation14 + $0x48] sm:$0xf] %vm4657_vm3, %v4631_v39  ;;  %10889 = vmatmul.mubr.msk.bf16.gmra.mrb[12].mxu1 %vm654_vm7, %v11066_v44  ;;  %v13191_v39 = vld [vmem:[%s14293_s9] ss:$0 sm:$0xff] }
 0x38d   : > { %10892 = vmatprep.mubr.msk.bf16.mxu1 %vm11407_vm10, %v11406_v53 }
 0x38e   : > { %v5132_v45 = vpop.permute.xlu0 %5131 }
 0x38f   : > { %5165 = vst.msk [vmem:[#allocation14 + $0x40] sm:$0xf] %vm4764_vm4, %v5132_v45  ;;  %4529 = vrot.lane.b32.xlu0 %v10444_v49, %s14309_s2  ;;  %4741 = vrot.lane.b32.xlu1 %v10469_v50, %s14308_s25 }
 0x391   : > { %v4375_v12 = vld [vmem:[#allocation10 + $0x87] sm:$0xff] }
 0x392   : > { %v4526_v51 = vpop.permute.xlu0 %4525  ;;  %v11069_v9 = vld [vmem:[#allocation14 + $0x30] ss:$12 sps:$4 sm:$0xff]  }
 0x393   : > { %4558 = vst.msk [vmem:[#allocation14 + $0x54] sm:$0xf] %vm4550_vm2, %v4526_v51  ;;  %4929 = vrot.lane.b32.xlu0 %v10508_v42, %s14309_s2 }
 0x396   : > { %v11067_v8 = vld [vmem:[#allocation14 + $0x34] ss:$12 sps:$4 sm:$0xff]  }
 0x397   : > { %4636 = vrot.lane.b32.xlu0 %v10469_v50, %s14310_s1  ;;  %5598 = vmatprep.mubr.bf16.mxu0 %v11067_v8  ;;  %v4124_v54 = vpop.f32.mrb[76].mxu0 }
 0x398   : > { %5599 = vmatmul.mubr.bf16.gmra.mrb[92].mxu0 %v11069_v9  ;;  %v4125_v55 = vadd.f32 %v12993_v31, %v4124_v54  ;;  %v4126_v21 = vpop.f32.mrb[77].mxu0  ;;  %v4869_v54 = vld [vmem:[#allocation2 + $0x64] sm:$0xff] }
 0x399   : > { %v4127_v22 = vpop.f32.mrb[78].mxu0 }
 0x39a   : > { %v4176_v46 = vmax.f32 %v4125_v55, 0.0  ;;  %v4128_v56 = vadd.f32 %v12993_v31, %v4127_v22  ;;  %v4129_v47 = vpop.f32.mrb[79].mxu0 }
 0x39c   : > { %v13166_v29 = vpop.f32.mrb[4].mxu1  ;;  %4217 = vst.msk [vmem:[#allocation6 + $0x130] sm:$0xff] %vm654_vm7, %v4176_v46  ;;  %v4177_v57 = vmax.f32 %v4128_v56, 0.0  ;;  %v10498_v56 = vpack.c.bf16 %v4869_v54, %v4869_v54 }
 0x39d   : > { %v10882_v58 = vpop.f32.mrb[5].mxu1 }
 0x39e   : > { %v13169_v60 = vpop.f32.mrb[6].mxu1  ;;  %4218 = vst.msk [vmem:[#allocation6 + $0x138] sm:$0xff] %vm654_vm7, %v4177_v57 }
 0x39f   : > { %v10883_v61 = vpop.f32.mrb[7].mxu1 }
 0x3a3   : > { %v4300_v48 = vld [vmem:[#allocation6 + $0x122] ss:$2 sm:$0xff] }
 0x3a4   : > { %v4323_v52 = vmax.f32 %v4258_v62, %v4300_v48  ;;  %v4974_v62 = vld [vmem:[#allocation2 + $0x6c] sm:$0xff] }
 0x3a5   : > { %v5078_v48 = vld [vmem:[#allocation2 + $0x65] sm:$0xff] }
 0x3a6   : > { %4344 = vst.msk [vmem:[#allocation10 + $0x90] sm:$0xff] %vm654_vm7, %v4323_v52 }
 0x3a8   : > { %v4132_v63 = vpop.f32.mrb[80].mxu0 }
 0x3a9   : > { %v4133_v0 = vadd.f32 %v12993_v31, %v4132_v63  ;;  %v4134_v4 = vpop.f32.mrb[81].mxu0  ;;  %v10511_v63 = vpack.c.bf16 %v4974_v62, %v4974_v62 }
 0x3aa   : > { %v4135_v10 = vpop.f32.mrb[82].mxu0 }
 0x3ab   : > { %v4178_v11 = vmax.f32 %v4133_v0, 0.0  ;;  %v4136_v41 = vpop.f32.mrb[83].mxu0  ;;  %v10523_v0 = vpack.c.bf16 %v5078_v48, %v5078_v48 }
 0x3ac   : > { %v5079_v41 = vld [vmem:[#allocation2 + $0x6d] sm:$0xff] }
 0x3ad   : > { %4220 = vst.msk [vmem:[#allocation6 + $0x140] sm:$0xf] %vm4219_vm11, %v4178_v11  ;;  %v4376_v13 = vld [vmem:[#allocation10 + $0x90] sm:$0xff] }
 0x3ae   : > { %v4377_v14 = vmax.f32 %v4375_v12, %v4376_v13 }
 0x3b0   : > { %4378 = vst.msk [vmem:[#allocation2 + $0x5c] sm:$0xff] %vm654_vm7, %v4377_v14  ;;  %v5183_v14 = vld [vmem:[#allocation2 + $0x66] sm:$0xff] }
 0x3b7   : > { %v4972_v15 = vld [vmem:[#allocation2 + $0x5c] sm:$0xff] }
 0x3b8   : > { %v5076_v30 = vld [vmem:[#allocation2 + $0x55] sm:$0xff]  ;;  %v10509_v59 = vpack.c.bf16 %v4972_v15, %v4972_v15  ;;  %v5182_v18 = vld [vmem:[#allocation2 + $0x5e] sm:$0xff] }
 0x3b9   : > { %v10521_v16 = vpack.c.bf16 %v5076_v30, %v5076_v30  ;;  %v5181_v17 = vld [vmem:[#allocation2 + $0x56] sm:$0xff]  ;;  %v10535_v23 = vpack.c.bf16 %v5182_v18, %v5182_v18  ;;  %v4790_v28 = vld [vmem:[#allocation2 + $0x63] sm:$0xff]  ;;  %v5184_v15 = vld [vmem:[#allocation2 + $0x6e] sm:$0xff] }
 0x3ba   : > { %v10534_v31 = vpack.c.bf16 %v5181_v17, %v5181_v17  ;;  %5034 = vrot.lane.b32.xlu0 %v10509_v59, %s14310_s1  ;;  %v4789_v24 = vld [vmem:[#allocation2 + $0x5b] sm:$0xff]  ;;  %v10485_v36 = vpack.c.bf16 %v4790_v28, %v4790_v28  ;;  %v10524_v17 = vpack.c.bf16 %v5079_v41, %v5079_v41  ;;  %v4870_v18 = vld [vmem:[#allocation2 + $0x6c] sm:$0xf]  ;;  %v5185_v28 = vld [vmem:[#allocation2 + $0x76] sm:$0xf] }
 0x3bb   : > { %5137 = vrot.lane.b32.xlu1 %v10521_v16, %s14308_s25  ;;  %v4390_v26 = vld [vmem:[#allocation2 + $0x58] sm:$0xff]  ;;  %5248 = vst.msk [vmem:[#allocation14 + $0x74] sm:$0xf] %vm4219_vm11, %v10535_v23  ;;  %v10484_v1 = vpack.c.bf16 %v4789_v24, %v4789_v24  ;;  %v4391_v32 = vld [vmem:[#allocation2 + $0x60] sm:$0xf]  ;;  %v10537_v16 = vpack.c.bf16 %v5184_v15, %v5184_v15  ;;  %v10473_v23 = vpack.c.bf16 %v4684_v20, %v4684_v20 }
 0x3bc   : > { %5247 = vst.msk [vmem:[#allocation14 + $0x68] sm:$0xf] %vm4219_vm11, %v10534_v31  ;;  %v10433_v3 = vpack.c.bf16 %v4390_v26, %v4390_v26  ;;  %v10434_v6 = vpack.c.bf16 %v4391_v32, %v4391_v32  ;;  %v5077_v25 = vld [vmem:[#allocation2 + $0x5d] sm:$0xff]  ;;  %4856 = vst.msk [vmem:[#allocation14 + $0x88] sm:$0xf] %vm4219_vm11, %v10485_v36  ;;  %v10499_v31 = vpack.c.bf16 %v4870_v18, %v4870_v18 }
 0x3bd   : > { %4855 = vst.msk [vmem:[#allocation14 + $0x7c] sm:$0xf] %vm4219_vm11, %v10484_v1  ;;  %v10522_v38 = vpack.c.bf16 %v5077_v25, %v5077_v25  ;;  %v4469_v49 = vld [vmem:[#allocation2 + $0x59] sm:$0xff]  ;;  %v4683_v10 = vld [vmem:[#allocation2 + $0x62] sm:$0xff]  ;;  %5250 = vst.msk [vmem:[#allocation14 + $0x8c] sm:$0xf] %vm4219_vm11, %v10537_v16  ;;  %v10538_v32 = vpack.c.bf16 %v5185_v28, %v5185_v28 }
 0x3be   : > { %v4926_v33 = vpop.permute.xlu0 %4925  ;;  %v5029_v27 = vpop.permute.xlu1 %5028  ;;  %4456 = vst.msk [vmem:[#allocation14 + $0x84] sm:$0xf] %vm4219_vm11, %v10433_v3  ;;  %4743 = vrot.lane.b32.xlu0 %v10470_v34, %s14308_s25  ;;  %v10446_v55 = vpack.c.bf16 %v4469_v49, %v4469_v49  ;;  %v4576_v61 = vld [vmem:[#allocation2 + $0x5a] sm:$0xff]  ;;  %v10472_v12 = vpack.c.bf16 %v4683_v10, %v4683_v10  ;;  %v4577_v30 = vld [vmem:[#allocation2 + $0x62] sm:$0xf] }
 0x3bf   : > { %4957 = vst.msk [vmem:[#allocation14 + $0x58] sm:$0xf] %vm4550_vm2, %v4926_v33  ;;  %4531 = vrot.lane.b32.xlu1 %v10445_v35, %s14309_s2  ;;  %v10600_v7 = vpop.f32.mrb[84].mxu0  ;;  %v10459_v52 = vpack.c.bf16 %v4576_v61, %v4576_v61  ;;  %v4470_v11 = vld [vmem:[#allocation2 + $0x61] sm:$0xf]  ;;  %v10460_v19 = vpack.c.bf16 %v4577_v30, %v4577_v30 }
 0x3c0   : > { %5061 = vst.msk [vmem:[#allocation14 + $0x4c] sm:$0xf] %vm4657_vm3, %v5029_v27  ;;  %v10601_v37 = vpop.f32.mrb[85].mxu0  ;;  %v10447_v13 = vpack.c.bf16 %v4470_v11, %v4470_v11  ;;  %v4975_v24 = vld [vmem:[#allocation2 + $0x74] sm:$0xf] }
 0x3c1   : > { %4457 = vst.msk [vmem:[#allocation14 + $0x90] sm:$0x3] %vm658_vm8, %v10434_v6  ;;  %v10602_v43 = vadd.f32 %v10601_v37, %v10600_v7  ;;  %v10603_v45 = vpop.f32.mrb[86].mxu0  ;;  %v10512_v26 = vpack.c.bf16 %v4975_v24, %v4975_v24  ;;  %v5080_v3 = vld [vmem:[#allocation2 + $0x75] sm:$0xf] }
 0x3c2   : > { %v4633_v42 = vpop.permute.xlu0 %4632  ;;  %v4738_v44 = vpop.permute.xlu1 %4737  ;;  %5139 = vrot.lane.b32.xlu0 %v10522_v38, %s14308_s25  ;;  %v10525_v33 = vpack.c.bf16 %v5080_v3, %v5080_v3  ;;  %5251 = vst.msk [vmem:[#allocation14 + $0x98] sm:$0x3] %vm658_vm8, %v10538_v32 }
 0x3c3   : > { %4665 = vst.msk [vmem:[#allocation14 + $0x54] sm:$0xf] %vm4657_vm3, %v4633_v42  ;;  %v10604_v50 = vpop.f32.mrb[87].mxu0  ;;  %4931 = vrot.lane.b32.xlu1 %v10509_v59, %s14309_s2  ;;  %v5585_v51 = vadd.f32 %v10602_v43, %v13191_v39  ;;  %v11070_v9 = vld [vmem:[#allocation14 + $0x68] ss:$12 sps:$4 sm:$0xff]   ;;  %v10536_v59 = vpack.c.bf16 %v5183_v14, %v5183_v14 }
 0x3c4   : > { %4771 = vst.msk [vmem:[#allocation14 + $0x48] sm:$0xf] %vm4764_vm4, %v4738_v44  ;;  %v10605_v8 = vadd.f32 %v10604_v50, %v10603_v45  ;;  %10893 = vmatmul.mubr.msk.bf16.gmra.mrb[16].mxu1 %vm654_vm7, %v11070_v9 }
 0x3c5   : > { %v5673_v21 = vadd.f32 %v13100_v5, %v5585_v51  ;;  %10896 = vmatprep.mubr.msk.bf16.mxu1 %vm11407_vm10, %v11406_v53  ;;  %5249 = vst.msk [vmem:[#allocation14 + $0x80] sm:$0xf] %vm4219_vm11, %v10536_v59  ;;  %vm4670_vm11 = vcmask 779776  }
 0x3c6   : > { %v5588_v22 = vadd.f32 %v10605_v8, %v13191_v39  ;;  %v5134_v46 = vpop.permute.xlu1 %5133  ;;  %4533 = vrot.lane.b32.xlu0 %v10446_v55, %s14309_s2 }
 0x3c7   : > { %5166 = vst.msk [vmem:[#allocation14 + $0x4c] sm:$0xf] %vm4764_vm4, %v5134_v46  ;;  %4638 = vrot.lane.b32.xlu1 %v10470_v34, %s14310_s1  ;;  %v5726_v47 = vmax.f32 %v5673_v21, 0.0 }
 0x3c8   : > { %v5676_v57 = vadd.f32 %v13103_v40, %v5588_v22  ;;  %v4791_v40 = vld [vmem:[#allocation2 + $0x6b] sm:$0xf] }
 0x3c9   : > { %5740 = vst.msk [vmem:[#allocation7] sm:$0xff] %vm5739_vm5, %v5726_v47  ;;  %v10486_v4 = vpack.c.bf16 %v4791_v40, %v4791_v40  ;;  %v11080_v27 = vld [vmem:[#allocation14 + $0x98] ss:$0 sps:$4 sm:$0x33]  }
 0x3ca   : > { %v5727_v5 = vmax.f32 %v5676_v57, 0.0  ;;  %v4528_v58 = vpop.permute.xlu1 %4527  ;;  %4933 = vrot.lane.b32.xlu0 %v10498_v56, %s14309_s2 }
 0x3cb   : > { %4559 = vst.msk [vmem:[#allocation14 + $0x60] sm:$0xf] %vm4550_vm2, %v4528_v58  ;;  %5036 = vrot.lane.b32.xlu1 %v10498_v56, %s14310_s1 }
 0x3cc   : > { %5741 = vst.msk [vmem:[#allocation7 + $0x8] sm:$0xff] %vm5739_vm5, %v5727_v5  ;;  %v11077_v1 = vld [vmem:[#allocation14 + $0x80] ss:$12 sps:$4 sm:$0xff]  }
 0x3cd   : > { %4857 = vst.msk [vmem:[#allocation14 + $0x94] sm:$0x3] %vm658_vm8, %v10486_v4  ;;  %10897 = vmatmul.mubr.msk.bf16.gmra.mrb[20].mxu1 %vm654_vm7, %v11077_v1  ;;  %vm670_vm8 = vcmask 517120  }
 0x3ce   : > { %4640 = vrot.lane.b32.xlu0 %v10459_v52, %s14310_s1  ;;  %10900 = vmatprep.mubr.msk.bf16.mxu1 %vm11407_vm10, %v11406_v53  ;;  %v5264_v50 = vld [vmem:[#allocation14 + $0x48] sm:$0xff]  ;;  %671 = vst.msk [vmem:[#allocation3 + $0x12] sm:$0x3] %vm670_vm8, %v11406_v53  ;;  %672 = vst.msk [vmem:[#allocation3 + $0x18] sm:$0x3] %vm670_vm8, %v11406_v53 }
 0x3cf   : > { %4745 = vrot.lane.b32.xlu1 %v10459_v52, %s14308_s25  ;;  %673 = vst.msk [vmem:[#allocation3 + $0x1e] sm:$0x3] %vm670_vm8, %v11406_v53 }
 0x3d2   : > { %5038 = vrot.lane.b32.xlu0 %v10511_v63, %s14310_s1 }
 0x3d3   : > { %5141 = vrot.lane.b32.xlu1 %v10523_v0, %s14308_s25  ;;  %v5755_v52 = vld [vmem:[#allocation7 + $0x1] ss:$2 sm:$0xff] }
 0x3d5   : > { %10901 = vmatmul.mubr.msk.bf16.gmra.mrb[24].mxu1 %vm654_vm7, %v11080_v27 }
 0x3d6   : > { %4747 = vrot.lane.b32.xlu0 %v10472_v12, %s14308_s25 }
 0x3d7   : > { %4535 = vrot.lane.b32.xlu1 %v10447_v13, %s14309_s2 }
 0x3da   : > { %5143 = vrot.lane.b32.xlu0 %v10524_v17, %s14308_s25 }
 0x3db   : > { %4642 = vrot.lane.b32.xlu1 %v10460_v19, %s14310_s1 }
 0x3de   : > { %4935 = vrot.lane.b32.xlu0 %v10499_v31, %s14309_s2 }
 0x3df   : > { %4749 = vrot.lane.b32.xlu1 %v10473_v23, %s14308_s25 }
 0x3e2   : > { %5040 = vrot.lane.b32.xlu0 %v10512_v26, %s14310_s1 }
 0x3e6   : > { %5145 = vrot.lane.b32.xlu0 %v10525_v33, %s14308_s25 }
 0x3f0   : > { %v13232_v34 = vpop.f32.mrb[8].mxu1 }
 0x3f1   : > { %v10886_v35 = vpop.f32.mrb[9].mxu1 }
 0x3f2   : > { %v13234_v36 = vpop.f32.mrb[10].mxu1 }
 0x3f3   : > { %v10887_v6 = vpop.f32.mrb[11].mxu1 }
 0x3f5   : > { %v5031_v25 = vpop.permute.xlu0 %5030  ;;  %v4928_v7 = vpop.permute.xlu1 %4927 }
 0x3f6   : > { %5062 = vst.msk [vmem:[#allocation14 + $0x58] sm:$0xf] %vm4657_vm3, %v5031_v25 }
 0x3f7   : > { %4958 = vst.msk [vmem:[#allocation14 + $0x64] sm:$0xf] %vm4550_vm2, %v4928_v7 }
 0x3f9   : > { %v4740_v37 = vpop.permute.xlu0 %4739  ;;  %v4635_v42 = vpop.permute.xlu1 %4634 }
 0x3fa   : > { %4772 = vst.msk [vmem:[#allocation14 + $0x54] sm:$0xf] %vm4764_vm4, %v4740_v37 }
 0x3fb   : > { %4666 = vst.msk [vmem:[#allocation14 + $0x60] sm:$0xf] %vm4657_vm3, %v4635_v42 }
 0x3fd   : > { %v5136_v38 = vpop.permute.xlu0 %5135  ;;  %v5033_v43 = vpop.permute.xlu1 %5032 }
 0x3fe   : > { %5167 = vst.msk [vmem:[#allocation14 + $0x58] sm:$0xf] %vm4764_vm4, %v5136_v38 }
 0x3ff   : > { %5063 = vst.msk [vmem:[#allocation14 + $0x64] sm:$0xf] %vm4657_vm3, %v5033_v43 }
 0x401   : > { %v4530_v44 = vpop.permute.xlu0 %4529  ;;  %v4742_v45 = vpop.permute.xlu1 %4741 }
 0x402   : > { %4560 = vst.msk [vmem:[#allocation14 + $0x6c] sm:$0xf] %vm4550_vm2, %v4530_v44 }
 0x403   : > { %4773 = vst.msk [vmem:[#allocation14 + $0x60] sm:$0xf] %vm4764_vm4, %v4742_v45 }
 0x405   : > { %v4930_v49 = vpop.permute.xlu0 %4929  ;;  %v5266_v51 = vld [vmem:[#allocation14 + $0x54] sm:$0xff] }
 0x406   : > { %v11071_v8 = vld [vmem:[#allocation14 + $0x4c] ss:$12 sps:$4 sm:$0xff]   ;;  %4959 = vst.msk [vmem:[#allocation14 + $0x70] sm:$0xf] %vm4550_vm2, %v4930_v49  ;;  %v9700_v9 = vcombine.low %v5264_v50, %v5266_v51 }
 0x407   : > { %5606 = vmatprep.mubr.bf16.mxu0 %v11071_v8 }
 0x408   : > { %5607 = vmatmul.mubr.bf16.gmra.mrb[96].mxu0 %v9700_v9 }
 0x409   : > { %v4637_v54 = vpop.permute.xlu0 %4636 }
 0x40a   : > { %4667 = vst.msk [vmem:[#allocation14 + $0x6c] sm:$0xf] %vm4657_vm3, %v4637_v54 }
 0x40f   : > { %v10606_v55 = vpop.f32.mrb[88].mxu0 }
 0x410   : > { %v10607_v21 = vpop.f32.mrb[89].mxu0 }
 0x411   : > { %v10608_v22 = vadd.f32 %v10607_v21, %v10606_v55  ;;  %v10609_v46 = vpop.f32.mrb[90].mxu0  ;;  %v5843_v55 = vld [vmem:[#allocation3 + $0x1] sm:$0xff] }
 0x412   : > { %v10610_v56 = vpop.f32.mrb[91].mxu0  ;;  %v5917_v21 = vld [vmem:[#allocation3 + $0x6] sm:$0xff] }
 0x413   : > { %v5593_v47 = vadd.f32 %v10608_v22, %v13191_v39  ;;  %v10611_v57 = vadd.f32 %v10610_v56, %v10609_v46  ;;  %v10544_v22 = vpack.c.bf16 %v5843_v55, %v5843_v55 }
 0x415   : > { %v5681_v5 = vadd.f32 %v13166_v29, %v5593_v47  ;;  %v5596_v58 = vadd.f32 %v10611_v57, %v13191_v39  ;;  %5864 = vrot.lane.b32.xlu1 %v10544_v22, %s14310_s1  ;;  %v10554_v47 = vpack.c.bf16 %v5917_v21, %v5917_v21 }
 0x417   : > { %v5728_v61 = vmax.f32 %v5681_v5, 0.0  ;;  %v5684_v62 = vadd.f32 %v13169_v60, %v5596_v58 }
 0x419   : > { %5742 = vst.msk [vmem:[#allocation7 + $0x10] sm:$0xff] %vm5739_vm5, %v5728_v61  ;;  %v5729_v48 = vmax.f32 %v5684_v62, 0.0  ;;  %5938 = vrot.lane.b32.xlu1 %v10554_v47, %s14310_s1  ;;  %v5886_v47 = vld [vmem:[#allocation3 + $0x2] sm:$0xff] }
 0x41b   : > { %5743 = vst.msk [vmem:[#allocation7 + $0x18] sm:$0xff] %vm5739_vm5, %v5729_v48 }
 0x420   : > { %v5769_v40 = vld [vmem:[#allocation7 + $0x2] ss:$2 sm:$0xff] }
 0x421   : > { %v5782_v63 = vmax.f32 %v5755_v52, %v5769_v40 }
 0x422   : > { %v5757_v61 = vld [vmem:[#allocation7 + $0x11] ss:$2 sm:$0xff] }
 0x423   : > { %5789 = vst.msk [vmem:[#allocation11] sm:$0xff] %vm5739_vm5, %v5782_v63 }
 0x42c   : > { %v5035_v0 = vpop.permute.xlu0 %5034 }
 0x42d   : > { %v5138_v4 = vpop.permute.xlu1 %5137  ;;  %5064 = vst.msk [vmem:[#allocation14 + $0x70] sm:$0xf] %vm4657_vm3, %v5035_v0 }
 0x42e   : > { %5168 = vst.msk [vmem:[#allocation14 + $0x64] sm:$0xf] %vm4764_vm4, %v5138_v4 }
 0x430   : > { %v4744_v29 = vpop.permute.xlu0 %4743 }
 0x431   : > { %v4532_v10 = vpop.permute.xlu1 %4531  ;;  %4774 = vst.msk [vmem:[#allocation14 + $0x6c] sm:$0xf] %vm4764_vm4, %v4744_v29 }
 0x432   : > { %4561 = vst.msk [vmem:[#allocation14 + $0x78] sm:$0xf] %vm4550_vm2, %v4532_v10 }
 0x434   : > { %v5140_v60 = vpop.permute.xlu0 %5139 }
 0x435   : > { %v4932_v11 = vpop.permute.xlu1 %4931  ;;  %5169 = vst.msk [vmem:[#allocation14 + $0x70] sm:$0xf] %vm4764_vm4, %v5140_v60  ;;  %v5268_v15 = vld [vmem:[#allocation14 + $0x60] sm:$0xff] }
 0x436   : > { %4960 = vst.msk [vmem:[#allocation14 + $0x7c] sm:$0xf] %vm4550_vm2, %v4932_v11 }
 0x438   : > { %v4534_v41 = vpop.permute.xlu0 %4533 }
 0x439   : > { %v4639_v12 = vpop.permute.xlu1 %4638  ;;  %4562 = vst.msk [vmem:[#allocation14 + $0x84] sm:$0xf] %vm4550_vm2, %v4534_v41 }
 0x43a   : > { %4668 = vst.msk [vmem:[#allocation14 + $0x78] sm:$0xf] %vm4657_vm3, %v4639_v12 }
 0x43c   : > { %v4934_v13 = vpop.permute.xlu0 %4933  ;;  %v5270_v30 = vld [vmem:[#allocation14 + $0x6c] sm:$0xff] }
 0x43d   : > { %v5037_v14 = vpop.permute.xlu1 %5036  ;;  %v11073_v59 = vld [vmem:[#allocation14 + $0x64] ss:$12 sps:$4 sm:$0xff]   ;;  %4961 = vst.msk [vmem:[#allocation14 + $0x88] sm:$0xf] %vm4550_vm2, %v4934_v13  ;;  %v9703_v16 = vcombine.low %v5268_v15, %v5270_v30 }
 0x43e   : > { %5065 = vst.msk [vmem:[#allocation14 + $0x7c] sm:$0xf] %vm4657_vm3, %v5037_v14  ;;  %5614 = vmatprep.mubr.bf16.mxu0 %v11073_v59 }
 0x43f   : > { %5615 = vmatmul.mubr.bf16.gmra.mrb[100].mxu0 %v9703_v16 }
 0x440   : > { %v4641_v17 = vpop.permute.xlu0 %4640 }
 0x441   : > { %v4746_v18 = vpop.permute.xlu1 %4745  ;;  %4669 = vst.msk [vmem:[#allocation14 + $0x84] sm:$0xf] %vm4657_vm3, %v4641_v17 }
 0x442   : > { %4775 = vst.msk [vmem:[#allocation14 + $0x78] sm:$0xf] %vm4764_vm4, %v4746_v18 }
 0x444   : > { %v5039_v20 = vpop.permute.xlu0 %5038 }
 0x445   : > { %v5142_v19 = vpop.permute.xlu1 %5141  ;;  %5066 = vst.msk [vmem:[#allocation14 + $0x88] sm:$0xf] %vm4657_vm3, %v5039_v20 }
 0x446   : > { %5170 = vst.msk [vmem:[#allocation14 + $0x7c] sm:$0xf] %vm4764_vm4, %v5142_v19 }
 0x448   : > { %v4748_v31 = vpop.permute.xlu0 %4747 }
 0x449   : > { %v4536_v23 = vpop.permute.xlu1 %4535  ;;  %4776 = vst.msk [vmem:[#allocation14 + $0x84] sm:$0xf] %vm4764_vm4, %v4748_v31 }
 0x44a   : > { %4564 = vst.msk [vmem:[#allocation14 + $0x90] sm:$0x3] %vm4563_vm9, %v4536_v23 }
 0x44c   : > { %v5144_v24 = vpop.permute.xlu0 %5143 }
 0x44d   : > { %v4643_v26 = vpop.permute.xlu1 %4642  ;;  %5171 = vst.msk [vmem:[#allocation14 + $0x88] sm:$0xf] %vm4764_vm4, %v5144_v24  ;;  %v5272_v32 = vld [vmem:[#allocation14 + $0x78] sm:$0xff]  ;;  %vm7587_vm4 = vcmask 1048064  }
 0x44e   : > { %4671 = vst.msk [vmem:[#allocation14 + $0x90] sm:$0x3] %vm4670_vm11, %v4643_v26 }
 0x450   : > { %v4936_v1 = vpop.permute.xlu0 %4935 }
 0x451   : > { %v4750_v3 = vpop.permute.xlu1 %4749  ;;  %4962 = vst.msk [vmem:[#allocation14 + $0x94] sm:$0x3] %vm4563_vm9, %v4936_v1  ;;  %vm8087_vm9 = vcmask 516352  }
 0x452   : > { %4778 = vst.msk [vmem:[#allocation14 + $0x90] sm:$0x3] %vm4777_vm12, %v4750_v3 }
 0x454   : > { %v5041_v28 = vpop.permute.xlu0 %5040  ;;  %v5274_v33 = vld [vmem:[#allocation14 + $0x84] sm:$0xff] }
 0x455   : > { %v11075_v27 = vld [vmem:[#allocation14 + $0x7c] ss:$12 sps:$4 sm:$0xff]   ;;  %5067 = vst.msk [vmem:[#allocation14 + $0x94] sm:$0x3] %vm4670_vm11, %v5041_v28  ;;  %v9706_v35 = vcombine.low %v5272_v32, %v5274_v33 }
 0x456   : > { %5622 = vmatprep.mubr.bf16.mxu0 %v11075_v27  ;;  %v11081_v27 = vld [vmem:[%s14322_s5 + $0x40] sm:$0xff]  }
 0x457   : > { %5623 = vmatmul.mubr.bf16.gmra.mrb[104].mxu0 %v9706_v35  ;;  %v11082_v35 = vld [vmem:[%s14322_s5] sm:$0xff]   ;;  %10651 = vmatprep.subr.bf16.mxu1 %v11081_v27 }
 0x458   : > { %v5146_v6 = vpop.permute.xlu0 %5145  ;;  %10652 = vmatpush3.bf16.msra.mxu1 %v11082_v35 }
 0x459   : > { %5172 = vst.msk [vmem:[#allocation14 + $0x94] sm:$0x3] %vm4777_vm12, %v5146_v6  ;;  %vm8112_vm12 = vcmask 778752  }
 0x45f   : > { %v13277_v25 = vpop.f32.mrb[12].mxu1 }
 0x460   : > { %v10890_v7 = vpop.f32.mrb[13].mxu1  ;;  %v5276_v37 = vld [vmem:[#allocation14 + $0x90] sm:$0x33] }
 0x461   : > { %v13279_v42 = vpop.f32.mrb[14].mxu1  ;;  %v9710_v38 = vcombine.high %v5276_v37, %v5276_v37  ;;  %v9709_v43 = vcombine.low %v5276_v37, %v5276_v37  ;;  %v6105_v37 = vld [vmem:[#allocation3 + $0x26] sm:$0xff] }
 0x462   : > { %v10891_v44 = vpop.f32.mrb[15].mxu1 }
 0x463   : > { %5630 = vmatprep.mubr.bf16.mxu0 %v9710_v38  ;;  %v10582_v38 = vpack.c.bf16 %v6105_v37, %v6105_v37 }
 0x464   : > { %5631 = vmatmul.mubr.bf16.gmra.mrb[108].mxu0 %v9709_v43 }
 0x465   : > { %6131 = vst.msk [vmem:[#allocation15 + $0x4c] sm:$0xf] %vm5752_vm13, %v10582_v38 }
 0x46b   : > { %v10612_v45 = vpop.f32.mrb[92].mxu0 }
 0x46c   : > { %v10613_v49 = vpop.f32.mrb[93].mxu0 }
 0x46d   : > { %v10614_v50 = vadd.f32 %v10613_v49, %v10612_v45  ;;  %v10615_v51 = vpop.f32.mrb[94].mxu0  ;;  %v11083_v45 = vld [vmem:[%s14322_s5 + $0x48] sm:$0xff]  }
 0x46e   : > { %v10616_v8 = vpop.f32.mrb[95].mxu0  ;;  %v11084_v49 = vld [vmem:[%s14322_s5 + $0x8] sm:$0xff]   ;;  %10653 = vmatprep.subr.bf16.mxu1 %v11083_v45 }
 0x46f   : > { %v5601_v9 = vadd.f32 %v10614_v50, %v13191_v39  ;;  %v10617_v54 = vadd.f32 %v10616_v8, %v10615_v51  ;;  %10654 = vmatpush3.bf16.msra.mxu1 %v11084_v49  ;;  %v11086_v50 = vld [vmem:[%s14322_s5 + $0x10] sm:$0xff]  }
 0x471   : > { %v5689_v46 = vadd.f32 %v13232_v34, %v5601_v9  ;;  %v5604_v56 = vadd.f32 %v10617_v54, %v13191_v39  ;;  %v11087_v9 = vld [vmem:[%s14322_s5 + $0x58] sm:$0xff]   ;;  %v5812_v54 = vld [vmem:[#allocation3] sm:$0xff] }
 0x472   : > { %v10539_v21 = vpack.c.bf16 %v5812_v54, %v5812_v54 }
 0x473   : > { %v5730_v57 = vmax.f32 %v5689_v46, 0.0  ;;  %v5692_v5 = vadd.f32 %v13234_v36, %v5604_v56  ;;  %v11088_v46 = vld [vmem:[%s14322_s5 + $0x18] sm:$0xff]   ;;  %v11089_v56 = vld [vmem:[%s14322_s5 + $0x60] sm:$0xff]  }
 0x474   : > { %5838 = vst.msk [vmem:[#allocation15] sm:$0xf] %vm5752_vm13, %v10539_v21 }
 0x475   : > { %5744 = vst.msk [vmem:[#allocation7 + $0x20] sm:$0xff] %vm5739_vm5, %v5730_v57  ;;  %v5731_v58 = vmax.f32 %v5692_v5, 0.0  ;;  %v11090_v57 = vld [vmem:[%s14322_s5 + $0x20] sm:$0xff]   ;;  %v10549_v5 = vpack.c.bf16 %v5886_v47, %v5886_v47 }
 0x477   : > { %5745 = vst.msk [vmem:[#allocation7 + $0x28] sm:$0xff] %vm5739_vm5, %v5731_v58 }
 0x478   : > { %5912 = vst.msk [vmem:[#allocation15 + $0x4] sm:$0xf] %vm5752_vm13, %v10549_v5 }
 0x47c   : > { %v5771_v62 = vld [vmem:[#allocation7 + $0x12] ss:$2 sm:$0xff] }
 0x47d   : > { %v5783_v48 = vmax.f32 %v5757_v61, %v5771_v62  ;;  %v11091_v61 = vld [vmem:[%s14322_s5 + $0x68] sm:$0xff]  }
 0x47e   : > { %v5759_v51 = vld [vmem:[#allocation7 + $0x21] ss:$2 sm:$0xff] }
 0x47f   : > { %5790 = vst.msk [vmem:[#allocation11 + $0x8] sm:$0xff] %vm5739_vm5, %v5783_v48 }
 0x486   : > { %v5796_v34 = vld [vmem:[#allocation11 + $0x5] sm:$0xf]  ;;  %v5797_v52 = vld [vmem:[#allocation11 + $0xa] sm:$0xf] }
 0x487   : > { %v5798_v40 = vmax.f32 %v5796_v34, %v5797_v52  ;;  %v5865_v22 = vpop.permute.xlu1 %5864  ;;  %v11092_v34 = vld [vmem:[%s14322_s5 + $0x28] sm:$0xff]  }
 0x488   : > { %5880 = vst.msk [vmem:[#allocation15] sm:$0xf] %vm5879_vm14, %v5865_v22 }
 0x489   : > { %5799 = vst.msk [vmem:[#allocation3 + $0xe] sm:$0xf] %vm5752_vm13, %v5798_v40  ;;  %v11093_v40 = vld [vmem:[%s14322_s5 + $0x70] sm:$0xff]  }
 0x48b   : > { %v5939_v58 = vpop.permute.xlu1 %5938 }
 0x48c   : > { %5953 = vst.msk [vmem:[#allocation15 + $0x4] sm:$0xf] %vm5879_vm14, %v5939_v58 }
 0x490   : > { %v5844_v63 = vld [vmem:[#allocation3 + $0x9] sm:$0xff] }
 0x491   : > { %v5813_v36 = vld [vmem:[#allocation3 + $0x8] sm:$0xff]  ;;  %v10545_v4 = vpack.c.bf16 %v5844_v63, %v5844_v63  ;;  %v11094_v63 = vld [vmem:[%s14322_s5 + $0x30] sm:$0xff]  }
 0x492   : > { %v5887_v0 = vld [vmem:[#allocation3 + $0xa] sm:$0xff]  ;;  %v13291_v29 = vpack.c.bf16 %v5813_v36, %v5813_v36  ;;  %v11095_v36 = vld [vmem:[%s14322_s5 + $0x78] sm:$0xff]  }
 0x493   : > { %v10550_v10 = vpack.c.bf16 %v5887_v0, %v5887_v0  ;;  %v5958_v60 = vld [vmem:[#allocation3 + $0x7] sm:$0xff]  ;;  %5866 = vrot.lane.b32.xlu0 %v10545_v4, %s14310_s1  ;;  %v11096_v0 = vld [vmem:[%s14322_s5 + $0x38] sm:$0xff]  }
 0x494   : > { %v6030_v11 = vld [vmem:[#allocation3 + $0xc] sm:$0xff]  ;;  %v10559_v41 = vpack.c.bf16 %v5958_v60, %v5958_v60  ;;  %5839 = vst.msk [vmem:[#allocation15 + $0x14] sm:$0xf] %vm5752_vm13, %v13291_v29 }
 0x495   : > { %v10569_v12 = vpack.c.bf16 %v6030_v11, %v6030_v11  ;;  %5913 = vst.msk [vmem:[#allocation15 + $0x18] sm:$0xf] %vm5752_vm13, %v10550_v10 }
 0x496   : > { %5984 = vst.msk [vmem:[#allocation15 + $0x8] sm:$0xf] %vm5752_vm13, %v10559_v41 }
 0x497   : > { %6056 = vst.msk [vmem:[#allocation15 + $0xc] sm:$0xf] %vm5752_vm13, %v10569_v12  ;;  %v13299_v13 = vpop.f32.mrb[16].mxu1 }
 0x498   : > { %v10894_v14 = vpop.f32.mrb[17].mxu1 }
 0x499   : > { %v13301_v15 = vpop.f32.mrb[18].mxu1 }
 0x49a   : > { %v10895_v30 = vpop.f32.mrb[19].mxu1 }
 0x4a0   : > { %v13303_v59 = vpop.f32.mrb[20].mxu1 }
 0x4a1   : > { %v10898_v16 = vpop.f32.mrb[21].mxu1 }
 0x4a2   : > { %v13305_v17 = vpop.f32.mrb[22].mxu1 }
 0x4a3   : > { %v10899_v18 = vpop.f32.mrb[23].mxu1 }
 0x4a8   : > { %v13307_v20 = vpop.f32.mrb[24].mxu1 }
 0x4a9   : > { %v10902_v19 = vpop.f32.mrb[25].mxu1 }
 0x4aa   : > { %v5723_v31 = vpop.f32.mrb[26].mxu1 }
 0x4ab   : > { %v10903_v23 = vpop.f32.mrb[27].mxu1 }
 0x4db   : > { %v10618_v24 = vpop.f32.mrb[96].mxu0 }
 0x4dc   : > { %v10619_v26 = vpop.f32.mrb[97].mxu0 }
 0x4dd   : > { %v10620_v1 = vadd.f32 %v10619_v26, %v10618_v24  ;;  %v10621_v3 = vpop.f32.mrb[98].mxu0 }
 0x4de   : > { %v10622_v28 = vpop.f32.mrb[99].mxu0 }
 0x4df   : > { %v5609_v32 = vadd.f32 %v10620_v1, %v13191_v39  ;;  %v10623_v33 = vadd.f32 %v10622_v28, %v10621_v3 }
 0x4e1   : > { %v5697_v6 = vadd.f32 %v13277_v25, %v5609_v32  ;;  %v5612_v7 = vadd.f32 %v10623_v33, %v13191_v39 }
 0x4e3   : > { %v5732_v43 = vmax.f32 %v5697_v6, 0.0  ;;  %v5700_v44 = vadd.f32 %v13279_v42, %v5612_v7  ;;  %v11085_v42 = vld [vmem:[%s14322_s5 + $0x50] sm:$0xff]  }
 0x4e4   : > { %10655 = vmatprep.subr.bf16.mxu1 %v11085_v42 }
 0x4e5   : > { %5746 = vst.msk [vmem:[#allocation7 + $0x30] sm:$0xff] %vm5739_vm5, %v5732_v43  ;;  %v5733_v25 = vmax.f32 %v5700_v44, 0.0  ;;  %10656 = vmatpush3.bf16.msra.mxu1 %v11086_v50 }
 0x4e6   : > { %10657 = vmatprep.subr.bf16.mxu1 %v11087_v9 }
 0x4e7   : > { %5747 = vst.msk [vmem:[#allocation7 + $0x38] sm:$0xff] %vm5739_vm5, %v5733_v25 }
 0x4e9   : > { %10658 = vmatpush3.bf16.msra.mxu1 %v11088_v46 }
 0x4ea   : > { %10659 = vmatprep.subr.bf16.mxu1 %v11089_v56 }
 0x4ec   : > { %v5773_v8 = vld [vmem:[#allocation7 + $0x22] ss:$2 sm:$0xff] }
 0x4ed   : > { %v5784_v55 = vmax.f32 %v5759_v51, %v5773_v8  ;;  %10660 = vmatpush3.bf16.msra.mxu1 %v11090_v57 }
 0x4ee   : > { %10661 = vmatprep.subr.bf16.mxu1 %v11091_v61  ;;  %v5761_v7 = vld [vmem:[#allocation7 + $0x31] ss:$2 sm:$0xff] }
 0x4ef   : > { %5791 = vst.msk [vmem:[#allocation11 + $0x10] sm:$0xff] %vm5739_vm5, %v5784_v55 }
 0x4f1   : > { %10662 = vmatpush3.bf16.msra.mxu1 %v11092_v34 }
 0x4f2   : > { %10663 = vmatprep.subr.bf16.mxu1 %v11093_v40 }
 0x4f5   : > { %10664 = vmatpush3.bf16.msra.mxu1 %v11094_v63 }
 0x4f6   : > { %v5800_v62 = vld [vmem:[#allocation11 + $0xf] sm:$0xf]  ;;  %v5801_v48 = vld [vmem:[#allocation11 + $0x14] sm:$0xf]  ;;  %10665 = vmatprep.subr.bf16.mxu1 %v11095_v36 }
 0x4f7   : > { %v5802_v52 = vmax.f32 %v5800_v62, %v5801_v48  ;;  %v11100_v62 = vld [vmem:[%s14322_s5 + $0xc0] sm:$0xff]  }
 0x4f9   : > { %5803 = vst.msk [vmem:[#allocation3 + $0x14] sm:$0xf] %vm5752_vm13, %v5802_v52  ;;  %10666 = vmatpush3.bf16.msra.mxu1 %v11096_v0 }
 0x4fa   : > { %10685 = vmatprep.subr.bf16.mxu1 %v11100_v62  ;;  %v11105_v62 = vld [vmem:[%s14322_s5 + $0x90] sm:$0xff]  }
 0x500   : > { %v5845_v4 = vld [vmem:[#allocation3 + $0x11] sm:$0xff] }
 0x501   : > { %v5918_v10 = vld [vmem:[#allocation3 + $0xe] sm:$0xff]  ;;  %v10546_v60 = vpack.c.bf16 %v5845_v4, %v5845_v4 }
 0x502   : > { %v10555_v11 = vpack.c.bf16 %v5918_v10, %v5918_v10  ;;  %v5990_v41 = vld [vmem:[#allocation3 + $0x10] sm:$0xff] }
 0x503   : > { %v13370_v12 = vpack.c.bf16 %v5990_v41, %v5990_v41  ;;  %v5888_v14 = vld [vmem:[#allocation3 + $0x12] sm:$0xff]  ;;  %5868 = vrot.lane.b32.xlu1 %v10546_v60, %s14310_s1 }
 0x504   : > { %v5959_v30 = vld [vmem:[#allocation3 + $0xf] sm:$0xff]  ;;  %5940 = vrot.lane.b32.xlu0 %v10555_v11, %s14310_s1  ;;  %v10551_v16 = vpack.c.bf16 %v5888_v14, %v5888_v14  ;;  %6128 = vst.msk [vmem:[#allocation15 + $0x10] sm:$0xf] %vm5752_vm13, %v10555_v11 }
 0x505   : > { %v10560_v18 = vpack.c.bf16 %v5959_v30, %v5959_v30  ;;  %5840 = vst.msk [vmem:[#allocation15 + $0x28] sm:$0xf] %vm5752_vm13, %v13370_v12  ;;  %v5867_v19 = vpop.permute.xlu0 %5866 }
 0x506   : > { %5914 = vst.msk [vmem:[#allocation15 + $0x2c] sm:$0xf] %vm5752_vm13, %v10551_v16 }
 0x507   : > { %5985 = vst.msk [vmem:[#allocation15 + $0x1c] sm:$0xf] %vm5752_vm13, %v10560_v18 }
 0x508   : > { %5881 = vst.msk [vmem:[#allocation15 + $0x14] sm:$0xf] %vm5879_vm14, %v5867_v19 }
 0x512   : > { %v10624_v31 = vpop.f32.mrb[100].mxu0 }
 0x513   : > { %v10625_v23 = vpop.f32.mrb[101].mxu0 }
 0x514   : > { %v10626_v24 = vadd.f32 %v10625_v23, %v10624_v31  ;;  %v10627_v26 = vpop.f32.mrb[102].mxu0 }
 0x515   : > { %v10628_v1 = vpop.f32.mrb[103].mxu0 }
 0x516   : > { %v5617_v3 = vadd.f32 %v10626_v24, %v13191_v39  ;;  %v10629_v28 = vadd.f32 %v10628_v1, %v10627_v26 }
 0x518   : > { %v5705_v32 = vadd.f32 %v13299_v13, %v5617_v3  ;;  %v5620_v33 = vadd.f32 %v10629_v28, %v13191_v39 }
 0x51a   : > { %v5734_v27 = vmax.f32 %v5705_v32, 0.0  ;;  %v5708_v35 = vadd.f32 %v13301_v15, %v5620_v33 }
 0x51c   : > { %5748 = vst.msk [vmem:[#allocation7 + $0x40] sm:$0xff] %vm5739_vm5, %v5734_v27  ;;  %v5735_v6 = vmax.f32 %v5708_v35, 0.0  ;;  %v5921_v35 = vld [vmem:[#allocation3 + $0x26] sm:$0xf] }
 0x51e   : > { %5749 = vst.msk [vmem:[#allocation7 + $0x48] sm:$0xff] %vm5739_vm5, %v5735_v6 }
 0x523   : > { %v5775_v37 = vld [vmem:[#allocation7 + $0x32] ss:$2 sm:$0xff] }
 0x524   : > { %v5785_v38 = vmax.f32 %v5761_v7, %v5775_v37  ;;  %v6061_v37 = vld [vmem:[#allocation3 + $0xd] sm:$0xff] }
 0x525   : > { %v5763_v56 = vld [vmem:[#allocation7 + $0x41] ss:$2 sm:$0xff] }
 0x526   : > { %5792 = vst.msk [vmem:[#allocation11 + $0x18] sm:$0xff] %vm5739_vm5, %v5785_v38  ;;  %v10558_v38 = vpack.c.bf16 %v5921_v35, %v5921_v35 }
 0x52a   : > { %v10630_v43 = vpop.f32.mrb[104].mxu0 }
 0x52b   : > { %v10631_v44 = vpop.f32.mrb[105].mxu0 }
 0x52c   : > { %v10632_v45 = vadd.f32 %v10631_v44, %v10630_v43  ;;  %v10633_v49 = vpop.f32.mrb[106].mxu0  ;;  %v10574_v43 = vpack.c.bf16 %v6061_v37, %v6061_v37  ;;  %v6033_v44 = vld [vmem:[#allocation3 + $0x24] sm:$0xff] }
 0x52d   : > { %v10634_v13 = vpop.f32.mrb[107].mxu0  ;;  %v5804_v58 = vld [vmem:[#allocation11 + $0x19] sm:$0xf] }
 0x52e   : > { %v10635_v25 = vadd.f32 %v10634_v13, %v10633_v49  ;;  %v5625_v42 = vadd.f32 %v10632_v45, %v13191_v39  ;;  %v10572_v45 = vpack.c.bf16 %v6033_v44, %v6033_v44 }
 0x530   : > { %v5713_v15 = vadd.f32 %v13303_v59, %v5625_v42  ;;  %v5628_v50 = vadd.f32 %v10635_v25, %v13191_v39  ;;  %6059 = vst.msk [vmem:[#allocation15 + $0x48] sm:$0xf] %vm5752_vm13, %v10572_v45 }
 0x532   : > { %v5736_v51 = vmax.f32 %v5713_v15, 0.0  ;;  %v5716_v8 = vadd.f32 %v13305_v17, %v5628_v50 }
 0x534   : > { %5750 = vst.msk [vmem:[#allocation7 + $0x50] sm:$0xff] %vm5739_vm5, %v5736_v51  ;;  %v5737_v9 = vmax.f32 %v5716_v8, 0.0  ;;  %v6064_v51 = vld [vmem:[#allocation3 + $0x25] sm:$0xff] }
 0x536   : > { %5751 = vst.msk [vmem:[#allocation7 + $0x58] sm:$0xff] %vm5739_vm5, %v5737_v9  ;;  %v10577_v9 = vpack.c.bf16 %v6064_v51, %v6064_v51 }
 0x537   : > { %v10636_v54 = vpop.f32.mrb[108].mxu0 }
 0x538   : > { %v10637_v55 = vpop.f32.mrb[109].mxu0 }
 0x539   : > { %v10638_v21 = vadd.f32 %v10637_v55, %v10636_v54  ;;  %v10639_v22 = vpop.f32.mrb[110].mxu0  ;;  %v5962_v54 = vld [vmem:[#allocation3 + $0x27] sm:$0xf]  ;;  %v6034_v55 = vld [vmem:[#allocation3 + $0x2c] sm:$0xf] }
 0x53a   : > { %v10640_v46 = vpop.f32.mrb[111].mxu0  ;;  %v6065_v22 = vld [vmem:[#allocation3 + $0x2d] sm:$0xf] }
 0x53b   : > { %v5777_v47 = vld [vmem:[#allocation7 + $0x42] ss:$2 sm:$0xff]  ;;  %v5633_v57 = vadd.f32 %v10638_v21, %v13191_v39  ;;  %v10563_v46 = vpack.c.bf16 %v5962_v54, %v5962_v54 }
 0x53c   : > { %v5786_v59 = vmax.f32 %v5763_v56, %v5777_v47  ;;  %v10573_v56 = vpack.c.bf16 %v6034_v55, %v6034_v55  ;;  %v10578_v47 = vpack.c.bf16 %v6065_v22, %v6065_v22 }
 0x53d   : > { %v5721_v5 = vadd.f32 %v13307_v20, %v5633_v57  ;;  %v5765_v34 = vld [vmem:[#allocation7 + $0x51] ss:$2 sm:$0xff]  ;;  %5988 = vst.msk [vmem:[#allocation15 + $0x58] sm:$0x3] %vm670_vm8, %v10563_v46 }
 0x53e   : > { %5793 = vst.msk [vmem:[#allocation11 + $0x20] sm:$0xff] %vm5739_vm5, %v5786_v59  ;;  %v11101_v57 = vld [vmem:[%s14322_s5 + $0x80] sm:$0xff]   ;;  %v11097_v59 = vld [vmem:[#allocation15] ss:$20 sps:$4 sm:$0xff]  }
 0x53f   : > { %v5738_v17 = vmax.f32 %v5721_v5, 0.0  ;;  %6060 = vst.msk [vmem:[#allocation15 + $0x5c] sm:$0x3] %vm670_vm8, %v10573_v56 }
 0x541   : > { %5753 = vst.msk [vmem:[#allocation7 + $0x60] sm:$0xf] %vm5752_vm13, %v5738_v17  ;;  %v11102_v17 = vld [vmem:[%s14322_s5 + $0xc8] sm:$0xff]  }
 0x545   : > { %v5805_v61 = vld [vmem:[#allocation11 + $0x1e] sm:$0xf]  ;;  %v5808_v11 = vld [vmem:[#allocation11 + $0x23] sm:$0xf] }
 0x546   : > { %v5806_v48 = vmax.f32 %v5804_v58, %v5805_v61  ;;  %v11103_v58 = vld [vmem:[%s14322_s5 + $0x88] sm:$0xff]   ;;  %v11104_v61 = vld [vmem:[%s14322_s5 + $0xd0] sm:$0xff]  }
 0x548   : > { %v5779_v52 = vld [vmem:[#allocation7 + $0x52] ss:$2 sm:$0xff]  ;;  %5807 = vst.msk [vmem:[#allocation3 + $0x1a] sm:$0xf] %vm5752_vm13, %v5806_v48 }
 0x549   : > { %v5787_v39 = vmax.f32 %v5765_v34, %v5779_v52  ;;  %v11106_v48 = vld [vmem:[%s14322_s5 + $0xd8] sm:$0xff]   ;;  %v11110_v52 = vld [vmem:[%s14322_s5 + $0xe0] sm:$0xff]  }
 0x54a   : > { %v11107_v34 = vld [vmem:[%s14322_s5 + $0x98] sm:$0xff]  }
 0x54b   : > { %5794 = vst.msk [vmem:[#allocation11 + $0x28] sm:$0xff] %vm5739_vm5, %v5787_v39  ;;  %v11111_v39 = vld [vmem:[%s14322_s5 + $0xa0] sm:$0xff]  }
 0x54f   : > { %v5919_v20 = vld [vmem:[#allocation3 + $0x16] sm:$0xff] }
 0x550   : > { %v5991_v40 = vld [vmem:[#allocation3 + $0x18] sm:$0xff]  ;;  %v10556_v63 = vpack.c.bf16 %v5919_v20, %v5919_v20  ;;  %v11113_v20 = vld [vmem:[%s14322_s5 + $0xe8] sm:$0xff]  }
 0x551   : > { %v10566_v36 = vpack.c.bf16 %v5991_v40, %v5991_v40  ;;  %v5960_v0 = vld [vmem:[#allocation3 + $0x17] sm:$0xff]  ;;  %v11114_v40 = vld [vmem:[%s14322_s5 + $0xa8] sm:$0xff]  }
 0x552   : > { %v6031_v4 = vld [vmem:[#allocation3 + $0x14] sm:$0xff]  ;;  %v10561_v10 = vpack.c.bf16 %v5960_v0, %v5960_v0  ;;  %5942 = vrot.lane.b32.xlu1 %v10556_v63, %s14310_s1  ;;  %v5809_v41 = vld [vmem:[#allocation11 + $0x28] sm:$0xf]  ;;  %6129 = vst.msk [vmem:[#allocation15 + $0x24] sm:$0xf] %vm5752_vm13, %v10556_v63 }
 0x553   : > { %v10570_v60 = vpack.c.bf16 %v6031_v4, %v6031_v4  ;;  %5841 = vst.msk [vmem:[#allocation15 + $0x3c] sm:$0xf] %vm5752_vm13, %v10566_v36  ;;  %v5810_v14 = vmax.f32 %v5808_v11, %v5809_v41  ;;  %v6062_v13 = vld [vmem:[#allocation3 + $0x15] sm:$0xff]  ;;  %v6106_v63 = vld [vmem:[#allocation3 + $0x2e] sm:$0xf] }
 0x554   : > { %5986 = vst.msk [vmem:[#allocation15 + $0x30] sm:$0xf] %vm5752_vm13, %v10561_v10  ;;  %v10575_v42 = vpack.c.bf16 %v6062_v13, %v6062_v13  ;;  %v10583_v0 = vpack.c.bf16 %v6106_v63, %v6106_v63  ;;  %v11116_v4 = vld [vmem:[%s14322_s5 + $0xb0] sm:$0xff]   ;;  %v11117_v10 = vld [vmem:[%s14322_s5 + $0xf8] sm:$0xff]   ;;  %v11125_v13 = vld [vmem:[%s14322_s5 + $0x108] sm:$0xff]  }
 0x555   : > { %6057 = vst.msk [vmem:[#allocation15 + $0x20] sm:$0xf] %vm5752_vm13, %v10570_v60  ;;  %5811 = vst.msk [vmem:[#allocation3 + $0x20] sm:$0xf] %vm5752_vm13, %v5810_v14  ;;  %v11121_v60 = vld [vmem:[%s14322_s5 + $0xb8] sm:$0xff]  }
 0x556   : > { %6132 = vst.msk [vmem:[#allocation15 + $0x60] sm:$0x3] %vm670_vm8, %v10583_v0  ;;  %v11139_v63 = vld [vmem:[%s14290_s6 + $0x58] sm:$0xff]   ;;  %v11143_v0 = vld [vmem:[%s14290_s6 + $0x60] sm:$0xff]  }
 0x559   : > { %v11130_v54 = vld [vmem:[#allocation15 + $0x10] ss:$20 sps:$4 sm:$0xff]  }
 0x55c   : > { %v5847_v30 = vld [vmem:[#allocation3 + $0x21] sm:$0xf]  ;;  %v5846_v16 = vld [vmem:[#allocation3 + $0x19] sm:$0xff] }
 0x55d   : > { %v5920_v18 = vld [vmem:[#allocation3 + $0x1e] sm:$0xff]  ;;  %v10548_v19 = vpack.c.bf16 %v5847_v30, %v5847_v30  ;;  %v10547_v31 = vpack.c.bf16 %v5846_v16, %v5846_v16 }
 0x55e   : > { %v10557_v23 = vpack.c.bf16 %v5920_v18, %v5920_v18  ;;  %v5816_v24 = vld [vmem:[#allocation3 + $0x20] sm:$0xf] }
 0x55f   : > { %v10543_v26 = vpack.c.bf16 %v5816_v24, %v5816_v24  ;;  %v5889_v1 = vld [vmem:[#allocation3 + $0x1a] sm:$0xff]  ;;  %v5890_v3 = vld [vmem:[#allocation3 + $0x22] sm:$0xf]  ;;  %5872 = vrot.lane.b32.xlu1 %v10548_v19, %s14310_s1  ;;  %5870 = vrot.lane.b32.xlu0 %v10547_v31, %s14310_s1 }
 0x560   : > { %v10552_v28 = vpack.c.bf16 %v5889_v1, %v5889_v1  ;;  %v10553_v32 = vpack.c.bf16 %v5890_v3, %v5890_v3  ;;  %v6032_v33 = vld [vmem:[#allocation3 + $0x1c] sm:$0xff]  ;;  %6130 = vst.msk [vmem:[#allocation15 + $0x38] sm:$0xf] %vm5752_vm13, %v10557_v23 }
 0x561   : > { %v5961_v27 = vld [vmem:[#allocation3 + $0x1f] sm:$0xff]  ;;  %5842 = vst.msk [vmem:[#allocation15 + $0x50] sm:$0x3] %vm670_vm8, %v10543_v26  ;;  %v10571_v6 = vpack.c.bf16 %v6032_v33, %v6032_v33 }
 0x562   : > { %v10562_v7 = vpack.c.bf16 %v5961_v27, %v5961_v27  ;;  %5915 = vst.msk [vmem:[#allocation15 + $0x40] sm:$0xf] %vm5752_vm13, %v10552_v28  ;;  %v6063_v49 = vld [vmem:[#allocation3 + $0x1d] sm:$0xff] }
 0x563   : > { %5916 = vst.msk [vmem:[#allocation15 + $0x54] sm:$0x3] %vm670_vm8, %v10553_v32  ;;  %6010 = vrot.lane.b32.xlu1 %v13291_v29, %s14310_s1  ;;  %5944 = vrot.lane.b32.xlu0 %v10557_v23, %s14310_s1  ;;  %v5993_v29 = vld [vmem:[#allocation3 + $0x28] sm:$0xf]  ;;  %v10576_v25 = vpack.c.bf16 %v6063_v49, %v6063_v49  ;;  %v5992_v15 = vld [vmem:[#allocation3 + $0x20] sm:$0xff]  ;;  %vm8061_vm8 = vcmask 253952  }
 0x564   : > { %6058 = vst.msk [vmem:[#allocation15 + $0x34] sm:$0xf] %vm5752_vm13, %v10571_v6  ;;  %5987 = vst.msk [vmem:[#allocation15 + $0x44] sm:$0xf] %vm5752_vm13, %v10562_v7  ;;  %v10568_v50 = vpack.c.bf16 %v5993_v29, %v5993_v29  ;;  %v10567_v8 = vpack.c.bf16 %v5992_v15, %v5992_v15 }
 0x567   : > { %6082 = vrot.lane.b32.xlu1 %v10574_v43, %s14310_s1  ;;  %5946 = vrot.lane.b32.xlu0 %v10558_v38, %s14310_s1  ;;  %v11122_v43 = vld [vmem:[%s14322_s5 + $0x100] sm:$0xff]  }
 0x568   : > { %v11131_v55 = vld [vmem:[#allocation15 + $0x38] ss:$20 sps:$4 sm:$0xff]  }
 0x56b   : > { %6014 = vrot.lane.b32.xlu1 %v10566_v36, %s14310_s1  ;;  %6012 = vrot.lane.b32.xlu0 %v13370_v12, %s14310_s1  ;;  %v11115_v36 = vld [vmem:[%s14322_s5 + $0xf0] sm:$0xff]  }
 0x56f   : > { %6086 = vrot.lane.b32.xlu1 %v10576_v25, %s14310_s1  ;;  %6084 = vrot.lane.b32.xlu0 %v10575_v42, %s14310_s1  ;;  %v11126_v42 = vld [vmem:[%s14322_s5 + $0x110] sm:$0xff]  }
 0x573   : > { %6016 = vrot.lane.b32.xlu0 %v10567_v8, %s14310_s1  ;;  %6018 = vrot.lane.b32.xlu1 %v10568_v50, %s14310_s1  ;;  %v11129_v8 = vld [vmem:[%s14322_s5 + $0x118] sm:$0xff]  }
 0x575   : > { %v5869_v21 = vpop.permute.xlu1 %5868 }
 0x576   : > { %v5941_v12 = vpop.permute.xlu0 %5940  ;;  %5882 = vst.msk [vmem:[#allocation15 + $0x28] sm:$0xf] %vm5879_vm14, %v5869_v21  ;;  %v11132_v21 = vld [vmem:[#allocation15 + $0x60] ss:$0 sps:$4 sm:$0x33]  }
 0x577   : > { %5954 = vst.msk [vmem:[#allocation15 + $0x18] sm:$0xf] %vm5879_vm14, %v5941_v12  ;;  %6088 = vrot.lane.b32.xlu0 %v10577_v9, %s14310_s1 }
 0x57b   : > { %6090 = vrot.lane.b32.xlu0 %v10578_v47, %s14310_s1  ;;  %s14325_s1 = sld [smem:[#allocation22_spill]] }
 0x57e   : > { %v11099_v5 = vld [vmem:[#allocation15 + $0x4] ss:$20 sps:$4 sm:$0xff]  }
 0x57f   : > { %6551 = vmatprep.mubr.bf16.mxu1 %v11099_v5  ;;  %v11134_v5 = vld [vmem:[%s14290_s6] sm:$0xff]  }
 0x580   : > { %6552 = vmatmul.mubr.bf16.vlgmr.msra.gmra.mrb[28].mxu1 %v11097_v59  ;;  %v11133_v59 = vld [vmem:[%s14290_s6 + $0x40] sm:$0xff]  }
 0x581   : > { %10686 = vmatpush3.bf16.msra.mxu1 %v11101_v57  ;;  %10726 = vmatprep.subr.bf16.mxu0 %v11133_v59  ;;  %s645_s2 = scalar_lea.vmem %s14325_s1, %s14331_s24  ;;  %s14328_s1 = smov 32  }
 0x582   : > { %10687 = vmatprep.subr.bf16.mxu1 %v11102_v17  ;;  %10727 = vmatpush3.bf16.msra.mxu0 %v11134_v5  ;;  %v11135_v17 = vld [vmem:[%s14290_s6 + $0x48] sm:$0xff]  }
 0x583   : > { %10728 = vmatprep.subr.bf16.mxu0 %v11135_v17 }
 0x585   : > { %10688 = vmatpush3.bf16.msra.mxu1 %v11103_v58  ;;  %v11136_v58 = vld [vmem:[%s14290_s6 + $0x8] sm:$0xff]  }
 0x586   : > { %10689 = vmatprep.subr.bf16.mxu1 %v11104_v61  ;;  %10729 = vmatpush3.bf16.msra.mxu0 %v11136_v58  ;;  %v11141_v61 = vld [vmem:[%s14290_s6 + $0xc0] sm:$0xff]  }
 0x589   : > { %10690 = vmatpush3.bf16.msra.mxu1 %v11105_v62  ;;  %v11142_v62 = vld [vmem:[%s14290_s6 + $0x80] sm:$0xff]  }
 0x58a   : > { %10691 = vmatprep.subr.bf16.mxu1 %v11106_v48  ;;  %v11137_v48 = vld [vmem:[%s14290_s6 + $0x50] sm:$0xff]  }
 0x58b   : > { %10730 = vmatprep.subr.bf16.mxu0 %v11137_v48 }
 0x58d   : > { %10692 = vmatpush3.bf16.msra.mxu1 %v11107_v34  ;;  %v11138_v34 = vld [vmem:[%s14290_s6 + $0x10] sm:$0xff]  }
 0x58e   : > { %10693 = vmatprep.subr.bf16.mxu1 %v11110_v52  ;;  %v11144_v52 = vld [vmem:[%s14290_s6 + $0xc8] sm:$0xff]   ;;  %10731 = vmatpush3.bf16.msra.mxu0 %v11138_v34 }
 0x58f   : > { %10732 = vmatprep.subr.bf16.mxu0 %v11139_v63 }
 0x591   : > { %10694 = vmatpush3.bf16.msra.mxu1 %v11111_v39  ;;  %v11146_v39 = vld [vmem:[%s14290_s6 + $0x88] sm:$0xff]  }
 0x592   : > { %10695 = vmatprep.subr.bf16.mxu1 %v11113_v20  ;;  %v11147_v20 = vld [vmem:[%s14290_s6 + $0xd0] sm:$0xff]  }
 0x595   : > { %10696 = vmatpush3.bf16.msra.mxu1 %v11114_v40  ;;  %v11148_v40 = vld [vmem:[%s14290_s6 + $0x90] sm:$0xff]  }
 0x596   : > { %10697 = vmatprep.subr.bf16.mxu1 %v11115_v36  ;;  %v11140_v36 = vld [vmem:[%s14290_s6 + $0x18] sm:$0xff]  }
 0x597   : > { %10733 = vmatpush3.bf16.msra.mxu0 %v11140_v36 }
 0x598   : > { %10734 = vmatprep.subr.bf16.mxu0 %v11143_v0 }
 0x599   : > { %10698 = vmatpush3.bf16.msra.mxu1 %v11116_v4  ;;  %v11151_v4 = vld [vmem:[%s14290_s6 + $0xd8] sm:$0xff]  }
 0x59a   : > { %10699 = vmatprep.subr.bf16.mxu1 %v11117_v10  ;;  %v11152_v10 = vld [vmem:[%s14290_s6 + $0x98] sm:$0xff]  }
 0x59d   : > { %10700 = vmatpush3.bf16.msra.mxu1 %v11121_v60  ;;  %v11153_v60 = vld [vmem:[%s14290_s6 + $0xe0] sm:$0xff]  }
 0x59e   : > { %10904 = vmatprep.subr.bf16.mxu1 %v11406_v53 }
 0x5c4   : > { %v5943_v11 = vpop.permute.xlu1 %5942 }
 0x5c5   : > { %5955 = vst.msk [vmem:[#allocation15 + $0x2c] sm:$0xf] %vm5879_vm14, %v5943_v11  ;;  %v11145_v11 = vld [vmem:[%s14290_s6 + $0x20] sm:$0xff]  }
 0x5c6   : > { %10735 = vmatpush3.bf16.msra.mxu0 %v11145_v11 }
 0x5cc   : > { %v6139_v24 = vld [vmem:[#allocation15 + $0x28] sm:$0xff] }
 0x5d1   : > { %v5873_v41 = vpop.permute.xlu1 %5872  ;;  %v5871_v14 = vpop.permute.xlu0 %5870 }
 0x5d2   : > { %5885 = vst.msk [vmem:[#allocation15 + $0x50] sm:$0x3] %vm5884_vm15, %v5873_v41  ;;  %v11149_v41 = vld [vmem:[%s14290_s6 + $0x68] sm:$0xff]  }
 0x5d3   : > { %5883 = vst.msk [vmem:[#allocation15 + $0x3c] sm:$0xf] %vm5879_vm14, %v5871_v14  ;;  %v11154_v14 = vld [vmem:[%s14290_s6 + $0xa0] sm:$0xff]   ;;  %10736 = vmatprep.subr.bf16.mxu0 %v11149_v41 }
 0x5d5   : > { %v6011_v30 = vpop.permute.xlu1 %6010  ;;  %v5945_v16 = vpop.permute.xlu0 %5944 }
 0x5d6   : > { %6025 = vst.msk [vmem:[#allocation15 + $0x8] sm:$0xf] %vm5879_vm14, %v6011_v30  ;;  %5956 = vst.msk [vmem:[#allocation15 + $0x40] sm:$0xf] %vm5879_vm14, %v5945_v16  ;;  %v11157_v30 = vld [vmem:[%s14290_s6 + $0xe8] sm:$0xff]  }
 0x5d7   : > { %v11150_v16 = vld [vmem:[%s14290_s6 + $0x28] sm:$0xff]  }
 0x5d8   : > { %10737 = vmatpush3.bf16.msra.mxu0 %v11150_v16 }
 0x5d9   : > { %v6083_v18 = vpop.permute.xlu1 %6082  ;;  %v5947_v19 = vpop.permute.xlu0 %5946 }
 0x5da   : > { %6097 = vst.msk [vmem:[#allocation15 + $0xc] sm:$0xf] %vm5879_vm14, %v6083_v18  ;;  %v11155_v18 = vld [vmem:[%s14290_s6 + $0x70] sm:$0xff]  }
 0x5db   : > { %5957 = vst.msk [vmem:[#allocation15 + $0x54] sm:$0x3] %vm5884_vm15, %v5947_v19  ;;  %v11158_v19 = vld [vmem:[%s14290_s6 + $0xa8] sm:$0xff]   ;;  %10738 = vmatprep.subr.bf16.mxu0 %v11155_v18 }
 0x5dd   : > { %v6015_v31 = vpop.permute.xlu1 %6014  ;;  %v6013_v23 = vpop.permute.xlu0 %6012  ;;  %v6142_v26 = vld [vmem:[#allocation15 + $0x3c] sm:$0xff] }
 0x5de   : > { %v11108_v1 = vld [vmem:[#allocation15 + $0x2c] ss:$20 sps:$4 sm:$0xff]   ;;  %6027 = vst.msk [vmem:[#allocation15 + $0x30] sm:$0xf] %vm5879_vm14, %v6015_v31  ;;  %6026 = vst.msk [vmem:[#allocation15 + $0x1c] sm:$0xf] %vm5879_vm14, %v6013_v23  ;;  %v9788_v3 = vcombine.low %v6139_v24, %v6142_v26 }
 0x5df   : > { %6559 = vmatprep.mubr.bf16.mxu1 %v11108_v1  ;;  %v11159_v31 = vld [vmem:[%s14290_s6 + $0xf0] sm:$0xff]   ;;  %v11160_v24 = vld [vmem:[%s14290_s6 + $0x78] sm:$0xff]  }
 0x5e0   : > { %6560 = vmatmul.mubr.bf16.gmra.mrb[32].mxu1 %v9788_v3  ;;  %v11156_v23 = vld [vmem:[%s14290_s6 + $0x30] sm:$0xff]   ;;  %v11163_v1 = vld [vmem:[%s14290_s6 + $0xf8] sm:$0xff]  }
 0x5e1   : > { %v6087_v28 = vpop.permute.xlu1 %6086  ;;  %v6085_v32 = vpop.permute.xlu0 %6084  ;;  %v11161_v26 = vld [vmem:[%s14290_s6 + $0xb0] sm:$0xff]   ;;  %10739 = vmatpush3.bf16.msra.mxu0 %v11156_v23  ;;  %v11162_v3 = vld [vmem:[%s14290_s6 + $0x38] sm:$0xff]  }
 0x5e2   : > { %v6145_v33 = vld [vmem:[#allocation15 + $0x50] sm:$0x33]  ;;  %6099 = vst.msk [vmem:[#allocation15 + $0x34] sm:$0xf] %vm5879_vm14, %v6087_v28  ;;  %6098 = vst.msk [vmem:[#allocation15 + $0x20] sm:$0xf] %vm5879_vm14, %v6085_v32  ;;  %10740 = vmatprep.subr.bf16.mxu0 %v11160_v24 }
 0x5e3   : > { %v9794_v27 = vcombine.high %v6145_v33, %v6145_v33  ;;  %v9793_v7 = vcombine.low %v6145_v33, %v6145_v33  ;;  %v11164_v28 = vld [vmem:[%s14290_s6 + $0xb8] sm:$0xff]   ;;  %v11165_v32 = vld [vmem:[%s14290_s6 + $0x140] sm:$0xff]  }
 0x5e4   : > { %v11166_v33 = vld [vmem:[%s14290_s6 + $0x1c0] sm:$0xff]  }
 0x5e5   : > { %6567 = vmatprep.mubr.bf16.mxu1 %v9794_v27  ;;  %v6017_v35 = vpop.permute.xlu0 %6016  ;;  %v6019_v6 = vpop.permute.xlu1 %6018  ;;  %v11118_v45 = vld [vmem:[#allocation15 + $0x8] ss:$20 sps:$4 sm:$0xff]   ;;  %10741 = vmatpush3.bf16.msra.mxu0 %v11162_v3 }
 0x5e6   : > { %6028 = vst.msk [vmem:[#allocation15 + $0x44] sm:$0xf] %vm5879_vm14, %v6017_v35  ;;  %10770 = vmatprep.subr.bf16.mxu0 %v11165_v32 }
 0x5e7   : > { %6029 = vst.msk [vmem:[#allocation15 + $0x58] sm:$0x3] %vm5884_vm15, %v6019_v6 }
 0x5e8   : > { %6568 = vmatmul.mubr.bf16.gmra.mrb[36].mxu1 %v9793_v7 }
 0x5e9   : > { %v6089_v37 = vpop.permute.xlu0 %6088  ;;  %v11120_v38 = vld [vmem:[#allocation15 + $0xc] ss:$20 sps:$4 sm:$0xff]   ;;  %v6140_v25 = vld [vmem:[#allocation15 + $0x30] sm:$0xff] }
 0x5ea   : > { %6100 = vst.msk [vmem:[#allocation15 + $0x48] sm:$0xf] %vm5879_vm14, %v6089_v37  ;;  %6607 = vmatprep.mubr.bf16.mxu1 %v11120_v38  ;;  %vm8137_vm14 = vcmask 1041152  }
 0x5ed   : > { %v6091_v44 = vpop.permute.xlu0 %6090 }
 0x5ee   : > { %6101 = vst.msk [vmem:[#allocation15 + $0x5c] sm:$0x3] %vm5884_vm15, %v6091_v44 }
 0x5f0   : > { %6608 = vmatmul.mubr.bf16.vlgmr.msra.gmra.mrb[40].mxu1 %v11118_v45 }
 0x5f1   : > { %10905 = vmatpush3.bf16.msra.mxu1 %v11122_v43  ;;  %v11123_v49 = vld [vmem:[#allocation15 + $0x34] ss:$20 sps:$4 sm:$0xff]  }
 0x5f2   : > { %10906 = vmatprep.subr.bf16.mxu1 %v11406_v53  ;;  %v6143_v29 = vld [vmem:[#allocation15 + $0x44] sm:$0xff]  ;;  %6615 = vmatprep.mubr.bf16.mxu1 %v11123_v49 }
 0x5f3   : > { %v9790_v50 = vcombine.low %v6140_v25, %v6143_v29  ;;  %v9782_v29 = vld [vmem:[%s14294_s10] ss:$0 sm:$0xff] }
 0x5f5   : > { %10907 = vmatpush3.bf16.msra.mxu1 %v11125_v13  ;;  %v6146_v15 = vld [vmem:[#allocation15 + $0x58] sm:$0x33] }
 0x5f6   : > { %10908 = vmatprep.subr.bf16.mxu1 %v11406_v53  ;;  %v9796_v51 = vcombine.high %v6146_v15, %v6146_v15  ;;  %v9795_v9 = vcombine.low %v6146_v15, %v6146_v15 }
 0x5f8   : > { %6616 = vmatmul.mubr.bf16.gmra.mrb[44].mxu1 %v9790_v50 }
 0x5f9   : > { %10909 = vmatpush3.bf16.msra.mxu1 %v11126_v42  ;;  %6623 = vmatprep.mubr.bf16.mxu1 %v9796_v51 }
 0x5fa   : > { %10910 = vmatprep.subr.bf16.mxu1 %v11406_v53 }
 0x5fd   : > { %10911 = vmatpush3.bf16.msra.mxu1 %v11129_v8 }
 0x5fe   : > { %10748 = vmatprep.subr.bf16.mxu1 %v11141_v61 }
 0x600   : > { %6624 = vmatmul.mubr.bf16.gmra.mrb[48].mxu1 %v9795_v9 }
 0x601   : > { %10912 = vmatprep.mubr.msk.bf16.mxu1 %vm11407_vm10, %v11406_v53 }
 0x608   : > { %10913 = vmatmul.mubr.msk.bf16.vlgmr.msra.gmra.mrb[52].mxu1 %vm5739_vm5, %v11130_v54 }
 0x609   : > { %10916 = vmatprep.mubr.msk.bf16.mxu1 %vm11407_vm10, %v11406_v53  ;;  %10749 = vmatpush3.bf16.msra.mxu1 %v11142_v62 }
 0x60a   : > { %10750 = vmatprep.subr.bf16.mxu1 %v11144_v52 }
 0x60d   : > { %10751 = vmatpush3.bf16.msra.mxu1 %v11146_v39 }
 0x60e   : > { %10752 = vmatprep.subr.bf16.mxu1 %v11147_v20 }
 0x610   : > { %10917 = vmatmul.mubr.msk.bf16.gmra.mrb[56].mxu1 %vm5739_vm5, %v11131_v55 }
 0x611   : > { %10920 = vmatprep.mubr.msk.bf16.mxu1 %vm11407_vm10, %v11406_v53  ;;  %10753 = vmatpush3.bf16.msra.mxu1 %v11148_v40 }
 0x612   : > { %10754 = vmatprep.subr.bf16.mxu1 %v11151_v4 }
 0x615   : > { %10755 = vmatpush3.bf16.msra.mxu1 %v11152_v10 }
 0x616   : > { %10756 = vmatprep.subr.bf16.mxu1 %v11153_v60 }
 0x618   : > { %10921 = vmatmul.mubr.msk.bf16.gmra.mrb[60].mxu1 %vm5739_vm5, %v11132_v21 }
 0x619   : > { %10757 = vmatpush3.bf16.msra.mxu1 %v11154_v14 }
 0x61a   : > { %10758 = vmatprep.subr.bf16.mxu1 %v11157_v30 }
 0x61d   : > { %10759 = vmatpush3.bf16.msra.mxu1 %v11158_v19 }
 0x61e   : > { %10760 = vmatprep.subr.bf16.mxu1 %v11159_v31 }
 0x621   : > { %10761 = vmatpush3.bf16.msra.mxu1 %v11161_v26 }
 0x622   : > { %10762 = vmatprep.subr.bf16.mxu1 %v11163_v1 }
 0x625   : > { %10763 = vmatpush3.bf16.msra.mxu1 %v11164_v28 }
 0x626   : > { %10792 = vmatprep.subr.bf16.mxu1 %v11166_v33 }
 0x653   : > { %v10667_v12 = vpop.f32.mrb[28].mxu1 }
 0x654   : > { %v10668_v22 = vpop.f32.mrb[29].mxu1 }
 0x655   : > { %v13521_v46 = vadd.f32 %v10668_v22, %v10667_v12  ;;  %v10670_v56 = vpop.f32.mrb[30].mxu1 }
 0x656   : > { %v10671_v47 = vpop.f32.mrb[31].mxu1 }
 0x657   : > { %v13523_v57 = vadd.f32 %v10671_v47, %v10670_v56  ;;  %v6554_v15 = vadd.f32 %v13521_v46, %v9782_v29  ;;  %v7558_v46 = vld [vmem:[%s14323_s28] sm:$0xff] }
 0x658   : > { %vm7560_vm0 = vcmp.ne.f32.partialorder %v7558_v46, 0.0  ;;  %v11169_v46 = vld [vmem:[%s14290_s6 + $0x148] sm:$0xff]  }
 0x659   : > { %v6557_v9 = vadd.f32 %v13523_v57, %v9782_v29  ;;  %v7559_v57 = vld [vmem:[%s14323_s28 + $0x8] sm:$0xff]  ;;  %v7562_v48 = vsel %vm7560_vm0, 1, %v11401_v2  ;;  %vm8411_vm0 = vcmask 130048  }
 0x65a   : > { %vm7561_vm1 = vcmp.ne.f32.partialorder %v7559_v57, 0.0  ;;  %7565 = vperm.xlu1 %10981, %v7562_v48   ;;  %v11170_v57 = vld [vmem:[%s14290_s6 + $0x1c8] sm:$0xff]  }
 0x65b   : > { %v7563_v34 = vsel %vm7561_vm1, 1, %v11401_v2  ;;  %vm9022_vm1 = vcmask 1040384  }
 0x65c   : > { %7568 = vperm.xlu0 %10982, %v7563_v34   ;;  %v11171_v34 = vld [vmem:[%s14290_s6 + $0x108] sm:$0xff]  }
 0x6b3   : > { %v10673_v27 = vpop.f32.mrb[32].mxu1 }
 0x6b4   : > { %v10674_v35 = vpop.f32.mrb[33].mxu1 }
 0x6b5   : > { %v10675_v6 = vadd.f32 %v10674_v35, %v10673_v27  ;;  %v10676_v7 = vpop.f32.mrb[34].mxu1 }
 0x6b6   : > { %v10677_v37 = vpop.f32.mrb[35].mxu1 }
 0x6b7   : > { %v10678_v38 = vadd.f32 %v10677_v37, %v10676_v7  ;;  %v6562_v56 = vadd.f32 %v10675_v6, %v9782_v29 }
 0x6b9   : > { %v6565_v17 = vadd.f32 %v10678_v38, %v9782_v29 }
 0x6bb   : > { %v10679_v43 = vpop.f32.mrb[36].mxu1 }
 0x6bc   : > { %v10680_v44 = vpop.f32.mrb[37].mxu1 }
 0x6bd   : > { %v10681_v45 = vadd.f32 %v10680_v44, %v10679_v43  ;;  %v10682_v49 = vpop.f32.mrb[38].mxu1 }
 0x6be   : > { %v10683_v13 = vpop.f32.mrb[39].mxu1 }
 0x6bf   : > { %v6570_v20 = vadd.f32 %v10681_v45, %v9782_v29 }
 0x6c3   : > { %v10701_v25 = vpop.f32.mrb[40].mxu1 }
 0x6c4   : > { %v10702_v42 = vpop.f32.mrb[41].mxu1 }
 0x6c5   : > { %v10703_v50 = vadd.f32 %v10702_v42, %v10701_v25  ;;  %v10704_v51 = vpop.f32.mrb[42].mxu1 }
 0x6c6   : > { %v10705_v8 = vpop.f32.mrb[43].mxu1 }
 0x6c7   : > { %v10706_v54 = vadd.f32 %v10705_v8, %v10704_v51  ;;  %v6610_v55 = vadd.f32 %v10703_v50, %v6554_v15  ;;  %v6727_v15 = vld [vmem:[#allocation4 + $0x1] sm:$0xff] }
 0x6c8   : > { %v6723_v50 = vld [vmem:[#allocation4] sm:$0xff] }
 0x6c9   : > { %v6613_v21 = vadd.f32 %v10706_v54, %v6557_v9  ;;  %v6731_v51 = vld [vmem:[#allocation4 + $0x2] sm:$0xff]  ;;  %v6752_v54 = vld [vmem:[#allocation4 + $0x11] sm:$0xff] }
 0x6ca   : > { %v11167_v9 = vld [vmem:[%s14290_s6 + $0x100] sm:$0xff]  }
 0x6cb   : > { %v10707_v12 = vpop.f32.mrb[44].mxu1 }
 0x6cc   : > { %v10708_v22 = vpop.f32.mrb[45].mxu1 }
 0x6cd   : > { %v10709_v47 = vadd.f32 %v10708_v22, %v10707_v12  ;;  %v10710_v59 = vpop.f32.mrb[46].mxu1 }
 0x6ce   : > { %v10711_v5 = vpop.f32.mrb[47].mxu1 }
 0x6cf   : > { %v10712_v58 = vadd.f32 %v10711_v5, %v10710_v59  ;;  %v6618_v61 = vadd.f32 %v10709_v47, %v6562_v56  ;;  %v11168_v5 = vld [vmem:[%s14290_s6 + $0x180] sm:$0xff]  }
 0x6d1   : > { %v6621_v62 = vadd.f32 %v10712_v58, %v6565_v17 }
 0x6d3   : > { %v10713_v52 = vpop.f32.mrb[48].mxu1 }
 0x6d4   : > { %v10714_v39 = vpop.f32.mrb[49].mxu1 }
 0x6d5   : > { %v10715_v40 = vadd.f32 %v10714_v39, %v10713_v52  ;;  %v10716_v63 = vpop.f32.mrb[50].mxu1  ;;  %v11172_v52 = vld [vmem:[%s14290_s6 + $0x188] sm:$0xff]   ;;  %v11173_v39 = vld [vmem:[%s14290_s6 + $0x150] sm:$0xff]  }
 0x6d6   : > { %v10717_v36 = vpop.f32.mrb[51].mxu1  ;;  %v11176_v63 = vld [vmem:[%s14290_s6 + $0x190] sm:$0xff]  }
 0x6d7   : > { %v6626_v0 = vadd.f32 %v10715_v40, %v6570_v20  ;;  %v11174_v20 = vld [vmem:[%s14290_s6 + $0x1d0] sm:$0xff]   ;;  %v11177_v36 = vld [vmem:[%s14290_s6 + $0x158] sm:$0xff]  }
 0x6d8   : > { %v11175_v40 = vld [vmem:[%s14290_s6 + $0x110] sm:$0xff]  }
 0x6db   : > { %v6665_v4 = vpop.f32.mrb[52].mxu1 }
 0x6dc   : > { %v6666_v10 = vadd.f32 %v6665_v4, %v6610_v55  ;;  %v10914_v60 = vpop.f32.mrb[53].mxu1  ;;  %v11179_v4 = vld [vmem:[%s14290_s6 + $0x118] sm:$0xff]  }
 0x6dd   : > { %v6668_v11 = vpop.f32.mrb[54].mxu1  ;;  %v11181_v60 = vld [vmem:[%s14290_s6 + $0x160] sm:$0xff]  }
 0x6de   : > { %v6687_v41 = vmax.f32 %v6666_v10, 0.0  ;;  %v6669_v14 = vadd.f32 %v6668_v11, %v6613_v21  ;;  %v10915_v30 = vpop.f32.mrb[55].mxu1  ;;  %v11180_v10 = vld [vmem:[%s14290_s6 + $0x198] sm:$0xff]   ;;  %v11182_v11 = vld [vmem:[%s14290_s6 + $0x1e0] sm:$0xff]  }
 0x6df   : > { %v11185_v30 = vld [vmem:[%s14290_s6 + $0x168] sm:$0xff]  }
 0x6e0   : > { %6692 = vst [vmem:[#allocation8] sm:$0xff] %v6687_v41  ;;  %v6688_v16 = vmax.f32 %v6669_v14, 0.0  ;;  %v11183_v41 = vld [vmem:[%s14290_s6 + $0x120] sm:$0xff]  }
 0x6e1   : > { %v11184_v14 = vld [vmem:[%s14290_s6 + $0x1a0] sm:$0xff]  }
 0x6e2   : > { %6693 = vst [vmem:[#allocation8 + $0x8] sm:$0xff] %v6688_v16  ;;  %v11186_v16 = vld [vmem:[%s14290_s6 + $0x1e8] sm:$0xff]  }
 0x6e3   : > { %v6673_v2 = vpop.f32.mrb[56].mxu1 }
 0x6e4   : > { %v6674_v18 = vadd.f32 %v6673_v2, %v6618_v61  ;;  %v10918_v19 = vpop.f32.mrb[57].mxu1  ;;  %v11187_v2 = vld [vmem:[%s14290_s6 + $0x128] sm:$0xff]  }
 0x6e5   : > { %v6676_v31 = vpop.f32.mrb[58].mxu1  ;;  %v11189_v19 = vld [vmem:[%s14290_s6 + $0x170] sm:$0xff]  }
 0x6e6   : > { %v6689_v23 = vmax.f32 %v6674_v18, 0.0  ;;  %v6677_v24 = vadd.f32 %v6676_v31, %v6621_v62  ;;  %v10919_v26 = vpop.f32.mrb[59].mxu1  ;;  %v11188_v18 = vld [vmem:[%s14290_s6 + $0x1a8] sm:$0xff]   ;;  %v11190_v31 = vld [vmem:[%s14290_s6 + $0x1f0] sm:$0xff]  }
 0x6e7   : > { %v11193_v26 = vld [vmem:[%s14290_s6 + $0x178] sm:$0xff]  }
 0x6e8   : > { %6694 = vst [vmem:[#allocation8 + $0x10] sm:$0xff] %v6689_v23  ;;  %v6690_v1 = vmax.f32 %v6677_v24, 0.0  ;;  %v11191_v23 = vld [vmem:[%s14290_s6 + $0x130] sm:$0xff]  }
 0x6e9   : > { %v6698_v6 = vld [vmem:[#allocation8 + $0x1] ss:$2 sm:$0xff]  ;;  %v11192_v24 = vld [vmem:[%s14290_s6 + $0x1b0] sm:$0xff]  }
 0x6ea   : > { %6695 = vst [vmem:[#allocation8 + $0x18] sm:$0xff] %v6690_v1  ;;  %v11194_v1 = vld [vmem:[%s14290_s6 + $0x1f8] sm:$0xff]  }
 0x6eb   : > { %v6681_v3 = vpop.f32.mrb[60].mxu1 }
 0x6ec   : > { %v6682_v28 = vadd.f32 %v6681_v3, %v6626_v0  ;;  %v10922_v32 = vpop.f32.mrb[61].mxu1  ;;  %v11178_v0 = vld [vmem:[%s14290_s6 + $0x1d8] sm:$0xff]  }
 0x6ed   : > { %v6684_v33 = vpop.f32.mrb[62].mxu1  ;;  %v11195_v3 = vld [vmem:[%s14290_s6 + $0x138] sm:$0xff]  }
 0x6ee   : > { %v6691_v27 = vmax.f32 %v6682_v28, 0.0  ;;  %v10923_v35 = vpop.f32.mrb[63].mxu1  ;;  %v11196_v28 = vld [vmem:[%s14290_s6 + $0x1b8] sm:$0xff]   ;;  %v6748_v33 = vld [vmem:[#allocation4 + $0x10] sm:$0xff] }
 0x6ef   : > { %v6704_v7 = vld [vmem:[#allocation8 + $0x2] ss:$2 sm:$0xff] }
 0x6f0   : > { %v6709_v37 = vmax.f32 %v6698_v6, %v6704_v7  ;;  %6696 = vst [vmem:[#allocation8 + $0x20] sm:$0xf] %v6691_v27  ;;  %v11197_v35 = vld [vmem:[%s14290_s6 + $0x200] sm:$0xff]  }
 0x6f1   : > { %v6700_v38 = vld [vmem:[#allocation8 + $0x11] ss:$2 sm:$0xff] }
 0x6f2   : > { %6712 = vst [vmem:[#allocation12] sm:$0xff] %v6709_v37  ;;  %v11198_v37 = vld [vmem:[%s14290_s6 + $0x208] sm:$0xff]  }
 0x6f7   : > { %v6706_v43 = vld [vmem:[#allocation8 + $0x12] ss:$2 sm:$0xff] }
 0x6f8   : > { %v6710_v44 = vmax.f32 %v6700_v38, %v6706_v43  ;;  %v11199_v38 = vld [vmem:[%s14290_s6 + $0x210] sm:$0xff]   ;;  %v11200_v43 = vld [vmem:[%s14290_s6 + $0x218] sm:$0xff]  }
 0x6f9   : > { %v6715_v45 = vld [vmem:[#allocation12 + $0x3] sm:$0x3]  ;;  %v6716_v49 = vld [vmem:[#allocation12 + $0x6] sm:$0x3] }
 0x6fa   : > { %6713 = vst [vmem:[#allocation12 + $0x8] sm:$0xff] %v6710_v44  ;;  %v6717_v13 = vmax.f32 %v6715_v45, %v6716_v49  ;;  %v11201_v44 = vld [vmem:[%s14290_s6 + $0x220] sm:$0xff]   ;;  %v11202_v45 = vld [vmem:[%s14290_s6 + $0x228] sm:$0xff]   ;;  %v11203_v49 = vld [vmem:[%s14290_s6 + $0x230] sm:$0xff]  }
 0x6fc   : > { %6718 = vst [vmem:[#allocation4 + $0xa] sm:$0x3] %v6717_v13  ;;  %v11204_v13 = vld [vmem:[%s14290_s6 + $0x238] sm:$0xff]  }
 0x701   : > { %v6719_v29 = vld [vmem:[#allocation12 + $0x9] sm:$0x3]  ;;  %v6720_v25 = vld [vmem:[#allocation12 + $0xc] sm:$0x3] }
 0x702   : > { %v6721_v42 = vmax.f32 %v6719_v29, %v6720_v25  ;;  %v6756_v29 = vld [vmem:[#allocation4 + $0x12] sm:$0xff] }
 0x703   : > { %v6735_v8 = vld [vmem:[#allocation4 + $0x4] sm:$0xff] }
 0x704   : > { %6722 = vst [vmem:[#allocation4 + $0xe] sm:$0x3] %v6721_v42  ;;  %v6743_v61 = vld [vmem:[#allocation4 + $0x6] sm:$0xff] }
 0x705   : > { %v6739_v27 = vld [vmem:[#allocation4 + $0x5] sm:$0xff] }
 0x706   : > { %v11205_v42 = vld [vmem:[%s14291_s7 + $0x40] sm:$0xff]  }
 0x70b   : > { %v6728_v55 = vld [vmem:[#allocation4 + $0x9] sm:$0xff] }
 0x70c   : > { %v6736_v21 = vld [vmem:[#allocation4 + $0xc] sm:$0xff]  ;;  %v6729_v22 = vpack.c.bf16 %v6728_v55, %v6727_v15  ;;  %v6753_v48 = vpack.c.bf16 %v6752_v54, %v6728_v55  ;;  %v11211_v55 = vld [vmem:[%s14291_s7 + $0x50] sm:$0xff]  }
 0x70d   : > { %v13643_v12 = vld [vmem:[#allocation4 + $0x8] sm:$0xff]  ;;  %v6737_v56 = vpack.c.bf16 %v6736_v21, %v6735_v8  ;;  %v11208_v54 = vld [vmem:[%s14291_s7 + $0x8] sm:$0xff]  }
 0x70e   : > { %v6725_v47 = vpack.c.bf16 %v13643_v12, %v6723_v50  ;;  %v13646_v59 = vld [vmem:[#allocation4 + $0xa] sm:$0xff]  ;;  %7383 = vmatprep.mubr.bf16.mxu0 %v6729_v22  ;;  %v6749_v7 = vpack.c.bf16 %v6748_v33, %v13643_v12  ;;  %v11217_v12 = vld [vmem:[%s14291_s7 + $0xd0] sm:$0xff]  }
 0x70f   : > { %v6744_v17 = vld [vmem:[#allocation4 + $0xe] sm:$0xff]  ;;  %v6733_v58 = vpack.c.bf16 %v13646_v59, %v6731_v51  ;;  %7424 = vmatprep.mubr.bf16.mxu1 %v6737_v56  ;;  %v6757_v25 = vpack.c.bf16 %v6756_v29, %v13646_v59  ;;  %v11212_v22 = vld [vmem:[%s14291_s7 + $0x10] sm:$0xff]   ;;  %v11215_v56 = vld [vmem:[%s14291_s7 + $0x58] sm:$0xff]  }
 0x710   : > { %7384 = vmatmul.mubr.bf16.vlgmr.msra.gmra.mrb[112].mxu0 %v6725_v47  ;;  %v6745_v62 = vpack.c.bf16 %v6744_v17, %v6743_v61  ;;  %v6740_v32 = vld [vmem:[#allocation4 + $0xd] sm:$0xff]  ;;  %v11218_v47 = vld [vmem:[%s14291_s7 + $0x90] sm:$0xff]   ;;  %v11221_v59 = vld [vmem:[%s14291_s7 + $0xd8] sm:$0xff]  }
 0x711   : > { %7425 = vmatmul.mubr.bf16.vlgmr.msra.gmra.mrb[64].mxu1 %v6733_v58  ;;  %10771 = vmatpush3.bf16.msra.mxu0 %v11167_v9  ;;  %v6741_v6 = vpack.c.bf16 %v6740_v32, %v6739_v27  ;;  %v11206_v15 = vld [vmem:[%s14291_s7] sm:$0xff]   ;;  %v11207_v50 = vld [vmem:[%s14291_s7 + $0x48] sm:$0xff]   ;;  %v11222_v58 = vld [vmem:[%s14291_s7 + $0x98] sm:$0xff]  }
 0x712   : > { %10793 = vmatpush3.bf16.msra.mxu1 %v11168_v5  ;;  %7465 = vmatprep.mubr.bf16.mxu0 %v6745_v62  ;;  %v11209_v51 = vld [vmem:[%s14291_s7 + $0xc0] sm:$0xff]   ;;  %v11213_v9 = vld [vmem:[%s14291_s7 + $0xc8] sm:$0xff]   ;;  %v11216_v5 = vld [vmem:[%s14291_s7 + $0x18] sm:$0xff]  }
 0x713   : > { %7506 = vmatprep.mubr.bf16.mxu1 %v6753_v48  ;;  %10772 = vmatprep.subr.bf16.mxu0 %v11169_v46  ;;  %v11210_v8 = vld [vmem:[%s14291_s7 + $0x80] sm:$0xff]   ;;  %v11214_v21 = vld [vmem:[%s14291_s7 + $0x88] sm:$0xff]  }
 0x714   : > { %10794 = vmatprep.subr.bf16.mxu1 %v11170_v57  ;;  %v11219_v17 = vld [vmem:[%s14291_s7 + $0x60] sm:$0xff]   ;;  %v11223_v46 = vld [vmem:[%s14291_s7 + $0x68] sm:$0xff]  }
 0x715   : > { %10773 = vmatpush3.bf16.msra.mxu0 %v11171_v34  ;;  %v11220_v61 = vld [vmem:[%s14291_s7 + $0x20] sm:$0xff]  }
 0x716   : > { %10795 = vmatpush3.bf16.msra.mxu1 %v11172_v52  ;;  %10774 = vmatprep.subr.bf16.mxu0 %v11173_v39  ;;  %v9837_v48 = vld [vmem:[%s14295_s11] ss:$0 sm:$0xff] }
 0x717   : > { %10796 = vmatprep.subr.bf16.mxu1 %v11174_v20 }
 0x719   : > { %10775 = vmatpush3.bf16.msra.mxu0 %v11175_v40 }
 0x71a   : > { %10797 = vmatpush3.bf16.msra.mxu1 %v11176_v63  ;;  %10776 = vmatprep.subr.bf16.mxu0 %v11177_v36 }
 0x71b   : > { %10798 = vmatprep.subr.bf16.mxu1 %v11178_v0 }
 0x71d   : > { %10777 = vmatpush3.bf16.msra.mxu0 %v11179_v4 }
 0x71e   : > { %10799 = vmatpush3.bf16.msra.mxu1 %v11180_v10  ;;  %10778 = vmatprep.subr.bf16.mxu0 %v11181_v60 }
 0x71f   : > { %10800 = vmatprep.subr.bf16.mxu1 %v11182_v11 }
 0x721   : > { %10779 = vmatpush3.bf16.msra.mxu0 %v11183_v41 }
 0x722   : > { %10801 = vmatpush3.bf16.msra.mxu1 %v11184_v14  ;;  %10780 = vmatprep.subr.bf16.mxu0 %v11185_v30 }
 0x723   : > { %10802 = vmatprep.subr.bf16.mxu1 %v11186_v16 }
 0x725   : > { %10781 = vmatpush3.bf16.msra.mxu0 %v11187_v2 }
 0x726   : > { %10803 = vmatpush3.bf16.msra.mxu1 %v11188_v18  ;;  %10782 = vmatprep.subr.bf16.mxu0 %v11189_v19 }
 0x727   : > { %10804 = vmatprep.subr.bf16.mxu1 %v11190_v31 }
 0x729   : > { %10783 = vmatpush3.bf16.msra.mxu0 %v11191_v23 }
 0x72a   : > { %10805 = vmatpush3.bf16.msra.mxu1 %v11192_v24  ;;  %10784 = vmatprep.subr.bf16.mxu0 %v11193_v26 }
 0x72b   : > { %10806 = vmatprep.subr.bf16.mxu1 %v11194_v1 }
 0x72d   : > { %10785 = vmatpush3.bf16.msra.mxu0 %v11195_v3 }
 0x72e   : > { %10807 = vmatpush3.bf16.msra.mxu1 %v11196_v28  ;;  %10924 = vmatprep.subr.bf16.mxu0 %v11406_v53 }
 0x72f   : > { %10823 = vmatprep.subr.bf16.mxu1 %v11205_v42  ;;  %v11224_v42 = vld [vmem:[%s14291_s7 + $0x28] sm:$0xff]  }
 0x730   : > { %7466 = vmatmul.mubr.bf16.vlgmr.msra.gmra.mrb[116].mxu0 %v6741_v6  ;;  %v7566_v6 = vpop.permute.xlu1 %7565 }
 0x731   : > { %7507 = vmatmul.mubr.bf16.vlgmr.msra.gmra.mrb[68].mxu1 %v6749_v7  ;;  %10925 = vmatpush3.bf16.msra.mxu0 %v11197_v35  ;;  %vm7570_vm2 = vcmp.eq.s32.totalorder %v7566_v6, 1  ;;  %v11243_v6 = vld [vmem:[%s14297_s13 + $0x4] ss:$16 sps:$4 sm:$0xff]  }
 0x732   : > { %10940 = vmatprep.mubr.msk.bf16.mxu0 %vm11407_vm10, %v11406_v53  ;;  %10926 = vmatprep.subr.bf16.mxu0 %v11406_v53 }
 0x733   : > { %10824 = vmatpush3.bf16.msra.mxu1 %v11206_v15  ;;  %v11225_v15 = vld [vmem:[%s14291_s7 + $0xe0] sm:$0xff]  }
 0x734   : > { %10825 = vmatprep.subr.bf16.mxu1 %v11207_v50  ;;  %v11226_v50 = vld [vmem:[%s14291_s7 + $0xa0] sm:$0xff]  }
 0x735   : > { %10927 = vmatpush3.bf16.msra.mxu0 %v11198_v37 }
 0x736   : > { %10928 = vmatprep.subr.bf16.mxu0 %v11406_v53 }
 0x737   : > { %10826 = vmatpush3.bf16.msra.mxu1 %v11208_v54  ;;  %v11229_v54 = vld [vmem:[%s14291_s7 + $0xe8] sm:$0xff]  }
 0x738   : > { %10827 = vmatprep.subr.bf16.mxu1 %v11211_v55  ;;  %v11230_v55 = vld [vmem:[%s14291_s7 + $0xa8] sm:$0xff]  }
 0x739   : > { %10929 = vmatpush3.bf16.msra.mxu0 %v11199_v38 }
 0x73a   : > { %10930 = vmatprep.subr.bf16.mxu0 %v11406_v53 }
 0x73b   : > { %10828 = vmatpush3.bf16.msra.mxu1 %v11212_v22 }
 0x73c   : > { %10829 = vmatprep.subr.bf16.mxu1 %v11215_v56  ;;  %v11232_v56 = vld [vmem:[%s14291_s7 + $0x38] sm:$0xff]  }
 0x73d   : > { %10931 = vmatpush3.bf16.msra.mxu0 %v11200_v43  ;;  %v7569_v43 = vpop.permute.xlu0 %7568 }
 0x73e   : > { %10932 = vmatprep.subr.bf16.mxu0 %v11406_v53  ;;  %vm7571_vm3 = vcmp.eq.s32.totalorder %v7569_v43, 1 }
 0x73f   : > { %10830 = vmatpush3.bf16.msra.mxu1 %v11216_v5 }
 0x740   : > { %10831 = vmatprep.subr.bf16.mxu1 %v11219_v17 }
 0x741   : > { %10933 = vmatpush3.bf16.msra.mxu0 %v11201_v44 }
 0x742   : > { %10934 = vmatprep.subr.bf16.mxu0 %v11406_v53 }
 0x743   : > { %10832 = vmatpush3.bf16.msra.mxu1 %v11220_v61 }
 0x744   : > { %10833 = vmatprep.subr.bf16.mxu1 %v11223_v46 }
 0x745   : > { %10935 = vmatpush3.bf16.msra.mxu0 %v11202_v45 }
 0x746   : > { %10936 = vmatprep.subr.bf16.mxu0 %v11406_v53 }
 0x747   : > { %10834 = vmatpush3.bf16.msra.mxu1 %v11224_v42 }
 0x749   : > { %10937 = vmatpush3.bf16.msra.mxu0 %v11203_v49 }
 0x74a   : > { %10938 = vmatprep.subr.bf16.mxu0 %v11406_v53 }
 0x74d   : > { %10939 = vmatpush3.bf16.msra.mxu0 %v11204_v13 }
 0x74e   : > { %10845 = vmatprep.subr.bf16.mxu0 %v11209_v51 }
 0x750   : > { %10941 = vmatmul.mubr.bf16.vlgmr.msra.gmra.mrb[120].mxu0 %v6757_v25 }
 0x751   : > { %10846 = vmatpush3.bf16.msra.mxu0 %v11210_v8  ;;  %v11227_v8 = vld [vmem:[%s14291_s7 + $0x70] sm:$0xff]  }
 0x752   : > { %10847 = vmatprep.subr.bf16.mxu0 %v11213_v9  ;;  %10835 = vmatprep.subr.bf16.mxu1 %v11227_v8  ;;  %v11228_v9 = vld [vmem:[%s14291_s7 + $0x30] sm:$0xff]  }
 0x753   : > { %10836 = vmatpush3.bf16.msra.mxu1 %v11228_v9 }
 0x755   : > { %10848 = vmatpush3.bf16.msra.mxu0 %v11214_v21  ;;  %v11231_v21 = vld [vmem:[%s14291_s7 + $0x78] sm:$0xff]  }
 0x756   : > { %10849 = vmatprep.subr.bf16.mxu0 %v11217_v12  ;;  %10837 = vmatprep.subr.bf16.mxu1 %v11231_v21 }
 0x757   : > { %10838 = vmatpush3.bf16.msra.mxu1 %v11232_v56 }
 0x758   : > { %10944 = vmatprep.subr.bf16.mxu1 %v11406_v53 }
 0x759   : > { %10850 = vmatpush3.bf16.msra.mxu0 %v11218_v47 }
 0x75a   : > { %10851 = vmatprep.subr.bf16.mxu0 %v11221_v59 }
 0x75d   : > { %10852 = vmatpush3.bf16.msra.mxu0 %v11222_v58 }
 0x75e   : > { %10853 = vmatprep.subr.bf16.mxu0 %v11225_v15 }
 0x761   : > { %10854 = vmatpush3.bf16.msra.mxu0 %v11226_v50 }
 0x762   : > { %10855 = vmatprep.subr.bf16.mxu0 %v11229_v54 }
 0x765   : > { %10856 = vmatpush3.bf16.msra.mxu0 %v11230_v55 }
 0x7e3   : > { %v10742_v57 = vpop.f32.mrb[112].mxu0 }
 0x7e4   : > { %v10764_v62 = vpop.f32.mrb[64].mxu1  ;;  %v10743_v34 = vpop.f32.mrb[113].mxu0 }
 0x7e5   : > { %v10765_v52 = vpop.f32.mrb[65].mxu1  ;;  %v10744_v39 = vadd.f32 %v10743_v34, %v10742_v57  ;;  %v10745_v40 = vpop.f32.mrb[114].mxu0 }
 0x7e6   : > { %v10766_v20 = vadd.f32 %v10765_v52, %v10764_v62  ;;  %v10767_v63 = vpop.f32.mrb[66].mxu1  ;;  %v10746_v36 = vpop.f32.mrb[115].mxu0 }
 0x7e7   : > { %v10768_v0 = vpop.f32.mrb[67].mxu1  ;;  %v7386_v4 = vadd.f32 %v10744_v39, %v9837_v48  ;;  %v10747_v10 = vadd.f32 %v10746_v36, %v10745_v40  ;;  %v11233_v36 = vld [vmem:[%s14291_s7 + $0xf0] sm:$0xff]  }
 0x7e8   : > { %v10769_v60 = vadd.f32 %v10768_v0, %v10767_v63  ;;  %v11234_v0 = vld [vmem:[%s14291_s7 + $0xb0] sm:$0xff]   ;;  %10857 = vmatprep.subr.bf16.mxu0 %v11233_v36 }
 0x7e9   : > { %v7427_v11 = vadd.f32 %v10766_v20, %v7386_v4  ;;  %v7389_v41 = vadd.f32 %v10747_v10, %v9837_v48  ;;  %v11235_v10 = vld [vmem:[%s14291_s7 + $0xf8] sm:$0xff]   ;;  %10858 = vmatpush3.bf16.msra.mxu0 %v11234_v0  ;;  %v11255_v36 = vld [vmem:[%s14297_s13 + $0x44] ss:$16 sps:$4 sm:$0xff]  }
 0x7ea   : > { %10859 = vmatprep.subr.bf16.mxu0 %v11235_v10  ;;  %v11258_v0 = vld [vmem:[%s14297_s13 + $0x4c] ss:$16 sps:$4 sm:$0xff]   ;;  %v11256_v10 = vld [vmem:[%s14297_s13 + $0x48] ss:$16 sps:$4 sm:$0xff]  }
 0x7eb   : > { %v7430_v14 = vadd.f32 %v10769_v60, %v7389_v41  ;;  %v11237_v41 = vld [vmem:[%s14291_s7 + $0xb8] sm:$0xff]  }
 0x7ed   : > { %10860 = vmatpush3.bf16.msra.mxu0 %v11237_v41 }
 0x803   : > { %v10786_v30 = vpop.f32.mrb[116].mxu0 }
 0x804   : > { %v10808_v16 = vpop.f32.mrb[68].mxu1  ;;  %v10787_v2 = vpop.f32.mrb[117].mxu0 }
 0x805   : > { %v10809_v18 = vpop.f32.mrb[69].mxu1  ;;  %v10788_v19 = vadd.f32 %v10787_v2, %v10786_v30  ;;  %v10789_v23 = vpop.f32.mrb[118].mxu0 }
 0x806   : > { %v10810_v31 = vadd.f32 %v10809_v18, %v10808_v16  ;;  %v10811_v24 = vpop.f32.mrb[70].mxu1  ;;  %v10790_v26 = vpop.f32.mrb[119].mxu0 }
 0x807   : > { %v10812_v1 = vpop.f32.mrb[71].mxu1  ;;  %v7468_v3 = vadd.f32 %v10788_v19, %v7427_v11  ;;  %v10791_v28 = vadd.f32 %v10790_v26, %v10789_v23  ;;  %v11236_v26 = vld [vmem:[%s14291_s7 + $0x100] sm:$0xff]  }
 0x808   : > { %v10813_v32 = vadd.f32 %v10812_v1, %v10811_v24 }
 0x809   : > { %v7471_v33 = vadd.f32 %v10791_v28, %v7430_v14  ;;  %v7509_v27 = vadd.f32 %v10810_v31, %v7468_v3  ;;  %v11238_v3 = vld [vmem:[%s14291_s7 + $0x108] sm:$0xff]  }
 0x80b   : > { %v7512_v35 = vadd.f32 %v10813_v32, %v7471_v33  ;;  %v11239_v32 = vld [vmem:[%s14291_s7 + $0x110] sm:$0xff]   ;;  %v11240_v33 = vld [vmem:[%s14291_s7 + $0x118] sm:$0xff]  }
 0x823   : > { %v7549_v7 = vpop.f32.mrb[120].mxu0 }
 0x824   : > { %v7550_v37 = vadd.f32 %v7549_v7, %v7509_v27  ;;  %v10942_v38 = vpop.f32.mrb[121].mxu0  ;;  %v11244_v7 = vld [vmem:[%s14297_s13 + $0x8] ss:$16 sps:$4 sm:$0xff]  }
 0x825   : > { %v7552_v44 = vpop.f32.mrb[122].mxu0  ;;  %v8145_v38 = vld [vmem:[#allocation18 + $0x1] sm:$0x1] }
 0x826   : > { %v7556_v45 = vmax.f32 %v7550_v37, 0.0  ;;  %v7553_v49 = vadd.f32 %v7552_v44, %v7512_v35  ;;  %v10943_v13 = vpop.f32.mrb[123].mxu0  ;;  %v11241_v35 = vld [vmem:[%s14297_s13] ss:$16 sps:$4 sm:$0xff]  }
 0x827   : > { %v8142_v37 = vld [vmem:[%s645_s2] sm:$0x1] }
 0x828   : > { %v7557_v29 = vmax.f32 %v7553_v49, 0.0  ;;  %v7572_v25 = vsel %vm7570_vm2, %v7556_v45, 0.0 }
 0x829   : > { %7574 = vst.msk [vmem:[#allocation5 + $0x5] sm:$0xff] %vm5739_vm5, %v7572_v25 }
 0x82a   : > { %v7573_v51 = vsel %vm7571_vm3, %v7557_v29, 0.0  ;;  %v9910_v29 = vld [vmem:[%s14296_s12] ss:$0 sm:$0xff]  ;;  %vm9030_vm3 = vcmask 0  }
 0x82b   : > { %7575 = vst.msk [vmem:[#allocation5 + $0xd] sm:$0xff] %vm5739_vm5, %v7573_v51 }
 0x830   : > { %v7593_v12 = vld [vmem:[#allocation5 + $0x4] sm:$0xff] }
 0x831   : > { %v7589_v22 = vld [vmem:[#allocation5 + $0x2] sm:$0xff] }
 0x832   : > { %v7625_v47 = vld [vmem:[#allocation5 + $0xa] sm:$0xff]  ;;  %v7626_v59 = vld [vmem:[#allocation5 + $0x12] sm:$0xff]  ;;  %v7576_v57 = vld [vmem:[#allocation5] sm:$0xff] }
 0x833   : > { %v7617_v5 = vld [vmem:[#allocation5 + $0x9] sm:$0xff]  ;;  %v7627_v17 = vpack.c.bf16 %v7626_v59, %v7625_v47  ;;  %v7618_v58 = vld [vmem:[#allocation5 + $0x11] sm:$0xff]  ;;  %v7591_v46 = vpack.c.bf16 %v7625_v47, %v7589_v22  ;;  %v7580_v60 = vld [vmem:[#allocation5 + $0x1] sm:$0xff] }
 0x834   : > { %v7594_v61 = vld [vmem:[#allocation5 + $0xc] sm:$0xff]  ;;  %v7619_v62 = vpack.c.bf16 %v7618_v58, %v7617_v5  ;;  %v7582_v11 = vpack.c.bf16 %v7617_v5, %v7580_v60 }
 0x835   : > { %v7595_v48 = vpack.c.bf16 %v7594_v61, %v7593_v12  ;;  %v7614_v34 = vld [vmem:[#allocation5 + $0x10] sm:$0xff]  ;;  %v7613_v52 = vld [vmem:[#allocation5 + $0x8] sm:$0xff]  ;;  %7628 = vst.msk [vmem:[#allocation17 + $0x20] sm:$0xff] %vm5739_vm5, %v7627_v17  ;;  %7592 = vst.msk [vmem:[#allocation17 + $0x8] sm:$0xff] %vm5739_vm5, %v7591_v46  ;;  %v11410_v46 = vmov 1966171168  }
 0x836   : > { %v7601_v39 = vld [vmem:[#allocation5 + $0x5] sm:$0xff]  ;;  %v7615_v20 = vpack.c.bf16 %v7614_v34, %v7613_v52  ;;  %v7578_v40 = vpack.c.bf16 %v7613_v52, %v7576_v57  ;;  %v7602_v63 = vld [vmem:[#allocation5 + $0xd] sm:$0xff]  ;;  %7621 = vrot.lane.b32.xlu0 %v7619_v62, %s14324_s27  ;;  %v8071_v57 = vunpack.c.l.s4 %v11410_v46  ;;  %v8073_v62 = vlaneseq }
 0x837   : > { %7597 = vrot.lane.b32.xlu1 %v7595_v48, %s14324_s27  ;;  %v7603_v4 = vpack.c.bf16 %v7602_v63, %v7601_v39  ;;  %v7605_v14 = vld [vmem:[#allocation5 + $0x6] sm:$0xff]  ;;  %v7606_v30 = vld [vmem:[#allocation5 + $0xe] sm:$0xff] }
 0x838   : > { %7616 = vst.msk [vmem:[#allocation17 + $0x18] sm:$0xff] %vm5739_vm5, %v7615_v20  ;;  %7579 = vst.msk [vmem:[#allocation17] sm:$0xff] %vm5739_vm5, %v7578_v40  ;;  %v7607_v16 = vpack.c.bf16 %v7606_v30, %v7605_v14  ;;  %v11249_v34 = vld [vmem:[%s14297_s13 + $0x24] ss:$16 sps:$4 sm:$0xff]   ;;  %v11252_v52 = vld [vmem:[%s14297_s13 + $0x2c] ss:$16 sps:$4 sm:$0xff]   ;;  %v8072_v40 = vunpack.c.0.s8 %v8071_v57 }
 0x839   : > { %7604 = vst.msk [vmem:[#allocation17 + $0x10] sm:$0xff] %vm5739_vm5, %v7603_v4  ;;  %v11247_v39 = vld [vmem:[%s14297_s13 + $0x20] ss:$16 sps:$4 sm:$0xff]   ;;  %v11250_v20 = vld [vmem:[%s14297_s13 + $0x28] ss:$16 sps:$4 sm:$0xff]   ;;  %v13936_v63 = vshrl.u32 %v8073_v62, 7 }
 0x83a   : > { %v11253_v4 = vld [vmem:[%s14297_s13 + $0x40] ss:$16 sps:$4 sm:$0xff]   ;;  %vm9005_vm2 = vcmp.lt.s32.totalorder %v8073_v62, 256 }
 0x83b   : > { %7584 = vrot.lane.b32.xlu1 %v7582_v11, %s14324_s27  ;;  %v13951_v60 = vsub.s32 %v8072_v40, %v13936_v63  ;;  %v8064_v14 = vld [vmem:[#allocation18] sm:$0x1]  ;;  %v11300_v40 = vld [vmem:[%s14299_s15 + $0x14] ss:$8 sps:$4 sm:$0xff]   ;;  %v11304_v11 = vld [vmem:[%s14299_s15 + $0x30] ss:$8 sps:$4 sm:$0xff]  }
 0x83c   : > { %v7633_v27 = vld [vmem:[#allocation17 + $0x20] sm:$0xff] }
 0x83f   : > { %7609 = vrot.lane.b32.xlu1 %v7607_v16, %s14324_s27 }
 0x8a8   : > { %v7622_v2 = vpop.permute.xlu0 %7621 }
 0x8a9   : > { %v7598_v18 = vpop.permute.xlu1 %7597  ;;  %7624 = vst.msk [vmem:[#allocation17 + $0x18] sm:$0xff] %vm7587_vm4, %v7622_v2 }
 0x8aa   : > { %7600 = vst.msk [vmem:[#allocation17 + $0x8] sm:$0xff] %vm7587_vm4, %v7598_v18  ;;  %v11261_v18 = vld [vmem:[%s14297_s13 + $0x64] ss:$16 sps:$4 sm:$0xff]  }
 0x8ad   : > { %v7585_v19 = vpop.permute.xlu1 %7584 }
 0x8ae   : > { %7588 = vst.msk [vmem:[#allocation17] sm:$0xff] %vm7587_vm4, %v7585_v19  ;;  %v11264_v19 = vld [vmem:[%s14297_s13 + $0x6c] ss:$16 sps:$4 sm:$0xff]  }
 0x8b0   : > { %v7632_v24 = vld [vmem:[#allocation17 + $0x18] sm:$0xff] }
 0x8b1   : > { %v7610_v31 = vpop.permute.xlu1 %7609  ;;  %v7630_v23 = vld [vmem:[#allocation17 + $0x8] sm:$0xff]  ;;  %8005 = vmatprep.mubr.bf16.mxu0 %v7632_v24 }
 0x8b2   : > { %7612 = vst.msk [vmem:[#allocation17 + $0x10] sm:$0xff] %vm7587_vm4, %v7610_v31  ;;  %7964 = vmatprep.mubr.bf16.mxu1 %v7630_v23  ;;  %v11259_v24 = vld [vmem:[%s14297_s13 + $0x60] ss:$16 sps:$4 sm:$0xff]  }
 0x8b5   : > { %v7629_v1 = vld [vmem:[#allocation17] sm:$0xff] }
 0x8b6   : > { %7965 = vmatmul.mubr.bf16.vlgmr.msra.gmra.mrb[72].mxu1 %v7629_v1 }
 0x8b7   : > { %10945 = vmatpush3.bf16.msra.mxu1 %v11236_v26  ;;  %10952 = vmatprep.mubr.msk.bf16.mxu1 %vm11407_vm10, %v11406_v53  ;;  %vm8143_vm10 = vcmask 122880  }
 0x8b8   : > { %10946 = vmatprep.subr.bf16.mxu1 %v11406_v53 }
 0x8b9   : > { %v7631_v28 = vld [vmem:[#allocation17 + $0x10] sm:$0xff] }
 0x8ba   : > { %8006 = vmatmul.mubr.bf16.vlgmr.msra.gmra.mrb[124].mxu0 %v7631_v28 }
 0x8bb   : > { %10947 = vmatpush3.bf16.msra.mxu1 %v11238_v3 }
 0x8bc   : > { %10948 = vmatprep.subr.bf16.mxu1 %v11406_v53 }
 0x8bf   : > { %10949 = vmatpush3.bf16.msra.mxu1 %v11239_v32  ;;  %v11262_v32 = vld [vmem:[%s14297_s13 + $0x68] ss:$16 sps:$4 sm:$0xff]  }
 0x8c0   : > { %10950 = vmatprep.subr.bf16.mxu1 %v11406_v53  ;;  %v11246_v53 = vld [vmem:[%s14297_s13 + $0xc] ss:$16 sps:$4 sm:$0xff]  }
 0x8c1   : > { %8456 = vmatprep.subr.bf16.mxu0 %v11246_v53  ;;  %v11265_v53 = vld [vmem:[%s14297_s13 + $0x80] ss:$16 sps:$4 sm:$0xff]  }
 0x8c2   : > { %8457 = vmatpush1.bf16.msra.mxu0 %v11244_v7  ;;  %v11270_v7 = vld [vmem:[%s14297_s13 + $0x8c] ss:$16 sps:$4 sm:$0xff]  }
 0x8c3   : > { %10951 = vmatpush3.bf16.msra.mxu1 %v11240_v33  ;;  %8458 = vmatprep.subr.bf16.mxu0 %v11252_v52 }
 0x8c4   : > { %8415 = vmatprep.subr.bf16.mxu1 %v11243_v6  ;;  %v11267_v6 = vld [vmem:[%s14297_s13 + $0x84] ss:$16 sps:$4 sm:$0xff]  }
 0x8c6   : > { %10953 = vmatmul.mubr.msk.bf16.vlgmr.msra.gmra.mrb[76].mxu1 %vm5739_vm5, %v7633_v27  ;;  %vm8062_vm5 = vsmask.f32 256  ;;  %8459 = vmatpush1.bf16.msra.mxu0 %v11250_v20 }
 0x8c7   : > { %8416 = vmatpush1.bf16.msra.mxu1 %v11241_v35  ;;  %vm8144_vm6 = vmand %vm8143_vm10, %vm8062_vm5  ;;  %8460 = vmatprep.subr.bf16.mxu0 %v11258_v0  ;;  %v11303_v0 = vld [vmem:[%s14299_s15 + $0x24] ss:$8 sps:$4 sm:$0xff]  }
 0x8c8   : > { %v8146_v43 = vsel %vm8144_vm6, %v8142_v37, %v8145_v38  ;;  %8417 = vmatprep.subr.bf16.mxu1 %v11249_v34  ;;  %v11268_v37 = vld [vmem:[%s14297_s13 + $0x88] ss:$16 sps:$4 sm:$0xff]   ;;  %vm8088_vm11 = vmand %vm8087_vm9, %vm8062_vm5 }
 0x8c9   : > { %8147 = vst [vmem:[#allocation18 + $0x1] sm:$0x1] %v8146_v43  ;;  %vm8113_vm13 = vmand %vm8112_vm12, %vm8062_vm5 }
 0x8ca   : > { %8461 = vmatpush1.bf16.msra.mxu0 %v11256_v10  ;;  %vm8138_vm15 = vmand %vm8137_vm14, %vm8062_vm5  ;;  %v11306_v10 = vld [vmem:[%s14299_s15 + $0x34] ss:$8 sps:$4 sm:$0xff]  }
 0x8cb   : > { %8418 = vmatpush1.bf16.msra.mxu1 %v11247_v39  ;;  %8462 = vmatprep.subr.bf16.mxu0 %v11264_v19  ;;  %v11295_v39 = vld [vmem:[%s14299_s15] ss:$8 sps:$4 sm:$0xff]   ;;  %v11318_v19 = vld [vmem:[%s14299_s15 + $0x74] ss:$8 sps:$4 sm:$0xff]  }
 0x8cc   : > { %8419 = vmatprep.subr.bf16.mxu1 %v11255_v36  ;;  %v11298_v36 = vld [vmem:[%s14299_s15 + $0x10] ss:$8 sps:$4 sm:$0xff]  }
 0x8ce   : > { %8463 = vmatpush1.bf16.msra.mxu0 %v11262_v32  ;;  %v11330_v32 = vld [vmem:[%s14299_s15 + $0xb4] ss:$8 sps:$4 sm:$0xff]  }
 0x8cf   : > { %8420 = vmatpush1.bf16.msra.mxu1 %v11253_v4  ;;  %8464 = vmatprep.subr.bf16.mxu0 %v11270_v7  ;;  %v11301_v4 = vld [vmem:[%s14299_s15 + $0x20] ss:$8 sps:$4 sm:$0xff]   ;;  %v11334_v7 = vld [vmem:[%s14299_s15 + $0xd0] ss:$8 sps:$4 sm:$0xff]  }
 0x8d0   : > { %8421 = vmatprep.subr.bf16.mxu1 %v11261_v18  ;;  %v11313_v18 = vld [vmem:[%s14299_s15 + $0x60] ss:$8 sps:$4 sm:$0xff]  }
 0x8d2   : > { %8465 = vmatpush1.bf16.msra.mxu0 %v11268_v37  ;;  %v11337_v37 = vld [vmem:[%s14299_s15 + $0xe0] ss:$8 sps:$4 sm:$0xff]  }
 0x8d3   : > { %8422 = vmatpush1.bf16.msra.mxu1 %v11259_v24  ;;  %v11319_v24 = vld [vmem:[%s14299_s15 + $0x80] ss:$8 sps:$4 sm:$0xff]  }
 0x8d4   : > { %8423 = vmatprep.subr.bf16.mxu1 %v11267_v6  ;;  %v11336_v6 = vld [vmem:[%s14299_s15 + $0xd4] ss:$8 sps:$4 sm:$0xff]  }
 0x8d7   : > { %8424 = vmatpush1.bf16.msra.mxu1 %v11265_v53  ;;  %v11339_v53 = vld [vmem:[%s14299_s15 + $0xe4] ss:$8 sps:$4 sm:$0xff]  }
 0x989   : > { %v10839_v44 = vpop.f32.mrb[72].mxu1 }
 0x98a   : > { %v10840_v45 = vpop.f32.mrb[73].mxu1 }
 0x98b   : > { %v10841_v49 = vadd.f32 %v10840_v45, %v10839_v44  ;;  %v10842_v13 = vpop.f32.mrb[74].mxu1  ;;  %v11273_v44 = vld [vmem:[%s14297_s13 + $0xa4] ss:$16 sps:$4 sm:$0xff]   ;;  %v11276_v45 = vld [vmem:[%s14297_s13 + $0xac] ss:$16 sps:$4 sm:$0xff]  }
 0x98c   : > { %v10843_v25 = vpop.f32.mrb[75].mxu1  ;;  %8425 = vmatprep.subr.bf16.mxu1 %v11273_v44  ;;  %8466 = vmatprep.subr.bf16.mxu0 %v11276_v45  ;;  %v11345_v44 = vld [vmem:[%s14299_s15 + $0x104] ss:$8 sps:$4 sm:$0xff]   ;;  %v14146_v45 = vsub.s32 0, %v13936_v63 }
 0x98d   : > { %v10844_v42 = vadd.f32 %v10843_v25, %v10842_v13  ;;  %v10861_v15 = vpop.f32.mrb[124].mxu0  ;;  %v7967_v51 = vadd.f32 %v10841_v49, %v9910_v29  ;;  %v11271_v49 = vld [vmem:[%s14297_s13 + $0xa0] ss:$16 sps:$4 sm:$0xff]   ;;  %v11274_v13 = vld [vmem:[%s14297_s13 + $0xa8] ss:$16 sps:$4 sm:$0xff]  }
 0x98e   : > { %v10862_v50 = vpop.f32.mrb[125].mxu0  ;;  %8426 = vmatpush1.bf16.msra.mxu1 %v11271_v49  ;;  %8467 = vmatpush1.bf16.msra.mxu0 %v11274_v13  ;;  %v11279_v25 = vld [vmem:[%s14297_s13 + $0xc4] ss:$16 sps:$4 sm:$0xff]   ;;  %v14151_v49 = vld [vmem:[%s14298_s14] sm:$0xf]  ;;  %v14154_v13 = vsub.s32 1, %v13936_v63 }
 0x98f   : > { %v10863_v8 = vadd.f32 %v10862_v50, %v10861_v15  ;;  %v10864_v9 = vpop.f32.mrb[126].mxu0  ;;  %v7970_v55 = vadd.f32 %v10844_v42, %v9910_v29  ;;  %v11277_v29 = vld [vmem:[%s14297_s13 + $0xc0] ss:$16 sps:$4 sm:$0xff]   ;;  %v11280_v42 = vld [vmem:[%s14297_s13 + $0xc8] ss:$16 sps:$4 sm:$0xff]   ;;  %8427 = vmatprep.subr.bf16.mxu1 %v11279_v25  ;;  %v8394_v25 = vrot.slane %v14151_v49, %v14146_v45 }
 0x990   : > { %v10865_v54 = vpop.f32.mrb[127].mxu0  ;;  %v11282_v15 = vld [vmem:[%s14297_s13 + $0xcc] ss:$16 sps:$4 sm:$0xff]   ;;  %v11285_v50 = vld [vmem:[%s14297_s13 + $0xe4] ss:$16 sps:$4 sm:$0xff]  }
 0x991   : > { %v10866_v21 = vadd.f32 %v10865_v54, %v10864_v9  ;;  %v8008_v12 = vadd.f32 %v10863_v8, %v7967_v51  ;;  %v11288_v51 = vld [vmem:[%s14297_s13 + $0xec] ss:$16 sps:$4 sm:$0xff]   ;;  %8468 = vmatprep.subr.bf16.mxu0 %v11282_v15  ;;  %v11283_v8 = vld [vmem:[%s14297_s13 + $0xe0] ss:$16 sps:$4 sm:$0xff]   ;;  %v11286_v9 = vld [vmem:[%s14297_s13 + $0xe8] ss:$16 sps:$4 sm:$0xff]  }
 0x992   : > { %8428 = vmatpush1.bf16.msra.mxu1 %v11277_v29  ;;  %8469 = vmatpush1.bf16.msra.mxu0 %v11280_v42  ;;  %v11291_v54 = vld [vmem:[%s14297_s13 + $0x104] ss:$16 sps:$4 sm:$0xff]   ;;  %v8405_v29 = vsub.s32 3, %v13936_v63  ;;  %v8398_v42 = vrot.slane %v14151_v49, %v14154_v13 }
 0x993   : > { %v8011_v22 = vadd.f32 %v10866_v21, %v7970_v55  ;;  %8429 = vmatprep.subr.bf16.mxu1 %v11285_v50  ;;  %8470 = vmatprep.subr.bf16.mxu0 %v11288_v51  ;;  %v11294_v55 = vld [vmem:[%s14297_s13 + $0x10c] ss:$16 sps:$4 sm:$0xff]   ;;  %v11289_v21 = vld [vmem:[%s14297_s13 + $0x100] ss:$16 sps:$4 sm:$0xff]  }
 0x994   : > { %v8406_v15 = vrot.slane %v14151_v49, %v8405_v29 }
 0x996   : > { %8430 = vmatpush1.bf16.msra.mxu1 %v11283_v8  ;;  %8471 = vmatpush1.bf16.msra.mxu0 %v11286_v9 }
 0x997   : > { %8431 = vmatprep.subr.bf16.mxu1 %v11291_v54  ;;  %8472 = vmatprep.subr.bf16.mxu0 %v11294_v55 }
 0x999   : > { %v8048_v56 = vpop.f32.mrb[76].mxu1 }
 0x99a   : > { %v8049_v47 = vadd.f32 %v8048_v56, %v8008_v12  ;;  %v10954_v59 = vpop.f32.mrb[77].mxu1  ;;  %v11292_v12 = vld [vmem:[%s14297_s13 + $0x108] ss:$16 sps:$4 sm:$0xff]   ;;  %8432 = vmatpush1.bf16.msra.mxu1 %v11289_v21 }
 0x99b   : > { %v8051_v5 = vpop.f32.mrb[78].mxu1  ;;  %8473 = vmatpush1.bf16.msra.mxu0 %v11292_v12 }
 0x99c   : > { %v8055_v17 = vmax.f32 %v8049_v47, 0.0  ;;  %v8052_v58 = vadd.f32 %v8051_v5, %v8011_v22  ;;  %v10955_v61 = vpop.f32.mrb[79].mxu1  ;;  %v11297_v22 = vld [vmem:[%s14299_s15 + $0x4] ss:$8 sps:$4 sm:$0xff]  }
 0x99d   : > { %8901 = vmatprep.subr.bf16.mxu1 %v11297_v22 }
 0x99e   : > { %8057 = vst.msk [vmem:[#allocation9] sm:$0xff] %vm654_vm7, %v8055_v17  ;;  %v8056_v48 = vmax.f32 %v8052_v58, 0.0 }
 0x9a0   : > { %8058 = vst.msk [vmem:[#allocation9 + $0x8] sm:$0xff] %vm654_vm7, %v8056_v48  ;;  %vm13954_vm7 = vmand %vm8061_vm8, %vm8062_vm5 }
 0x9a5   : > { %v8067_v41 = vld [vmem:[#allocation9 + $0x6] sm:$0x1]  ;;  %v8059_v30 = vld [vmem:[#allocation9 + $0x5] sm:$0x1] }
 0x9a6   : > { %v8068_v16 = vpack.c.bf16 %v8067_v41, %v8067_v41  ;;  %v8060_v2 = vpack.c.bf16 %v8059_v30, %v8059_v30  ;;  %v11309_v41 = vld [vmem:[%s14299_s15 + $0x44] ss:$8 sps:$4 sm:$0xff]   ;;  %v11312_v30 = vld [vmem:[%s14299_s15 + $0x54] ss:$8 sps:$4 sm:$0xff]  }
 0x9a7   : > { %v8092_v31 = vld [vmem:[#allocation9 + $0x9] sm:$0x1]  ;;  %v8117_v23 = vld [vmem:[#allocation9 + $0xa] sm:$0x1] }
 0x9a8   : > { %v8076_v26 = vrot.slane %v8068_v16, %v13951_v60  ;;  %v8093_v1 = vpack.c.bf16 %v8092_v31, %v8092_v31  ;;  %v8118_v3 = vpack.c.bf16 %v8117_v23, %v8117_v23  ;;  %v8065_v28 = vsel %vm13954_vm7, %v8060_v2, %v8064_v14  ;;  %v11307_v14 = vld [vmem:[%s14299_s15 + $0x40] ss:$8 sps:$4 sm:$0xff]   ;;  %v11310_v16 = vld [vmem:[%s14299_s15 + $0x50] ss:$8 sps:$4 sm:$0xff]   ;;  %v11315_v2 = vld [vmem:[%s14299_s15 + $0x64] ss:$8 sps:$4 sm:$0xff]  }
 0x9a9   : > { %8066 = vst [vmem:[#allocation18] sm:$0x1] %v8065_v28  ;;  %v11316_v31 = vld [vmem:[%s14299_s15 + $0x70] ss:$8 sps:$4 sm:$0xff]   ;;  %v11321_v23 = vld [vmem:[%s14299_s15 + $0x84] ss:$8 sps:$4 sm:$0xff]  }
 0x9aa   : > { %v8083_v33 = vrot.slane %v8076_v26, %v13951_v60  ;;  %v8101_v27 = vrot.slane %v8093_v1, %v13951_v60  ;;  %v8126_v35 = vrot.slane %v8118_v3, %v13951_v60  ;;  %v11324_v26 = vld [vmem:[%s14299_s15 + $0x94] ss:$8 sps:$4 sm:$0xff]   ;;  %v11322_v1 = vld [vmem:[%s14299_s15 + $0x90] ss:$8 sps:$4 sm:$0xff]   ;;  %v11327_v3 = vld [vmem:[%s14299_s15 + $0xa4] ss:$8 sps:$4 sm:$0xff]  }
 0x9ab   : > { %v11325_v28 = vld [vmem:[%s14299_s15 + $0xa0] ss:$8 sps:$4 sm:$0xff]  }
 0x9ac   : > { %8084 = vrot.lane.b32.xlu0 %v8083_v33, %s14328_s1  ;;  %v8108_v38 = vrot.slane %v8101_v27, %v13951_v60  ;;  %v8133_v43 = vrot.slane %v8126_v35, %v13951_v60  ;;  %v11328_v33 = vld [vmem:[%s14299_s15 + $0xb0] ss:$8 sps:$4 sm:$0xff]   ;;  %v11333_v27 = vld [vmem:[%s14299_s15 + $0xc4] ss:$8 sps:$4 sm:$0xff]   ;;  %v11331_v35 = vld [vmem:[%s14299_s15 + $0xc0] ss:$8 sps:$4 sm:$0xff]  }
 0x9ae   : > { %8109 = vrot.lane.b32.xlu1 %v8108_v38, %s14324_s27  ;;  %s14329_s27 = smov 96   ;;  %v11342_v38 = vld [vmem:[%s14299_s15 + $0xf4] ss:$8 sps:$4 sm:$0xff]  }
 0x9b0   : > { %8134 = vrot.lane.b32.xlu0 %v8133_v43, %s14329_s27  ;;  %v8089_v47 = vld [vmem:[#allocation18] sm:$0x1]  ;;  %v11340_v43 = vld [vmem:[%s14299_s15 + $0xf0] ss:$8 sps:$4 sm:$0xff]  }
 0xa1e   : > { %v8085_v56 = vpop.permute.xlu0 %8084 }
 0xa1f   : > { %v8090_v59 = vsel %vm8088_vm11, %v8085_v56, %v8089_v47 }
 0xa20   : > { %8091 = vst [vmem:[#allocation18] sm:$0x1] %v8090_v59  ;;  %v8110_v5 = vpop.permute.xlu1 %8109 }
 0xa22   : > { %v8135_v61 = vpop.permute.xlu0 %8134 }
 0xa27   : > { %v8114_v17 = vld [vmem:[#allocation18] sm:$0x1] }
 0xa28   : > { %v8115_v58 = vsel %vm8113_vm13, %v8110_v5, %v8114_v17 }
 0xa29   : > { %8116 = vst [vmem:[#allocation18] sm:$0x1] %v8115_v58 }
 0xa30   : > { %v8139_v46 = vld [vmem:[#allocation18] sm:$0x1] }
 0xa31   : > { %v8140_v57 = vsel %vm8138_vm15, %v8135_v61, %v8139_v46  ;;  %v11343_v61 = vld [vmem:[%s14299_s15 + $0x100] ss:$8 sps:$4 sm:$0xff]  }
 0xa32   : > { %8141 = vst [vmem:[#allocation18] sm:$0x1] %v8140_v57  ;;  %v11348_v57 = vld [vmem:[%s14299_s15 + $0x114] ss:$8 sps:$4 sm:$0xff]  }
 0xa39   : > { %v9948_v48 = vld.sshfl [vmem:[#allocation18] sm:$0x11 pattern:$0x75316420] }
 0xa3a   : > { %v8194_v34 = vcombine.high %v9948_v48, %v9948_v48  ;;  %v8201_v20 = vrot.slane %v9948_v48, %v13951_v60 }
 0xa3c   : > { %v8208_v52 = vrot.slane %v8194_v34, %v13951_v60  ;;  %v11346_v34 = vld [vmem:[%s14299_s15 + $0x110] ss:$8 sps:$4 sm:$0xff]  }
 0xa3e   : > { %9985 = vmatprep.mubr.msk.bf16.mxu1 %vm8411_vm0, %v8208_v52  ;;  %9986 = vmatprep.mubr.msk.bf16.mxu0 %vm8411_vm0, %v8208_v52  ;;  %v11351_v52 = vld [vmem:[%s14299_s15 + $0x124] ss:$8 sps:$4 sm:$0xff]  }
 0xa3f   : > { %8448 = vmatmul.mubr.bf16.vlgmr.msra.gmra.mrb[80].mxu1 %v8201_v20  ;;  %8489 = vmatmul.mubr.bf16.vlgmr.msra.gmra.mrb[128].mxu0 %v8201_v20  ;;  %v11354_v20 = vld [vmem:[%s14299_s15 + $0x134] ss:$8 sps:$4 sm:$0xff]  }
 0xa40   : > { %8902 = vmatpush1.bf16.msra.mxu1 %v11295_v39  ;;  %v11349_v39 = vld [vmem:[%s14299_s15 + $0x120] ss:$8 sps:$4 sm:$0xff]  }
 0xa41   : > { %8903 = vmatprep.subr.bf16.mxu1 %v11300_v40  ;;  %v11352_v40 = vld [vmem:[%s14299_s15 + $0x130] ss:$8 sps:$4 sm:$0xff]  }
 0xa44   : > { %8904 = vmatpush1.bf16.msra.mxu1 %v11298_v36  ;;  %v11357_v36 = vld [vmem:[%s14299_s15 + $0x144] ss:$8 sps:$4 sm:$0xff]  }
 0xa45   : > { %8905 = vmatprep.subr.bf16.mxu1 %v11303_v0  ;;  %v11355_v0 = vld [vmem:[%s14299_s15 + $0x140] ss:$8 sps:$4 sm:$0xff]  }
 0xa48   : > { %8906 = vmatpush1.bf16.msra.mxu1 %v11301_v4  ;;  %v11360_v4 = vld [vmem:[%s14299_s15 + $0x154] ss:$8 sps:$4 sm:$0xff]  }
 0xa49   : > { %8907 = vmatprep.subr.bf16.mxu1 %v11306_v10  ;;  %v11358_v10 = vld [vmem:[%s14299_s15 + $0x150] ss:$8 sps:$4 sm:$0xff]  }
 0xa4c   : > { %8908 = vmatpush1.bf16.msra.mxu1 %v11304_v11  ;;  %v11363_v11 = vld [vmem:[%s14299_s15 + $0x164] ss:$8 sps:$4 sm:$0xff]  }
 0xa4d   : > { %8909 = vmatprep.subr.bf16.mxu1 %v11309_v41  ;;  %v11361_v41 = vld [vmem:[%s14299_s15 + $0x160] ss:$8 sps:$4 sm:$0xff]  }
 0xa50   : > { %8910 = vmatpush1.bf16.msra.mxu1 %v11307_v14  ;;  %v11366_v14 = vld [vmem:[%s14299_s15 + $0x174] ss:$8 sps:$4 sm:$0xff]  }
 0xa51   : > { %8911 = vmatprep.subr.bf16.mxu1 %v11312_v30  ;;  %v11364_v30 = vld [vmem:[%s14299_s15 + $0x170] ss:$8 sps:$4 sm:$0xff]  }
 0xa54   : > { %8912 = vmatpush1.bf16.msra.mxu1 %v11310_v16  ;;  %v11369_v16 = vld [vmem:[%s14299_s15 + $0x184] ss:$8 sps:$4 sm:$0xff]  }
 0xa55   : > { %8913 = vmatprep.subr.bf16.mxu1 %v11315_v2  ;;  %v11367_v2 = vld [vmem:[%s14299_s15 + $0x180] ss:$8 sps:$4 sm:$0xff]  }
 0xa58   : > { %8914 = vmatpush1.bf16.msra.mxu1 %v11313_v18  ;;  %v11372_v18 = vld [vmem:[%s14299_s15 + $0x194] ss:$8 sps:$4 sm:$0xff]  }
 0xa59   : > { %8915 = vmatprep.subr.bf16.mxu1 %v11318_v19  ;;  %v11370_v19 = vld [vmem:[%s14299_s15 + $0x190] ss:$8 sps:$4 sm:$0xff]  }
 0xa5c   : > { %8916 = vmatpush1.bf16.msra.mxu1 %v11316_v31  ;;  %v11375_v31 = vld [vmem:[%s14299_s15 + $0x1a4] ss:$8 sps:$4 sm:$0xff]  }
 0xa5d   : > { %8917 = vmatprep.subr.bf16.mxu1 %v11321_v23  ;;  %v11373_v23 = vld [vmem:[%s14299_s15 + $0x1a0] ss:$8 sps:$4 sm:$0xff]  }
 0xa60   : > { %8918 = vmatpush1.bf16.msra.mxu1 %v11319_v24  ;;  %v11378_v24 = vld [vmem:[%s14299_s15 + $0x1b4] ss:$8 sps:$4 sm:$0xff]  }
 0xa61   : > { %8919 = vmatprep.subr.bf16.mxu1 %v11324_v26  ;;  %v11376_v26 = vld [vmem:[%s14299_s15 + $0x1b0] ss:$8 sps:$4 sm:$0xff]  }
 0xa64   : > { %8920 = vmatpush1.bf16.msra.mxu1 %v11322_v1  ;;  %v11381_v1 = vld [vmem:[%s14299_s15 + $0x1c4] ss:$8 sps:$4 sm:$0xff]  }
 0xa65   : > { %8921 = vmatprep.subr.bf16.mxu1 %v11327_v3  ;;  %v11379_v3 = vld [vmem:[%s14299_s15 + $0x1c0] ss:$8 sps:$4 sm:$0xff]  }
 0xa68   : > { %8922 = vmatpush1.bf16.msra.mxu1 %v11325_v28  ;;  %v8401_v28 = vsub.s32 2, %v13936_v63  ;;  %v11385_v63 = vld [vmem:[%s14299_s15 + $0x1e0] ss:$8 sps:$4 sm:$0xff]  }
 0xa69   : > { %8923 = vmatprep.subr.bf16.mxu1 %v11330_v32  ;;  %v11384_v32 = vld [vmem:[%s14299_s15 + $0x1d4] ss:$8 sps:$4 sm:$0xff]  }
 0xa6c   : > { %8924 = vmatpush1.bf16.msra.mxu1 %v11328_v33  ;;  %v11382_v33 = vld [vmem:[%s14299_s15 + $0x1d0] ss:$8 sps:$4 sm:$0xff]  }
 0xa6d   : > { %8925 = vmatprep.subr.bf16.mxu1 %v11333_v27  ;;  %v8402_v27 = vrot.slane %v14151_v49, %v8401_v28  ;;  %v9008_v49 = vld [vmem:[%s14301_s17] sm:$0x3] }
 0xa70   : > { %8926 = vmatpush1.bf16.msra.mxu1 %v11331_v35  ;;  %v11387_v35 = vld [vmem:[%s14299_s15 + $0x1e4] ss:$8 sps:$4 sm:$0xff]  }
 0xa71   : > { %8927 = vmatprep.subr.bf16.mxu1 %v11336_v6 }
 0xa74   : > { %8928 = vmatpush1.bf16.msra.mxu1 %v11334_v7  ;;  %v11390_v7 = vld [vmem:[%s14299_s15 + $0x1f4] ss:$8 sps:$4 sm:$0xff]  }
 0xa75   : > { %8929 = vmatprep.subr.bf16.mxu1 %v11339_v53  ;;  %v11388_v53 = vld [vmem:[%s14299_s15 + $0x1f0] ss:$8 sps:$4 sm:$0xff]  }
 0xa78   : > { %8930 = vmatpush1.bf16.msra.mxu1 %v11337_v37 }
 0xa79   : > { %8931 = vmatprep.subr.bf16.mxu1 %v11342_v38 }
 0xa7c   : > { %8932 = vmatpush1.bf16.msra.mxu1 %v11340_v43  ;;  %v8569_v43 = vld [vmem:[%s14300_s16] sm:$0x3] }
 0xa7d   : > { %8942 = vmatprep.subr.bf16.mxu1 %v11345_v44  ;;  %v8894_v44 = vrot.slane %v8569_v43, %v14146_v45  ;;  %v8898_v29 = vrot.slane %v8569_v43, %v14154_v13 }
 0xb12   : > { %v8449_v50 = vpop.f32.mrb[80].mxu1  ;;  %v14162_v51 = vpop.f32.mrb[128].mxu0 }
 0xb13   : > { %v8450_v8 = vadd.f32 %v8449_v50, %v8394_v25  ;;  %v8451_v9 = vpop.f32.mrb[81].mxu1  ;;  %v8492_v54 = vpop.f32.mrb[129].mxu0  ;;  %v8491_v6 = vadd.f32 %v14162_v51, %v8402_v27 }
 0xb14   : > { %v8452_v55 = vadd.f32 %v8451_v9, %v8398_v42  ;;  %v8493_v21 = vadd.f32 %v8492_v54, %v8406_v15  ;;  %v8453_v12 = vpop.f32.mrb[82].mxu1  ;;  %v8494_v22 = vpop.f32.mrb[130].mxu0  ;;  %v9013_v15 = vrot.slane %v9008_v49, %v14146_v45 }
 0xb15   : > { %v8497_v56 = vmax.f32 %v8450_v8, 0.0  ;;  %v8454_v47 = vpop.f32.mrb[83].mxu1  ;;  %v8495_v59 = vpop.f32.mrb[131].mxu0  ;;  %v8499_v37 = vmax.f32 %v8491_v6, 0.0  ;;  %v9017_v8 = vrot.slane %v9008_v49, %v14154_v13 }
 0xb16   : > { %v8498_v5 = vmax.f32 %v8452_v55, 0.0  ;;  %v8500_v17 = vmax.f32 %v8493_v21, 0.0 }
 0xb17   : > { %v8501_v46 = vpack.c.bf16 %v8497_v56, %v8497_v56  ;;  %v8503_v38 = vpack.c.bf16 %v8499_v37, %v8499_v37 }
 0xb18   : > { %v8502_v58 = vpack.c.bf16 %v8498_v5, %v8498_v5  ;;  %v8504_v48 = vpack.c.bf16 %v8500_v17, %v8500_v17  ;;  %v9028_v17 = vld [vmem:[#allocation19] sm:$0x1] }
 0xb1a   : > { %8933 = vmatprep.mubr.bf16.mxu1 %v8502_v58 }
 0xb1b   : > { %8934 = vmatmul.mubr.bf16.vlgmr.msra.gmra.mrb[84].mxu1 %v8501_v46 }
 0xb1c   : > { %8943 = vmatpush1.bf16.msra.mxu1 %v11343_v61  ;;  %8974 = vmatprep.mubr.bf16.mxu1 %v8504_v48 }
 0xb1d   : > { %8944 = vmatprep.subr.bf16.mxu1 %v11348_v57 }
 0xb20   : > { %8945 = vmatpush1.bf16.msra.mxu1 %v11346_v34 }
 0xb21   : > { %8946 = vmatprep.subr.bf16.mxu1 %v11351_v52 }
 0xb24   : > { %8947 = vmatpush1.bf16.msra.mxu1 %v11349_v39 }
 0xb25   : > { %8948 = vmatprep.subr.bf16.mxu1 %v11354_v20 }
 0xb28   : > { %8949 = vmatpush1.bf16.msra.mxu1 %v11352_v40 }
 0xb29   : > { %8950 = vmatprep.subr.bf16.mxu1 %v11357_v36 }
 0xb2c   : > { %8951 = vmatpush1.bf16.msra.mxu1 %v11355_v0 }
 0xb2d   : > { %8952 = vmatprep.subr.bf16.mxu1 %v11360_v4 }
 0xb30   : > { %8953 = vmatpush1.bf16.msra.mxu1 %v11358_v10 }
 0xb31   : > { %8954 = vmatprep.subr.bf16.mxu1 %v11363_v11 }
 0xb34   : > { %8955 = vmatpush1.bf16.msra.mxu1 %v11361_v41 }
 0xb35   : > { %8956 = vmatprep.subr.bf16.mxu1 %v11366_v14 }
 0xb38   : > { %8957 = vmatpush1.bf16.msra.mxu1 %v11364_v30 }
 0xb39   : > { %8958 = vmatprep.subr.bf16.mxu1 %v11369_v16 }
 0xb3c   : > { %8959 = vmatpush1.bf16.msra.mxu1 %v11367_v2 }
 0xb3d   : > { %8960 = vmatprep.subr.bf16.mxu1 %v11372_v18 }
 0xb40   : > { %8961 = vmatpush1.bf16.msra.mxu1 %v11370_v19 }
 0xb41   : > { %8962 = vmatprep.subr.bf16.mxu1 %v11375_v31 }
 0xb44   : > { %8963 = vmatpush1.bf16.msra.mxu1 %v11373_v23 }
 0xb45   : > { %8964 = vmatprep.subr.bf16.mxu1 %v11378_v24 }
 0xb48   : > { %8965 = vmatpush1.bf16.msra.mxu1 %v11376_v26 }
 0xb49   : > { %8966 = vmatprep.subr.bf16.mxu1 %v11381_v1 }
 0xb4c   : > { %8967 = vmatpush1.bf16.msra.mxu1 %v11379_v3 }
 0xb4d   : > { %8968 = vmatprep.subr.bf16.mxu1 %v11384_v32 }
 0xb50   : > { %8969 = vmatpush1.bf16.msra.mxu1 %v11382_v33 }
 0xb51   : > { %8970 = vmatprep.subr.bf16.mxu1 %v11387_v35 }
 0xb54   : > { %8971 = vmatpush1.bf16.msra.mxu1 %v11385_v63 }
 0xb55   : > { %8972 = vmatprep.subr.bf16.mxu1 %v11390_v7 }
 0xb58   : > { %8973 = vmatpush1.bf16.msra.mxu1 %v11388_v53 }
 0xb5b   : > { %8975 = vmatmul.mubr.bf16.vlgmr.msra.gmra.mrb[84].mxu1 %v8503_v38 }
 0xc2e   : > { %v8976_v25 = vpop.f32.mrb[84].mxu1 }
 0xc2f   : > { %v10956_v42 = vadd.f32 %v8976_v25, %v8894_v44  ;;  %v8978_v50 = vpop.f32.mrb[85].mxu1 }
 0xc30   : > { %v10957_v51 = vadd.f32 %v8978_v50, %v8898_v29  ;;  %v8980_v9 = vpop.f32.mrb[86].mxu1 }
 0xc31   : > { %v8983_v54 = vmax.f32 %v10956_v42, 0.0  ;;  %v8981_v55 = vpop.f32.mrb[87].mxu1 }
 0xc32   : > { %v8984_v21 = vmax.f32 %v10957_v51, 0.0 }
 0xc33   : > { %v9020_v12 = vmul.f32 %v9013_v15, %v8983_v54 }
 0xc34   : > { %v8987_v22 = vcombine.low %v8983_v54, %v8984_v21  ;;  %v9021_v56 = vmul.f32 %v9017_v8, %v8984_v21 }
 0xc35   : > { %v9023_v47 = vsel %vm9022_vm1, %v9020_v12, 0.0 }
 0xc36   : > { %v8994_v59 = vrot.slane %v8987_v22, %v13951_v60  ;;  %v9024_v5 = vsel %vm9022_vm1, %v9021_v56, 0.0 }
 0xc37   : > { %v9025_v45 = vadd.f32 %v9024_v5, %v9023_v47 }
 0xc38   : > { %v9001_v13 = vrot.slane %v8994_v59, %v13951_v60 }
 0xc39   : > { %9026 = vadd.xlane.f32.xlu1 %v9025_v45 }
 0xc3a   : > { %9007 = vst.msk [vmem:[%s652_s30] sm:$0x3] %vm9005_vm2, %v9001_v13 }
 0xcc6   : > { %v9027_v58 = vpop.xlane.xlu1 %9026 }
 0xcc7   : > { %v9029_v61 = vadd.f32 %v9028_v17, %v9027_v58 }
 0xcc9   : > { %9031 = vst.msk [vmem:[%s648_s3] sm:$0x1] %vm9030_vm3, %v9029_v61 }
 0xcca PF: > { %s33_s23 = sadd.s32 1, %s11399_s23  }
 0xccb   : > { %p30_p4 = scmp.ge.s32.totalorder %s33_s23, 4  }
 0xccd   :  { %32 = sbr.rel (!%p30_p4) target bundleno = 7 (0x7), region = 203 }

</bundles_post_ra>
